<compile_context>
chip_gen: v6e
topology: v6e:2x2x1
jax: 0.10.0
libtpu: 0.0.40
codegen_flags: <defaults>
</compile_context>

<pallas_src>
import math
import functools

import jax
import jax.numpy as jnp
from jax.experimental import pallas as pl
from jax.experimental.pallas import tpu as pltpu


# bf16 operands on the MXU (f32 accumulation).  Elementwise math stays f32.
MXU_DTYPE = jnp.bfloat16
NEG_INF = -1e30


def _mm(a, b):
    return jnp.dot(a.astype(MXU_DTYPE), b.astype(MXU_DTYPE),
                   preferred_element_type=jnp.float32)


def _mm_nt(a, b):
    # a @ b.T without materializing the transpose (MXU handles transposed rhs).
    return jax.lax.dot_general(
        a.astype(MXU_DTYPE), b.astype(MXU_DTYPE),
        dimension_numbers=(((1,), (1,)), ((), ())),
        preferred_element_type=jnp.float32)


def _mm_f32(a, b):
    # Exact f32 path for one-hot gathers / selection matmuls.
    return jnp.dot(a.astype(jnp.float32), b.astype(jnp.float32),
                   preferred_element_type=jnp.float32)


def _layer_norm(v, w, b, eps=1e-5):
    mu = jnp.mean(v, axis=-1, keepdims=True)
    var = jnp.mean((v - mu) ** 2, axis=-1, keepdims=True)
    return (v - mu) * jax.lax.rsqrt(var + eps) * w + b


def _gelu_exact(x):
    # matches torch.nn.functional.gelu (erf formulation)
    return 0.5 * x * (1.0 + jax.lax.erf(x * (1.0 / math.sqrt(2.0))))


# ----------------------------- fused GPT kernel ------------------------------

def gpt_fused_kernel(
    # per-grid-step batched data, pre-flattened to (block_b*T, ...)
    states_ref, act_ref, ts_ref,
    # batch-invariant selection / mask constants (precomputed in the wrapper)
    sel_state_ref, sel_action_ref, rep2_ref, cpe_ref,
    head_mask_ref, attn_bias_ref, row_unpack_ref, sel_out_ref,
    # embedding / encoder weights
    state_w_ref, state_b_ref, act_emb_ref, gpe_ref,
    # stacked per-layer weights (leading dim = n_layer)
    ln1w_ref, ln1b_ref, wqkv_ref, bqkv_ref, wproj_ref, bproj_ref,
    ln2w_ref, ln2b_ref, wfc1_ref, bfc1_ref, wfc2_ref, bfc2_ref,
    # final LN + actor head (lane-padded to a multiple of 128)
    lnfw_ref, lnfb_ref, headw_ref,
    # output: (block_b*T, Vp)
    out_ref,
    *, n_head, n_layer, vocab_size,
):
    f32 = jnp.float32
    C = state_w_ref.shape[1]
    H = n_head
    hd = C // H
    BT = states_ref.shape[0]              # block_b * T  (state/action rows)
    R = sel_state_ref.shape[0]            # block_b * 2T (interleaved token rows)
    scale = 1.0 / math.sqrt(hd)

    # ------------------------------ embeddings ------------------------------
    se = jnp.tanh(_mm(states_ref[...], state_w_ref[...]) + state_b_ref[...])   # (BT, C)

    a_onehot = (act_ref[...] ==
                jax.lax.broadcasted_iota(jnp.int32, (BT, vocab_size), 1)).astype(f32)
    ae = jnp.tanh(_mm_f32(a_onehot, act_emb_ref[...]))                         # (BT, C)

    n_ts = gpe_ref.shape[0]
    t_onehot = (ts_ref[...] ==
                jax.lax.broadcasted_iota(jnp.int32, (BT, n_ts), 1)).astype(f32)
    gpe = _mm_f32(t_onehot, gpe_ref[...])                                      # (BT, C)
    # TODO(synk): for large max_timestep, scalar-prefetch the timestep ids and
    # gather gpe rows directly instead of the one-hot matmul.

    # interleave state/action tokens + repeat_interleave(gpe, 2) via the
    # precomputed selection matmuls (exact f32 row picks, no strided scatters).
    x = (_mm_f32(sel_state_ref[...], se) + _mm_f32(sel_action_ref[...], ae)
         + _mm_f32(rep2_ref[...], gpe) + cpe_ref[...])                         # (R, C)
    # TODO(synk): embedding dropout treated as eval-mode identity (p = 0).

    head_mask = head_mask_ref[...]          # (H*R, C) per-head lane mask
    attn_bias = attn_bias_ref[...]          # (H*R, R) causal + same-batch bias
    row_unpack = row_unpack_ref[...]        # (R, H*R) head re-pack selector

    # ----------------------------- transformer -------------------------------
    # Statically unrolled: n_layer is tiny and all weights stay VMEM-resident.
    # For deep/wide configs, make the layer a grid axis and stream per-layer
    # weights (double-buffered BlockSpecs indexed by the layer id).
    for l in range(n_layer):
        # --- causal self-attention: all heads in one block-diagonal matmul ---
        # (H-times redundant over lanes; fine while C << 128.)
        h = _layer_norm(x, ln1w_ref[l], ln1b_ref[l])
        qkv = _mm(h, wqkv_ref[l]) + bqkv_ref[l]            # (R, 3C), fused Q/K/V
        q = qkv[:, :C]
        k = qkv[:, C:2 * C]
        v = qkv[:, 2 * C:]

        q_bd = jnp.tile(q, (H, 1)) * head_mask             # (H*R, C)
        s = _mm_nt(q_bd, k) * scale + attn_bias            # (H*R, R) scores
        m = jnp.max(s, axis=-1, keepdims=True)             # exact per-(head,query) max
        e = jnp.exp(s - m)
        p = e * pl.reciprocal(jnp.sum(e, axis=-1, keepdims=True), approx=True)

        y_full = _mm(p, v)                                 # (H*R, C)
        y = _mm_f32(row_unpack, y_full * head_mask)        # (R, C) heads re-packed
        x = x + _mm(y, wproj_ref[l]) + bproj_ref[l]        # resid dropout = identity

        # --- MLP ---
        h2 = _layer_norm(x, ln2w_ref[l], ln2b_ref[l])
        g = _gelu_exact(_mm(h2, wfc1_ref[l]) + bfc1_ref[l])
        x = x + _mm(g, wfc2_ref[l]) + bfc2_ref[l]          # resid dropout = identity

    # --------------- final LN + actor head on action-token rows ---------------
    x_act = _mm_f32(sel_out_ref[...], x)                   # (BT, C) == rows 1::2
    h_f = _layer_norm(x_act, lnfw_ref[...], lnfb_ref[...])
    out_ref[...] = _mm(h_f, headw_ref[...])                # (BT, Vp) lane-dense store


# --------------------------------- wrapper ------------------------------------

def gpt_forward(params, states, pre_actions, timesteps, cfg, block_b=None):
    """model_type='state_action', actor head, eval mode (dropout = identity)."""
    B, T, S = states.shape
    C = cfg["n_embd"]
    H = cfg["n_head"]
    V = cfg["vocab_size"]
    NL = cfg["n_layer"]
    hd = C // H
    L = 2 * T
    Vp = ((V + 127) // 128) * 128                 # lane-dense head output

    # Batch elements packed per grid step (amortizes per-step pipeline overhead,
    # raises sublane utilization of every matmul/softmax).
    Bb = min(B, 8) if block_b is None else block_b
    B_pad = ((B + Bb - 1) // Bb) * Bb
    R = Bb * L                                    # token rows per grid step
    BT = Bb * T
    HR = H * R

    f32 = jnp.float32
    blk = params["blocks"]

    # --------- batch-invariant selection / mask constants (built once) --------
    row = jnp.arange(R)
    i_of = row % L                                # position within a sequence
    b_of = row // L                               # batch index within the block
    col_bt = jnp.arange(BT)
    pick = col_bt[None, :] == (b_of * T + i_of // 2)[:, None]
    sel_state = (pick & (i_of[:, None] % 2 == 0)).astype(f32)    # rows 0,2,4,...
    sel_action = (pick & (i_of[:, None] % 2 == 1)).astype(f32)   # rows 1,3,5,...
    rep2 = pick.astype(f32)                       # repeat_interleave(., 2, axis=0)

    cpe_tiled = jnp.tile(params["pos_emb"][0, :L, :].astype(f32), (Bb, 1))   # (R, C)

    hrow = jnp.arange(HR)
    h_of = hrow // R
    r_of = hrow % R
    lane = jnp.arange(C)
    head_mask = (lane[None, :] // hd == h_of[:, None]).astype(f32)           # (HR, C)

    col_r = jnp.arange(R)
    same_batch = (r_of[:, None] // L) == (col_r[None, :] // L)
    causal = (r_of[:, None] % L) >= (col_r[None, :] % L)
    attn_bias = jnp.where(same_batch & causal, 0.0, NEG_INF).astype(f32)      # (HR, R)

    row_unpack = (hrow[None, :] % R == col_r[:, None]).astype(f32)            # (R, HR)

    trow = jnp.arange(BT)
    out_col = (trow // T) * L + 2 * (trow % T) + 1
    sel_out = (col_r[None, :] == out_col[:, None]).astype(f32)                # (BT, R)

    # ------------------------------ weights -----------------------------------
    gpe_tab = params["global_pos_emb"][0]                  # (max_timestep+1, C)
    n_ts = gpe_tab.shape[0]
    n_ts_p = ((n_ts + 7) // 8) * 8                         # pad sublane dim to 8
    gpe_tab = jnp.pad(gpe_tab, ((0, n_ts_p - n_ts), (0, 0)))
    head_w = jnp.pad(params["head_w"], ((0, 0), (0, Vp - V)))

    # ------------------------------ inputs ------------------------------------
    states_f = states.astype(f32)
    act_ids = pre_actions.astype(jnp.int32)
    ts_ids = timesteps.astype(jnp.int32)
    if B_pad != B:
        pad = ((0, B_pad - B), (0, 0), (0, 0))
        states_f = jnp.pad(states_f, pad)
        act_ids = jnp.pad(act_ids, pad)
        ts_ids = jnp.pad(ts_ids, pad)
    # Pre-flatten (batch, time) in the wrapper so the kernel never reshapes.
    states_2d = states_f.reshape(B_pad * T, S)
    act_2d = act_ids.reshape(B_pad * T, 1)
    ts_2d = ts_ids.reshape(B_pad * T, 1)

    consts_and_weights = [
        sel_state, sel_action, rep2, cpe_tiled,
        head_mask, attn_bias, row_unpack, sel_out,
        params["state_w"], params["state_b"], params["action_emb"], gpe_tab,
        blk["ln1_w"], blk["ln1_b"], blk["w_qkv"], blk["b_qkv"],
        blk["w_proj"], blk["b_proj"], blk["ln2_w"], blk["ln2_b"],
        blk["w_fc1"], blk["b_fc1"], blk["w_fc2"], blk["b_fc2"],
        params["lnf_w"], params["lnf_b"], head_w,
    ]

    def batched_spec(last_dim):
        return pl.BlockSpec((BT, last_dim), lambda g: (g, 0))

    def const_spec(a, single_buffer):
        nd = a.ndim
        idx = lambda g, _nd=nd: (0,) * _nd
        if single_buffer:
            # Grid-invariant index_map: one VMEM buffer is enough (halves VMEM
            # spent on weights/constants vs. default double-buffering).
            return pl.BlockSpec(a.shape, idx,
                                pipeline_mode=pl.Buffered(buffer_count=1))
        return pl.BlockSpec(a.shape, idx)

    kernel = functools.partial(gpt_fused_kernel, n_head=H, n_layer=NL, vocab_size=V)

    def run(single_buffer):
        in_specs = [batched_spec(S), batched_spec(1), batched_spec(1)]
        in_specs += [const_spec(a, single_buffer) for a in consts_and_weights]
        return pl.pallas_call(
            kernel,
            out_shape=jax.ShapeDtypeStruct((B_pad * T, Vp), jnp.float32),
            grid=(B_pad // Bb,),
            in_specs=in_specs,
            out_specs=pl.BlockSpec((BT, Vp), lambda g: (g, 0)),
            compiler_params=pltpu.CompilerParams(
                dimension_semantics=("parallel",),    # batch blocks independent
                vmem_limit_bytes=48 * 1024 * 1024,    # > 16/32 MiB defaults, < v7x 64 MiB
            ),
        )(states_2d, act_2d, ts_2d, *consts_and_weights)

    try:
        logits_p = run(True)
    except Exception:
        # pipeline_mode / pl.Buffered(1) not supported on this jax build:
        # fall back to default double-buffered input specs.
        logits_p = run(False)

    logits_p = logits_p.reshape(B_pad, T, Vp)
    return logits_p[:B, :, :V]                             # (B, T, vocab)


# ------------------------------- parameters -----------------------------------

def init_params(key, cfg):
    C = cfg["n_embd"]
    V = cfg["vocab_size"]
    S = cfg["state_size"]
    NL = cfg["n_layer"]
    std = 0.02

    def nrm(k, shape):
        return std * jax.random.normal(k, shape, jnp.float32)

    keys = iter(jax.random.split(key, 16 + 8 * NL))
    params = {
        # NOTE: PyTorch inits pos_emb / global_pos_emb to zeros; small normals
        # here so the positional-gather path is exercised non-trivially.
        "pos_emb": nrm(next(keys), (1, cfg["block_size"] + 1, C)),
        "global_pos_emb": nrm(next(keys), (1, cfg["max_timestep"] + 1, C)),
        "state_w": nrm(next(keys), (S, C)),
        "state_b": jnp.zeros((1, C), jnp.float32),
        "action_emb": nrm(next(keys), (V, C)),
        "lnf_w": jnp.ones((1, C), jnp.float32),
        "lnf_b": jnp.zeros((1, C), jnp.float32),
        "head_w": nrm(next(keys), (C, V)),                # actor head, no bias
    }

    wq, wk, wv, wp, w1, w2 = [], [], [], [], [], []
    for _ in range(NL):
        wq.append(nrm(next(keys), (C, C)))
        wk.append(nrm(next(keys), (C, C)))
        wv.append(nrm(next(keys), (C, C)))
        wp.append(nrm(next(keys), (C, C)))
        w1.append(nrm(next(keys), (C, 2 * C)))
        w2.append(nrm(next(keys), (2 * C, C)))

    params["blocks"] = {
        "ln1_w": jnp.ones((NL, 1, C), jnp.float32),
        "ln1_b": jnp.zeros((NL, 1, C), jnp.float32),
        # q/k/v fused along the output dim -> one (C, 3C) matmul per layer
        "w_qkv": jnp.stack([jnp.concatenate([a, b, d], axis=1)
                            for a, b, d in zip(wq, wk, wv)]),
        "b_qkv": jnp.zeros((NL, 1, 3 * C), jnp.float32),
        "w_proj": jnp.stack(wp),
        "b_proj": jnp.zeros((NL, 1, C), jnp.float32),
        "ln2_w": jnp.ones((NL, 1, C), jnp.float32),
        "ln2_b": jnp.zeros((NL, 1, C), jnp.float32),
        "w_fc1": jnp.stack(w1),
        "b_fc1": jnp.zeros((NL, 1, 2 * C), jnp.float32),
        "w_fc2": jnp.stack(w2),
        "b_fc2": jnp.zeros((NL, 1, C), jnp.float32),
    }
    return params


# ------------------------ pure-JAX reference (for checking) --------------------

def gpt_reference(params, states, pre_actions, timesteps, cfg):
    mm = functools.partial(jnp.matmul, precision=jax.lax.Precision.HIGHEST)
    B, T, S = states.shape
    C, H, V = cfg["n_embd"], cfg["n_head"], cfg["vocab_size"]
    L, hd = 2 * T, C // cfg["n_head"]
    blk = params["blocks"]

    def ln(v, w, b):
        mu = v.mean(-1, keepdims=True)
        var = ((v - mu) ** 2).mean(-1, keepdims=True)
        return (v - mu) / jnp.sqrt(var + 1e-5) * w + b

    se = jnp.tanh(mm(states.reshape(-1, S).astype(jnp.float32),
                     params["state_w"]) + params["state_b"]).reshape(B, T, C)
    ae = jnp.tanh(jnp.take(params["action_emb"],
                           pre_actions[..., 0].astype(jnp.int32), axis=0))
    tok = jnp.stack([se, ae], axis=2).reshape(B, L, C)
    gpe = jnp.take(params["global_pos_emb"][0],
                   timesteps[..., 0].astype(jnp.int32), axis=0)
    x = tok + jnp.repeat(gpe, 2, axis=1) + params["pos_emb"][:, :L, :]

    mask = jnp.tril(jnp.ones((L, L), bool))
    for l in range(cfg["n_layer"]):
        h = ln(x, blk["ln1_w"][l], blk["ln1_b"][l])
        qkv = mm(h, blk["w_qkv"][l]) + blk["b_qkv"][l]
        q, k, v = qkv[..., :C], qkv[..., C:2 * C], qkv[..., 2 * C:]
        q = q.reshape(B, L, H, hd).transpose(0, 2, 1, 3)
        k = k.reshape(B, L, H, hd).transpose(0, 2, 1, 3)
        v = v.reshape(B, L, H, hd).transpose(0, 2, 1, 3)
        att = mm(q, jnp.swapaxes(k, -1, -2)) / math.sqrt(hd)
        att = jnp.where(mask, att, -jnp.inf)
        att = jax.nn.softmax(att, axis=-1)
        y = mm(att, v).transpose(0, 2, 1, 3).reshape(B, L, C)
        x = x + mm(y, blk["w_proj"][l]) + blk["b_proj"][l]
        h2 = ln(x, blk["ln2_w"][l], blk["ln2_b"][l])
        g = _gelu_exact(mm(h2, blk["w_fc1"][l]) + blk["b_fc1"][l])
        x = x + mm(g, blk["w_fc2"][l]) + blk["b_fc2"][l]

    x = ln(x, params["lnf_w"], params["lnf_b"])
    logits = mm(x, params["head_w"])
    return logits[:, 1::2, :]


# ----------------------------------- main ---------------------------------------

if __name__ == "__main__":
    cfg = dict(
        n_embd=32,
        n_head=4,
        n_layer=2,
        vocab_size=16,
        block_size=16,      # 2*T <= block_size + 1
        max_timestep=32,
        state_size=16,
    )
    B, T = 2, 8

    key = jax.random.PRNGKey(0)
    kp, ks, ka, kt = jax.random.split(key, 4)

    params = init_params(kp, cfg)
    states = jax.random.normal(ks, (B, T, cfg["state_size"]), jnp.float32)
    pre_actions = jax.random.randint(ka, (B, T, 1), 0, cfg["vocab_size"], jnp.int32)
    timesteps = jax.random.randint(kt, (B, T, 1), 0, cfg["max_timestep"] + 1, jnp.int32)

    logits = gpt_forward(params, states, pre_actions, timesteps, cfg)
    logits = jax.block_until_ready(logits)
    assert logits.shape == (B, T, cfg["vocab_size"])

    # Pure-JAX f32 reference.  The kernel uses bf16 MXU operands (f32 accum) and
    # an approx-reciprocal softmax, so tolerances are set accordingly
    # (observed deviations are ~1e-3 at these shapes).
    ref = gpt_reference(params, states, pre_actions, timesteps, cfg)
    max_err = float(jnp.max(jnp.abs(logits - ref)))
    assert jnp.allclose(logits, ref, atol=2e-2, rtol=2e-2), max_err

    # TODO(synk): dropout layers are treated as eval-mode identity (p = 0).
    print("KERNEL_OK")
</pallas_src>

<mosaic_0001>
module attributes {stable_mosaic.version = 11 : i64} {
  func.func @gpt_fused_kernel(%arg0: i32, %arg1: memref<16x16xf32, #tpu.memory_space<vmem>>, %arg2: memref<16x1xi32, #tpu.memory_space<vmem>>, %arg3: memref<16x1xi32, #tpu.memory_space<vmem>>, %arg4: memref<32x16xf32, #tpu.memory_space<vmem>>, %arg5: memref<32x16xf32, #tpu.memory_space<vmem>>, %arg6: memref<32x16xf32, #tpu.memory_space<vmem>>, %arg7: memref<32x32xf32, #tpu.memory_space<vmem>>, %arg8: memref<128x32xf32, #tpu.memory_space<vmem>>, %arg9: memref<128x32xf32, #tpu.memory_space<vmem>>, %arg10: memref<32x128xf32, #tpu.memory_space<vmem>>, %arg11: memref<16x32xf32, #tpu.memory_space<vmem>>, %arg12: memref<16x32xf32, #tpu.memory_space<vmem>>, %arg13: memref<1x32xf32, #tpu.memory_space<vmem>>, %arg14: memref<16x32xf32, #tpu.memory_space<vmem>>, %arg15: memref<40x32xf32, #tpu.memory_space<vmem>>, %arg16: memref<2x1x32xf32, #tpu.memory_space<vmem>>, %arg17: memref<2x1x32xf32, #tpu.memory_space<vmem>>, %arg18: memref<2x32x96xf32, #tpu.memory_space<vmem>>, %arg19: memref<2x1x96xf32, #tpu.memory_space<vmem>>, %arg20: memref<2x32x32xf32, #tpu.memory_space<vmem>>, %arg21: memref<2x1x32xf32, #tpu.memory_space<vmem>>, %arg22: memref<2x1x32xf32, #tpu.memory_space<vmem>>, %arg23: memref<2x1x32xf32, #tpu.memory_space<vmem>>, %arg24: memref<2x32x64xf32, #tpu.memory_space<vmem>>, %arg25: memref<2x1x64xf32, #tpu.memory_space<vmem>>, %arg26: memref<2x64x32xf32, #tpu.memory_space<vmem>>, %arg27: memref<2x1x32xf32, #tpu.memory_space<vmem>>, %arg28: memref<1x32xf32, #tpu.memory_space<vmem>>, %arg29: memref<1x32xf32, #tpu.memory_space<vmem>>, %arg30: memref<32x128xf32, #tpu.memory_space<vmem>>, %arg31: memref<16x128xf32, #tpu.memory_space<vmem>>) attributes {dimension_semantics = [#tpu.dimension_semantics<parallel>], iteration_bounds = array<i64: 1>, scalar_prefetch = 0 : i64, scratch_operands = 0 : i64, tpu.core_type = #tpu.core_type<tc>, window_params = [{transform_indices = @transform_0, window_bounds = array<i64: 16, 16>}, {transform_indices = @transform_1, window_bounds = array<i64: 16, 1>}, {transform_indices = @transform_2, window_bounds = array<i64: 16, 1>}, {pipeline_mode = #tpu.pipeline_mode<synchronous>, transform_indices = @transform_3, window_bounds = array<i64: 32, 16>}, {pipeline_mode = #tpu.pipeline_mode<synchronous>, transform_indices = @transform_4, window_bounds = array<i64: 32, 16>}, {pipeline_mode = #tpu.pipeline_mode<synchronous>, transform_indices = @transform_5, window_bounds = array<i64: 32, 16>}, {pipeline_mode = #tpu.pipeline_mode<synchronous>, transform_indices = @transform_6, window_bounds = array<i64: 32, 32>}, {pipeline_mode = #tpu.pipeline_mode<synchronous>, transform_indices = @transform_7, window_bounds = array<i64: 128, 32>}, {pipeline_mode = #tpu.pipeline_mode<synchronous>, transform_indices = @transform_8, window_bounds = array<i64: 128, 32>}, {pipeline_mode = #tpu.pipeline_mode<synchronous>, transform_indices = @transform_9, window_bounds = array<i64: 32, 128>}, {pipeline_mode = #tpu.pipeline_mode<synchronous>, transform_indices = @transform_10, window_bounds = array<i64: 16, 32>}, {pipeline_mode = #tpu.pipeline_mode<synchronous>, transform_indices = @transform_11, window_bounds = array<i64: 16, 32>}, {pipeline_mode = #tpu.pipeline_mode<synchronous>, transform_indices = @transform_12, window_bounds = array<i64: 1, 32>}, {pipeline_mode = #tpu.pipeline_mode<synchronous>, transform_indices = @transform_13, window_bounds = array<i64: 16, 32>}, {pipeline_mode = #tpu.pipeline_mode<synchronous>, transform_indices = @transform_14, window_bounds = array<i64: 40, 32>}, {pipeline_mode = #tpu.pipeline_mode<synchronous>, transform_indices = @transform_15, window_bounds = array<i64: 2, 1, 32>}, {pipeline_mode = #tpu.pipeline_mode<synchronous>, transform_indices = @transform_16, window_bounds = array<i64: 2, 1, 32>}, {pipeline_mode = #tpu.pipeline_mode<synchronous>, transform_indices = @transform_17, window_bounds = array<i64: 2, 32, 96>}, {pipeline_mode = #tpu.pipeline_mode<synchronous>, transform_indices = @transform_18, window_bounds = array<i64: 2, 1, 96>}, {pipeline_mode = #tpu.pipeline_mode<synchronous>, transform_indices = @transform_19, window_bounds = array<i64: 2, 32, 32>}, {pipeline_mode = #tpu.pipeline_mode<synchronous>, transform_indices = @transform_20, window_bounds = array<i64: 2, 1, 32>}, {pipeline_mode = #tpu.pipeline_mode<synchronous>, transform_indices = @transform_21, window_bounds = array<i64: 2, 1, 32>}, {pipeline_mode = #tpu.pipeline_mode<synchronous>, transform_indices = @transform_22, window_bounds = array<i64: 2, 1, 32>}, {pipeline_mode = #tpu.pipeline_mode<synchronous>, transform_indices = @transform_23, window_bounds = array<i64: 2, 32, 64>}, {pipeline_mode = #tpu.pipeline_mode<synchronous>, transform_indices = @transform_24, window_bounds = array<i64: 2, 1, 64>}, {pipeline_mode = #tpu.pipeline_mode<synchronous>, transform_indices = @transform_25, window_bounds = array<i64: 2, 64, 32>}, {pipeline_mode = #tpu.pipeline_mode<synchronous>, transform_indices = @transform_26, window_bounds = array<i64: 2, 1, 32>}, {pipeline_mode = #tpu.pipeline_mode<synchronous>, transform_indices = @transform_27, window_bounds = array<i64: 1, 32>}, {pipeline_mode = #tpu.pipeline_mode<synchronous>, transform_indices = @transform_28, window_bounds = array<i64: 1, 32>}, {pipeline_mode = #tpu.pipeline_mode<synchronous>, transform_indices = @transform_29, window_bounds = array<i64: 32, 128>}, {transform_indices = @transform_30, window_bounds = array<i64: 16, 128>}]} {
    %c0 = arith.constant 0 : index
    %c0_0 = arith.constant 0 : index
    %0 = vector.load %arg1[%c0, %c0_0] : memref<16x16xf32, #tpu.memory_space<vmem>>, vector<16x16xf32>
    %c0_1 = arith.constant 0 : index
    %c0_2 = arith.constant 0 : index
    %1 = vector.load %arg12[%c0_1, %c0_2] : memref<16x32xf32, #tpu.memory_space<vmem>>, vector<16x32xf32>
    %2 = arith.truncf %0 : vector<16x16xf32> to vector<16x16xbf16>
    %3 = arith.truncf %1 : vector<16x32xf32> to vector<16x32xbf16>
    %cst = arith.constant dense<0.000000e+00> : vector<16x32xf32>
    %4 = tpu.matmul %2, %3, %cst {dimension_numbers = #tpu.dot_dimension_numbers<[1], [0], [0], [1], [0, 0, 1, 1], [], []>} : vector<16x16xbf16>, vector<16x32xbf16>, vector<16x32xf32> -> vector<16x32xf32>
    %c0_3 = arith.constant 0 : index
    %c0_4 = arith.constant 0 : index
    %5 = vector.load %arg13[%c0_3, %c0_4] : memref<1x32xf32, #tpu.memory_space<vmem>>, vector<1x32xf32>
    %6 = vector.broadcast %5 : vector<1x32xf32> to vector<16x32xf32>
    %7 = arith.addf %4, %6 : vector<16x32xf32>
    %8 = math.tanh %7 : vector<16x32xf32>
    %c0_5 = arith.constant 0 : index
    %c0_6 = arith.constant 0 : index
    %9 = vector.load %arg2[%c0_5, %c0_6] : memref<16x1xi32, #tpu.memory_space<vmem>>, vector<16x1xi32>
    %10 = tpu.iota {dimensions = array<i32: 1>} : vector<16x16xi32>
    %11 = vector.broadcast %9 : vector<16x1xi32> to vector<16x16xi32>
    %12 = arith.cmpi eq, %11, %10 : vector<16x16xi32>
    %13 = arith.extui %12 : vector<16x16xi1> to vector<16x16xi32>
    %14 = arith.sitofp %13 : vector<16x16xi32> to vector<16x16xf32>
    %c0_7 = arith.constant 0 : index
    %c0_8 = arith.constant 0 : index
    %15 = vector.load %arg14[%c0_7, %c0_8] : memref<16x32xf32, #tpu.memory_space<vmem>>, vector<16x32xf32>
    %cst_9 = arith.constant dense<0.000000e+00> : vector<16x32xf32>
    %16 = tpu.matmul %14, %15, %cst_9 {dimension_numbers = #tpu.dot_dimension_numbers<[1], [0], [0], [1], [0, 0, 1, 1], [], []>} : vector<16x16xf32>, vector<16x32xf32>, vector<16x32xf32> -> vector<16x32xf32>
    %17 = math.tanh %16 : vector<16x32xf32>
    %c0_10 = arith.constant 0 : index
    %c0_11 = arith.constant 0 : index
    %18 = vector.load %arg3[%c0_10, %c0_11] : memref<16x1xi32, #tpu.memory_space<vmem>>, vector<16x1xi32>
    %19 = tpu.iota {dimensions = array<i32: 1>} : vector<16x40xi32>
    %20 = vector.broadcast %18 : vector<16x1xi32> to vector<16x40xi32>
    %21 = arith.cmpi eq, %20, %19 : vector<16x40xi32>
    %22 = arith.extui %21 : vector<16x40xi1> to vector<16x40xi32>
    %23 = arith.sitofp %22 : vector<16x40xi32> to vector<16x40xf32>
    %c0_12 = arith.constant 0 : index
    %c0_13 = arith.constant 0 : index
    %24 = vector.load %arg15[%c0_12, %c0_13] : memref<40x32xf32, #tpu.memory_space<vmem>>, vector<40x32xf32>
    %cst_14 = arith.constant dense<0.000000e+00> : vector<16x32xf32>
    %25 = tpu.matmul %23, %24, %cst_14 {dimension_numbers = #tpu.dot_dimension_numbers<[1], [0], [0], [1], [0, 0, 1, 1], [], []>} : vector<16x40xf32>, vector<40x32xf32>, vector<16x32xf32> -> vector<16x32xf32>
    %c0_15 = arith.constant 0 : index
    %c0_16 = arith.constant 0 : index
    %26 = vector.load %arg4[%c0_15, %c0_16] : memref<32x16xf32, #tpu.memory_space<vmem>>, vector<32x16xf32>
    %cst_17 = arith.constant dense<0.000000e+00> : vector<32x32xf32>
    %27 = tpu.matmul %26, %8, %cst_17 {dimension_numbers = #tpu.dot_dimension_numbers<[1], [0], [0], [1], [0, 0, 1, 1], [], []>} : vector<32x16xf32>, vector<16x32xf32>, vector<32x32xf32> -> vector<32x32xf32>
    %c0_18 = arith.constant 0 : index
    %c0_19 = arith.constant 0 : index
    %28 = vector.load %arg5[%c0_18, %c0_19] : memref<32x16xf32, #tpu.memory_space<vmem>>, vector<32x16xf32>
    %cst_20 = arith.constant dense<0.000000e+00> : vector<32x32xf32>
    %29 = tpu.matmul %28, %17, %cst_20 {dimension_numbers = #tpu.dot_dimension_numbers<[1], [0], [0], [1], [0, 0, 1, 1], [], []>} : vector<32x16xf32>, vector<16x32xf32>, vector<32x32xf32> -> vector<32x32xf32>
    %30 = arith.addf %27, %29 : vector<32x32xf32>
    %c0_21 = arith.constant 0 : index
    %c0_22 = arith.constant 0 : index
    %31 = vector.load %arg6[%c0_21, %c0_22] : memref<32x16xf32, #tpu.memory_space<vmem>>, vector<32x16xf32>
    %cst_23 = arith.constant dense<0.000000e+00> : vector<32x32xf32>
    %32 = tpu.matmul %31, %25, %cst_23 {dimension_numbers = #tpu.dot_dimension_numbers<[1], [0], [0], [1], [0, 0, 1, 1], [], []>} : vector<32x16xf32>, vector<16x32xf32>, vector<32x32xf32> -> vector<32x32xf32>
    %33 = arith.addf %30, %32 : vector<32x32xf32>
    %c0_24 = arith.constant 0 : index
    %c0_25 = arith.constant 0 : index
    %34 = vector.load %arg7[%c0_24, %c0_25] : memref<32x32xf32, #tpu.memory_space<vmem>>, vector<32x32xf32>
    %35 = arith.addf %33, %34 : vector<32x32xf32>
    %c0_26 = arith.constant 0 : index
    %c0_27 = arith.constant 0 : index
    %36 = vector.load %arg8[%c0_26, %c0_27] : memref<128x32xf32, #tpu.memory_space<vmem>>, vector<128x32xf32>
    %c0_28 = arith.constant 0 : index
    %c0_29 = arith.constant 0 : index
    %37 = vector.load %arg9[%c0_28, %c0_29] : memref<128x32xf32, #tpu.memory_space<vmem>>, vector<128x32xf32>
    %c0_30 = arith.constant 0 : index
    %c0_31 = arith.constant 0 : index
    %38 = vector.load %arg10[%c0_30, %c0_31] : memref<32x128xf32, #tpu.memory_space<vmem>>, vector<32x128xf32>
    %c0_32 = arith.constant 0 : index
    %c0_33 = arith.constant 0 : index
    %c0_34 = arith.constant 0 : index
    %39 = vector.load %arg16[%c0_32, %c0_33, %c0_34] : memref<2x1x32xf32, #tpu.memory_space<vmem>>, vector<1x1x32xf32>
    %40 = vector.shape_cast %39 : vector<1x1x32xf32> to vector<1x32xf32>
    %c0_35 = arith.constant 0 : index
    %c0_36 = arith.constant 0 : index
    %c0_37 = arith.constant 0 : index
    %41 = vector.load %arg17[%c0_35, %c0_36, %c0_37] : memref<2x1x32xf32, #tpu.memory_space<vmem>>, vector<1x1x32xf32>
    %42 = vector.shape_cast %41 : vector<1x1x32xf32> to vector<1x32xf32>
    %cst_38 = arith.constant dense<0.000000e+00> : vector<32xf32>
    %43 = vector.multi_reduction <add>, %35, %cst_38 [1] : vector<32x32xf32> to vector<32xf32>
    %44 = vector.shape_cast %43 : vector<32xf32> to vector<32x1xf32>
    %cst_39 = arith.constant 3.200000e+01 : f32
    %45 = vector.broadcast %cst_39 : f32 to vector<32x1xf32>
    %46 = arith.divf %44, %45 : vector<32x1xf32>
    %47 = vector.broadcast %46 : vector<32x1xf32> to vector<32x32xf32>
    %48 = arith.subf %35, %47 : vector<32x32xf32>
    %49 = arith.mulf %48, %48 : vector<32x32xf32>
    %cst_40 = arith.constant dense<0.000000e+00> : vector<32xf32>
    %50 = vector.multi_reduction <add>, %49, %cst_40 [1] : vector<32x32xf32> to vector<32xf32>
    %51 = vector.shape_cast %50 : vector<32xf32> to vector<32x1xf32>
    %cst_41 = arith.constant 3.200000e+01 : f32
    %52 = vector.broadcast %cst_41 : f32 to vector<32x1xf32>
    %53 = arith.divf %51, %52 : vector<32x1xf32>
    %54 = vector.broadcast %46 : vector<32x1xf32> to vector<32x32xf32>
    %55 = arith.subf %35, %54 : vector<32x32xf32>
    %cst_42 = arith.constant 9.99999974E-6 : f32
    %56 = vector.broadcast %cst_42 : f32 to vector<32x1xf32>
    %57 = arith.addf %53, %56 : vector<32x1xf32>
    %58 = math.rsqrt %57 : vector<32x1xf32>
    %59 = vector.broadcast %58 : vector<32x1xf32> to vector<32x32xf32>
    %60 = arith.mulf %55, %59 : vector<32x32xf32>
    %61 = vector.broadcast %40 : vector<1x32xf32> to vector<32x32xf32>
    %62 = arith.mulf %60, %61 : vector<32x32xf32>
    %63 = vector.broadcast %42 : vector<1x32xf32> to vector<32x32xf32>
    %64 = arith.addf %62, %63 : vector<32x32xf32>
    %c0_43 = arith.constant 0 : index
    %c0_44 = arith.constant 0 : index
    %c0_45 = arith.constant 0 : index
    %65 = vector.load %arg18[%c0_43, %c0_44, %c0_45] : memref<2x32x96xf32, #tpu.memory_space<vmem>>, vector<1x32x96xf32>
    %66 = vector.shape_cast %65 : vector<1x32x96xf32> to vector<32x96xf32>
    %67 = arith.truncf %64 : vector<32x32xf32> to vector<32x32xbf16>
    %68 = arith.truncf %66 : vector<32x96xf32> to vector<32x96xbf16>
    %cst_46 = arith.constant dense<0.000000e+00> : vector<32x96xf32>
    %69 = tpu.matmul %67, %68, %cst_46 {dimension_numbers = #tpu.dot_dimension_numbers<[1], [0], [0], [1], [0, 0, 1, 1], [], []>} : vector<32x32xbf16>, vector<32x96xbf16>, vector<32x96xf32> -> vector<32x96xf32>
    %c0_47 = arith.constant 0 : index
    %c0_48 = arith.constant 0 : index
    %c0_49 = arith.constant 0 : index
    %70 = vector.load %arg19[%c0_47, %c0_48, %c0_49] : memref<2x1x96xf32, #tpu.memory_space<vmem>>, vector<1x1x96xf32>
    %71 = vector.shape_cast %70 : vector<1x1x96xf32> to vector<1x96xf32>
    %72 = vector.broadcast %71 : vector<1x96xf32> to vector<32x96xf32>
    %73 = arith.addf %69, %72 : vector<32x96xf32>
    %74 = vector.extract_strided_slice %73 {offsets = [0, 0], sizes = [32, 32], strides = [1, 1]} : vector<32x96xf32> to vector<32x32xf32>
    %75 = vector.extract_strided_slice %73 {offsets = [0, 32], sizes = [32, 32], strides = [1, 1]} : vector<32x96xf32> to vector<32x32xf32>
    %76 = vector.extract_strided_slice %73 {offsets = [0, 64], sizes = [32, 32], strides = [1, 1]} : vector<32x96xf32> to vector<32x32xf32>
    %77 = tpu.concatenate %74, %74, %74, %74 in 0 : vector<32x32xf32>, vector<32x32xf32>, vector<32x32xf32>, vector<32x32xf32> -> vector<128x32xf32>
    %78 = arith.mulf %77, %36 : vector<128x32xf32>
    %79 = arith.truncf %78 : vector<128x32xf32> to vector<128x32xbf16>
    %80 = arith.truncf %75 : vector<32x32xf32> to vector<32x32xbf16>
    %cst_50 = arith.constant dense<0.000000e+00> : vector<128x32xf32>
    %81 = tpu.matmul %79, %80, %cst_50 {dimension_numbers = #tpu.dot_dimension_numbers<[1], [1], [0], [0], [0, 0, 1, 0], [], []>} : vector<128x32xbf16>, vector<32x32xbf16>, vector<128x32xf32> -> vector<128x32xf32>
    %cst_51 = arith.constant 0.353553385 : f32
    %82 = vector.broadcast %cst_51 : f32 to vector<128x32xf32>
    %83 = arith.mulf %81, %82 : vector<128x32xf32>
    %84 = arith.addf %83, %37 : vector<128x32xf32>
    %cst_52 = arith.constant dense<0xFF800000> : vector<128xf32>
    %85 = vector.multi_reduction <maximumf>, %84, %cst_52 [1] : vector<128x32xf32> to vector<128xf32>
    %86 = vector.shape_cast %85 : vector<128xf32> to vector<128x1xf32>
    %87 = vector.broadcast %86 : vector<128x1xf32> to vector<128x32xf32>
    %88 = arith.subf %84, %87 : vector<128x32xf32>
    %89 = math.exp %88 : vector<128x32xf32>
    %cst_53 = arith.constant dense<0.000000e+00> : vector<128xf32>
    %90 = vector.multi_reduction <add>, %89, %cst_53 [1] : vector<128x32xf32> to vector<128xf32>
    %91 = vector.shape_cast %90 : vector<128xf32> to vector<128x1xf32>
    %92 = tpu.reciprocal %91 {approx = true} : vector<128x1xf32> -> vector<128x1xf32>
    %93 = vector.broadcast %92 : vector<128x1xf32> to vector<128x32xf32>
    %94 = arith.mulf %89, %93 : vector<128x32xf32>
    %95 = arith.truncf %94 : vector<128x32xf32> to vector<128x32xbf16>
    %96 = arith.truncf %76 : vector<32x32xf32> to vector<32x32xbf16>
    %cst_54 = arith.constant dense<0.000000e+00> : vector<128x32xf32>
    %97 = tpu.matmul %95, %96, %cst_54 {dimension_numbers = #tpu.dot_dimension_numbers<[1], [0], [0], [1], [0, 0, 1, 1], [], []>} : vector<128x32xbf16>, vector<32x32xbf16>, vector<128x32xf32> -> vector<128x32xf32>
    %98 = arith.mulf %97, %36 : vector<128x32xf32>
    %cst_55 = arith.constant dense<0.000000e+00> : vector<32x32xf32>
    %99 = tpu.matmul %38, %98, %cst_55 {dimension_numbers = #tpu.dot_dimension_numbers<[1], [0], [0], [1], [0, 0, 1, 1], [], []>} : vector<32x128xf32>, vector<128x32xf32>, vector<32x32xf32> -> vector<32x32xf32>
    %c0_56 = arith.constant 0 : index
    %c0_57 = arith.constant 0 : index
    %c0_58 = arith.constant 0 : index
    %100 = vector.load %arg20[%c0_56, %c0_57, %c0_58] : memref<2x32x32xf32, #tpu.memory_space<vmem>>, vector<1x32x32xf32>
    %101 = vector.shape_cast %100 : vector<1x32x32xf32> to vector<32x32xf32>
    %102 = arith.truncf %99 : vector<32x32xf32> to vector<32x32xbf16>
    %103 = arith.truncf %101 : vector<32x32xf32> to vector<32x32xbf16>
    %cst_59 = arith.constant dense<0.000000e+00> : vector<32x32xf32>
    %104 = tpu.matmul %102, %103, %cst_59 {dimension_numbers = #tpu.dot_dimension_numbers<[1], [0], [0], [1], [0, 0, 1, 1], [], []>} : vector<32x32xbf16>, vector<32x32xbf16>, vector<32x32xf32> -> vector<32x32xf32>
    %105 = arith.addf %35, %104 : vector<32x32xf32>
    %c0_60 = arith.constant 0 : index
    %c0_61 = arith.constant 0 : index
    %c0_62 = arith.constant 0 : index
    %106 = vector.load %arg21[%c0_60, %c0_61, %c0_62] : memref<2x1x32xf32, #tpu.memory_space<vmem>>, vector<1x1x32xf32>
    %107 = vector.shape_cast %106 : vector<1x1x32xf32> to vector<1x32xf32>
    %108 = vector.broadcast %107 : vector<1x32xf32> to vector<32x32xf32>
    %109 = arith.addf %105, %108 : vector<32x32xf32>
    %c0_63 = arith.constant 0 : index
    %c0_64 = arith.constant 0 : index
    %c0_65 = arith.constant 0 : index
    %110 = vector.load %arg22[%c0_63, %c0_64, %c0_65] : memref<2x1x32xf32, #tpu.memory_space<vmem>>, vector<1x1x32xf32>
    %111 = vector.shape_cast %110 : vector<1x1x32xf32> to vector<1x32xf32>
    %c0_66 = arith.constant 0 : index
    %c0_67 = arith.constant 0 : index
    %c0_68 = arith.constant 0 : index
    %112 = vector.load %arg23[%c0_66, %c0_67, %c0_68] : memref<2x1x32xf32, #tpu.memory_space<vmem>>, vector<1x1x32xf32>
    %113 = vector.shape_cast %112 : vector<1x1x32xf32> to vector<1x32xf32>
    %cst_69 = arith.constant dense<0.000000e+00> : vector<32xf32>
    %114 = vector.multi_reduction <add>, %109, %cst_69 [1] : vector<32x32xf32> to vector<32xf32>
    %115 = vector.shape_cast %114 : vector<32xf32> to vector<32x1xf32>
    %cst_70 = arith.constant 3.200000e+01 : f32
    %116 = vector.broadcast %cst_70 : f32 to vector<32x1xf32>
    %117 = arith.divf %115, %116 : vector<32x1xf32>
    %118 = vector.broadcast %117 : vector<32x1xf32> to vector<32x32xf32>
    %119 = arith.subf %109, %118 : vector<32x32xf32>
    %120 = arith.mulf %119, %119 : vector<32x32xf32>
    %cst_71 = arith.constant dense<0.000000e+00> : vector<32xf32>
    %121 = vector.multi_reduction <add>, %120, %cst_71 [1] : vector<32x32xf32> to vector<32xf32>
    %122 = vector.shape_cast %121 : vector<32xf32> to vector<32x1xf32>
    %cst_72 = arith.constant 3.200000e+01 : f32
    %123 = vector.broadcast %cst_72 : f32 to vector<32x1xf32>
    %124 = arith.divf %122, %123 : vector<32x1xf32>
    %125 = vector.broadcast %117 : vector<32x1xf32> to vector<32x32xf32>
    %126 = arith.subf %109, %125 : vector<32x32xf32>
    %cst_73 = arith.constant 9.99999974E-6 : f32
    %127 = vector.broadcast %cst_73 : f32 to vector<32x1xf32>
    %128 = arith.addf %124, %127 : vector<32x1xf32>
    %129 = math.rsqrt %128 : vector<32x1xf32>
    %130 = vector.broadcast %129 : vector<32x1xf32> to vector<32x32xf32>
    %131 = arith.mulf %126, %130 : vector<32x32xf32>
    %132 = vector.broadcast %111 : vector<1x32xf32> to vector<32x32xf32>
    %133 = arith.mulf %131, %132 : vector<32x32xf32>
    %134 = vector.broadcast %113 : vector<1x32xf32> to vector<32x32xf32>
    %135 = arith.addf %133, %134 : vector<32x32xf32>
    %c0_74 = arith.constant 0 : index
    %c0_75 = arith.constant 0 : index
    %c0_76 = arith.constant 0 : index
    %136 = vector.load %arg24[%c0_74, %c0_75, %c0_76] : memref<2x32x64xf32, #tpu.memory_space<vmem>>, vector<1x32x64xf32>
    %137 = vector.shape_cast %136 : vector<1x32x64xf32> to vector<32x64xf32>
    %138 = arith.truncf %135 : vector<32x32xf32> to vector<32x32xbf16>
    %139 = arith.truncf %137 : vector<32x64xf32> to vector<32x64xbf16>
    %cst_77 = arith.constant dense<0.000000e+00> : vector<32x64xf32>
    %140 = tpu.matmul %138, %139, %cst_77 {dimension_numbers = #tpu.dot_dimension_numbers<[1], [0], [0], [1], [0, 0, 1, 1], [], []>} : vector<32x32xbf16>, vector<32x64xbf16>, vector<32x64xf32> -> vector<32x64xf32>
    %c0_78 = arith.constant 0 : index
    %c0_79 = arith.constant 0 : index
    %c0_80 = arith.constant 0 : index
    %141 = vector.load %arg25[%c0_78, %c0_79, %c0_80] : memref<2x1x64xf32, #tpu.memory_space<vmem>>, vector<1x1x64xf32>
    %142 = vector.shape_cast %141 : vector<1x1x64xf32> to vector<1x64xf32>
    %143 = vector.broadcast %142 : vector<1x64xf32> to vector<32x64xf32>
    %144 = arith.addf %140, %143 : vector<32x64xf32>
    %cst_81 = arith.constant 5.000000e-01 : f32
    %145 = vector.broadcast %cst_81 : f32 to vector<32x64xf32>
    %146 = arith.mulf %145, %144 : vector<32x64xf32>
    %cst_82 = arith.constant 0.707106769 : f32
    %147 = vector.broadcast %cst_82 : f32 to vector<32x64xf32>
    %148 = arith.mulf %144, %147 : vector<32x64xf32>
    %149 = math.erf %148 : vector<32x64xf32>
    %cst_83 = arith.constant 1.000000e+00 : f32
    %150 = vector.broadcast %cst_83 : f32 to vector<32x64xf32>
    %151 = arith.addf %150, %149 : vector<32x64xf32>
    %152 = arith.mulf %146, %151 : vector<32x64xf32>
    %c0_84 = arith.constant 0 : index
    %c0_85 = arith.constant 0 : index
    %c0_86 = arith.constant 0 : index
    %153 = vector.load %arg26[%c0_84, %c0_85, %c0_86] : memref<2x64x32xf32, #tpu.memory_space<vmem>>, vector<1x64x32xf32>
    %154 = vector.shape_cast %153 : vector<1x64x32xf32> to vector<64x32xf32>
    %155 = arith.truncf %152 : vector<32x64xf32> to vector<32x64xbf16>
    %156 = arith.truncf %154 : vector<64x32xf32> to vector<64x32xbf16>
    %cst_87 = arith.constant dense<0.000000e+00> : vector<32x32xf32>
    %157 = tpu.matmul %155, %156, %cst_87 {dimension_numbers = #tpu.dot_dimension_numbers<[1], [0], [0], [1], [0, 0, 1, 1], [], []>} : vector<32x64xbf16>, vector<64x32xbf16>, vector<32x32xf32> -> vector<32x32xf32>
    %158 = arith.addf %109, %157 : vector<32x32xf32>
    %c0_88 = arith.constant 0 : index
    %c0_89 = arith.constant 0 : index
    %c0_90 = arith.constant 0 : index
    %159 = vector.load %arg27[%c0_88, %c0_89, %c0_90] : memref<2x1x32xf32, #tpu.memory_space<vmem>>, vector<1x1x32xf32>
    %160 = vector.shape_cast %159 : vector<1x1x32xf32> to vector<1x32xf32>
    %161 = vector.broadcast %160 : vector<1x32xf32> to vector<32x32xf32>
    %162 = arith.addf %158, %161 : vector<32x32xf32>
    %c1 = arith.constant 1 : index
    %c0_91 = arith.constant 0 : index
    %c0_92 = arith.constant 0 : index
    %163 = vector.load %arg16[%c1, %c0_91, %c0_92] : memref<2x1x32xf32, #tpu.memory_space<vmem>>, vector<1x1x32xf32>
    %164 = vector.shape_cast %163 : vector<1x1x32xf32> to vector<1x32xf32>
    %c1_93 = arith.constant 1 : index
    %c0_94 = arith.constant 0 : index
    %c0_95 = arith.constant 0 : index
    %165 = vector.load %arg17[%c1_93, %c0_94, %c0_95] : memref<2x1x32xf32, #tpu.memory_space<vmem>>, vector<1x1x32xf32>
    %166 = vector.shape_cast %165 : vector<1x1x32xf32> to vector<1x32xf32>
    %cst_96 = arith.constant dense<0.000000e+00> : vector<32xf32>
    %167 = vector.multi_reduction <add>, %162, %cst_96 [1] : vector<32x32xf32> to vector<32xf32>
    %168 = vector.shape_cast %167 : vector<32xf32> to vector<32x1xf32>
    %cst_97 = arith.constant 3.200000e+01 : f32
    %169 = vector.broadcast %cst_97 : f32 to vector<32x1xf32>
    %170 = arith.divf %168, %169 : vector<32x1xf32>
    %171 = vector.broadcast %170 : vector<32x1xf32> to vector<32x32xf32>
    %172 = arith.subf %162, %171 : vector<32x32xf32>
    %173 = arith.mulf %172, %172 : vector<32x32xf32>
    %cst_98 = arith.constant dense<0.000000e+00> : vector<32xf32>
    %174 = vector.multi_reduction <add>, %173, %cst_98 [1] : vector<32x32xf32> to vector<32xf32>
    %175 = vector.shape_cast %174 : vector<32xf32> to vector<32x1xf32>
    %cst_99 = arith.constant 3.200000e+01 : f32
    %176 = vector.broadcast %cst_99 : f32 to vector<32x1xf32>
    %177 = arith.divf %175, %176 : vector<32x1xf32>
    %178 = vector.broadcast %170 : vector<32x1xf32> to vector<32x32xf32>
    %179 = arith.subf %162, %178 : vector<32x32xf32>
    %cst_100 = arith.constant 9.99999974E-6 : f32
    %180 = vector.broadcast %cst_100 : f32 to vector<32x1xf32>
    %181 = arith.addf %177, %180 : vector<32x1xf32>
    %182 = math.rsqrt %181 : vector<32x1xf32>
    %183 = vector.broadcast %182 : vector<32x1xf32> to vector<32x32xf32>
    %184 = arith.mulf %179, %183 : vector<32x32xf32>
    %185 = vector.broadcast %164 : vector<1x32xf32> to vector<32x32xf32>
    %186 = arith.mulf %184, %185 : vector<32x32xf32>
    %187 = vector.broadcast %166 : vector<1x32xf32> to vector<32x32xf32>
    %188 = arith.addf %186, %187 : vector<32x32xf32>
    %c1_101 = arith.constant 1 : index
    %c0_102 = arith.constant 0 : index
    %c0_103 = arith.constant 0 : index
    %189 = vector.load %arg18[%c1_101, %c0_102, %c0_103] : memref<2x32x96xf32, #tpu.memory_space<vmem>>, vector<1x32x96xf32>
    %190 = vector.shape_cast %189 : vector<1x32x96xf32> to vector<32x96xf32>
    %191 = arith.truncf %188 : vector<32x32xf32> to vector<32x32xbf16>
    %192 = arith.truncf %190 : vector<32x96xf32> to vector<32x96xbf16>
    %cst_104 = arith.constant dense<0.000000e+00> : vector<32x96xf32>
    %193 = tpu.matmul %191, %192, %cst_104 {dimension_numbers = #tpu.dot_dimension_numbers<[1], [0], [0], [1], [0, 0, 1, 1], [], []>} : vector<32x32xbf16>, vector<32x96xbf16>, vector<32x96xf32> -> vector<32x96xf32>
    %c1_105 = arith.constant 1 : index
    %c0_106 = arith.constant 0 : index
    %c0_107 = arith.constant 0 : index
    %194 = vector.load %arg19[%c1_105, %c0_106, %c0_107] : memref<2x1x96xf32, #tpu.memory_space<vmem>>, vector<1x1x96xf32>
    %195 = vector.shape_cast %194 : vector<1x1x96xf32> to vector<1x96xf32>
    %196 = vector.broadcast %195 : vector<1x96xf32> to vector<32x96xf32>
    %197 = arith.addf %193, %196 : vector<32x96xf32>
    %198 = vector.extract_strided_slice %197 {offsets = [0, 0], sizes = [32, 32], strides = [1, 1]} : vector<32x96xf32> to vector<32x32xf32>
    %199 = vector.extract_strided_slice %197 {offsets = [0, 32], sizes = [32, 32], strides = [1, 1]} : vector<32x96xf32> to vector<32x32xf32>
    %200 = vector.extract_strided_slice %197 {offsets = [0, 64], sizes = [32, 32], strides = [1, 1]} : vector<32x96xf32> to vector<32x32xf32>
    %201 = tpu.concatenate %198, %198, %198, %198 in 0 : vector<32x32xf32>, vector<32x32xf32>, vector<32x32xf32>, vector<32x32xf32> -> vector<128x32xf32>
    %202 = arith.mulf %201, %36 : vector<128x32xf32>
    %203 = arith.truncf %202 : vector<128x32xf32> to vector<128x32xbf16>
    %204 = arith.truncf %199 : vector<32x32xf32> to vector<32x32xbf16>
    %cst_108 = arith.constant dense<0.000000e+00> : vector<128x32xf32>
    %205 = tpu.matmul %203, %204, %cst_108 {dimension_numbers = #tpu.dot_dimension_numbers<[1], [1], [0], [0], [0, 0, 1, 0], [], []>} : vector<128x32xbf16>, vector<32x32xbf16>, vector<128x32xf32> -> vector<128x32xf32>
    %cst_109 = arith.constant 0.353553385 : f32
    %206 = vector.broadcast %cst_109 : f32 to vector<128x32xf32>
    %207 = arith.mulf %205, %206 : vector<128x32xf32>
    %208 = arith.addf %207, %37 : vector<128x32xf32>
    %cst_110 = arith.constant dense<0xFF800000> : vector<128xf32>
    %209 = vector.multi_reduction <maximumf>, %208, %cst_110 [1] : vector<128x32xf32> to vector<128xf32>
    %210 = vector.shape_cast %209 : vector<128xf32> to vector<128x1xf32>
    %211 = vector.broadcast %210 : vector<128x1xf32> to vector<128x32xf32>
    %212 = arith.subf %208, %211 : vector<128x32xf32>
    %213 = math.exp %212 : vector<128x32xf32>
    %cst_111 = arith.constant dense<0.000000e+00> : vector<128xf32>
    %214 = vector.multi_reduction <add>, %213, %cst_111 [1] : vector<128x32xf32> to vector<128xf32>
    %215 = vector.shape_cast %214 : vector<128xf32> to vector<128x1xf32>
    %216 = tpu.reciprocal %215 {approx = true} : vector<128x1xf32> -> vector<128x1xf32>
    %217 = vector.broadcast %216 : vector<128x1xf32> to vector<128x32xf32>
    %218 = arith.mulf %213, %217 : vector<128x32xf32>
    %219 = arith.truncf %218 : vector<128x32xf32> to vector<128x32xbf16>
    %220 = arith.truncf %200 : vector<32x32xf32> to vector<32x32xbf16>
    %cst_112 = arith.constant dense<0.000000e+00> : vector<128x32xf32>
    %221 = tpu.matmul %219, %220, %cst_112 {dimension_numbers = #tpu.dot_dimension_numbers<[1], [0], [0], [1], [0, 0, 1, 1], [], []>} : vector<128x32xbf16>, vector<32x32xbf16>, vector<128x32xf32> -> vector<128x32xf32>
    %222 = arith.mulf %221, %36 : vector<128x32xf32>
    %cst_113 = arith.constant dense<0.000000e+00> : vector<32x32xf32>
    %223 = tpu.matmul %38, %222, %cst_113 {dimension_numbers = #tpu.dot_dimension_numbers<[1], [0], [0], [1], [0, 0, 1, 1], [], []>} : vector<32x128xf32>, vector<128x32xf32>, vector<32x32xf32> -> vector<32x32xf32>
    %c1_114 = arith.constant 1 : index
    %c0_115 = arith.constant 0 : index
    %c0_116 = arith.constant 0 : index
    %224 = vector.load %arg20[%c1_114, %c0_115, %c0_116] : memref<2x32x32xf32, #tpu.memory_space<vmem>>, vector<1x32x32xf32>
    %225 = vector.shape_cast %224 : vector<1x32x32xf32> to vector<32x32xf32>
    %226 = arith.truncf %223 : vector<32x32xf32> to vector<32x32xbf16>
    %227 = arith.truncf %225 : vector<32x32xf32> to vector<32x32xbf16>
    %cst_117 = arith.constant dense<0.000000e+00> : vector<32x32xf32>
    %228 = tpu.matmul %226, %227, %cst_117 {dimension_numbers = #tpu.dot_dimension_numbers<[1], [0], [0], [1], [0, 0, 1, 1], [], []>} : vector<32x32xbf16>, vector<32x32xbf16>, vector<32x32xf32> -> vector<32x32xf32>
    %229 = arith.addf %162, %228 : vector<32x32xf32>
    %c1_118 = arith.constant 1 : index
    %c0_119 = arith.constant 0 : index
    %c0_120 = arith.constant 0 : index
    %230 = vector.load %arg21[%c1_118, %c0_119, %c0_120] : memref<2x1x32xf32, #tpu.memory_space<vmem>>, vector<1x1x32xf32>
    %231 = vector.shape_cast %230 : vector<1x1x32xf32> to vector<1x32xf32>
    %232 = vector.broadcast %231 : vector<1x32xf32> to vector<32x32xf32>
    %233 = arith.addf %229, %232 : vector<32x32xf32>
    %c1_121 = arith.constant 1 : index
    %c0_122 = arith.constant 0 : index
    %c0_123 = arith.constant 0 : index
    %234 = vector.load %arg22[%c1_121, %c0_122, %c0_123] : memref<2x1x32xf32, #tpu.memory_space<vmem>>, vector<1x1x32xf32>
    %235 = vector.shape_cast %234 : vector<1x1x32xf32> to vector<1x32xf32>
    %c1_124 = arith.constant 1 : index
    %c0_125 = arith.constant 0 : index
    %c0_126 = arith.constant 0 : index
    %236 = vector.load %arg23[%c1_124, %c0_125, %c0_126] : memref<2x1x32xf32, #tpu.memory_space<vmem>>, vector<1x1x32xf32>
    %237 = vector.shape_cast %236 : vector<1x1x32xf32> to vector<1x32xf32>
    %cst_127 = arith.constant dense<0.000000e+00> : vector<32xf32>
    %238 = vector.multi_reduction <add>, %233, %cst_127 [1] : vector<32x32xf32> to vector<32xf32>
    %239 = vector.shape_cast %238 : vector<32xf32> to vector<32x1xf32>
    %cst_128 = arith.constant 3.200000e+01 : f32
    %240 = vector.broadcast %cst_128 : f32 to vector<32x1xf32>
    %241 = arith.divf %239, %240 : vector<32x1xf32>
    %242 = vector.broadcast %241 : vector<32x1xf32> to vector<32x32xf32>
    %243 = arith.subf %233, %242 : vector<32x32xf32>
    %244 = arith.mulf %243, %243 : vector<32x32xf32>
    %cst_129 = arith.constant dense<0.000000e+00> : vector<32xf32>
    %245 = vector.multi_reduction <add>, %244, %cst_129 [1] : vector<32x32xf32> to vector<32xf32>
    %246 = vector.shape_cast %245 : vector<32xf32> to vector<32x1xf32>
    %cst_130 = arith.constant 3.200000e+01 : f32
    %247 = vector.broadcast %cst_130 : f32 to vector<32x1xf32>
    %248 = arith.divf %246, %247 : vector<32x1xf32>
    %249 = vector.broadcast %241 : vector<32x1xf32> to vector<32x32xf32>
    %250 = arith.subf %233, %249 : vector<32x32xf32>
    %cst_131 = arith.constant 9.99999974E-6 : f32
    %251 = vector.broadcast %cst_131 : f32 to vector<32x1xf32>
    %252 = arith.addf %248, %251 : vector<32x1xf32>
    %253 = math.rsqrt %252 : vector<32x1xf32>
    %254 = vector.broadcast %253 : vector<32x1xf32> to vector<32x32xf32>
    %255 = arith.mulf %250, %254 : vector<32x32xf32>
    %256 = vector.broadcast %235 : vector<1x32xf32> to vector<32x32xf32>
    %257 = arith.mulf %255, %256 : vector<32x32xf32>
    %258 = vector.broadcast %237 : vector<1x32xf32> to vector<32x32xf32>
    %259 = arith.addf %257, %258 : vector<32x32xf32>
    %c1_132 = arith.constant 1 : index
    %c0_133 = arith.constant 0 : index
    %c0_134 = arith.constant 0 : index
    %260 = vector.load %arg24[%c1_132, %c0_133, %c0_134] : memref<2x32x64xf32, #tpu.memory_space<vmem>>, vector<1x32x64xf32>
    %261 = vector.shape_cast %260 : vector<1x32x64xf32> to vector<32x64xf32>
    %262 = arith.truncf %259 : vector<32x32xf32> to vector<32x32xbf16>
    %263 = arith.truncf %261 : vector<32x64xf32> to vector<32x64xbf16>
    %cst_135 = arith.constant dense<0.000000e+00> : vector<32x64xf32>
    %264 = tpu.matmul %262, %263, %cst_135 {dimension_numbers = #tpu.dot_dimension_numbers<[1], [0], [0], [1], [0, 0, 1, 1], [], []>} : vector<32x32xbf16>, vector<32x64xbf16>, vector<32x64xf32> -> vector<32x64xf32>
    %c1_136 = arith.constant 1 : index
    %c0_137 = arith.constant 0 : index
    %c0_138 = arith.constant 0 : index
    %265 = vector.load %arg25[%c1_136, %c0_137, %c0_138] : memref<2x1x64xf32, #tpu.memory_space<vmem>>, vector<1x1x64xf32>
    %266 = vector.shape_cast %265 : vector<1x1x64xf32> to vector<1x64xf32>
    %267 = vector.broadcast %266 : vector<1x64xf32> to vector<32x64xf32>
    %268 = arith.addf %264, %267 : vector<32x64xf32>
    %cst_139 = arith.constant 5.000000e-01 : f32
    %269 = vector.broadcast %cst_139 : f32 to vector<32x64xf32>
    %270 = arith.mulf %269, %268 : vector<32x64xf32>
    %cst_140 = arith.constant 0.707106769 : f32
    %271 = vector.broadcast %cst_140 : f32 to vector<32x64xf32>
    %272 = arith.mulf %268, %271 : vector<32x64xf32>
    %273 = math.erf %272 : vector<32x64xf32>
    %cst_141 = arith.constant 1.000000e+00 : f32
    %274 = vector.broadcast %cst_141 : f32 to vector<32x64xf32>
    %275 = arith.addf %274, %273 : vector<32x64xf32>
    %276 = arith.mulf %270, %275 : vector<32x64xf32>
    %c1_142 = arith.constant 1 : index
    %c0_143 = arith.constant 0 : index
    %c0_144 = arith.constant 0 : index
    %277 = vector.load %arg26[%c1_142, %c0_143, %c0_144] : memref<2x64x32xf32, #tpu.memory_space<vmem>>, vector<1x64x32xf32>
    %278 = vector.shape_cast %277 : vector<1x64x32xf32> to vector<64x32xf32>
    %279 = arith.truncf %276 : vector<32x64xf32> to vector<32x64xbf16>
    %280 = arith.truncf %278 : vector<64x32xf32> to vector<64x32xbf16>
    %cst_145 = arith.constant dense<0.000000e+00> : vector<32x32xf32>
    %281 = tpu.matmul %279, %280, %cst_145 {dimension_numbers = #tpu.dot_dimension_numbers<[1], [0], [0], [1], [0, 0, 1, 1], [], []>} : vector<32x64xbf16>, vector<64x32xbf16>, vector<32x32xf32> -> vector<32x32xf32>
    %282 = arith.addf %233, %281 : vector<32x32xf32>
    %c1_146 = arith.constant 1 : index
    %c0_147 = arith.constant 0 : index
    %c0_148 = arith.constant 0 : index
    %283 = vector.load %arg27[%c1_146, %c0_147, %c0_148] : memref<2x1x32xf32, #tpu.memory_space<vmem>>, vector<1x1x32xf32>
    %284 = vector.shape_cast %283 : vector<1x1x32xf32> to vector<1x32xf32>
    %285 = vector.broadcast %284 : vector<1x32xf32> to vector<32x32xf32>
    %286 = arith.addf %282, %285 : vector<32x32xf32>
    %c0_149 = arith.constant 0 : index
    %c0_150 = arith.constant 0 : index
    %287 = vector.load %arg11[%c0_149, %c0_150] : memref<16x32xf32, #tpu.memory_space<vmem>>, vector<16x32xf32>
    %cst_151 = arith.constant dense<0.000000e+00> : vector<16x32xf32>
    %288 = tpu.matmul %287, %286, %cst_151 {dimension_numbers = #tpu.dot_dimension_numbers<[1], [0], [0], [1], [0, 0, 1, 1], [], []>} : vector<16x32xf32>, vector<32x32xf32>, vector<16x32xf32> -> vector<16x32xf32>
    %c0_152 = arith.constant 0 : index
    %c0_153 = arith.constant 0 : index
    %289 = vector.load %arg28[%c0_152, %c0_153] : memref<1x32xf32, #tpu.memory_space<vmem>>, vector<1x32xf32>
    %c0_154 = arith.constant 0 : index
    %c0_155 = arith.constant 0 : index
    %290 = vector.load %arg29[%c0_154, %c0_155] : memref<1x32xf32, #tpu.memory_space<vmem>>, vector<1x32xf32>
    %cst_156 = arith.constant dense<0.000000e+00> : vector<16xf32>
    %291 = vector.multi_reduction <add>, %288, %cst_156 [1] : vector<16x32xf32> to vector<16xf32>
    %292 = vector.shape_cast %291 : vector<16xf32> to vector<16x1xf32>
    %cst_157 = arith.constant 3.200000e+01 : f32
    %293 = vector.broadcast %cst_157 : f32 to vector<16x1xf32>
    %294 = arith.divf %292, %293 : vector<16x1xf32>
    %295 = vector.broadcast %294 : vector<16x1xf32> to vector<16x32xf32>
    %296 = arith.subf %288, %295 : vector<16x32xf32>
    %297 = arith.mulf %296, %296 : vector<16x32xf32>
    %cst_158 = arith.constant dense<0.000000e+00> : vector<16xf32>
    %298 = vector.multi_reduction <add>, %297, %cst_158 [1] : vector<16x32xf32> to vector<16xf32>
    %299 = vector.shape_cast %298 : vector<16xf32> to vector<16x1xf32>
    %cst_159 = arith.constant 3.200000e+01 : f32
    %300 = vector.broadcast %cst_159 : f32 to vector<16x1xf32>
    %301 = arith.divf %299, %300 : vector<16x1xf32>
    %302 = vector.broadcast %294 : vector<16x1xf32> to vector<16x32xf32>
    %303 = arith.subf %288, %302 : vector<16x32xf32>
    %cst_160 = arith.constant 9.99999974E-6 : f32
    %304 = vector.broadcast %cst_160 : f32 to vector<16x1xf32>
    %305 = arith.addf %301, %304 : vector<16x1xf32>
    %306 = math.rsqrt %305 : vector<16x1xf32>
    %307 = vector.broadcast %306 : vector<16x1xf32> to vector<16x32xf32>
    %308 = arith.mulf %303, %307 : vector<16x32xf32>
    %309 = vector.broadcast %289 : vector<1x32xf32> to vector<16x32xf32>
    %310 = arith.mulf %308, %309 : vector<16x32xf32>
    %311 = vector.broadcast %290 : vector<1x32xf32> to vector<16x32xf32>
    %312 = arith.addf %310, %311 : vector<16x32xf32>
    %c0_161 = arith.constant 0 : index
    %c0_162 = arith.constant 0 : index
    %313 = vector.load %arg30[%c0_161, %c0_162] : memref<32x128xf32, #tpu.memory_space<vmem>>, vector<32x128xf32>
    %314 = arith.truncf %312 : vector<16x32xf32> to vector<16x32xbf16>
    %315 = arith.truncf %313 : vector<32x128xf32> to vector<32x128xbf16>
    %cst_163 = arith.constant dense<0.000000e+00> : vector<16x128xf32>
    %316 = tpu.matmul %314, %315, %cst_163 {dimension_numbers = #tpu.dot_dimension_numbers<[1], [0], [0], [1], [0, 0, 1, 1], [], []>} : vector<16x32xbf16>, vector<32x128xbf16>, vector<16x128xf32> -> vector<16x128xf32>
    %c0_164 = arith.constant 0 : index
    %c0_165 = arith.constant 0 : index
    %317 = vector.load %arg31[%c0_164, %c0_165] : memref<16x128xf32, #tpu.memory_space<vmem>>, vector<16x128xf32>
    tpu.vector_store %arg31[%c0_164, %c0_165], %316 {strides = array<i32>} : memref<16x128xf32, #tpu.memory_space<vmem>>, vector<16x128xf32>,
    return
  }
  func.func @transform_0(%arg0: i32) -> (i32, i32) {
    %c0_i32 = arith.constant 0 : i32
    %c0_i32_0 = arith.constant 0 : i32
    return %arg0, %c0_i32 : i32, i32
  }
  func.func @transform_1(%arg0: i32) -> (i32, i32) {
    %c0_i32 = arith.constant 0 : i32
    %c0_i32_0 = arith.constant 0 : i32
    return %arg0, %c0_i32 : i32, i32
  }
  func.func @transform_2(%arg0: i32) -> (i32, i32) {
    %c0_i32 = arith.constant 0 : i32
    %c0_i32_0 = arith.constant 0 : i32
    return %arg0, %c0_i32 : i32, i32
  }
  func.func @transform_3(%arg0: i32) -> (i32, i32) {
    %c0_i32 = arith.constant 0 : i32
    %c0_i32_0 = arith.constant 0 : i32
    %c0_i32_1 = arith.constant 0 : i32
    return %c0_i32, %c0_i32_0 : i32, i32
  }
  func.func @transform_4(%arg0: i32) -> (i32, i32) {
    %c0_i32 = arith.constant 0 : i32
    %c0_i32_0 = arith.constant 0 : i32
    %c0_i32_1 = arith.constant 0 : i32
    return %c0_i32, %c0_i32_0 : i32, i32
  }
  func.func @transform_5(%arg0: i32) -> (i32, i32) {
    %c0_i32 = arith.constant 0 : i32
    %c0_i32_0 = arith.constant 0 : i32
    %c0_i32_1 = arith.constant 0 : i32
    return %c0_i32, %c0_i32_0 : i32, i32
  }
  func.func @transform_6(%arg0: i32) -> (i32, i32) {
    %c0_i32 = arith.constant 0 : i32
    %c0_i32_0 = arith.constant 0 : i32
    %c0_i32_1 = arith.constant 0 : i32
    return %c0_i32, %c0_i32_0 : i32, i32
  }
  func.func @transform_7(%arg0: i32) -> (i32, i32) {
    %c0_i32 = arith.constant 0 : i32
    %c0_i32_0 = arith.constant 0 : i32
    %c0_i32_1 = arith.constant 0 : i32
    return %c0_i32, %c0_i32_0 : i32, i32
  }
  func.func @transform_8(%arg0: i32) -> (i32, i32) {
    %c0_i32 = arith.constant 0 : i32
    %c0_i32_0 = arith.constant 0 : i32
    %c0_i32_1 = arith.constant 0 : i32
    return %c0_i32, %c0_i32_0 : i32, i32
  }
  func.func @transform_9(%arg0: i32) -> (i32, i32) {
    %c0_i32 = arith.constant 0 : i32
    %c0_i32_0 = arith.constant 0 : i32
    %c0_i32_1 = arith.constant 0 : i32
    return %c0_i32, %c0_i32_0 : i32, i32
  }
  func.func @transform_10(%arg0: i32) -> (i32, i32) {
    %c0_i32 = arith.constant 0 : i32
    %c0_i32_0 = arith.constant 0 : i32
    %c0_i32_1 = arith.constant 0 : i32
    return %c0_i32, %c0_i32_0 : i32, i32
  }
  func.func @transform_11(%arg0: i32) -> (i32, i32) {
    %c0_i32 = arith.constant 0 : i32
    %c0_i32_0 = arith.constant 0 : i32
    %c0_i32_1 = arith.constant 0 : i32
    return %c0_i32, %c0_i32_0 : i32, i32
  }
  func.func @transform_12(%arg0: i32) -> (i32, i32) {
    %c0_i32 = arith.constant 0 : i32
    %c0_i32_0 = arith.constant 0 : i32
    %c0_i32_1 = arith.constant 0 : i32
    return %c0_i32, %c0_i32_0 : i32, i32
  }
  func.func @transform_13(%arg0: i32) -> (i32, i32) {
    %c0_i32 = arith.constant 0 : i32
    %c0_i32_0 = arith.constant 0 : i32
    %c0_i32_1 = arith.constant 0 : i32
    return %c0_i32, %c0_i32_0 : i32, i32
  }
  func.func @transform_14(%arg0: i32) -> (i32, i32) {
    %c0_i32 = arith.constant 0 : i32
    %c0_i32_0 = arith.constant 0 : i32
    %c0_i32_1 = arith.constant 0 : i32
    return %c0_i32, %c0_i32_0 : i32, i32
  }
  func.func @transform_15(%arg0: i32) -> (i32, i32, i32) {
    %c0_i32 = arith.constant 0 : i32
    %c0_i32_0 = arith.constant 0 : i32
    %c0_i32_1 = arith.constant 0 : i32
    %c0_i32_2 = arith.constant 0 : i32
    return %c0_i32, %c0_i32_0, %c0_i32_1 : i32, i32, i32
  }
  func.func @transform_16(%arg0: i32) -> (i32, i32, i32) {
    %c0_i32 = arith.constant 0 : i32
    %c0_i32_0 = arith.constant 0 : i32
    %c0_i32_1 = arith.constant 0 : i32
    %c0_i32_2 = arith.constant 0 : i32
    return %c0_i32, %c0_i32_0, %c0_i32_1 : i32, i32, i32
  }
  func.func @transform_17(%arg0: i32) -> (i32, i32, i32) {
    %c0_i32 = arith.constant 0 : i32
    %c0_i32_0 = arith.constant 0 : i32
    %c0_i32_1 = arith.constant 0 : i32
    %c0_i32_2 = arith.constant 0 : i32
    return %c0_i32, %c0_i32_0, %c0_i32_1 : i32, i32, i32
  }
  func.func @transform_18(%arg0: i32) -> (i32, i32, i32) {
    %c0_i32 = arith.constant 0 : i32
    %c0_i32_0 = arith.constant 0 : i32
    %c0_i32_1 = arith.constant 0 : i32
    %c0_i32_2 = arith.constant 0 : i32
    return %c0_i32, %c0_i32_0, %c0_i32_1 : i32, i32, i32
  }
  func.func @transform_19(%arg0: i32) -> (i32, i32, i32) {
    %c0_i32 = arith.constant 0 : i32
    %c0_i32_0 = arith.constant 0 : i32
    %c0_i32_1 = arith.constant 0 : i32
    %c0_i32_2 = arith.constant 0 : i32
    return %c0_i32, %c0_i32_0, %c0_i32_1 : i32, i32, i32
  }
  func.func @transform_20(%arg0: i32) -> (i32, i32, i32) {
    %c0_i32 = arith.constant 0 : i32
    %c0_i32_0 = arith.constant 0 : i32
    %c0_i32_1 = arith.constant 0 : i32
    %c0_i32_2 = arith.constant 0 : i32
    return %c0_i32, %c0_i32_0, %c0_i32_1 : i32, i32, i32
  }
  func.func @transform_21(%arg0: i32) -> (i32, i32, i32) {
    %c0_i32 = arith.constant 0 : i32
    %c0_i32_0 = arith.constant 0 : i32
    %c0_i32_1 = arith.constant 0 : i32
    %c0_i32_2 = arith.constant 0 : i32
    return %c0_i32, %c0_i32_0, %c0_i32_1 : i32, i32, i32
  }
  func.func @transform_22(%arg0: i32) -> (i32, i32, i32) {
    %c0_i32 = arith.constant 0 : i32
    %c0_i32_0 = arith.constant 0 : i32
    %c0_i32_1 = arith.constant 0 : i32
    %c0_i32_2 = arith.constant 0 : i32
    return %c0_i32, %c0_i32_0, %c0_i32_1 : i32, i32, i32
  }
  func.func @transform_23(%arg0: i32) -> (i32, i32, i32) {
    %c0_i32 = arith.constant 0 : i32
    %c0_i32_0 = arith.constant 0 : i32
    %c0_i32_1 = arith.constant 0 : i32
    %c0_i32_2 = arith.constant 0 : i32
    return %c0_i32, %c0_i32_0, %c0_i32_1 : i32, i32, i32
  }
  func.func @transform_24(%arg0: i32) -> (i32, i32, i32) {
    %c0_i32 = arith.constant 0 : i32
    %c0_i32_0 = arith.constant 0 : i32
    %c0_i32_1 = arith.constant 0 : i32
    %c0_i32_2 = arith.constant 0 : i32
    return %c0_i32, %c0_i32_0, %c0_i32_1 : i32, i32, i32
  }
  func.func @transform_25(%arg0: i32) -> (i32, i32, i32) {
    %c0_i32 = arith.constant 0 : i32
    %c0_i32_0 = arith.constant 0 : i32
    %c0_i32_1 = arith.constant 0 : i32
    %c0_i32_2 = arith.constant 0 : i32
    return %c0_i32, %c0_i32_0, %c0_i32_1 : i32, i32, i32
  }
  func.func @transform_26(%arg0: i32) -> (i32, i32, i32) {
    %c0_i32 = arith.constant 0 : i32
    %c0_i32_0 = arith.constant 0 : i32
    %c0_i32_1 = arith.constant 0 : i32
    %c0_i32_2 = arith.constant 0 : i32
    return %c0_i32, %c0_i32_0, %c0_i32_1 : i32, i32, i32
  }
  func.func @transform_27(%arg0: i32) -> (i32, i32) {
    %c0_i32 = arith.constant 0 : i32
    %c0_i32_0 = arith.constant 0 : i32
    %c0_i32_1 = arith.constant 0 : i32
    return %c0_i32, %c0_i32_0 : i32, i32
  }
  func.func @transform_28(%arg0: i32) -> (i32, i32) {
    %c0_i32 = arith.constant 0 : i32
    %c0_i32_0 = arith.constant 0 : i32
    %c0_i32_1 = arith.constant 0 : i32
    return %c0_i32, %c0_i32_0 : i32, i32
  }
  func.func @transform_29(%arg0: i32) -> (i32, i32) {
    %c0_i32 = arith.constant 0 : i32
    %c0_i32_0 = arith.constant 0 : i32
    %c0_i32_1 = arith.constant 0 : i32
    return %c0_i32, %c0_i32_0 : i32, i32
  }
  func.func @transform_30(%arg0: i32) -> (i32, i32) {
    %c0_i32 = arith.constant 0 : i32
    %c0_i32_0 = arith.constant 0 : i32
    return %arg0, %c0_i32 : i32, i32
  }
}

module attributes {stable_mosaic.version = 11 : i64} {
  func.func @gpt_fused_kernel(%arg0: i32, %arg1: memref<16x16xf32, #tpu.memory_space<vmem>>, %arg2: memref<16x1xi32, #tpu.memory_space<vmem>>, %arg3: memref<16x1xi32, #tpu.memory_space<vmem>>, %arg4: memref<32x16xf32, #tpu.memory_space<vmem>>, %arg5: memref<32x16xf32, #tpu.memory_space<vmem>>, %arg6: memref<32x16xf32, #tpu.memory_space<vmem>>, %arg7: memref<32x32xf32, #tpu.memory_space<vmem>>, %arg8: memref<128x32xf32, #tpu.memory_space<vmem>>, %arg9: memref<128x32xf32, #tpu.memory_space<vmem>>, %arg10: memref<32x128xf32, #tpu.memory_space<vmem>>, %arg11: memref<16x32xf32, #tpu.memory_space<vmem>>, %arg12: memref<16x32xf32, #tpu.memory_space<vmem>>, %arg13: memref<1x32xf32, #tpu.memory_space<vmem>>, %arg14: memref<16x32xf32, #tpu.memory_space<vmem>>, %arg15: memref<40x32xf32, #tpu.memory_space<vmem>>, %arg16: memref<2x1x32xf32, #tpu.memory_space<vmem>>, %arg17: memref<2x1x32xf32, #tpu.memory_space<vmem>>, %arg18: memref<2x32x96xf32, #tpu.memory_space<vmem>>, %arg19: memref<2x1x96xf32, #tpu.memory_space<vmem>>, %arg20: memref<2x32x32xf32, #tpu.memory_space<vmem>>, %arg21: memref<2x1x32xf32, #tpu.memory_space<vmem>>, %arg22: memref<2x1x32xf32, #tpu.memory_space<vmem>>, %arg23: memref<2x1x32xf32, #tpu.memory_space<vmem>>, %arg24: memref<2x32x64xf32, #tpu.memory_space<vmem>>, %arg25: memref<2x1x64xf32, #tpu.memory_space<vmem>>, %arg26: memref<2x64x32xf32, #tpu.memory_space<vmem>>, %arg27: memref<2x1x32xf32, #tpu.memory_space<vmem>>, %arg28: memref<1x32xf32, #tpu.memory_space<vmem>>, %arg29: memref<1x32xf32, #tpu.memory_space<vmem>>, %arg30: memref<32x128xf32, #tpu.memory_space<vmem>>, %arg31: memref<16x128xf32, #tpu.memory_space<vmem>>) attributes {dimension_semantics = [#tpu.dimension_semantics<parallel>], iteration_bounds = array<i64: 1>, scalar_prefetch = 0 : i64, scratch_operands = 0 : i64, tpu.core_type = #tpu.core_type<tc>, window_params = [{transform_indices = @transform_0, window_bounds = array<i64: 16, 16>}, {transform_indices = @transform_1, window_bounds = array<i64: 16, 1>}, {transform_indices = @transform_2, window_bounds = array<i64: 16, 1>}, {pipeline_mode = #tpu.pipeline_mode<synchronous>, transform_indices = @transform_3, window_bounds = array<i64: 32, 16>}, {pipeline_mode = #tpu.pipeline_mode<synchronous>, transform_indices = @transform_4, window_bounds = array<i64: 32, 16>}, {pipeline_mode = #tpu.pipeline_mode<synchronous>, transform_indices = @transform_5, window_bounds = array<i64: 32, 16>}, {pipeline_mode = #tpu.pipeline_mode<synchronous>, transform_indices = @transform_6, window_bounds = array<i64: 32, 32>}, {pipeline_mode = #tpu.pipeline_mode<synchronous>, transform_indices = @transform_7, window_bounds = array<i64: 128, 32>}, {pipeline_mode = #tpu.pipeline_mode<synchronous>, transform_indices = @transform_8, window_bounds = array<i64: 128, 32>}, {pipeline_mode = #tpu.pipeline_mode<synchronous>, transform_indices = @transform_9, window_bounds = array<i64: 32, 128>}, {pipeline_mode = #tpu.pipeline_mode<synchronous>, transform_indices = @transform_10, window_bounds = array<i64: 16, 32>}, {pipeline_mode = #tpu.pipeline_mode<synchronous>, transform_indices = @transform_11, window_bounds = array<i64: 16, 32>}, {pipeline_mode = #tpu.pipeline_mode<synchronous>, transform_indices = @transform_12, window_bounds = array<i64: 1, 32>}, {pipeline_mode = #tpu.pipeline_mode<synchronous>, transform_indices = @transform_13, window_bounds = array<i64: 16, 32>}, {pipeline_mode = #tpu.pipeline_mode<synchronous>, transform_indices = @transform_14, window_bounds = array<i64: 40, 32>}, {pipeline_mode = #tpu.pipeline_mode<synchronous>, transform_indices = @transform_15, window_bounds = array<i64: 2, 1, 32>}, {pipeline_mode = #tpu.pipeline_mode<synchronous>, transform_indices = @transform_16, window_bounds = array<i64: 2, 1, 32>}, {pipeline_mode = #tpu.pipeline_mode<synchronous>, transform_indices = @transform_17, window_bounds = array<i64: 2, 32, 96>}, {pipeline_mode = #tpu.pipeline_mode<synchronous>, transform_indices = @transform_18, window_bounds = array<i64: 2, 1, 96>}, {pipeline_mode = #tpu.pipeline_mode<synchronous>, transform_indices = @transform_19, window_bounds = array<i64: 2, 32, 32>}, {pipeline_mode = #tpu.pipeline_mode<synchronous>, transform_indices = @transform_20, window_bounds = array<i64: 2, 1, 32>}, {pipeline_mode = #tpu.pipeline_mode<synchronous>, transform_indices = @transform_21, window_bounds = array<i64: 2, 1, 32>}, {pipeline_mode = #tpu.pipeline_mode<synchronous>, transform_indices = @transform_22, window_bounds = array<i64: 2, 1, 32>}, {pipeline_mode = #tpu.pipeline_mode<synchronous>, transform_indices = @transform_23, window_bounds = array<i64: 2, 32, 64>}, {pipeline_mode = #tpu.pipeline_mode<synchronous>, transform_indices = @transform_24, window_bounds = array<i64: 2, 1, 64>}, {pipeline_mode = #tpu.pipeline_mode<synchronous>, transform_indices = @transform_25, window_bounds = array<i64: 2, 64, 32>}, {pipeline_mode = #tpu.pipeline_mode<synchronous>, transform_indices = @transform_26, window_bounds = array<i64: 2, 1, 32>}, {pipeline_mode = #tpu.pipeline_mode<synchronous>, transform_indices = @transform_27, window_bounds = array<i64: 1, 32>}, {pipeline_mode = #tpu.pipeline_mode<synchronous>, transform_indices = @transform_28, window_bounds = array<i64: 1, 32>}, {pipeline_mode = #tpu.pipeline_mode<synchronous>, transform_indices = @transform_29, window_bounds = array<i64: 32, 128>}, {transform_indices = @transform_30, window_bounds = array<i64: 16, 128>}]} {
    %c0 = arith.constant 0 : index
    %c0_0 = arith.constant 0 : index
    %0 = vector.load %arg1[%c0, %c0_0] : memref<16x16xf32, #tpu.memory_space<vmem>>, vector<16x16xf32>
    %c0_1 = arith.constant 0 : index
    %c0_2 = arith.constant 0 : index
    %1 = vector.load %arg12[%c0_1, %c0_2] : memref<16x32xf32, #tpu.memory_space<vmem>>, vector<16x32xf32>
    %2 = arith.truncf %0 : vector<16x16xf32> to vector<16x16xbf16>
    %3 = arith.truncf %1 : vector<16x32xf32> to vector<16x32xbf16>
    %cst = arith.constant dense<0.000000e+00> : vector<16x32xf32>
    %4 = tpu.matmul %2, %3, %cst {dimension_numbers = #tpu.dot_dimension_numbers<[1], [0], [0], [1], [0, 0, 1, 1], [], []>} : vector<16x16xbf16>, vector<16x32xbf16>, vector<16x32xf32> -> vector<16x32xf32>
    %c0_3 = arith.constant 0 : index
    %c0_4 = arith.constant 0 : index
    %5 = vector.load %arg13[%c0_3, %c0_4] : memref<1x32xf32, #tpu.memory_space<vmem>>, vector<1x32xf32>
    %6 = vector.broadcast %5 : vector<1x32xf32> to vector<16x32xf32>
    %7 = arith.addf %4, %6 : vector<16x32xf32>
    %8 = math.tanh %7 : vector<16x32xf32>
    %c0_5 = arith.constant 0 : index
    %c0_6 = arith.constant 0 : index
    %9 = vector.load %arg2[%c0_5, %c0_6] : memref<16x1xi32, #tpu.memory_space<vmem>>, vector<16x1xi32>
    %10 = tpu.iota {dimensions = array<i32: 1>} : vector<16x16xi32>
    %11 = vector.broadcast %9 : vector<16x1xi32> to vector<16x16xi32>
    %12 = arith.cmpi eq, %11, %10 : vector<16x16xi32>
    %13 = arith.extui %12 : vector<16x16xi1> to vector<16x16xi32>
    %14 = arith.sitofp %13 : vector<16x16xi32> to vector<16x16xf32>
    %c0_7 = arith.constant 0 : index
    %c0_8 = arith.constant 0 : index
    %15 = vector.load %arg14[%c0_7, %c0_8] : memref<16x32xf32, #tpu.memory_space<vmem>>, vector<16x32xf32>
    %cst_9 = arith.constant dense<0.000000e+00> : vector<16x32xf32>
    %16 = tpu.matmul %14, %15, %cst_9 {dimension_numbers = #tpu.dot_dimension_numbers<[1], [0], [0], [1], [0, 0, 1, 1], [], []>} : vector<16x16xf32>, vector<16x32xf32>, vector<16x32xf32> -> vector<16x32xf32>
    %17 = math.tanh %16 : vector<16x32xf32>
    %c0_10 = arith.constant 0 : index
    %c0_11 = arith.constant 0 : index
    %18 = vector.load %arg3[%c0_10, %c0_11] : memref<16x1xi32, #tpu.memory_space<vmem>>, vector<16x1xi32>
    %19 = tpu.iota {dimensions = array<i32: 1>} : vector<16x40xi32>
    %20 = vector.broadcast %18 : vector<16x1xi32> to vector<16x40xi32>
    %21 = arith.cmpi eq, %20, %19 : vector<16x40xi32>
    %22 = arith.extui %21 : vector<16x40xi1> to vector<16x40xi32>
    %23 = arith.sitofp %22 : vector<16x40xi32> to vector<16x40xf32>
    %c0_12 = arith.constant 0 : index
    %c0_13 = arith.constant 0 : index
    %24 = vector.load %arg15[%c0_12, %c0_13] : memref<40x32xf32, #tpu.memory_space<vmem>>, vector<40x32xf32>
    %cst_14 = arith.constant dense<0.000000e+00> : vector<16x32xf32>
    %25 = tpu.matmul %23, %24, %cst_14 {dimension_numbers = #tpu.dot_dimension_numbers<[1], [0], [0], [1], [0, 0, 1, 1], [], []>} : vector<16x40xf32>, vector<40x32xf32>, vector<16x32xf32> -> vector<16x32xf32>
    %c0_15 = arith.constant 0 : index
    %c0_16 = arith.constant 0 : index
    %26 = vector.load %arg4[%c0_15, %c0_16] : memref<32x16xf32, #tpu.memory_space<vmem>>, vector<32x16xf32>
    %cst_17 = arith.constant dense<0.000000e+00> : vector<32x32xf32>
    %27 = tpu.matmul %26, %8, %cst_17 {dimension_numbers = #tpu.dot_dimension_numbers<[1], [0], [0], [1], [0, 0, 1, 1], [], []>} : vector<32x16xf32>, vector<16x32xf32>, vector<32x32xf32> -> vector<32x32xf32>
    %c0_18 = arith.constant 0 : index
    %c0_19 = arith.constant 0 : index
    %28 = vector.load %arg5[%c0_18, %c0_19] : memref<32x16xf32, #tpu.memory_space<vmem>>, vector<32x16xf32>
    %cst_20 = arith.constant dense<0.000000e+00> : vector<32x32xf32>
    %29 = tpu.matmul %28, %17, %cst_20 {dimension_numbers = #tpu.dot_dimension_numbers<[1], [0], [0], [1], [0, 0, 1, 1], [], []>} : vector<32x16xf32>, vector<16x32xf32>, vector<32x32xf32> -> vector<32x32xf32>
    %30 = arith.addf %27, %29 : vector<32x32xf32>
    %c0_21 = arith.constant 0 : index
    %c0_22 = arith.constant 0 : index
    %31 = vector.load %arg6[%c0_21, %c0_22] : memref<32x16xf32, #tpu.memory_space<vmem>>, vector<32x16xf32>
    %cst_23 = arith.constant dense<0.000000e+00> : vector<32x32xf32>
    %32 = tpu.matmul %31, %25, %cst_23 {dimension_numbers = #tpu.dot_dimension_numbers<[1], [0], [0], [1], [0, 0, 1, 1], [], []>} : vector<32x16xf32>, vector<16x32xf32>, vector<32x32xf32> -> vector<32x32xf32>
    %33 = arith.addf %30, %32 : vector<32x32xf32>
    %c0_24 = arith.constant 0 : index
    %c0_25 = arith.constant 0 : index
    %34 = vector.load %arg7[%c0_24, %c0_25] : memref<32x32xf32, #tpu.memory_space<vmem>>, vector<32x32xf32>
    %35 = arith.addf %33, %34 : vector<32x32xf32>
    %c0_26 = arith.constant 0 : index
    %c0_27 = arith.constant 0 : index
    %36 = vector.load %arg8[%c0_26, %c0_27] : memref<128x32xf32, #tpu.memory_space<vmem>>, vector<128x32xf32>
    %c0_28 = arith.constant 0 : index
    %c0_29 = arith.constant 0 : index
    %37 = vector.load %arg9[%c0_28, %c0_29] : memref<128x32xf32, #tpu.memory_space<vmem>>, vector<128x32xf32>
    %c0_30 = arith.constant 0 : index
    %c0_31 = arith.constant 0 : index
    %38 = vector.load %arg10[%c0_30, %c0_31] : memref<32x128xf32, #tpu.memory_space<vmem>>, vector<32x128xf32>
    %c0_32 = arith.constant 0 : index
    %c0_33 = arith.constant 0 : index
    %c0_34 = arith.constant 0 : index
    %39 = vector.load %arg16[%c0_32, %c0_33, %c0_34] : memref<2x1x32xf32, #tpu.memory_space<vmem>>, vector<1x1x32xf32>
    %40 = vector.shape_cast %39 : vector<1x1x32xf32> to vector<1x32xf32>
    %c0_35 = arith.constant 0 : index
    %c0_36 = arith.constant 0 : index
    %c0_37 = arith.constant 0 : index
    %41 = vector.load %arg17[%c0_35, %c0_36, %c0_37] : memref<2x1x32xf32, #tpu.memory_space<vmem>>, vector<1x1x32xf32>
    %42 = vector.shape_cast %41 : vector<1x1x32xf32> to vector<1x32xf32>
    %cst_38 = arith.constant dense<0.000000e+00> : vector<32xf32>
    %43 = vector.multi_reduction <add>, %35, %cst_38 [1] : vector<32x32xf32> to vector<32xf32>
    %44 = vector.shape_cast %43 : vector<32xf32> to vector<32x1xf32>
    %cst_39 = arith.constant 3.200000e+01 : f32
    %45 = vector.broadcast %cst_39 : f32 to vector<32x1xf32>
    %46 = arith.divf %44, %45 : vector<32x1xf32>
    %47 = vector.broadcast %46 : vector<32x1xf32> to vector<32x32xf32>
    %48 = arith.subf %35, %47 : vector<32x32xf32>
    %49 = arith.mulf %48, %48 : vector<32x32xf32>
    %cst_40 = arith.constant dense<0.000000e+00> : vector<32xf32>
    %50 = vector.multi_reduction <add>, %49, %cst_40 [1] : vector<32x32xf32> to vector<32xf32>
    %51 = vector.shape_cast %50 : vector<32xf32> to vector<32x1xf32>
    %cst_41 = arith.constant 3.200000e+01 : f32
    %52 = vector.broadcast %cst_41 : f32 to vector<32x1xf32>
    %53 = arith.divf %51, %52 : vector<32x1xf32>
    %54 = vector.broadcast %46 : vector<32x1xf32> to vector<32x32xf32>
    %55 = arith.subf %35, %54 : vector<32x32xf32>
    %cst_42 = arith.constant 9.99999974E-6 : f32
    %56 = vector.broadcast %cst_42 : f32 to vector<32x1xf32>
    %57 = arith.addf %53, %56 : vector<32x1xf32>
    %58 = math.rsqrt %57 : vector<32x1xf32>
    %59 = vector.broadcast %58 : vector<32x1xf32> to vector<32x32xf32>
    %60 = arith.mulf %55, %59 : vector<32x32xf32>
    %61 = vector.broadcast %40 : vector<1x32xf32> to vector<32x32xf32>
    %62 = arith.mulf %60, %61 : vector<32x32xf32>
    %63 = vector.broadcast %42 : vector<1x32xf32> to vector<32x32xf32>
    %64 = arith.addf %62, %63 : vector<32x32xf32>
    %c0_43 = arith.constant 0 : index
    %c0_44 = arith.constant 0 : index
    %c0_45 = arith.constant 0 : index
    %65 = vector.load %arg18[%c0_43, %c0_44, %c0_45] : memref<2x32x96xf32, #tpu.memory_space<vmem>>, vector<1x32x96xf32>
    %66 = vector.shape_cast %65 : vector<1x32x96xf32> to vector<32x96xf32>
    %67 = arith.truncf %64 : vector<32x32xf32> to vector<32x32xbf16>
    %68 = arith.truncf %66 : vector<32x96xf32> to vector<32x96xbf16>
    %cst_46 = arith.constant dense<0.000000e+00> : vector<32x96xf32>
    %69 = tpu.matmul %67, %68, %cst_46 {dimension_numbers = #tpu.dot_dimension_numbers<[1], [0], [0], [1], [0, 0, 1, 1], [], []>} : vector<32x32xbf16>, vector<32x96xbf16>, vector<32x96xf32> -> vector<32x96xf32>
    %c0_47 = arith.constant 0 : index
    %c0_48 = arith.constant 0 : index
    %c0_49 = arith.constant 0 : index
    %70 = vector.load %arg19[%c0_47, %c0_48, %c0_49] : memref<2x1x96xf32, #tpu.memory_space<vmem>>, vector<1x1x96xf32>
    %71 = vector.shape_cast %70 : vector<1x1x96xf32> to vector<1x96xf32>
    %72 = vector.broadcast %71 : vector<1x96xf32> to vector<32x96xf32>
    %73 = arith.addf %69, %72 : vector<32x96xf32>
    %74 = vector.extract_strided_slice %73 {offsets = [0, 0], sizes = [32, 32], strides = [1, 1]} : vector<32x96xf32> to vector<32x32xf32>
    %75 = vector.extract_strided_slice %73 {offsets = [0, 32], sizes = [32, 32], strides = [1, 1]} : vector<32x96xf32> to vector<32x32xf32>
    %76 = vector.extract_strided_slice %73 {offsets = [0, 64], sizes = [32, 32], strides = [1, 1]} : vector<32x96xf32> to vector<32x32xf32>
    %77 = tpu.concatenate %74, %74, %74, %74 in 0 : vector<32x32xf32>, vector<32x32xf32>, vector<32x32xf32>, vector<32x32xf32> -> vector<128x32xf32>
    %78 = arith.mulf %77, %36 : vector<128x32xf32>
    %79 = arith.truncf %78 : vector<128x32xf32> to vector<128x32xbf16>
    %80 = arith.truncf %75 : vector<32x32xf32> to vector<32x32xbf16>
    %cst_50 = arith.constant dense<0.000000e+00> : vector<128x32xf32>
    %81 = tpu.matmul %79, %80, %cst_50 {dimension_numbers = #tpu.dot_dimension_numbers<[1], [1], [0], [0], [0, 0, 1, 0], [], []>} : vector<128x32xbf16>, vector<32x32xbf16>, vector<128x32xf32> -> vector<128x32xf32>
    %cst_51 = arith.constant 0.353553385 : f32
    %82 = vector.broadcast %cst_51 : f32 to vector<128x32xf32>
    %83 = arith.mulf %81, %82 : vector<128x32xf32>
    %84 = arith.addf %83, %37 : vector<128x32xf32>
    %cst_52 = arith.constant dense<0xFF800000> : vector<128xf32>
    %85 = vector.multi_reduction <maximumf>, %84, %cst_52 [1] : vector<128x32xf32> to vector<128xf32>
    %86 = vector.shape_cast %85 : vector<128xf32> to vector<128x1xf32>
    %87 = vector.broadcast %86 : vector<128x1xf32> to vector<128x32xf32>
    %88 = arith.subf %84, %87 : vector<128x32xf32>
    %89 = math.exp %88 : vector<128x32xf32>
    %cst_53 = arith.constant dense<0.000000e+00> : vector<128xf32>
    %90 = vector.multi_reduction <add>, %89, %cst_53 [1] : vector<128x32xf32> to vector<128xf32>
    %91 = vector.shape_cast %90 : vector<128xf32> to vector<128x1xf32>
    %92 = tpu.reciprocal %91 {approx = true} : vector<128x1xf32> -> vector<128x1xf32>
    %93 = vector.broadcast %92 : vector<128x1xf32> to vector<128x32xf32>
    %94 = arith.mulf %89, %93 : vector<128x32xf32>
    %95 = arith.truncf %94 : vector<128x32xf32> to vector<128x32xbf16>
    %96 = arith.truncf %76 : vector<32x32xf32> to vector<32x32xbf16>
    %cst_54 = arith.constant dense<0.000000e+00> : vector<128x32xf32>
    %97 = tpu.matmul %95, %96, %cst_54 {dimension_numbers = #tpu.dot_dimension_numbers<[1], [0], [0], [1], [0, 0, 1, 1], [], []>} : vector<128x32xbf16>, vector<32x32xbf16>, vector<128x32xf32> -> vector<128x32xf32>
    %98 = arith.mulf %97, %36 : vector<128x32xf32>
    %cst_55 = arith.constant dense<0.000000e+00> : vector<32x32xf32>
    %99 = tpu.matmul %38, %98, %cst_55 {dimension_numbers = #tpu.dot_dimension_numbers<[1], [0], [0], [1], [0, 0, 1, 1], [], []>} : vector<32x128xf32>, vector<128x32xf32>, vector<32x32xf32> -> vector<32x32xf32>
    %c0_56 = arith.constant 0 : index
    %c0_57 = arith.constant 0 : index
    %c0_58 = arith.constant 0 : index
    %100 = vector.load %arg20[%c0_56, %c0_57, %c0_58] : memref<2x32x32xf32, #tpu.memory_space<vmem>>, vector<1x32x32xf32>
    %101 = vector.shape_cast %100 : vector<1x32x32xf32> to vector<32x32xf32>
    %102 = arith.truncf %99 : vector<32x32xf32> to vector<32x32xbf16>
    %103 = arith.truncf %101 : vector<32x32xf32> to vector<32x32xbf16>
    %cst_59 = arith.constant dense<0.000000e+00> : vector<32x32xf32>
    %104 = tpu.matmul %102, %103, %cst_59 {dimension_numbers = #tpu.dot_dimension_numbers<[1], [0], [0], [1], [0, 0, 1, 1], [], []>} : vector<32x32xbf16>, vector<32x32xbf16>, vector<32x32xf32> -> vector<32x32xf32>
    %105 = arith.addf %35, %104 : vector<32x32xf32>
    %c0_60 = arith.constant 0 : index
    %c0_61 = arith.constant 0 : index
    %c0_62 = arith.constant 0 : index
    %106 = vector.load %arg21[%c0_60, %c0_61, %c0_62] : memref<2x1x32xf32, #tpu.memory_space<vmem>>, vector<1x1x32xf32>
    %107 = vector.shape_cast %106 : vector<1x1x32xf32> to vector<1x32xf32>
    %108 = vector.broadcast %107 : vector<1x32xf32> to vector<32x32xf32>
    %109 = arith.addf %105, %108 : vector<32x32xf32>
    %c0_63 = arith.constant 0 : index
    %c0_64 = arith.constant 0 : index
    %c0_65 = arith.constant 0 : index
    %110 = vector.load %arg22[%c0_63, %c0_64, %c0_65] : memref<2x1x32xf32, #tpu.memory_space<vmem>>, vector<1x1x32xf32>
    %111 = vector.shape_cast %110 : vector<1x1x32xf32> to vector<1x32xf32>
    %c0_66 = arith.constant 0 : index
    %c0_67 = arith.constant 0 : index
    %c0_68 = arith.constant 0 : index
    %112 = vector.load %arg23[%c0_66, %c0_67, %c0_68] : memref<2x1x32xf32, #tpu.memory_space<vmem>>, vector<1x1x32xf32>
    %113 = vector.shape_cast %112 : vector<1x1x32xf32> to vector<1x32xf32>
    %cst_69 = arith.constant dense<0.000000e+00> : vector<32xf32>
    %114 = vector.multi_reduction <add>, %109, %cst_69 [1] : vector<32x32xf32> to vector<32xf32>
    %115 = vector.shape_cast %114 : vector<32xf32> to vector<32x1xf32>
    %cst_70 = arith.constant 3.200000e+01 : f32
    %116 = vector.broadcast %cst_70 : f32 to vector<32x1xf32>
    %117 = arith.divf %115, %116 : vector<32x1xf32>
    %118 = vector.broadcast %117 : vector<32x1xf32> to vector<32x32xf32>
    %119 = arith.subf %109, %118 : vector<32x32xf32>
    %120 = arith.mulf %119, %119 : vector<32x32xf32>
    %cst_71 = arith.constant dense<0.000000e+00> : vector<32xf32>
    %121 = vector.multi_reduction <add>, %120, %cst_71 [1] : vector<32x32xf32> to vector<32xf32>
    %122 = vector.shape_cast %121 : vector<32xf32> to vector<32x1xf32>
    %cst_72 = arith.constant 3.200000e+01 : f32
    %123 = vector.broadcast %cst_72 : f32 to vector<32x1xf32>
    %124 = arith.divf %122, %123 : vector<32x1xf32>
    %125 = vector.broadcast %117 : vector<32x1xf32> to vector<32x32xf32>
    %126 = arith.subf %109, %125 : vector<32x32xf32>
    %cst_73 = arith.constant 9.99999974E-6 : f32
    %127 = vector.broadcast %cst_73 : f32 to vector<32x1xf32>
    %128 = arith.addf %124, %127 : vector<32x1xf32>
    %129 = math.rsqrt %128 : vector<32x1xf32>
    %130 = vector.broadcast %129 : vector<32x1xf32> to vector<32x32xf32>
    %131 = arith.mulf %126, %130 : vector<32x32xf32>
    %132 = vector.broadcast %111 : vector<1x32xf32> to vector<32x32xf32>
    %133 = arith.mulf %131, %132 : vector<32x32xf32>
    %134 = vector.broadcast %113 : vector<1x32xf32> to vector<32x32xf32>
    %135 = arith.addf %133, %134 : vector<32x32xf32>
    %c0_74 = arith.constant 0 : index
    %c0_75 = arith.constant 0 : index
    %c0_76 = arith.constant 0 : index
    %136 = vector.load %arg24[%c0_74, %c0_75, %c0_76] : memref<2x32x64xf32, #tpu.memory_space<vmem>>, vector<1x32x64xf32>
    %137 = vector.shape_cast %136 : vector<1x32x64xf32> to vector<32x64xf32>
    %138 = arith.truncf %135 : vector<32x32xf32> to vector<32x32xbf16>
    %139 = arith.truncf %137 : vector<32x64xf32> to vector<32x64xbf16>
    %cst_77 = arith.constant dense<0.000000e+00> : vector<32x64xf32>
    %140 = tpu.matmul %138, %139, %cst_77 {dimension_numbers = #tpu.dot_dimension_numbers<[1], [0], [0], [1], [0, 0, 1, 1], [], []>} : vector<32x32xbf16>, vector<32x64xbf16>, vector<32x64xf32> -> vector<32x64xf32>
    %c0_78 = arith.constant 0 : index
    %c0_79 = arith.constant 0 : index
    %c0_80 = arith.constant 0 : index
    %141 = vector.load %arg25[%c0_78, %c0_79, %c0_80] : memref<2x1x64xf32, #tpu.memory_space<vmem>>, vector<1x1x64xf32>
    %142 = vector.shape_cast %141 : vector<1x1x64xf32> to vector<1x64xf32>
    %143 = vector.broadcast %142 : vector<1x64xf32> to vector<32x64xf32>
    %144 = arith.addf %140, %143 : vector<32x64xf32>
    %cst_81 = arith.constant 5.000000e-01 : f32
    %145 = vector.broadcast %cst_81 : f32 to vector<32x64xf32>
    %146 = arith.mulf %145, %144 : vector<32x64xf32>
    %cst_82 = arith.constant 0.707106769 : f32
    %147 = vector.broadcast %cst_82 : f32 to vector<32x64xf32>
    %148 = arith.mulf %144, %147 : vector<32x64xf32>
    %149 = math.erf %148 : vector<32x64xf32>
    %cst_83 = arith.constant 1.000000e+00 : f32
    %150 = vector.broadcast %cst_83 : f32 to vector<32x64xf32>
    %151 = arith.addf %150, %149 : vector<32x64xf32>
    %152 = arith.mulf %146, %151 : vector<32x64xf32>
    %c0_84 = arith.constant 0 : index
    %c0_85 = arith.constant 0 : index
    %c0_86 = arith.constant 0 : index
    %153 = vector.load %arg26[%c0_84, %c0_85, %c0_86] : memref<2x64x32xf32, #tpu.memory_space<vmem>>, vector<1x64x32xf32>
    %154 = vector.shape_cast %153 : vector<1x64x32xf32> to vector<64x32xf32>
    %155 = arith.truncf %152 : vector<32x64xf32> to vector<32x64xbf16>
    %156 = arith.truncf %154 : vector<64x32xf32> to vector<64x32xbf16>
    %cst_87 = arith.constant dense<0.000000e+00> : vector<32x32xf32>
    %157 = tpu.matmul %155, %156, %cst_87 {dimension_numbers = #tpu.dot_dimension_numbers<[1], [0], [0], [1], [0, 0, 1, 1], [], []>} : vector<32x64xbf16>, vector<64x32xbf16>, vector<32x32xf32> -> vector<32x32xf32>
    %158 = arith.addf %109, %157 : vector<32x32xf32>
    %c0_88 = arith.constant 0 : index
    %c0_89 = arith.constant 0 : index
    %c0_90 = arith.constant 0 : index
    %159 = vector.load %arg27[%c0_88, %c0_89, %c0_90] : memref<2x1x32xf32, #tpu.memory_space<vmem>>, vector<1x1x32xf32>
    %160 = vector.shape_cast %159 : vector<1x1x32xf32> to vector<1x32xf32>
    %161 = vector.broadcast %160 : vector<1x32xf32> to vector<32x32xf32>
    %162 = arith.addf %158, %161 : vector<32x32xf32>
    %c1 = arith.constant 1 : index
    %c0_91 = arith.constant 0 : index
    %c0_92 = arith.constant 0 : index
    %163 = vector.load %arg16[%c1, %c0_91, %c0_92] : memref<2x1x32xf32, #tpu.memory_space<vmem>>, vector<1x1x32xf32>
    %164 = vector.shape_cast %163 : vector<1x1x32xf32> to vector<1x32xf32>
    %c1_93 = arith.constant 1 : index
    %c0_94 = arith.constant 0 : index
    %c0_95 = arith.constant 0 : index
    %165 = vector.load %arg17[%c1_93, %c0_94, %c0_95] : memref<2x1x32xf32, #tpu.memory_space<vmem>>, vector<1x1x32xf32>
    %166 = vector.shape_cast %165 : vector<1x1x32xf32> to vector<1x32xf32>
    %cst_96 = arith.constant dense<0.000000e+00> : vector<32xf32>
    %167 = vector.multi_reduction <add>, %162, %cst_96 [1] : vector<32x32xf32> to vector<32xf32>
    %168 = vector.shape_cast %167 : vector<32xf32> to vector<32x1xf32>
    %cst_97 = arith.constant 3.200000e+01 : f32
    %169 = vector.broadcast %cst_97 : f32 to vector<32x1xf32>
    %170 = arith.divf %168, %169 : vector<32x1xf32>
    %171 = vector.broadcast %170 : vector<32x1xf32> to vector<32x32xf32>
    %172 = arith.subf %162, %171 : vector<32x32xf32>
    %173 = arith.mulf %172, %172 : vector<32x32xf32>
    %cst_98 = arith.constant dense<0.000000e+00> : vector<32xf32>
    %174 = vector.multi_reduction <add>, %173, %cst_98 [1] : vector<32x32xf32> to vector<32xf32>
    %175 = vector.shape_cast %174 : vector<32xf32> to vector<32x1xf32>
    %cst_99 = arith.constant 3.200000e+01 : f32
    %176 = vector.broadcast %cst_99 : f32 to vector<32x1xf32>
    %177 = arith.divf %175, %176 : vector<32x1xf32>
    %178 = vector.broadcast %170 : vector<32x1xf32> to vector<32x32xf32>
    %179 = arith.subf %162, %178 : vector<32x32xf32>
    %cst_100 = arith.constant 9.99999974E-6 : f32
    %180 = vector.broadcast %cst_100 : f32 to vector<32x1xf32>
    %181 = arith.addf %177, %180 : vector<32x1xf32>
    %182 = math.rsqrt %181 : vector<32x1xf32>
    %183 = vector.broadcast %182 : vector<32x1xf32> to vector<32x32xf32>
    %184 = arith.mulf %179, %183 : vector<32x32xf32>
    %185 = vector.broadcast %164 : vector<1x32xf32> to vector<32x32xf32>
    %186 = arith.mulf %184, %185 : vector<32x32xf32>
    %187 = vector.broadcast %166 : vector<1x32xf32> to vector<32x32xf32>
    %188 = arith.addf %186, %187 : vector<32x32xf32>
    %c1_101 = arith.constant 1 : index
    %c0_102 = arith.constant 0 : index
    %c0_103 = arith.constant 0 : index
    %189 = vector.load %arg18[%c1_101, %c0_102, %c0_103] : memref<2x32x96xf32, #tpu.memory_space<vmem>>, vector<1x32x96xf32>
    %190 = vector.shape_cast %189 : vector<1x32x96xf32> to vector<32x96xf32>
    %191 = arith.truncf %188 : vector<32x32xf32> to vector<32x32xbf16>
    %192 = arith.truncf %190 : vector<32x96xf32> to vector<32x96xbf16>
    %cst_104 = arith.constant dense<0.000000e+00> : vector<32x96xf32>
    %193 = tpu.matmul %191, %192, %cst_104 {dimension_numbers = #tpu.dot_dimension_numbers<[1], [0], [0], [1], [0, 0, 1, 1], [], []>} : vector<32x32xbf16>, vector<32x96xbf16>, vector<32x96xf32> -> vector<32x96xf32>
    %c1_105 = arith.constant 1 : index
    %c0_106 = arith.constant 0 : index
    %c0_107 = arith.constant 0 : index
    %194 = vector.load %arg19[%c1_105, %c0_106, %c0_107] : memref<2x1x96xf32, #tpu.memory_space<vmem>>, vector<1x1x96xf32>
    %195 = vector.shape_cast %194 : vector<1x1x96xf32> to vector<1x96xf32>
    %196 = vector.broadcast %195 : vector<1x96xf32> to vector<32x96xf32>
    %197 = arith.addf %193, %196 : vector<32x96xf32>
    %198 = vector.extract_strided_slice %197 {offsets = [0, 0], sizes = [32, 32], strides = [1, 1]} : vector<32x96xf32> to vector<32x32xf32>
    %199 = vector.extract_strided_slice %197 {offsets = [0, 32], sizes = [32, 32], strides = [1, 1]} : vector<32x96xf32> to vector<32x32xf32>
    %200 = vector.extract_strided_slice %197 {offsets = [0, 64], sizes = [32, 32], strides = [1, 1]} : vector<32x96xf32> to vector<32x32xf32>
    %201 = tpu.concatenate %198, %198, %198, %198 in 0 : vector<32x32xf32>, vector<32x32xf32>, vector<32x32xf32>, vector<32x32xf32> -> vector<128x32xf32>
    %202 = arith.mulf %201, %36 : vector<128x32xf32>
    %203 = arith.truncf %202 : vector<128x32xf32> to vector<128x32xbf16>
    %204 = arith.truncf %199 : vector<32x32xf32> to vector<32x32xbf16>
    %cst_108 = arith.constant dense<0.000000e+00> : vector<128x32xf32>
    %205 = tpu.matmul %203, %204, %cst_108 {dimension_numbers = #tpu.dot_dimension_numbers<[1], [1], [0], [0], [0, 0, 1, 0], [], []>} : vector<128x32xbf16>, vector<32x32xbf16>, vector<128x32xf32> -> vector<128x32xf32>
    %cst_109 = arith.constant 0.353553385 : f32
    %206 = vector.broadcast %cst_109 : f32 to vector<128x32xf32>
    %207 = arith.mulf %205, %206 : vector<128x32xf32>
    %208 = arith.addf %207, %37 : vector<128x32xf32>
    %cst_110 = arith.constant dense<0xFF800000> : vector<128xf32>
    %209 = vector.multi_reduction <maximumf>, %208, %cst_110 [1] : vector<128x32xf32> to vector<128xf32>
    %210 = vector.shape_cast %209 : vector<128xf32> to vector<128x1xf32>
    %211 = vector.broadcast %210 : vector<128x1xf32> to vector<128x32xf32>
    %212 = arith.subf %208, %211 : vector<128x32xf32>
    %213 = math.exp %212 : vector<128x32xf32>
    %cst_111 = arith.constant dense<0.000000e+00> : vector<128xf32>
    %214 = vector.multi_reduction <add>, %213, %cst_111 [1] : vector<128x32xf32> to vector<128xf32>
    %215 = vector.shape_cast %214 : vector<128xf32> to vector<128x1xf32>
    %216 = tpu.reciprocal %215 {approx = true} : vector<128x1xf32> -> vector<128x1xf32>
    %217 = vector.broadcast %216 : vector<128x1xf32> to vector<128x32xf32>
    %218 = arith.mulf %213, %217 : vector<128x32xf32>
    %219 = arith.truncf %218 : vector<128x32xf32> to vector<128x32xbf16>
    %220 = arith.truncf %200 : vector<32x32xf32> to vector<32x32xbf16>
    %cst_112 = arith.constant dense<0.000000e+00> : vector<128x32xf32>
    %221 = tpu.matmul %219, %220, %cst_112 {dimension_numbers = #tpu.dot_dimension_numbers<[1], [0], [0], [1], [0, 0, 1, 1], [], []>} : vector<128x32xbf16>, vector<32x32xbf16>, vector<128x32xf32> -> vector<128x32xf32>
    %222 = arith.mulf %221, %36 : vector<128x32xf32>
    %cst_113 = arith.constant dense<0.000000e+00> : vector<32x32xf32>
    %223 = tpu.matmul %38, %222, %cst_113 {dimension_numbers = #tpu.dot_dimension_numbers<[1], [0], [0], [1], [0, 0, 1, 1], [], []>} : vector<32x128xf32>, vector<128x32xf32>, vector<32x32xf32> -> vector<32x32xf32>
    %c1_114 = arith.constant 1 : index
    %c0_115 = arith.constant 0 : index
    %c0_116 = arith.constant 0 : index
    %224 = vector.load %arg20[%c1_114, %c0_115, %c0_116] : memref<2x32x32xf32, #tpu.memory_space<vmem>>, vector<1x32x32xf32>
    %225 = vector.shape_cast %224 : vector<1x32x32xf32> to vector<32x32xf32>
    %226 = arith.truncf %223 : vector<32x32xf32> to vector<32x32xbf16>
    %227 = arith.truncf %225 : vector<32x32xf32> to vector<32x32xbf16>
    %cst_117 = arith.constant dense<0.000000e+00> : vector<32x32xf32>
    %228 = tpu.matmul %226, %227, %cst_117 {dimension_numbers = #tpu.dot_dimension_numbers<[1], [0], [0], [1], [0, 0, 1, 1], [], []>} : vector<32x32xbf16>, vector<32x32xbf16>, vector<32x32xf32> -> vector<32x32xf32>
    %229 = arith.addf %162, %228 : vector<32x32xf32>
    %c1_118 = arith.constant 1 : index
    %c0_119 = arith.constant 0 : index
    %c0_120 = arith.constant 0 : index
    %230 = vector.load %arg21[%c1_118, %c0_119, %c0_120] : memref<2x1x32xf32, #tpu.memory_space<vmem>>, vector<1x1x32xf32>
    %231 = vector.shape_cast %230 : vector<1x1x32xf32> to vector<1x32xf32>
    %232 = vector.broadcast %231 : vector<1x32xf32> to vector<32x32xf32>
    %233 = arith.addf %229, %232 : vector<32x32xf32>
    %c1_121 = arith.constant 1 : index
    %c0_122 = arith.constant 0 : index
    %c0_123 = arith.constant 0 : index
    %234 = vector.load %arg22[%c1_121, %c0_122, %c0_123] : memref<2x1x32xf32, #tpu.memory_space<vmem>>, vector<1x1x32xf32>
    %235 = vector.shape_cast %234 : vector<1x1x32xf32> to vector<1x32xf32>
    %c1_124 = arith.constant 1 : index
    %c0_125 = arith.constant 0 : index
    %c0_126 = arith.constant 0 : index
    %236 = vector.load %arg23[%c1_124, %c0_125, %c0_126] : memref<2x1x32xf32, #tpu.memory_space<vmem>>, vector<1x1x32xf32>
    %237 = vector.shape_cast %236 : vector<1x1x32xf32> to vector<1x32xf32>
    %cst_127 = arith.constant dense<0.000000e+00> : vector<32xf32>
    %238 = vector.multi_reduction <add>, %233, %cst_127 [1] : vector<32x32xf32> to vector<32xf32>
    %239 = vector.shape_cast %238 : vector<32xf32> to vector<32x1xf32>
    %cst_128 = arith.constant 3.200000e+01 : f32
    %240 = vector.broadcast %cst_128 : f32 to vector<32x1xf32>
    %241 = arith.divf %239, %240 : vector<32x1xf32>
    %242 = vector.broadcast %241 : vector<32x1xf32> to vector<32x32xf32>
    %243 = arith.subf %233, %242 : vector<32x32xf32>
    %244 = arith.mulf %243, %243 : vector<32x32xf32>
    %cst_129 = arith.constant dense<0.000000e+00> : vector<32xf32>
    %245 = vector.multi_reduction <add>, %244, %cst_129 [1] : vector<32x32xf32> to vector<32xf32>
    %246 = vector.shape_cast %245 : vector<32xf32> to vector<32x1xf32>
    %cst_130 = arith.constant 3.200000e+01 : f32
    %247 = vector.broadcast %cst_130 : f32 to vector<32x1xf32>
    %248 = arith.divf %246, %247 : vector<32x1xf32>
    %249 = vector.broadcast %241 : vector<32x1xf32> to vector<32x32xf32>
    %250 = arith.subf %233, %249 : vector<32x32xf32>
    %cst_131 = arith.constant 9.99999974E-6 : f32
    %251 = vector.broadcast %cst_131 : f32 to vector<32x1xf32>
    %252 = arith.addf %248, %251 : vector<32x1xf32>
    %253 = math.rsqrt %252 : vector<32x1xf32>
    %254 = vector.broadcast %253 : vector<32x1xf32> to vector<32x32xf32>
    %255 = arith.mulf %250, %254 : vector<32x32xf32>
    %256 = vector.broadcast %235 : vector<1x32xf32> to vector<32x32xf32>
    %257 = arith.mulf %255, %256 : vector<32x32xf32>
    %258 = vector.broadcast %237 : vector<1x32xf32> to vector<32x32xf32>
    %259 = arith.addf %257, %258 : vector<32x32xf32>
    %c1_132 = arith.constant 1 : index
    %c0_133 = arith.constant 0 : index
    %c0_134 = arith.constant 0 : index
    %260 = vector.load %arg24[%c1_132, %c0_133, %c0_134] : memref<2x32x64xf32, #tpu.memory_space<vmem>>, vector<1x32x64xf32>
    %261 = vector.shape_cast %260 : vector<1x32x64xf32> to vector<32x64xf32>
    %262 = arith.truncf %259 : vector<32x32xf32> to vector<32x32xbf16>
    %263 = arith.truncf %261 : vector<32x64xf32> to vector<32x64xbf16>
    %cst_135 = arith.constant dense<0.000000e+00> : vector<32x64xf32>
    %264 = tpu.matmul %262, %263, %cst_135 {dimension_numbers = #tpu.dot_dimension_numbers<[1], [0], [0], [1], [0, 0, 1, 1], [], []>} : vector<32x32xbf16>, vector<32x64xbf16>, vector<32x64xf32> -> vector<32x64xf32>
    %c1_136 = arith.constant 1 : index
    %c0_137 = arith.constant 0 : index
    %c0_138 = arith.constant 0 : index
    %265 = vector.load %arg25[%c1_136, %c0_137, %c0_138] : memref<2x1x64xf32, #tpu.memory_space<vmem>>, vector<1x1x64xf32>
    %266 = vector.shape_cast %265 : vector<1x1x64xf32> to vector<1x64xf32>
    %267 = vector.broadcast %266 : vector<1x64xf32> to vector<32x64xf32>
    %268 = arith.addf %264, %267 : vector<32x64xf32>
    %cst_139 = arith.constant 5.000000e-01 : f32
    %269 = vector.broadcast %cst_139 : f32 to vector<32x64xf32>
    %270 = arith.mulf %269, %268 : vector<32x64xf32>
    %cst_140 = arith.constant 0.707106769 : f32
    %271 = vector.broadcast %cst_140 : f32 to vector<32x64xf32>
    %272 = arith.mulf %268, %271 : vector<32x64xf32>
    %273 = math.erf %272 : vector<32x64xf32>
    %cst_141 = arith.constant 1.000000e+00 : f32
    %274 = vector.broadcast %cst_141 : f32 to vector<32x64xf32>
    %275 = arith.addf %274, %273 : vector<32x64xf32>
    %276 = arith.mulf %270, %275 : vector<32x64xf32>
    %c1_142 = arith.constant 1 : index
    %c0_143 = arith.constant 0 : index
    %c0_144 = arith.constant 0 : index
    %277 = vector.load %arg26[%c1_142, %c0_143, %c0_144] : memref<2x64x32xf32, #tpu.memory_space<vmem>>, vector<1x64x32xf32>
    %278 = vector.shape_cast %277 : vector<1x64x32xf32> to vector<64x32xf32>
    %279 = arith.truncf %276 : vector<32x64xf32> to vector<32x64xbf16>
    %280 = arith.truncf %278 : vector<64x32xf32> to vector<64x32xbf16>
    %cst_145 = arith.constant dense<0.000000e+00> : vector<32x32xf32>
    %281 = tpu.matmul %279, %280, %cst_145 {dimension_numbers = #tpu.dot_dimension_numbers<[1], [0], [0], [1], [0, 0, 1, 1], [], []>} : vector<32x64xbf16>, vector<64x32xbf16>, vector<32x32xf32> -> vector<32x32xf32>
    %282 = arith.addf %233, %281 : vector<32x32xf32>
    %c1_146 = arith.constant 1 : index
    %c0_147 = arith.constant 0 : index
    %c0_148 = arith.constant 0 : index
    %283 = vector.load %arg27[%c1_146, %c0_147, %c0_148] : memref<2x1x32xf32, #tpu.memory_space<vmem>>, vector<1x1x32xf32>
    %284 = vector.shape_cast %283 : vector<1x1x32xf32> to vector<1x32xf32>
    %285 = vector.broadcast %284 : vector<1x32xf32> to vector<32x32xf32>
    %286 = arith.addf %282, %285 : vector<32x32xf32>
    %c0_149 = arith.constant 0 : index
    %c0_150 = arith.constant 0 : index
    %287 = vector.load %arg11[%c0_149, %c0_150] : memref<16x32xf32, #tpu.memory_space<vmem>>, vector<16x32xf32>
    %cst_151 = arith.constant dense<0.000000e+00> : vector<16x32xf32>
    %288 = tpu.matmul %287, %286, %cst_151 {dimension_numbers = #tpu.dot_dimension_numbers<[1], [0], [0], [1], [0, 0, 1, 1], [], []>} : vector<16x32xf32>, vector<32x32xf32>, vector<16x32xf32> -> vector<16x32xf32>
    %c0_152 = arith.constant 0 : index
    %c0_153 = arith.constant 0 : index
    %289 = vector.load %arg28[%c0_152, %c0_153] : memref<1x32xf32, #tpu.memory_space<vmem>>, vector<1x32xf32>
    %c0_154 = arith.constant 0 : index
    %c0_155 = arith.constant 0 : index
    %290 = vector.load %arg29[%c0_154, %c0_155] : memref<1x32xf32, #tpu.memory_space<vmem>>, vector<1x32xf32>
    %cst_156 = arith.constant dense<0.000000e+00> : vector<16xf32>
    %291 = vector.multi_reduction <add>, %288, %cst_156 [1] : vector<16x32xf32> to vector<16xf32>
    %292 = vector.shape_cast %291 : vector<16xf32> to vector<16x1xf32>
    %cst_157 = arith.constant 3.200000e+01 : f32
    %293 = vector.broadcast %cst_157 : f32 to vector<16x1xf32>
    %294 = arith.divf %292, %293 : vector<16x1xf32>
    %295 = vector.broadcast %294 : vector<16x1xf32> to vector<16x32xf32>
    %296 = arith.subf %288, %295 : vector<16x32xf32>
    %297 = arith.mulf %296, %296 : vector<16x32xf32>
    %cst_158 = arith.constant dense<0.000000e+00> : vector<16xf32>
    %298 = vector.multi_reduction <add>, %297, %cst_158 [1] : vector<16x32xf32> to vector<16xf32>
    %299 = vector.shape_cast %298 : vector<16xf32> to vector<16x1xf32>
    %cst_159 = arith.constant 3.200000e+01 : f32
    %300 = vector.broadcast %cst_159 : f32 to vector<16x1xf32>
    %301 = arith.divf %299, %300 : vector<16x1xf32>
    %302 = vector.broadcast %294 : vector<16x1xf32> to vector<16x32xf32>
    %303 = arith.subf %288, %302 : vector<16x32xf32>
    %cst_160 = arith.constant 9.99999974E-6 : f32
    %304 = vector.broadcast %cst_160 : f32 to vector<16x1xf32>
    %305 = arith.addf %301, %304 : vector<16x1xf32>
    %306 = math.rsqrt %305 : vector<16x1xf32>
    %307 = vector.broadcast %306 : vector<16x1xf32> to vector<16x32xf32>
    %308 = arith.mulf %303, %307 : vector<16x32xf32>
    %309 = vector.broadcast %289 : vector<1x32xf32> to vector<16x32xf32>
    %310 = arith.mulf %308, %309 : vector<16x32xf32>
    %311 = vector.broadcast %290 : vector<1x32xf32> to vector<16x32xf32>
    %312 = arith.addf %310, %311 : vector<16x32xf32>
    %c0_161 = arith.constant 0 : index
    %c0_162 = arith.constant 0 : index
    %313 = vector.load %arg30[%c0_161, %c0_162] : memref<32x128xf32, #tpu.memory_space<vmem>>, vector<32x128xf32>
    %314 = arith.truncf %312 : vector<16x32xf32> to vector<16x32xbf16>
    %315 = arith.truncf %313 : vector<32x128xf32> to vector<32x128xbf16>
    %cst_163 = arith.constant dense<0.000000e+00> : vector<16x128xf32>
    %316 = tpu.matmul %314, %315, %cst_163 {dimension_numbers = #tpu.dot_dimension_numbers<[1], [0], [0], [1], [0, 0, 1, 1], [], []>} : vector<16x32xbf16>, vector<32x128xbf16>, vector<16x128xf32> -> vector<16x128xf32>
    %c0_164 = arith.constant 0 : index
    %c0_165 = arith.constant 0 : index
    %317 = vector.load %arg31[%c0_164, %c0_165] : memref<16x128xf32, #tpu.memory_space<vmem>>, vector<16x128xf32>
    tpu.vector_store %arg31[%c0_164, %c0_165], %316 {strides = array<i32>} : memref<16x128xf32, #tpu.memory_space<vmem>>, vector<16x128xf32>,
    return
  }
  func.func @transform_0(%arg0: i32) -> (i32, i32) {
    %c0_i32 = arith.constant 0 : i32
    %c0_i32_0 = arith.constant 0 : i32
    return %arg0, %c0_i32 : i32, i32
  }
  func.func @transform_1(%arg0: i32) -> (i32, i32) {
    %c0_i32 = arith.constant 0 : i32
    %c0_i32_0 = arith.constant 0 : i32
    return %arg0, %c0_i32 : i32, i32
  }
  func.func @transform_2(%arg0: i32) -> (i32, i32) {
    %c0_i32 = arith.constant 0 : i32
    %c0_i32_0 = arith.constant 0 : i32
    return %arg0, %c0_i32 : i32, i32
  }
  func.func @transform_3(%arg0: i32) -> (i32, i32) {
    %c0_i32 = arith.constant 0 : i32
    %c0_i32_0 = arith.constant 0 : i32
    %c0_i32_1 = arith.constant 0 : i32
    return %c0_i32, %c0_i32_0 : i32, i32
  }
  func.func @transform_4(%arg0: i32) -> (i32, i32) {
    %c0_i32 = arith.constant 0 : i32
    %c0_i32_0 = arith.constant 0 : i32
    %c0_i32_1 = arith.constant 0 : i32
    return %c0_i32, %c0_i32_0 : i32, i32
  }
  func.func @transform_5(%arg0: i32) -> (i32, i32) {
    %c0_i32 = arith.constant 0 : i32
    %c0_i32_0 = arith.constant 0 : i32
    %c0_i32_1 = arith.constant 0 : i32
    return %c0_i32, %c0_i32_0 : i32, i32
  }
  func.func @transform_6(%arg0: i32) -> (i32, i32) {
    %c0_i32 = arith.constant 0 : i32
    %c0_i32_0 = arith.constant 0 : i32
    %c0_i32_1 = arith.constant 0 : i32
    return %c0_i32, %c0_i32_0 : i32, i32
  }
  func.func @transform_7(%arg0: i32) -> (i32, i32) {
    %c0_i32 = arith.constant 0 : i32
    %c0_i32_0 = arith.constant 0 : i32
    %c0_i32_1 = arith.constant 0 : i32
    return %c0_i32, %c0_i32_0 : i32, i32
  }
  func.func @transform_8(%arg0: i32) -> (i32, i32) {
    %c0_i32 = arith.constant 0 : i32
    %c0_i32_0 = arith.constant 0 : i32
    %c0_i32_1 = arith.constant 0 : i32
    return %c0_i32, %c0_i32_0 : i32, i32
  }
  func.func @transform_9(%arg0: i32) -> (i32, i32) {
    %c0_i32 = arith.constant 0 : i32
    %c0_i32_0 = arith.constant 0 : i32
    %c0_i32_1 = arith.constant 0 : i32
    return %c0_i32, %c0_i32_0 : i32, i32
  }
  func.func @transform_10(%arg0: i32) -> (i32, i32) {
    %c0_i32 = arith.constant 0 : i32
    %c0_i32_0 = arith.constant 0 : i32
    %c0_i32_1 = arith.constant 0 : i32
    return %c0_i32, %c0_i32_0 : i32, i32
  }
  func.func @transform_11(%arg0: i32) -> (i32, i32) {
    %c0_i32 = arith.constant 0 : i32
    %c0_i32_0 = arith.constant 0 : i32
    %c0_i32_1 = arith.constant 0 : i32
    return %c0_i32, %c0_i32_0 : i32, i32
  }
  func.func @transform_12(%arg0: i32) -> (i32, i32) {
    %c0_i32 = arith.constant 0 : i32
    %c0_i32_0 = arith.constant 0 : i32
    %c0_i32_1 = arith.constant 0 : i32
    return %c0_i32, %c0_i32_0 : i32, i32
  }
  func.func @transform_13(%arg0: i32) -> (i32, i32) {
    %c0_i32 = arith.constant 0 : i32
    %c0_i32_0 = arith.constant 0 : i32
    %c0_i32_1 = arith.constant 0 : i32
    return %c0_i32, %c0_i32_0 : i32, i32
  }
  func.func @transform_14(%arg0: i32) -> (i32, i32) {
    %c0_i32 = arith.constant 0 : i32
    %c0_i32_0 = arith.constant 0 : i32
    %c0_i32_1 = arith.constant 0 : i32
    return %c0_i32, %c0_i32_0 : i32, i32
  }
  func.func @transform_15(%arg0: i32) -> (i32, i32, i32) {
    %c0_i32 = arith.constant 0 : i32
    %c0_i32_0 = arith.constant 0 : i32
    %c0_i32_1 = arith.constant 0 : i32
    %c0_i32_2 = arith.constant 0 : i32
    return %c0_i32, %c0_i32_0, %c0_i32_1 : i32, i32, i32
  }
  func.func @transform_16(%arg0: i32) -> (i32, i32, i32) {
    %c0_i32 = arith.constant 0 : i32
    %c0_i32_0 = arith.constant 0 : i32
    %c0_i32_1 = arith.constant 0 : i32
    %c0_i32_2 = arith.constant 0 : i32
    return %c0_i32, %c0_i32_0, %c0_i32_1 : i32, i32, i32
  }
  func.func @transform_17(%arg0: i32) -> (i32, i32, i32) {
    %c0_i32 = arith.constant 0 : i32
    %c0_i32_0 = arith.constant 0 : i32
    %c0_i32_1 = arith.constant 0 : i32
    %c0_i32_2 = arith.constant 0 : i32
    return %c0_i32, %c0_i32_0, %c0_i32_1 : i32, i32, i32
  }
  func.func @transform_18(%arg0: i32) -> (i32, i32, i32) {
    %c0_i32 = arith.constant 0 : i32
    %c0_i32_0 = arith.constant 0 : i32
    %c0_i32_1 = arith.constant 0 : i32
    %c0_i32_2 = arith.constant 0 : i32
    return %c0_i32, %c0_i32_0, %c0_i32_1 : i32, i32, i32
  }
  func.func @transform_19(%arg0: i32) -> (i32, i32, i32) {
    %c0_i32 = arith.constant 0 : i32
    %c0_i32_0 = arith.constant 0 : i32
    %c0_i32_1 = arith.constant 0 : i32
    %c0_i32_2 = arith.constant 0 : i32
    return %c0_i32, %c0_i32_0, %c0_i32_1 : i32, i32, i32
  }
  func.func @transform_20(%arg0: i32) -> (i32, i32, i32) {
    %c0_i32 = arith.constant 0 : i32
    %c0_i32_0 = arith.constant 0 : i32
    %c0_i32_1 = arith.constant 0 : i32
    %c0_i32_2 = arith.constant 0 : i32
    return %c0_i32, %c0_i32_0, %c0_i32_1 : i32, i32, i32
  }
  func.func @transform_21(%arg0: i32) -> (i32, i32, i32) {
    %c0_i32 = arith.constant 0 : i32
    %c0_i32_0 = arith.constant 0 : i32
    %c0_i32_1 = arith.constant 0 : i32
    %c0_i32_2 = arith.constant 0 : i32
    return %c0_i32, %c0_i32_0, %c0_i32_1 : i32, i32, i32
  }
  func.func @transform_22(%arg0: i32) -> (i32, i32, i32) {
    %c0_i32 = arith.constant 0 : i32
    %c0_i32_0 = arith.constant 0 : i32
    %c0_i32_1 = arith.constant 0 : i32
    %c0_i32_2 = arith.constant 0 : i32
    return %c0_i32, %c0_i32_0, %c0_i32_1 : i32, i32, i32
  }
  func.func @transform_23(%arg0: i32) -> (i32, i32, i32) {
    %c0_i32 = arith.constant 0 : i32
    %c0_i32_0 = arith.constant 0 : i32
    %c0_i32_1 = arith.constant 0 : i32
    %c0_i32_2 = arith.constant 0 : i32
    return %c0_i32, %c0_i32_0, %c0_i32_1 : i32, i32, i32
  }
  func.func @transform_24(%arg0: i32) -> (i32, i32, i32) {
    %c0_i32 = arith.constant 0 : i32
    %c0_i32_0 = arith.constant 0 : i32
    %c0_i32_1 = arith.constant 0 : i32
    %c0_i32_2 = arith.constant 0 : i32
    return %c0_i32, %c0_i32_0, %c0_i32_1 : i32, i32, i32
  }
  func.func @transform_25(%arg0: i32) -> (i32, i32, i32) {
    %c0_i32 = arith.constant 0 : i32
    %c0_i32_0 = arith.constant 0 : i32
    %c0_i32_1 = arith.constant 0 : i32
    %c0_i32_2 = arith.constant 0 : i32
    return %c0_i32, %c0_i32_0, %c0_i32_1 : i32, i32, i32
  }
  func.func @transform_26(%arg0: i32) -> (i32, i32, i32) {
    %c0_i32 = arith.constant 0 : i32
    %c0_i32_0 = arith.constant 0 : i32
    %c0_i32_1 = arith.constant 0 : i32
    %c0_i32_2 = arith.constant 0 : i32
    return %c0_i32, %c0_i32_0, %c0_i32_1 : i32, i32, i32
  }
  func.func @transform_27(%arg0: i32) -> (i32, i32) {
    %c0_i32 = arith.constant 0 : i32
    %c0_i32_0 = arith.constant 0 : i32
    %c0_i32_1 = arith.constant 0 : i32
    return %c0_i32, %c0_i32_0 : i32, i32
  }
  func.func @transform_28(%arg0: i32) -> (i32, i32) {
    %c0_i32 = arith.constant 0 : i32
    %c0_i32_0 = arith.constant 0 : i32
    %c0_i32_1 = arith.constant 0 : i32
    return %c0_i32, %c0_i32_0 : i32, i32
  }
  func.func @transform_29(%arg0: i32) -> (i32, i32) {
    %c0_i32 = arith.constant 0 : i32
    %c0_i32_0 = arith.constant 0 : i32
    %c0_i32_1 = arith.constant 0 : i32
    return %c0_i32, %c0_i32_0 : i32, i32
  }
  func.func @transform_30(%arg0: i32) -> (i32, i32) {
    %c0_i32 = arith.constant 0 : i32
    %c0_i32_0 = arith.constant 0 : i32
    return %arg0, %c0_i32 : i32, i32
  }
}

</mosaic_0001>

<bundles_post_ra>
// kernel: tpu_custom_call.1
= control target key start
LH: loop header
LB: loop body
LE: loop exit
PB: predicated region body
PF: predicated region fallthrough
CT: control target
= control target key end

     0   :  { %s3996_s6 = smov 1   ;;  %s3997_s10 = smov 2   ;;  %s5036_s0 = inlined_call_operand.smem [shape: u32[31], index: -1, kind: input, shape index: {}] }
   0x1   :  { %s4042_s5 = sld [smem:[%s5036_s0]]   ;;  %s3998_s14 = smov 3  }
   0x2   :  { %s4047_s9 = sld [smem:[%s5036_s0 + %s3996_s6]]   ;;  %s3999_s18 = smov 4  }
   0x3   :  { %s4052_s13 = sld [smem:[%s5036_s0 + %s3997_s10]]   ;;  %s4000_s22 = smov 5  }
   0x4   :  { %s4057_s17 = sld [smem:[%s5036_s0 + %s3998_s14]]   ;;  %s4001_s26 = smov 6  }
   0x5   :  { %s4062_s21 = sld [smem:[%s5036_s0 + %s3999_s18]]   ;;  %s4002_s30 = smov 7  }
   0x6   :  { %s4067_s25 = sld [smem:[%s5036_s0 + %s4000_s22]]   ;;  %s4003_s4 = smov 8  }
   0x7   :  { %s4072_s29 = sld [smem:[%s5036_s0 + %s4001_s26]]   ;;  %s4004_s10 = smov 9  }
   0x8   :  { %s4077_s3 = sld [smem:[%s5036_s0 + %s4002_s30]]   ;;  %s4005_s15 = smov 10  }
   0x9   :  { %s4082_s8 = sld [smem:[%s5036_s0 + %s4003_s4]]   ;;  %s4006_s20 = smov 11  }
   0xa   :  { %s4087_s14 = sld [smem:[%s5036_s0 + %s4004_s10]]   ;;  %s4007_s26 = smov 12  }
   0xb   :  { %s4092_s19 = sld [smem:[%s5036_s0 + %s4005_s15]]   ;;  %s4008_s1 = smov 13  }
   0xc   :  { %s4097_s24 = sld [smem:[%s5036_s0 + %s4006_s20]]   ;;  %s4009_s7 = smov 14  }
   0xd   :  { %s4102_s30 = sld [smem:[%s5036_s0 + %s4007_s26]]   ;;  %s4010_s15 = smov 15  }
   0xe   :  { %5050 = sst [smem:[#allocation5_spill]] %s4077_s3  ;;  %s4011_s22 = smov 16  }
   0xf   :  { %5051 = sst [smem:[#allocation6_spill]] %s4082_s8  ;;  %s4012_s28 = smov 17  }
  0x10   :  { %5052 = sst [smem:[#allocation7_spill]] %s4087_s14 }
  0x11   :  { %5053 = sst [smem:[#allocation8_spill]] %s4092_s19 }
  0x12   :  { %s4107_s6 = sld [smem:[%s5036_s0 + %s4008_s1]]  }
  0x13   :  { %s4112_s12 = sld [smem:[%s5036_s0 + %s4009_s7]]   ;;  %s4013_s7 = smov 18  }
  0x14   :  { %s4117_s20 = sld [smem:[%s5036_s0 + %s4010_s15]]   ;;  %s4014_s15 = smov 19  }
  0x15   :  { %s4122_s27 = sld [smem:[%s5036_s0 + %s4011_s22]]   ;;  %s4015_s22 = smov 20  }
  0x16   :  { %s4127_s4 = sld [smem:[%s5036_s0 + %s4012_s28]]   ;;  %s4016_s28 = smov 21  }
  0x17   :  { %s4132_s19 = sld [smem:[%s5036_s0 + %s4013_s7]]   ;;  %s4017_s7 = smov 22  }
  0x18   :  { %s4137_s14 = sld [smem:[%s5036_s0 + %s4014_s15]]   ;;  %s4018_s15 = smov 23  }
  0x19   :  { %s4142_s8 = sld [smem:[%s5036_s0 + %s4015_s22]]   ;;  %s4019_s22 = smov 24  }
  0x1a   :  { %s4147_s3 = sld [smem:[%s5036_s0 + %s4016_s28]]   ;;  %s4020_s28 = smov 25  }
  0x1d   :  { %5054 = sst [smem:[#allocation9_spill]] %s4132_s19 }
  0x1e   :  { %5055 = sst [smem:[#allocation10_spill]] %s4137_s14 }
  0x1f   :  { %5056 = sst [smem:[#allocation11_spill]] %s4142_s8 }
  0x20   :  { %5057 = sst [smem:[#allocation12_spill]] %s4147_s3 }
  0x21   :  { %s4152_s19 = sld [smem:[%s5036_s0 + %s4017_s7]]   ;;  %s4021_s7 = smov 26  }
  0x22   :  { %s4157_s14 = sld [smem:[%s5036_s0 + %s4018_s15]]   ;;  %s4022_s15 = smov 27  }
  0x23   :  { %s4162_s8 = sld [smem:[%s5036_s0 + %s4019_s22]]   ;;  %s4023_s22 = smov 28  }
  0x24   :  { %s4167_s3 = sld [smem:[%s5036_s0 + %s4020_s28]]   ;;  %s4024_s28 = smov 29  }
  0x27   :  { %5058 = sst [smem:[#allocation13_spill]] %s4152_s19 }
  0x28   :  { %5059 = sst [smem:[#allocation14_spill]] %s4157_s14 }
  0x29   :  { %5060 = sst [smem:[#allocation15_spill]] %s4162_s8 }
  0x2a   :  { %5061 = sst [smem:[#allocation16_spill]] %s4167_s3 }
  0x2b   :  { %s4172_s19 = sld [smem:[%s5036_s0 + %s4021_s7]]   ;;  %s4025_s7 = smov 30  }
  0x2c   :  { %s4177_s14 = sld [smem:[%s5036_s0 + %s4022_s15]]  }
  0x2d   :  { %s4182_s8 = sld [smem:[%s5036_s0 + %s4023_s22]]  }
  0x2e   :  { %s4187_s3 = sld [smem:[%s5036_s0 + %s4024_s28]]  }
  0x31   :  { %5062 = sst [smem:[#allocation17_spill]] %s4172_s19 }
  0x32   :  { %s4192_s19 = sld [smem:[%s5036_s0 + %s4025_s7]]  }
  0x33   :  { %v188_v0 = vld [vmem:[%s4047_s9] sm:$0xff]  ;;  %v4026_v2 = vmov 0   ;;  %v131_v4 = vld [vmem:[%s4097_s24 + $0x8] sm:$0xff]  ;;  %v4027_v11 = vmov 0.0   ;;  %vm4028_vm0 = vmmov 0  }
  0x34   :  { %v289_v1 = vld [vmem:[%s4052_s13] sm:$0xff]  ;;  %3748 = vset.pattern.permute.xlu0 %v4026_v2  ;;  %3749 = vset.pattern.permute.xlu1 %v4026_v2  ;;  %v129_v7 = vld [vmem:[%s4042_s5 + $0x8] sm:$0xff] }
  0x35   :  { %v130_v3 = vld [vmem:[%s4097_s24] sm:$0xff]  ;;  %193 = vperm.xlu0 %3748, %v188_v0   ;;  %292 = vperm.xlu1 %3749, %v289_v1   ;;  %v205_v8 = vld [vmem:[%s4107_s6 + $0x8] sm:$0xff] }
  0x36   :  { %v133_v5 = vpack.c.bf16 %v131_v4, %v130_v3  ;;  %v128_v6 = vld [vmem:[%s4042_s5] sm:$0xff]  ;;  %v189_v9 = vld [vmem:[%s4047_s9 + $0x8] sm:$0xff]  ;;  %3403 = vmatprep.subr.bf16.mxu0 %v4027_v11  ;;  %3405 = vmatprep.mubr.msk.bf16.mxu0 %vm4028_vm0, %v4027_v11 }
  0x37   :  { %v290_v10 = vld [vmem:[%s4052_s13 + $0x8] sm:$0xff]  ;;  %v132_v12 = vpack.c.bf16 %v129_v7, %v128_v6 }
  0x38   :  { %66 = vsyncpa [#allocation3], 0  ;;  %3404 = vmatpush3.bf16.msra.mxu0 %v133_v5  ;;  %vm141_vm1 = vcmask 130048   ;;  %3409 = vmatprep.subr.mxu1 %v205_v8  ;;  %v204_v13 = vld [vmem:[%s4107_s6] sm:$0xff]  ;;  %v306_v15 = vld [vmem:[%s4112_s12 + $0x18] sm:$0xff]  ;;  %v190_v19 = vlaneseq  ;;  %vm308_vm2 = vcmask 326656  }
  0x39   :  { %v307_v14 = vld [vmem:[%s4112_s12 + $0x20] sm:$0xff]  ;;  %3410 = vmatpush3.msra.mxu1 %v205_v8  ;;  %196 = vperm.xlu0 %3748, %v189_v9   ;;  %v305_v16 = vld [vmem:[%s4112_s12 + $0x10] sm:$0xff]  ;;  %v304_v17 = vld [vmem:[%s4112_s12 + $0x8] sm:$0xff]  ;;  %vm743_vm7 = vcmask 261120   ;;  %s5063_s0 = sld [smem:[#allocation9_spill]]  ;;  %s4029_s9 = smov 96  }
  0x3a   :  { %3416 = vmatprep.subr.mxu0 %v307_v14  ;;  %295 = vperm.xlu1 %3749, %v290_v10   ;;  %v303_v18 = vld [vmem:[%s4112_s12] sm:$0xff]  ;;  %v191_v20 = vand.u32 127, %v190_v19  ;;  %v593_v41 = vld [vmem:[%s4067_s25 + $0x8] sm:$0xff]  ;;  %v594_v43 = vld [vmem:[%s4067_s25 + $0x10] sm:$0xff]  ;;  %s5064_s5 = sld [smem:[#allocation5_spill]]  ;;  %vm1746_vm8 = vcmask 523264  }
  0x3b   :  { %3406 = vmatmul.mubr.msk.bf16.vlgmr.msra.gmra.mxu0 %vm141_vm1, %v132_v12  ;;  %3411 = vmatprep.subr.mxu1 %v204_v13  ;;  %v394_v33 = vld [vmem:[%s4062_s21] sm:$0xff]  ;;  %v595_v44 = vld [vmem:[%s4067_s25 + $0x18] sm:$0xff]  ;;  %v395_v48 = vld [vmem:[%s4062_s21 + $0x8] sm:$0xff]  ;;  %s5065_s13 = sld [smem:[#allocation6_spill]] }
  0x3c   :  { %3412 = vmatpush3.msra.mxu1 %v204_v13  ;;  %3417 = vmatpush3.msra.mxu0 %v307_v14  ;;  %v592_v34 = vld [vmem:[%s4067_s25] sm:$0xff]  ;;  %v396_v49 = vld [vmem:[%s4062_s21 + $0x10] sm:$0xff]  ;;  %v397_v51 = vld [vmem:[%s4062_s21 + $0x18] sm:$0xff]  ;;  %s5066_s21 = sld [smem:[#allocation7_spill]] }
  0x3d   :  { %3418 = vmatprep.subr.mxu0 %v306_v15  ;;  %v3128_v35 = vld [vmem:[%s4102_s30] ss:$0 sm:$0xff]  ;;  %v391_v53 = vld [vmem:[%s4057_s17 + $0x8] sm:$0xff]  ;;  %v392_v54 = vld [vmem:[%s4057_s17 + $0x10] sm:$0xff]  ;;  %s5067_s25 = sld [smem:[#allocation10_spill]] }
  0x3e   :  { %3419 = vmatpush3.msra.mxu0 %v306_v15  ;;  %v390_v52 = vld [vmem:[%s4057_s17] sm:$0xff]  ;;  %v393_v55 = vld [vmem:[%s4057_s17 + $0x18] sm:$0xff]  ;;  %v698_v0 = vld [vmem:[%s4072_s29 + $0x8] sm:$0xff]  ;;  %s4030_s17 = smov 64   ;;  %s5069_s24 = sld [smem:[#allocation14_spill]] }
  0x3f   :  { %3420 = vmatprep.subr.mxu0 %v305_v16  ;;  %v697_v4 = vld [vmem:[%s4072_s29] sm:$0xff]  ;;  %s5070_s30 = sld [smem:[#allocation12_spill]] }
  0x40   :  { %3421 = vmatpush3.msra.mxu0 %v305_v16  ;;  %v699_v16 = vld [vmem:[%s4072_s29 + $0x10] sm:$0xff]  ;;  %s5071_s6 = sld [smem:[#allocation13_spill]] }
  0x41   :  { %3422 = vmatprep.subr.mxu0 %v304_v17  ;;  %s5072_s12 = sld [smem:[#allocation16_spill]] }
  0x42   :  { %3423 = vmatpush3.msra.mxu0 %v304_v17  ;;  %s5073_s15 = sld [smem:[#allocation15_spill]] }
  0x43   :  { %3424 = vmatprep.subr.mxu0 %v303_v18  ;;  %s5074_s16 = sld [smem:[#allocation17_spill]] }
  0x44   :  { %3425 = vmatpush3.msra.mxu0 %v303_v18 }
  0xb0   :  { %v194_v21 = vpop.permute.xlu0 %193  ;;  %v293_v22 = vpop.permute.xlu1 %292 }
  0xb1   :  { %vm198_vm3 = vcmp.eq.s32.totalorder %v194_v21, %v191_v20  ;;  %vm297_vm4 = vcmp.eq.s32.totalorder %v293_v22, %v191_v20 }
  0xb2   :  { %v3130_v23 = vsel %vm198_vm3, 1.0, %v4027_v11  ;;  %v3134_v24 = vsel %vm297_vm4, 1.0, %v4027_v11 }
  0xb3   :  { %3413 = vmatprep.mubr.msk.f32.mxu1 %vm141_vm1, %v3130_v23  ;;  %3426 = vmatprep.mubr.msk.f32.mxu0 %vm308_vm2, %v3134_v24 }
  0xb4   :  { %v197_v25 = vpop.permute.xlu0 %196 }
  0xb5   :  { %v296_v26 = vpop.permute.xlu1 %295  ;;  %vm199_vm5 = vcmp.eq.s32.totalorder %v197_v25, %v191_v20 }
  0xb6   :  { %vm298_vm6 = vcmp.eq.s32.totalorder %v296_v26, %v191_v20  ;;  %v3131_v27 = vsel %vm199_vm5, 1.0, %v4027_v11  ;;  %v700_v20 = vld [vmem:[%s4072_s29 + $0x18] sm:$0xff]  ;;  %s5068_s29 = sld [smem:[#allocation11_spill]] }
  0xb7   :  { %v3135_v28 = vsel %vm298_vm6, 1.0, %v4027_v11  ;;  %3414 = vmatmul.mubr.msk.f32.vlgmr.msra.gmra.mxu1 %vm141_vm1, %v3131_v27 }
  0xb8   :  { %3427 = vmatmul.mubr.msk.f32.vlgmr.msra.gmra.mxu0 %vm308_vm2, %v3135_v28  ;;  %3433 = vmatprep.mubr.msk.f32.mxu1 %vm141_vm1, %v394_v33 }
  0xb9   :  { %3453 = vmatprep.mubr.msk.f32.mxu0 %vm141_vm1, %v592_v34 }
  0xfb   :  { %v179_v29 = vpop.f32.mrf.mxu0 }
  0xfc   :  { %v180_v42 = vadd.f32 %v3128_v35, %v179_v29 }
  0xfd   :  { %v3407_v30 = vpop.f32.mrf.mxu0 }
  0xff   :  { %v182_v31 = vpop.f32.mrf.mxu0 }
 0x100   :  { %v183_v36 = vadd.f32 %v3128_v35, %v182_v31 }
 0x101   :  { %v3408_v32 = vpop.f32.mrf.mxu0 }
 0x177   :  { %v3415_v37 = vpop.f32.mrf.mxu1 }
 0x178   :  { %v3428_v38 = vpop.f32.mrf.mxu0  ;;  %3750 = vtanh.f32 %v3415_v37 }
 0x179   :  { %3449 = vmatprep.subr.mxu0 %v3428_v38  ;;  %3752 = vtanh.f32 %v183_v36  ;;  %v278_v39 = vpop.f32.mrf.mxu1 }
 0x17a   :  { %v381_v40 = vpop.f32.mrf.mxu0  ;;  %3450 = vmatpush3.msra.mxu0 %v3428_v38  ;;  %3754 = vtanh.f32 %v278_v39 }
 0x17b   :  { %3451 = vmatprep.subr.mxu0 %v381_v40  ;;  %3756 = vtanh.f32 %v180_v42 }
 0x17c   :  { %3452 = vmatpush3.msra.mxu0 %v381_v40 }
 0x17d   :  { %3454 = vmatmul.mubr.msk.f32.vlgmr.msra.gmra.mxu0 %vm141_vm1, %v593_v41 }
 0x17e   :  { %3456 = vmatprep.mubr.msk.f32.mxu0 %vm141_vm1, %v594_v43 }
 0x181   :  { %3457 = vmatmul.mubr.msk.f32.gmra.mxu0 %vm141_vm1, %v595_v44 }
 0x185   :  { %v3751_v45 = vpop.eup %3750 }
 0x186   :  { %v3753_v46 = vpop.eup %3752  ;;  %3429 = vmatprep.subr.mxu1 %v3751_v45 }
 0x187   :  { %v3755_v47 = vpop.eup %3754  ;;  %3430 = vmatpush3.msra.mxu1 %v3751_v45  ;;  %v819_v45 = vld [vmem:[%s4127_s4 + $0x10] sm:$0xff] }
 0x188   :  { %3431 = vmatprep.subr.mxu1 %v3755_v47  ;;  %v3757_v50 = vpop.eup %3756 }
 0x189   :  { %3432 = vmatpush3.msra.mxu1 %v3755_v47 }
 0x18a   :  { %3434 = vmatmul.mubr.msk.f32.vlgmr.msra.gmra.mxu1 %vm141_vm1, %v395_v48  ;;  %3439 = vmatprep.subr.mxu1 %v3753_v46  ;;  %v817_v48 = vld [vmem:[%s4127_s4] sm:$0xff] }
 0x18b   :  { %3440 = vmatpush3.msra.mxu1 %v3753_v46  ;;  %3436 = vmatprep.mubr.msk.f32.mxu1 %vm141_vm1, %v396_v49  ;;  %v820_v46 = vld [vmem:[%s4127_s4 + $0x18] sm:$0xff]  ;;  %v818_v49 = vld [vmem:[%s4127_s4 + $0x8] sm:$0xff] }
 0x18c   :  { %3441 = vmatprep.subr.mxu1 %v3757_v50  ;;  %v824_v47 = vpack.c.bf16 %v820_v46, %v819_v45  ;;  %v4320_v46 = vld [vmem:[%s5064_s5 + $0x8] sm:$0xff] }
 0x18d   :  { %3442 = vmatpush3.msra.mxu1 %v3757_v50  ;;  %v823_v50 = vpack.c.bf16 %v818_v49, %v817_v48  ;;  %v4324_v48 = vld [vmem:[%s5064_s5 + $0x28] sm:$0xff] }
 0x18e   :  { %3437 = vmatmul.mubr.msk.f32.gmra.mxu1 %vm141_vm1, %v397_v51  ;;  %3459 = vmatprep.subr.bf16.mxu1 %v824_v47 }
 0x18f   :  { %3443 = vmatprep.mubr.msk.f32.mxu1 %vm141_vm1, %v390_v52 }
 0x192   :  { %3444 = vmatmul.mubr.msk.f32.vlgmr.msra.gmra.mxu1 %vm141_vm1, %v391_v53 }
 0x193   :  { %3446 = vmatprep.mubr.msk.f32.mxu1 %vm141_vm1, %v392_v54  ;;  %3460 = vmatpush3.bf16.msra.mxu1 %v824_v47 }
 0x194   :  { %3461 = vmatprep.subr.bf16.mxu1 %v823_v50 }
 0x196   :  { %3447 = vmatmul.mubr.msk.f32.gmra.mxu1 %vm141_vm1, %v393_v55 }
 0x197   :  { %3462 = vmatpush3.bf16.msra.mxu1 %v823_v50 }
 0x23d   :  { %v3455_v59 = vpop.f32.mrf.mxu0 }
 0x23f   :  { %v674_v62 = vpop.f32.mrf.mxu0 }
 0x241   :  { %v3458_v6 = vpop.f32.mrf.mxu0 }
 0x243   :  { %v684_v15 = vpop.f32.mrf.mxu0 }
 0x24a   :  { %v3435_v56 = vpop.f32.mrf.mxu1 }
 0x24c   :  { %v476_v57 = vpop.f32.mrf.mxu1 }
 0x24e   :  { %v3438_v58 = vpop.f32.mrf.mxu1 }
 0x250   :  { %v486_v60 = vpop.f32.mrf.mxu1 }
 0x252   :  { %v3445_v61 = vpop.f32.mrf.mxu1 }
 0x253   :  { %v579_v63 = vadd.f32 %v3445_v61, %v3435_v56 }
 0x254   :  { %v573_v1 = vpop.f32.mrf.mxu1 }
 0x255   :  { %v694_v2 = vadd.f32 %v3455_v59, %v579_v63  ;;  %v574_v3 = vadd.f32 %v573_v1, %v476_v57 }
 0x256   :  { %v3448_v5 = vpop.f32.mrf.mxu1 }
 0x257   :  { %v4246_v7 = vadd.f32 %v698_v0, %v694_v2  ;;  %v693_v8 = vadd.f32 %v674_v62, %v574_v3  ;;  %v589_v9 = vadd.f32 %v3448_v5, %v3438_v58  ;;  %v3150_v0 = vld [vmem:[%s4117_s20] ss:$0 sm:$0xff] }
 0x258   :  { %v583_v10 = vpop.f32.mrf.mxu1  ;;  %v3151_v5 = vld [vmem:[%s4122_s27] ss:$0 sm:$0xff] }
 0x259   :  { %v4248_v12 = vadd.f32 %v697_v4, %v693_v8  ;;  %v584_v13 = vadd.f32 %v583_v10, %v486_v60  ;;  %v747_v14 = vsel %vm743_vm7, %v4246_v7, 0.0  ;;  %v696_v17 = vadd.f32 %v3458_v6, %v589_v9 }
 0x25a   :  { %748 = vadd.xlane.f32.xlu1 %v747_v14 }
 0x25b   :  { %v695_v18 = vadd.f32 %v684_v15, %v584_v13  ;;  %v744_v19 = vsel %vm743_vm7, %v4248_v12, 0.0  ;;  %v4258_v22 = vadd.f32 %v700_v20, %v696_v17 }
 0x25c   :  { %745 = vadd.xlane.f32.xlu0 %v744_v19 }
 0x25d   :  { %v4256_v21 = vadd.f32 %v699_v16, %v695_v18  ;;  %v753_v24 = vsel %vm743_vm7, %v4258_v22, 0.0 }
 0x25f   :  { %v750_v23 = vsel %vm743_vm7, %v4256_v21, 0.0 }
 0x260   :  { %751 = vadd.xlane.f32.xlu0 %v750_v23 }
 0x264   :  { %754 = vadd.xlane.f32.xlu0 %v753_v24  ;;  %v3152_v24 = vld [vmem:[%s5063_s0] ss:$0 sm:$0xff] }
 0x2e3   :  { %v749_v25 = vpop.xlane.xlu1 %748 }
 0x2e4   :  { %v758_v26 = vmul.f32 0.03125, %v749_v25 }
 0x2e5   :  { %v746_v27 = vpop.xlane.xlu0 %745 }
 0x2e6   :  { %v762_v28 = vsub.f32 %v4246_v7, %v758_v26  ;;  %v757_v29 = vmul.f32 0.03125, %v746_v27  ;;  %v4282_v27 = vld [vmem:[%s5064_s5 + $0x10] sm:$0xff] }
 0x2e8   :  { %v761_v30 = vsub.f32 %v4248_v12, %v757_v29  ;;  %v766_v31 = vmul.f32 %v762_v28, %v762_v28  ;;  %v4285_v29 = vld [vmem:[%s5064_s5 + $0x30] sm:$0xff] }
 0x2e9   :  { %v752_v32 = vpop.xlane.xlu0 %751 }
 0x2ea   :  { %v759_v33 = vmul.f32 0.03125, %v752_v32  ;;  %v772_v34 = vsel %vm743_vm7, %v766_v31, 0.0  ;;  %v765_v35 = vmul.f32 %v761_v30, %v761_v30  ;;  %v4291_v32 = vld [vmem:[%s5064_s5] sm:$0xff] }
 0x2eb   :  { %773 = vadd.xlane.f32.xlu0 %v772_v34  ;;  %v4297_v34 = vld [vmem:[%s5064_s5 + $0x70] sm:$0xff] }
 0x2ec   :  { %v763_v36 = vsub.f32 %v4256_v21, %v759_v33  ;;  %v769_v37 = vsel %vm743_vm7, %v765_v35, 0.0  ;;  %v4294_v33 = vld [vmem:[%s5064_s5 + $0x20] sm:$0xff]  ;;  %v4300_v35 = vld [vmem:[%s5064_s5 + $0x18] sm:$0xff] }
 0x2ed   :  { %770 = vadd.xlane.f32.xlu1 %v769_v37  ;;  %v755_v38 = vpop.xlane.xlu0 %754  ;;  %v4303_v37 = vld [vmem:[%s5064_s5 + $0x38] sm:$0xff] }
 0x2ee   :  { %v760_v39 = vmul.f32 0.03125, %v755_v38  ;;  %v767_v40 = vmul.f32 %v763_v36, %v763_v36  ;;  %v4306_v38 = vld [vmem:[%s5064_s5 + $0x40] sm:$0xff] }
 0x2f0   :  { %v764_v41 = vsub.f32 %v4258_v22, %v760_v39  ;;  %v775_v42 = vsel %vm743_vm7, %v767_v40, 0.0 }
 0x2f1   :  { %776 = vadd.xlane.f32.xlu1 %v775_v42  ;;  %v4311_v42 = vld [vmem:[%s5064_s5 + $0x58] sm:$0xff] }
 0x2f2   :  { %v768_v43 = vmul.f32 %v764_v41, %v764_v41 }
 0x2f4   :  { %v778_v44 = vsel %vm743_vm7, %v768_v43, 0.0  ;;  %v4314_v43 = vld [vmem:[%s5064_s5 + $0x60] sm:$0xff] }
 0x2f5   :  { %779 = vadd.xlane.f32.xlu0 %v778_v44  ;;  %v4317_v44 = vld [vmem:[%s5064_s5 + $0x78] sm:$0xff] }
 0x374   :  { %v774_v51 = vpop.xlane.xlu0 %773 }
 0x375   :  { %v782_v52 = vmul.f32 0.03125, %v774_v51 }
 0x376   :  { %v771_v53 = vpop.xlane.xlu1 %770 }
 0x377   :  { %v786_v54 = vadd.f32 1e-05, %v782_v52  ;;  %v781_v55 = vmul.f32 0.03125, %v771_v53 }
 0x379   :  { %3758 = vrsqrt.f32 %v786_v54  ;;  %v785_v56 = vadd.f32 1e-05, %v781_v55 }
 0x37a   :  { %v777_v57 = vpop.xlane.xlu1 %776 }
 0x37b   :  { %3760 = vrsqrt.f32 %v785_v56  ;;  %v783_v58 = vmul.f32 0.03125, %v777_v57  ;;  %v4334_v56 = vld [vmem:[%s5064_s5 + $0x48] sm:$0xff] }
 0x37c   :  { %v4337_v57 = vld [vmem:[%s5064_s5 + $0x68] sm:$0xff] }
 0x37d   :  { %v787_v59 = vadd.f32 1e-05, %v783_v58 }
 0x37e   :  { %v780_v60 = vpop.xlane.xlu0 %779 }
 0x37f   :  { %3762 = vrsqrt.f32 %v787_v59  ;;  %v784_v61 = vmul.f32 0.03125, %v780_v60 }
 0x381   :  { %v788_v62 = vadd.f32 1e-05, %v784_v61 }
 0x383   :  { %3764 = vrsqrt.f32 %v788_v62 }
 0x386   :  { %v3759_v63 = vpop.eup %3758 }
 0x387   :  { %v794_v1 = vmul.f32 %v3759_v63, %v762_v28 }
 0x388   :  { %v3761_v2 = vpop.eup %3760 }
 0x389   :  { %v793_v3 = vmul.f32 %v3761_v2, %v761_v30  ;;  %v804_v4 = vmul.f32 %v3150_v0, %v794_v1  ;;  %v4288_v30 = vld [vmem:[%s5064_s5 + $0x50] sm:$0xff] }
 0x38b   :  { %v803_v6 = vmul.f32 %v3150_v0, %v793_v3  ;;  %v814_v13 = vadd.f32 %v3151_v5, %v804_v4 }
 0x38c   :  { %v3763_v8 = vpop.eup %3762 }
 0x38d   :  { %v795_v9 = vmul.f32 %v3763_v8, %v763_v36  ;;  %v813_v10 = vadd.f32 %v3151_v5, %v803_v6 }
 0x38f   :  { %v821_v14 = vpack.c.bf16 %v814_v13, %v813_v10  ;;  %v805_v17 = vmul.f32 %v3150_v0, %v795_v9 }
 0x390   :  { %v3765_v15 = vpop.eup %3764 }
 0x391   :  { %v796_v16 = vmul.f32 %v3765_v15, %v764_v41  ;;  %3463 = vmatprep.mubr.msk.bf16.mxu1 %vm743_vm7, %v821_v14  ;;  %v815_v19 = vadd.f32 %v3151_v5, %v805_v17 }
 0x393   :  { %v806_v18 = vmul.f32 %v3150_v0, %v796_v16 }
 0x395   :  { %v816_v20 = vadd.f32 %v3151_v5, %v806_v18 }
 0x397   :  { %v822_v23 = vpack.c.bf16 %v816_v20, %v815_v19  ;;  %v723_v19 = vld [vmem:[%s5065_s13 + $0x10] sm:$0xff] }
 0x399   :  { %3464 = vmatmul.mubr.msk.bf16.vlgmr.msra.gmra.mxu1 %vm743_vm7, %v822_v23 }
 0x459   :  { %v3465_v25 = vpop.f32.mrf.mxu1 }
 0x45a   :  { %v881_v26 = vadd.f32 %v3465_v25, %v3152_v24 }
 0x45b   :  { %v872_v28 = vpop.f32.mrf.mxu1 }
 0x45c   :  { %v873_v31 = vadd.f32 %v3152_v24, %v872_v28  ;;  %v889_v39 = vmul.f32 %v881_v26, %v4282_v27  ;;  %v893_v41 = vmul.f32 %v881_v26, %v4285_v29  ;;  %v897_v50 = vmul.f32 %v881_v26, %v4288_v30 }
 0x45d   :  { %v3466_v36 = vpop.f32.mrf.mxu1  ;;  %v901_v51 = vmul.f32 %v881_v26, %v4297_v34 }
 0x45e   :  { %v884_v40 = vadd.f32 %v3466_v36, %v3152_v24  ;;  %v887_v47 = vmul.f32 %v873_v31, %v4291_v32  ;;  %v891_v49 = vmul.f32 %v873_v31, %v4294_v33  ;;  %v895_v58 = vmul.f32 %v873_v31, %v4306_v38 }
 0x45f   :  { %v875_v45 = vpop.f32.mrf.mxu1  ;;  %v899_v60 = vmul.f32 %v873_v31, %v4314_v43 }
 0x460   :  { %v890_v52 = vmul.f32 %v884_v40, %v4300_v35  ;;  %v876_v53 = vadd.f32 %v3152_v24, %v875_v45  ;;  %v4330_v54 = vpack.c.bf16 %v884_v40, %v881_v26  ;;  %v894_v55 = vmul.f32 %v884_v40, %v4303_v37  ;;  %v721_v24 = vld [vmem:[%s5065_s13] sm:$0xff] }
 0x461   :  { %v898_v59 = vmul.f32 %v884_v40, %v4311_v42  ;;  %v902_v61 = vmul.f32 %v884_v40, %v4317_v44  ;;  %v722_v40 = vld [vmem:[%s5065_s13 + $0x8] sm:$0xff] }
 0x462   :  { %v904_v62 = vpack.c.bf16 %v890_v52, %v889_v39  ;;  %917 = vrot.lane.b32.xlu1 %v4330_v54, %s4029_s9  ;;  %v4345_v63 = vpack.c.bf16 %v876_v53, %v873_v31  ;;  %v888_v0 = vmul.f32 %v876_v53, %v4320_v46  ;;  %v892_v1 = vmul.f32 %v876_v53, %v4324_v48 }
 0x463   :  { %v906_v2 = vpack.c.bf16 %v894_v55, %v893_v41  ;;  %v896_v3 = vmul.f32 %v876_v53, %v4334_v56  ;;  %v908_v4 = vpack.c.bf16 %v898_v59, %v897_v50  ;;  %v900_v5 = vmul.f32 %v876_v53, %v4337_v57  ;;  %v724_v50 = vld [vmem:[%s5065_s13 + $0x18] sm:$0xff] }
 0x464   :  { %915 = vrot.lane.b32.xlu0 %v4345_v63, %s4029_s9  ;;  %v903_v6 = vpack.c.bf16 %v888_v0, %v887_v47  ;;  %v905_v8 = vpack.c.bf16 %v892_v1, %v891_v49  ;;  %v910_v9 = vpack.c.bf16 %v902_v61, %v901_v51  ;;  %v727_v49 = vld [vmem:[%s5065_s13 + $0x30] sm:$0xff] }
 0x465   :  { %v907_v10 = vpack.c.bf16 %v896_v3, %v895_v58  ;;  %v909_v13 = vpack.c.bf16 %v900_v5, %v899_v60  ;;  %v725_v58 = vld [vmem:[%s5065_s13 + $0x20] sm:$0xff] }
 0x466   :  { %3471 = vmatprep.mubr.msk.bf16.mxu0 %vm743_vm7, %v903_v6 }
 0x4d4   :  { %v918_v14 = vpop.permute.xlu1 %917 }
 0x4d5   :  { %v947_v15 = vsel %vm743_vm7, %v918_v14, 0  ;;  %3706 = vmatprep.subr.msk.bf16.mxu0 %vm743_vm7, %v918_v14 }
 0x4d6   :  { %3468 = vmatpush3.bf16.xpose.msra.mxu0 %v947_v15  ;;  %v916_v16 = vpop.permute.xlu0 %915 }
 0x4d7   :  { %3707 = vmatprep.subr.msk.bf16.mxu0 %vm743_vm7, %v916_v16  ;;  %v944_v17 = vsel %vm743_vm7, %v916_v16, 0 }
 0x4de   :  { %3470 = vmatpush3.bf16.xpose.msra.mxu0 %v944_v17 }
 0x4e5   :  { %3472 = vmatmul.mubr.msk.bf16.vlgmr.msra.gmra.mxu0 %vm743_vm7, %v904_v62 }
 0x4e6   :  { %3475 = vmatprep.mubr.msk.bf16.mxu0 %vm743_vm7, %v905_v8 }
 0x4ed   :  { %3476 = vmatmul.mubr.msk.bf16.gmra.mxu0 %vm743_vm7, %v906_v2 }
 0x4ee   :  { %3479 = vmatprep.mubr.msk.bf16.mxu0 %vm743_vm7, %v907_v10  ;;  %v731_v10 = vld [vmem:[%s5065_s13 + $0x50] sm:$0xff] }
 0x4f5   :  { %3480 = vmatmul.mubr.msk.bf16.gmra.mxu0 %vm743_vm7, %v908_v4  ;;  %v726_v4 = vld [vmem:[%s5065_s13 + $0x28] sm:$0xff] }
 0x4f6   :  { %3483 = vmatprep.mubr.msk.bf16.mxu0 %vm743_vm7, %v909_v13  ;;  %v728_v13 = vld [vmem:[%s5065_s13 + $0x38] sm:$0xff] }
 0x4fd   :  { %3484 = vmatmul.mubr.msk.bf16.gmra.mxu0 %vm743_vm7, %v910_v9 }
 0x5a5   :  { %v3473_v18 = vpop.f32.mrf.mxu0 }
 0x5a6   :  { %v1048_v20 = vmul.f32 0.35355338, %v3473_v18  ;;  %v729_v18 = vld [vmem:[%s5065_s13 + $0x40] sm:$0xff] }
 0x5a7   :  { %v983_v23 = vpop.f32.mrf.mxu0 }
 0x5a8   :  { %v1046_v25 = vmul.f32 0.35355338, %v983_v23  ;;  %v4367_v26 = vadd.f32 %v1048_v20, %v723_v19 }
 0x5a9   :  { %v3474_v28 = vpop.f32.mrf.mxu0 }
 0x5aa   :  { %v1084_v31 = vsel %vm743_vm7, %v4367_v26, -inf  ;;  %v4371_v36 = vadd.f32 %v1046_v25, %v721_v24  ;;  %v1049_v41 = vmul.f32 0.35355338, %v3474_v28 }
 0x5ab   :  { %1085 = vmax.xlane.f32.xlu1 %v1084_v31  ;;  %v986_v39 = vpop.f32.mrf.mxu0 }
 0x5ac   :  { %v1047_v45 = vmul.f32 0.35355338, %v986_v39  ;;  %v1078_v52 = vsel %vm743_vm7, %v4371_v36, -inf  ;;  %v4385_v62 = vadd.f32 %v1049_v41, %v724_v50  ;;  %v735_v50 = vld [vmem:[%s5065_s13 + $0x70] sm:$0xff] }
 0x5ad   :  { %v3477_v47 = vpop.f32.mrf.mxu0 }
 0x5ae   :  { %v1052_v51 = vmul.f32 0.35355338, %v3477_v47  ;;  %v4378_v53 = vadd.f32 %v1047_v45, %v722_v40  ;;  %v1087_v8 = vsel %vm743_vm7, %v4385_v62, -inf  ;;  %v730_v40 = vld [vmem:[%s5065_s13 + $0x48] sm:$0xff] }
 0x5af   :  { %1079 = vmax.xlane.f32.xlu1 %v1078_v52  ;;  %v999_v55 = vpop.f32.mrf.mxu0 }
 0x5b0   :  { %v1050_v59 = vmul.f32 0.35355338, %v999_v55  ;;  %v1081_v60 = vsel %vm743_vm7, %v4378_v53, -inf  ;;  %v4383_v61 = vadd.f32 %v1052_v51, %v727_v49  ;;  %v732_v51 = vld [vmem:[%s5065_s13 + $0x58] sm:$0xff] }
 0x5b1   :  { %1082 = vmax.xlane.f32.xlu0 %v1081_v60  ;;  %v3478_v0 = vpop.f32.mrf.mxu0  ;;  %v733_v60 = vld [vmem:[%s5065_s13 + $0x60] sm:$0xff] }
 0x5b2   :  { %v1096_v1 = vsel %vm743_vm7, %v4383_v61, -inf  ;;  %v4389_v2 = vadd.f32 %v1050_v59, %v725_v58  ;;  %v1053_v5 = vmul.f32 0.35355338, %v3478_v0 }
 0x5b3   :  { %1097 = vmax.xlane.f32.xlu1 %v1096_v1  ;;  %v1002_v3 = vpop.f32.mrf.mxu0 }
 0x5b4   :  { %v1051_v6 = vmul.f32 0.35355338, %v1002_v3  ;;  %v1090_v15 = vsel %vm743_vm7, %v4389_v2, -inf  ;;  %v4405_v24 = vadd.f32 %v1053_v5, %v728_v13 }
 0x5b5   :  { %1088 = vmax.xlane.f32.xlu0 %v1087_v8  ;;  %v3481_v9 = vpop.f32.mrf.mxu0 }
 0x5b6   :  { %v1056_v14 = vmul.f32 0.35355338, %v3481_v9  ;;  %v4398_v16 = vadd.f32 %v1051_v6, %v726_v4  ;;  %v1099_v47 = vsel %vm743_vm7, %v4405_v24, -inf }
 0x5b7   :  { %1091 = vmax.xlane.f32.xlu1 %v1090_v15  ;;  %v1015_v17 = vpop.f32.mrf.mxu0 }
 0x5b8   :  { %v1054_v19 = vmul.f32 0.35355338, %v1015_v17  ;;  %v1093_v20 = vsel %vm743_vm7, %v4398_v16, -inf  ;;  %v4403_v23 = vadd.f32 %v1056_v14, %v731_v10  ;;  %v734_v10 = vld [vmem:[%s5065_s13 + $0x68] sm:$0xff]  ;;  %v736_v17 = vld [vmem:[%s5065_s13 + $0x78] sm:$0xff] }
 0x5b9   :  { %1094 = vmax.xlane.f32.xlu0 %v1093_v20  ;;  %v3482_v25 = vpop.f32.mrf.mxu0 }
 0x5ba   :  { %v1108_v28 = vsel %vm743_vm7, %v4403_v23, -inf  ;;  %v4409_v31 = vadd.f32 %v1054_v19, %v729_v18  ;;  %v1057_v41 = vmul.f32 0.35355338, %v3482_v25 }
 0x5bb   :  { %1109 = vmax.xlane.f32.xlu1 %v1108_v28  ;;  %v1018_v39 = vpop.f32.mrf.mxu0 }
 0x5bc   :  { %v1055_v45 = vmul.f32 0.35355338, %v1018_v39  ;;  %v1102_v55 = vsel %vm743_vm7, %v4409_v31, -inf  ;;  %v4425_v4 = vadd.f32 %v1057_v41, %v732_v51 }
 0x5bd   :  { %1100 = vmax.xlane.f32.xlu0 %v1099_v47  ;;  %v3485_v49 = vpop.f32.mrf.mxu0 }
 0x5be   :  { %v1060_v52 = vmul.f32 0.35355338, %v3485_v49  ;;  %v4418_v58 = vadd.f32 %v1055_v45, %v730_v40  ;;  %v1111_v15 = vsel %vm743_vm7, %v4425_v4, -inf }
 0x5bf   :  { %1103 = vmax.xlane.f32.xlu1 %v1102_v55  ;;  %v1031_v59 = vpop.f32.mrf.mxu0 }
 0x5c0   :  { %v1058_v0 = vmul.f32 0.35355338, %v1031_v59  ;;  %v1105_v1 = vsel %vm743_vm7, %v4418_v58, -inf  ;;  %v4423_v3 = vadd.f32 %v1060_v52, %v735_v50 }
 0x5c1   :  { %1106 = vmax.xlane.f32.xlu0 %v1105_v1  ;;  %v3486_v5 = vpop.f32.mrf.mxu0 }
 0x5c2   :  { %v1120_v6 = vsel %vm743_vm7, %v4423_v3, -inf  ;;  %v4429_v8 = vadd.f32 %v1058_v0, %v733_v60  ;;  %v1061_v13 = vmul.f32 0.35355338, %v3486_v5 }
 0x5c3   :  { %1121 = vmax.xlane.f32.xlu1 %v1120_v6  ;;  %v1034_v9 = vpop.f32.mrf.mxu0 }
 0x5c4   :  { %v1059_v14 = vmul.f32 0.35355338, %v1034_v9  ;;  %v1114_v18 = vsel %vm743_vm7, %v4429_v8, -inf  ;;  %v4441_v25 = vadd.f32 %v1061_v13, %v736_v17 }
 0x5c5   :  { %1112 = vmax.xlane.f32.xlu0 %v1111_v15 }
 0x5c6   :  { %v4437_v19 = vadd.f32 %v1059_v14, %v734_v10  ;;  %v1123_v28 = vsel %vm743_vm7, %v4441_v25, -inf }
 0x5c7   :  { %1115 = vmax.xlane.f32.xlu1 %v1114_v18 }
 0x5c8   :  { %v1117_v20 = vsel %vm743_vm7, %v4437_v19, -inf }
 0x5c9   :  { %1118 = vmax.xlane.f32.xlu0 %v1117_v20 }
 0x5cd   :  { %1124 = vmax.xlane.f32.xlu0 %v1123_v28 }
 0x5d8   :  { %1264 = vrot.lane.b32.xlu1 %v4330_v54, %s4030_s17 }
 0x634   :  { %v1086_v39 = vpop.xlane.xlu1 %1085 }
 0x635   :  { %v1128_v40 = vsub.f32 %v4367_v26, %v1086_v39 }
 0x637   :  { %v1146_v41 = vmul.f32 1.442695, %v1128_v40 }
 0x638   :  { %v1080_v45 = vpop.xlane.xlu1 %1079 }
 0x639   :  { %3766 = vpow2.f32 %v1146_v41  ;;  %v1126_v47 = vsub.f32 %v4371_v36, %v1080_v45 }
 0x63a   :  { %v1083_v49 = vpop.xlane.xlu0 %1082 }
 0x63b   :  { %v1142_v50 = vmul.f32 1.442695, %v1126_v47  ;;  %v1127_v51 = vsub.f32 %v4378_v53, %v1083_v49 }
 0x63c   :  { %v1098_v52 = vpop.xlane.xlu1 %1097 }
 0x63d   :  { %3768 = vpow2.f32 %v1142_v50  ;;  %v1132_v55 = vsub.f32 %v4383_v61, %v1098_v52  ;;  %v1144_v0 = vmul.f32 1.442695, %v1127_v51 }
 0x63e   :  { %v1089_v59 = vpop.xlane.xlu0 %1088 }
 0x63f   :  { %v1154_v60 = vmul.f32 1.442695, %v1132_v55  ;;  %v1129_v54 = vsub.f32 %v4385_v62, %v1089_v59 }
 0x640   :  { %v1092_v1 = vpop.xlane.xlu1 %1091 }
 0x641   :  { %3770 = vpow2.f32 %v1154_v60  ;;  %v1148_v26 = vmul.f32 1.442695, %v1129_v54  ;;  %v1130_v5 = vsub.f32 %v4389_v2, %v1092_v1 }
 0x642   :  { %v1095_v6 = vpop.xlane.xlu0 %1094 }
 0x643   :  { %3772 = vpow2.f32 %v1148_v26  ;;  %v1150_v36 = vmul.f32 1.442695, %v1130_v5  ;;  %v1131_v53 = vsub.f32 %v4398_v16, %v1095_v6 }
 0x644   :  { %3774 = vpow2.f32 %v1144_v0  ;;  %v1110_v9 = vpop.xlane.xlu1 %1109 }
 0x645   :  { %3776 = vpow2.f32 %v1150_v36  ;;  %v1136_v61 = vsub.f32 %v4403_v23, %v1110_v9  ;;  %v1152_v2 = vmul.f32 1.442695, %v1131_v53 }
 0x646   :  { %v4455_v10 = vpop.eup %3766  ;;  %v1101_v13 = vpop.xlane.xlu0 %1100 }
 0x647   :  { %v1162_v62 = vmul.f32 1.442695, %v1136_v61  ;;  %v1133_v14 = vsub.f32 %v4405_v24, %v1101_v13  ;;  %v1180_v15 = vsel %vm743_vm7, %v4455_v10, 0.0 }
 0x648   :  { %v1104_v17 = vpop.xlane.xlu1 %1103  ;;  %1181 = vadd.xlane.f32.xlu1 %v1180_v15 }
 0x649   :  { %3778 = vpow2.f32 %v1162_v62  ;;  %v1156_v18 = vmul.f32 1.442695, %v1133_v14  ;;  %v1134_v16 = vsub.f32 %v4409_v31, %v1104_v17 }
 0x64a   :  { %v4461_v20 = vpop.eup %3768  ;;  %v1107_v28 = vpop.xlane.xlu0 %1106 }
 0x64b   :  { %3780 = vpow2.f32 %v1156_v18  ;;  %v1158_v23 = vmul.f32 1.442695, %v1134_v16  ;;  %v1174_v39 = vsel %vm743_vm7, %v4461_v20, 0.0  ;;  %v1135_v40 = vsub.f32 %v4418_v58, %v1107_v28 }
 0x64c   :  { %3782 = vpow2.f32 %v1152_v2  ;;  %v1122_v24 = vpop.xlane.xlu1 %1121  ;;  %1175 = vadd.xlane.f32.xlu1 %v1174_v39 }
 0x64d   :  { %3784 = vpow2.f32 %v1158_v23  ;;  %v1160_v52 = vmul.f32 1.442695, %v1135_v40  ;;  %v1140_v55 = vsub.f32 %v4423_v3, %v1122_v24 }
 0x64e   :  { %v4466_v41 = vpop.eup %3770  ;;  %v1113_v45 = vpop.xlane.xlu0 %1112 }
 0x64f   :  { %v1137_v47 = vsub.f32 %v4425_v4, %v1113_v45  ;;  %v1192_v31 = vsel %vm743_vm7, %v4466_v41, 0.0  ;;  %v1170_v1 = vmul.f32 1.442695, %v1140_v55 }
 0x650   :  { %v4471_v49 = vpop.eup %3772  ;;  %1193 = vadd.xlane.f32.xlu1 %v1192_v31  ;;  %v1116_v50 = vpop.xlane.xlu1 %1115 }
 0x651   :  { %v4473_v51 = vpop.eup %3774  ;;  %v1164_v59 = vmul.f32 1.442695, %v1137_v47  ;;  %v1183_v58 = vsel %vm743_vm7, %v4471_v49, 0.0  ;;  %v1138_v26 = vsub.f32 %v4429_v8, %v1116_v50 }
 0x652   :  { %v4478_v60 = vpop.eup %3776  ;;  %1184 = vadd.xlane.f32.xlu0 %v1183_v58  ;;  %v1119_v54 = vpop.xlane.xlu0 %1118  ;;  %v1177_v3 = vsel %vm743_vm7, %v4473_v51, 0.0 }
 0x653   :  { %3786 = vpow2.f32 %v1164_v59  ;;  %v1186_v4 = vsel %vm743_vm7, %v4478_v60, 0.0  ;;  %v1166_v9 = vmul.f32 1.442695, %v1138_v26  ;;  %v1139_v8 = vsub.f32 %v4437_v19, %v1119_v54 }
 0x654   :  { %1187 = vadd.xlane.f32.xlu1 %v1186_v4  ;;  %v1265_v0 = vpop.permute.xlu1 %1264  ;;  %3788 = vpow2.f32 %v1160_v52 }
 0x655   :  { %3487 = vmatprep.subr.bf16.mxu1 %v1265_v0  ;;  %3790 = vpow2.f32 %v1170_v1  ;;  %v1168_v15 = vmul.f32 1.442695, %v1139_v8 }
 0x656   :  { %v4485_v5 = vpop.eup %3778  ;;  %3488 = vmatpush3.bf16.msra.mxu1 %v1265_v0  ;;  %1178 = vadd.xlane.f32.xlu0 %v1177_v3  ;;  %v1125_v62 = vpop.xlane.xlu0 %1124  ;;  %3792 = vpow2.f32 %v1166_v9 }
 0x657   :  { %v1204_v6 = vsel %vm743_vm7, %v4485_v5, 0.0  ;;  %v1141_v2 = vsub.f32 %v4441_v25, %v1125_v62  ;;  %3794 = vpow2.f32 %v1168_v15 }
 0x658   :  { %v4489_v36 = vpop.eup %3780  ;;  %1205 = vadd.xlane.f32.xlu1 %v1204_v6 }
 0x659   :  { %v4491_v53 = vpop.eup %3782  ;;  %v1195_v61 = vsel %vm743_vm7, %v4489_v36, 0.0  ;;  %v1172_v18 = vmul.f32 1.442695, %v1141_v2 }
 0x65a   :  { %v4496_v13 = vpop.eup %3784  ;;  %1196 = vadd.xlane.f32.xlu0 %v1195_v61  ;;  %v1189_v17 = vsel %vm743_vm7, %v4491_v53, 0.0 }
 0x65b   :  { %v1198_v14 = vsel %vm743_vm7, %v4496_v13, 0.0  ;;  %3796 = vpow2.f32 %v1172_v18 }
 0x65c   :  { %1199 = vadd.xlane.f32.xlu1 %v1198_v14 }
 0x65e   :  { %1190 = vadd.xlane.f32.xlu0 %v1189_v17 }
 0x660   :  { %v4503_v19 = vpop.eup %3786 }
 0x661   :  { %v1207_v16 = vsel %vm743_vm7, %v4503_v19, 0.0  ;;  %v4507_v28 = vpop.eup %3788 }
 0x662   :  { %1208 = vadd.xlane.f32.xlu0 %v1207_v16  ;;  %v1201_v23 = vsel %vm743_vm7, %v4507_v28, 0.0  ;;  %v4511_v39 = vpop.eup %3790 }
 0x663   :  { %v1216_v25 = vsel %vm743_vm7, %v4511_v39, 0.0  ;;  %v4515_v24 = vpop.eup %3792 }
 0x664   :  { %v1210_v40 = vsel %vm743_vm7, %v4515_v24, 0.0  ;;  %v4521_v45 = vpop.eup %3794 }
 0x665   :  { %v1213_v47 = vsel %vm743_vm7, %v4521_v45, 0.0 }
 0x666   :  { %1202 = vadd.xlane.f32.xlu0 %v1201_v23 }
 0x668   :  { %v4525_v31 = vpop.eup %3796 }
 0x669   :  { %v1219_v50 = vsel %vm743_vm7, %v4525_v31, 0.0 }
 0x66a   :  { %1217 = vadd.xlane.f32.xlu0 %v1216_v25 }
 0x66d   :  { %1262 = vrot.lane.b32.xlu1 %v4345_v63, %s4030_s17 }
 0x66e   :  { %1211 = vadd.xlane.f32.xlu0 %v1210_v40 }
 0x672   :  { %1214 = vadd.xlane.f32.xlu0 %v1213_v47 }
 0x676   :  { %1220 = vadd.xlane.f32.xlu0 %v1219_v50 }
 0x6d1   :  { %v1182_v52 = vpop.xlane.xlu1 %1181 }
 0x6d5   :  { %v1176_v55 = vpop.xlane.xlu1 %1175 }
 0x6d9   :  { %v1194_v59 = vpop.xlane.xlu1 %1193 }
 0x6db   :  { %v1185_v63 = vpop.xlane.xlu0 %1184 }
 0x6dc   :  { %3798 = vrcp.f32 %v1185_v63 }
 0x6dd   :  { %v1188_v58 = vpop.xlane.xlu1 %1187  ;;  %3800 = vrcp.f32 %v1176_v55 }
 0x6de   :  { %3802 = vrcp.f32 %v1182_v52 }
 0x6df   :  { %v1179_v4 = vpop.xlane.xlu0 %1178 }
 0x6e0   :  { %3804 = vrcp.f32 %v1179_v4 }
 0x6e1   :  { %v1206_v54 = vpop.xlane.xlu1 %1205 }
 0x6e3   :  { %v1197_v0 = vpop.xlane.xlu0 %1196 }
 0x6e4   :  { %3806 = vrcp.f32 %v1197_v0 }
 0x6e5   :  { %v1200_v1 = vpop.xlane.xlu1 %1199  ;;  %3808 = vrcp.f32 %v1188_v58 }
 0x6e6   :  { %3810 = vrcp.f32 %v1194_v59 }
 0x6e7   :  { %v1191_v26 = vpop.xlane.xlu0 %1190 }
 0x6e8   :  { %3812 = vrcp.f32 %v1191_v26 }
 0x6e9   :  { %v1263_v3 = vpop.permute.xlu1 %1262  ;;  %v3799_v6 = vpop.eup %3798 }
 0x6ea   :  { %3489 = vmatprep.subr.bf16.mxu1 %v1263_v3  ;;  %v3801_v9 = vpop.eup %3800  ;;  %v1241_v14 = vmul.f32 %v3799_v6, %v4471_v49 }
 0x6eb   :  { %3490 = vmatpush3.bf16.msra.mxu1 %v1263_v3  ;;  %v1209_v8 = vpop.xlane.xlu0 %1208  ;;  %v3803_v61 = vpop.eup %3802  ;;  %v1238_v15 = vmul.f32 %v3801_v9, %v4461_v20 }
 0x6ec   :  { %3814 = vrcp.f32 %v1209_v8  ;;  %v1240_v18 = vmul.f32 %v3803_v61, %v4455_v10 }
 0x6ed   :  { %v3805_v62 = vpop.eup %3804  ;;  %3816 = vrcp.f32 %v1200_v1 }
 0x6ee   :  { %v1239_v2 = vmul.f32 %v3805_v62, %v4473_v51  ;;  %3818 = vrcp.f32 %v1206_v54  ;;  %v1255_v23 = vpack.c.bf16 %v1241_v14, %v1240_v18  ;;  %v1493_v18 = vld [vmem:[%s5067_s25 + $0x18] sm:$0xff] }
 0x6ef   :  { %v1203_v17 = vpop.xlane.xlu0 %1202 }
 0x6f0   :  { %3820 = vrcp.f32 %v1203_v17  ;;  %v1254_v16 = vpack.c.bf16 %v1239_v2, %v1238_v15  ;;  %v737_v2 = vld [vmem:[%s5066_s21] sm:$0xff]  ;;  %v1492_v17 = vld [vmem:[%s5067_s25 + $0x10] sm:$0xff] }
 0x6f1   :  { %v3807_v25 = vpop.eup %3806 }
 0x6f2   :  { %3491 = vmatprep.mubr.msk.bf16.mxu1 %vm743_vm7, %v1254_v16  ;;  %v3809_v40 = vpop.eup %3808  ;;  %v1245_v20 = vmul.f32 %v3807_v25, %v4489_v36  ;;  %v1497_v16 = vpack.c.bf16 %v1493_v18, %v1492_v17 }
 0x6f3   :  { %3492 = vmatmul.mubr.msk.bf16.vlgmr.msra.gmra.mxu1 %vm743_vm7, %v1255_v23  ;;  %v1218_v47 = vpop.xlane.xlu0 %1217  ;;  %v3811_v49 = vpop.eup %3810  ;;  %v1242_v51 = vmul.f32 %v3809_v40, %v4478_v60  ;;  %v1491_v23 = vld [vmem:[%s5067_s25 + $0x8] sm:$0xff] }
 0x6f4   :  { %v1244_v10 = vmul.f32 %v3811_v49, %v4466_v41  ;;  %3545 = vmatprep.subr.bf16.mxu0 %v1497_v16 }
 0x6f5   :  { %v3813_v50 = vpop.eup %3812  ;;  %3546 = vmatpush3.bf16.msra.mxu0 %v1497_v16 }
 0x6f6   :  { %v1243_v52 = vmul.f32 %v3813_v50, %v4491_v53  ;;  %v1257_v63 = vpack.c.bf16 %v1245_v20, %v1244_v10 }
 0x6f7   :  { %v1212_v55 = vpop.xlane.xlu0 %1211 }
 0x6f8   :  { %v1256_v59 = vpack.c.bf16 %v1243_v52, %v1242_v51  ;;  %3822 = vrcp.f32 %v1212_v55 }
 0x6f9   :  { %v3815_v58 = vpop.eup %3814 }
 0x6fa   :  { %3495 = vmatprep.mubr.msk.bf16.mxu1 %vm743_vm7, %v1256_v59  ;;  %v3817_v4 = vpop.eup %3816  ;;  %v1249_v60 = vmul.f32 %v3815_v58, %v4503_v19 }
 0x6fb   :  { %3496 = vmatmul.mubr.msk.bf16.gmra.mxu1 %vm743_vm7, %v1257_v63  ;;  %v1215_v54 = vpop.xlane.xlu0 %1214  ;;  %v3819_v0 = vpop.eup %3818  ;;  %v1246_v53 = vmul.f32 %v3817_v4, %v4496_v13 }
 0x6fc   :  { %3824 = vrcp.f32 %v1215_v54  ;;  %v1248_v26 = vmul.f32 %v3819_v0, %v4485_v5 }
 0x6fd   :  { %v3821_v36 = vpop.eup %3820  ;;  %3826 = vrcp.f32 %v1218_v47 }
 0x6fe   :  { %v1247_v41 = vmul.f32 %v3821_v36, %v4507_v28  ;;  %v1259_v6 = vpack.c.bf16 %v1249_v60, %v1248_v26 }
 0x6ff   :  { %v1221_v1 = vpop.xlane.xlu0 %1220 }
 0x700   :  { %3828 = vrcp.f32 %v1221_v1  ;;  %v1258_v3 = vpack.c.bf16 %v1247_v41, %v1246_v53 }
 0x702   :  { %3499 = vmatprep.mubr.msk.bf16.mxu1 %vm743_vm7, %v1258_v3 }
 0x703   :  { %3500 = vmatmul.mubr.msk.bf16.gmra.mxu1 %vm743_vm7, %v1259_v6 }
 0x705   :  { %v3823_v9 = vpop.eup %3822 }
 0x706   :  { %v1250_v13 = vmul.f32 %v3823_v9, %v4515_v24  ;;  %v1490_v24 = vld [vmem:[%s5067_s25] sm:$0xff] }
 0x709   :  { %v3825_v19 = vpop.eup %3824 }
 0x70a   :  { %v1251_v28 = vmul.f32 %v3825_v19, %v4521_v45  ;;  %v3827_v8 = vpop.eup %3826  ;;  %v1496_v45 = vpack.c.bf16 %v1491_v23, %v1490_v24 }
 0x70b   :  { %v1252_v62 = vmul.f32 %v3827_v8, %v4511_v39 }
 0x70c   :  { %v1260_v5 = vpack.c.bf16 %v1251_v28, %v1250_v13  ;;  %3547 = vmatprep.subr.bf16.mxu0 %v1496_v45  ;;  %v3173_v28 = vld [vmem:[%s5068_s29] ss:$0 sm:$0xff] }
 0x70d   :  { %v3829_v61 = vpop.eup %3828  ;;  %3548 = vmatpush3.bf16.msra.mxu0 %v1496_v45 }
 0x70e   :  { %3503 = vmatprep.mubr.msk.bf16.mxu1 %vm743_vm7, %v1260_v5  ;;  %v1253_v14 = vmul.f32 %v3829_v61, %v4525_v31 }
 0x710   :  { %v1261_v15 = vpack.c.bf16 %v1253_v14, %v1252_v62 }
 0x712   :  { %3504 = vmatmul.mubr.msk.bf16.gmra.mxu1 %vm743_vm7, %v1261_v15 }
 0x713   :  { %3539 = vmatprep.mubr.f32.mxu1 %v737_v2 }
 0x7b3   :  { %v3493_v25 = vpop.f32.mrf.mxu1 }
 0x7b5   :  { %v1326_v40 = vpop.f32.mrf.mxu1 }
 0x7b7   :  { %v3494_v39 = vpop.f32.mrf.mxu1 }
 0x7b9   :  { %v1329_v47 = vpop.f32.mrf.mxu1 }
 0x7bb   :  { %v3497_v31 = vpop.f32.mrf.mxu1 }
 0x7bd   :  { %v1342_v49 = vpop.f32.mrf.mxu1 }
 0x7bf   :  { %v3498_v50 = vpop.f32.mrf.mxu1 }
 0x7c1   :  { %v1345_v20 = vpop.f32.mrf.mxu1 }
 0x7c3   :  { %v3501_v51 = vpop.f32.mrf.mxu1 }
 0x7c4   :  { %v1399_v41 = vmul.f32 %v3501_v51, %v4288_v30  ;;  %v1394_v30 = vmul.f32 %v1345_v20, %v4324_v48  ;;  %v1389_v48 = vmul.f32 %v1326_v40, %v4291_v32 }
 0x7c5   :  { %v1358_v52 = vpop.f32.mrf.mxu1 }
 0x7c7   :  { %v3502_v55 = vpop.f32.mrf.mxu1 }
 0x7c8   :  { %v1400_v53 = vmul.f32 %v3502_v55, %v4311_v42  ;;  %v1395_v42 = vmul.f32 %v3497_v31, %v4285_v29  ;;  %v1390_v29 = vmul.f32 %v1329_v47, %v4320_v46 }
 0x7c9   :  { %v1361_v10 = vpop.f32.mrf.mxu1 }
 0x7d2   :  { %v3505_v59 = vpop.f32.mrf.mxu1 }
 0x7d3   :  { %v1403_v0 = vmul.f32 %v3505_v59, %v4297_v34  ;;  %v1398_v34 = vmul.f32 %v1361_v10, %v4334_v56  ;;  %v1393_v56 = vmul.f32 %v1342_v49, %v4294_v33  ;;  %v738_v33 = vld [vmem:[%s5066_s21 + $0x8] sm:$0xff] }
 0x7d4   :  { %v1374_v63 = vpop.f32.mrf.mxu1 }
 0x7d5   :  { %v1401_v60 = vmul.f32 %v1374_v63, %v4314_v43  ;;  %v1396_v43 = vmul.f32 %v3498_v50, %v4303_v37  ;;  %v1391_v37 = vmul.f32 %v3493_v25, %v4282_v27 }
 0x7d6   :  { %v3506_v58 = vpop.f32.mrf.mxu1 }
 0x7d7   :  { %v1404_v4 = vmul.f32 %v3506_v58, %v4317_v44  ;;  %v1397_v44 = vmul.f32 %v1358_v52, %v4306_v38  ;;  %v1392_v38 = vmul.f32 %v3494_v39, %v4300_v35  ;;  %v740_v35 = vld [vmem:[%s5066_s21 + $0x18] sm:$0xff] }
 0x7d8   :  { %v1377_v54 = vpop.f32.mrf.mxu1 }
 0x7d9   :  { %3507 = vmatprep.subr.mxu1 %v1404_v4  ;;  %v1402_v36 = vmul.f32 %v1377_v54, %v4337_v57  ;;  %v739_v57 = vld [vmem:[%s5066_s21 + $0x10] sm:$0xff]  ;;  %v1645_v54 = vld [vmem:[%s5069_s24 + $0x18] sm:$0xff] }
 0x7da   :  { %3508 = vmatpush3.msra.mxu1 %v1404_v4  ;;  %v1644_v4 = vld [vmem:[%s5069_s24 + $0x10] sm:$0xff] }
 0x7db   :  { %3509 = vmatprep.subr.mxu1 %v1403_v0 }
 0x7dc   :  { %3510 = vmatpush3.msra.mxu1 %v1403_v0  ;;  %v1649_v0 = vpack.c.bf16 %v1645_v54, %v1644_v4 }
 0x7dd   :  { %3511 = vmatprep.subr.mxu1 %v1402_v36 }
 0x7de   :  { %3512 = vmatpush3.msra.mxu1 %v1402_v36  ;;  %v1642_v36 = vld [vmem:[%s5069_s24] sm:$0xff] }
 0x7df   :  { %3513 = vmatprep.subr.mxu1 %v1401_v60 }
 0x7e0   :  { %3514 = vmatpush3.msra.mxu1 %v1401_v60  ;;  %v1643_v60 = vld [vmem:[%s5069_s24 + $0x8] sm:$0xff] }
 0x7e1   :  { %3515 = vmatprep.subr.mxu1 %v1400_v53 }
 0x7e2   :  { %3516 = vmatpush3.msra.mxu1 %v1400_v53  ;;  %v1648_v53 = vpack.c.bf16 %v1643_v60, %v1642_v36 }
 0x7e3   :  { %3517 = vmatprep.subr.mxu1 %v1399_v41 }
 0x7e4   :  { %3518 = vmatpush3.msra.mxu1 %v1399_v41 }
 0x7e5   :  { %3519 = vmatprep.subr.mxu1 %v1398_v34 }
 0x7e6   :  { %3520 = vmatpush3.msra.mxu1 %v1398_v34 }
 0x7e7   :  { %3521 = vmatprep.subr.mxu1 %v1397_v44 }
 0x7e8   :  { %3522 = vmatpush3.msra.mxu1 %v1397_v44 }
 0x7e9   :  { %3523 = vmatprep.subr.mxu1 %v1396_v43 }
 0x7ea   :  { %3524 = vmatpush3.msra.mxu1 %v1396_v43 }
 0x7eb   :  { %3525 = vmatprep.subr.mxu1 %v1395_v42 }
 0x7ec   :  { %3526 = vmatpush3.msra.mxu1 %v1395_v42 }
 0x7ed   :  { %3527 = vmatprep.subr.mxu1 %v1394_v30 }
 0x7ee   :  { %3528 = vmatpush3.msra.mxu1 %v1394_v30 }
 0x7ef   :  { %3529 = vmatprep.subr.mxu1 %v1393_v56 }
 0x7f0   :  { %3530 = vmatpush3.msra.mxu1 %v1393_v56 }
 0x7f1   :  { %3531 = vmatprep.subr.mxu1 %v1392_v38 }
 0x7f2   :  { %3532 = vmatpush3.msra.mxu1 %v1392_v38 }
 0x7f3   :  { %3533 = vmatprep.subr.mxu1 %v1391_v37 }
 0x7f4   :  { %3534 = vmatpush3.msra.mxu1 %v1391_v37 }
 0x7f5   :  { %3535 = vmatprep.subr.mxu1 %v1390_v29 }
 0x7f6   :  { %3536 = vmatpush3.msra.mxu1 %v1390_v29 }
 0x7f7   :  { %3537 = vmatprep.subr.mxu1 %v1389_v48 }
 0x7f8   :  { %3538 = vmatpush3.msra.mxu1 %v1389_v48 }
 0x7f9   :  { %3540 = vmatmul.mubr.f32.vlgmr.msra.gmra.mxu1 %v738_v33  ;;  %3553 = vmatprep.subr.bf16.mxu1 %v1649_v0 }
 0x7fa   :  { %3542 = vmatprep.mubr.f32.mxu1 %v739_v57  ;;  %3554 = vmatpush3.bf16.msra.mxu1 %v1649_v0 }
 0x7fb   :  { %3555 = vmatprep.subr.bf16.mxu1 %v1648_v53 }
 0x7fd   :  { %3543 = vmatmul.mubr.f32.gmra.mxu1 %v740_v35 }
 0x7fe   :  { %3556 = vmatpush3.bf16.msra.mxu1 %v1648_v53 }
 0x8b9   :  { %v3541_v27 = vpop.f32.mrf.mxu1 }
 0x8bb   :  { %v1471_v1 = vpop.f32.mrf.mxu1 }
 0x8bc   :  { %v1494_v26 = vpack.c.bf16 %v3541_v27, %v1471_v1 }
 0x8bd   :  { %v3544_v3 = vpop.f32.mrf.mxu1 }
 0x8be   :  { %3549 = vmatprep.mubr.msk.bf16.mxu0 %vm743_vm7, %v1494_v26  ;;  %v3174_v26 = vld [vmem:[%s5070_s30] ss:$0 sm:$0xff] }
 0x8bf   :  { %v1481_v46 = vpop.f32.mrf.mxu1 }
 0x8c0   :  { %v1495_v6 = vpack.c.bf16 %v3544_v3, %v1481_v46 }
 0x8c2   :  { %3550 = vmatmul.mubr.msk.bf16.vlgmr.msra.gmra.mxu0 %vm743_vm7, %v1495_v6 }
 0x982   :  { %v3551_v32 = vpop.f32.mrf.mxu0 }
 0x983   :  { %v1555_v19 = vadd.f32 %v3551_v32, %v4256_v21 }
 0x984   :  { %v1538_v9 = vpop.f32.mrf.mxu0 }
 0x985   :  { %v1553_v13 = vadd.f32 %v1538_v9, %v4248_v12  ;;  %v4584_v62 = vadd.f32 %v3173_v28, %v1555_v19  ;;  %v3175_v19 = vld [vmem:[%s5071_s6] ss:$0 sm:$0xff] }
 0x986   :  { %v3552_v8 = vpop.f32.mrf.mxu0 }
 0x987   :  { %v4582_v5 = vadd.f32 %v3173_v28, %v1553_v13  ;;  %v1556_v14 = vadd.f32 %v3552_v8, %v4258_v22  ;;  %v1576_v12 = vsel %vm743_vm7, %v4584_v62, 0.0 }
 0x988   :  { %v1541_v61 = vpop.f32.mrf.mxu0 }
 0x989   :  { %v1554_v15 = vadd.f32 %v1541_v61, %v4246_v7  ;;  %v1570_v2 = vsel %vm743_vm7, %v4582_v5, 0.0  ;;  %v4592_v21 = vadd.f32 %v3173_v28, %v1556_v14 }
 0x98a   :  { %1571 = vadd.xlane.f32.xlu0 %v1570_v2 }
 0x98b   :  { %v4590_v17 = vadd.f32 %v3173_v28, %v1554_v15  ;;  %v1579_v22 = vsel %vm743_vm7, %v4592_v21, 0.0 }
 0x98d   :  { %v1573_v18 = vsel %vm743_vm7, %v4590_v17, 0.0 }
 0x98e   :  { %1577 = vadd.xlane.f32.xlu0 %v1576_v12  ;;  %1574 = vadd.xlane.f32.xlu1 %v1573_v18 }
 0x992   :  { %1580 = vadd.xlane.f32.xlu0 %v1579_v22  ;;  %v1738_v22 = vld [vmem:[%s5072_s12 + $0x30] sm:$0xff] }
 0xa13   :  { %v1572_v7 = vpop.xlane.xlu0 %1571 }
 0xa14   :  { %v1582_v24 = vmul.f32 0.03125, %v1572_v7  ;;  %v1739_v7 = vld [vmem:[%s5072_s12 + $0x38] sm:$0xff] }
 0xa16   :  { %v1586_v25 = vsub.f32 %v4582_v5, %v1582_v24  ;;  %v1745_v24 = vpack.c.bf16 %v1739_v7, %v1738_v22 }
 0xa17   :  { %v1578_v16 = vpop.xlane.xlu0 %1577  ;;  %v1575_v23 = vpop.xlane.xlu1 %1574 }
 0xa18   :  { %v1584_v45 = vmul.f32 0.03125, %v1578_v16  ;;  %v1583_v39 = vmul.f32 0.03125, %v1575_v23  ;;  %v1590_v51 = vmul.f32 %v1586_v25, %v1586_v25  ;;  %3561 = vmatprep.subr.bf16.mxu0 %v1745_v24  ;;  %v1736_v16 = vld [vmem:[%s5072_s12 + $0x20] sm:$0xff]  ;;  %v1737_v23 = vld [vmem:[%s5072_s12 + $0x28] sm:$0xff] }
 0xa19   :  { %3562 = vmatpush3.bf16.msra.mxu0 %v1745_v24 }
 0xa1a   :  { %v1588_v40 = vsub.f32 %v4584_v62, %v1584_v45  ;;  %v1587_v49 = vsub.f32 %v4590_v17, %v1583_v39  ;;  %v1594_v55 = vsel %vm743_vm7, %v1590_v51, 0.0  ;;  %v1744_v45 = vpack.c.bf16 %v1737_v23, %v1736_v16 }
 0xa1b   :  { %v1581_v47 = vpop.xlane.xlu0 %1580 }
 0xa1c   :  { %v1592_v31 = vmul.f32 %v1588_v40, %v1588_v40  ;;  %v1585_v50 = vmul.f32 0.03125, %v1581_v47  ;;  %v1591_v10 = vmul.f32 %v1587_v49, %v1587_v49  ;;  %3563 = vmatprep.subr.bf16.mxu0 %v1744_v45  ;;  %v1732_v47 = vld [vmem:[%s5072_s12] sm:$0xff] }
 0xa1d   :  { %3564 = vmatpush3.bf16.msra.mxu0 %v1744_v45 }
 0xa1e   :  { %v1600_v20 = vsel %vm743_vm7, %v1592_v31, 0.0  ;;  %v1589_v52 = vsub.f32 %v4592_v21, %v1585_v50  ;;  %v1597_v59 = vsel %vm743_vm7, %v1591_v10, 0.0  ;;  %v1733_v31 = vld [vmem:[%s5072_s12 + $0x8] sm:$0xff]  ;;  %v3176_v50 = vld [vmem:[%s5073_s15] ss:$0 sm:$0xff] }
 0xa1f   :  { %1601 = vadd.xlane.f32.xlu0 %v1600_v20 }
 0xa20   :  { %v1593_v63 = vmul.f32 %v1589_v52, %v1589_v52 }
 0xa22   :  { %v1603_v58 = vsel %vm743_vm7, %v1593_v63, 0.0 }
 0xa23   :  { %1595 = vadd.xlane.f32.xlu0 %v1594_v55 }
 0xa27   :  { %1598 = vadd.xlane.f32.xlu0 %v1597_v59 }
 0xa2b   :  { %1604 = vadd.xlane.f32.xlu0 %v1603_v58 }
 0xaa8   :  { %v1602_v41 = vpop.xlane.xlu0 %1601 }
 0xaa9   :  { %v1608_v34 = vmul.f32 0.03125, %v1602_v41 }
 0xaab   :  { %v1612_v42 = vadd.f32 1e-05, %v1608_v34 }
 0xaac   :  { %v1596_v44 = vpop.xlane.xlu0 %1595 }
 0xaad   :  { %v1606_v43 = vmul.f32 0.03125, %v1596_v44 }
 0xaaf   :  { %v1610_v30 = vadd.f32 1e-05, %v1606_v43 }
 0xab0   :  { %v1599_v56 = vpop.xlane.xlu0 %1598 }
 0xab1   :  { %3830 = vrsqrt.f32 %v1610_v30  ;;  %v1607_v38 = vmul.f32 0.03125, %v1599_v56 }
 0xab2   :  { %3832 = vrsqrt.f32 %v1612_v42 }
 0xab3   :  { %v1611_v37 = vadd.f32 1e-05, %v1607_v38 }
 0xab4   :  { %v1605_v29 = vpop.xlane.xlu0 %1604 }
 0xab5   :  { %3834 = vrsqrt.f32 %v1611_v37  ;;  %v1609_v48 = vmul.f32 0.03125, %v1605_v29 }
 0xab7   :  { %v1613_v33 = vadd.f32 1e-05, %v1609_v48 }
 0xab9   :  { %3836 = vrsqrt.f32 %v1613_v33 }
 0xabe   :  { %v3831_v57 = vpop.eup %3830 }
 0xabf   :  { %v1618_v35 = vmul.f32 %v3831_v57, %v1586_v25  ;;  %v3833_v27 = vpop.eup %3832  ;;  %v1734_v25 = vld [vmem:[%s5072_s12 + $0x10] sm:$0xff] }
 0xac0   :  { %v1620_v3 = vmul.f32 %v3833_v27, %v1588_v40  ;;  %v1735_v40 = vld [vmem:[%s5072_s12 + $0x18] sm:$0xff] }
 0xac1   :  { %v1628_v6 = vmul.f32 %v3174_v26, %v1618_v35  ;;  %v1743_v39 = vpack.c.bf16 %v1735_v40, %v1734_v25 }
 0xac2   :  { %v3835_v1 = vpop.eup %3834  ;;  %v1630_v28 = vmul.f32 %v3174_v26, %v1620_v3 }
 0xac3   :  { %v1619_v46 = vmul.f32 %v3835_v1, %v1587_v49  ;;  %v1638_v8 = vadd.f32 %v3175_v19, %v1628_v6  ;;  %3565 = vmatprep.subr.bf16.mxu0 %v1743_v39  ;;  %v1742_v49 = vpack.c.bf16 %v1733_v31, %v1732_v47  ;;  %v3181_v6 = vld [vmem:[%s5074_s16] ss:$0 sm:$0xff] }
 0xac4   :  { %v1640_v2 = vadd.f32 %v3175_v19, %v1630_v28  ;;  %3566 = vmatpush3.bf16.msra.mxu0 %v1743_v39 }
 0xac5   :  { %v1629_v32 = vmul.f32 %v3174_v26, %v1619_v46  ;;  %3567 = vmatprep.subr.bf16.mxu0 %v1742_v49 }
 0xac6   :  { %v3837_v9 = vpop.eup %3836 }
 0xac7   :  { %v1621_v13 = vmul.f32 %v3837_v9, %v1589_v52  ;;  %v1639_v61 = vadd.f32 %v3175_v19, %v1629_v32 }
 0xac8   :  { %3568 = vmatpush3.bf16.msra.mxu0 %v1742_v49 }
 0xac9   :  { %v1631_v14 = vmul.f32 %v3174_v26, %v1621_v13  ;;  %v1646_v15 = vpack.c.bf16 %v1639_v61, %v1638_v8 }
 0xacb   :  { %v1641_v12 = vadd.f32 %v3175_v19, %v1631_v14  ;;  %3557 = vmatprep.mubr.msk.bf16.mxu1 %vm743_vm7, %v1646_v15 }
 0xacd   :  { %v1647_v18 = vpack.c.bf16 %v1641_v12, %v1640_v2 }
 0xacf   :  { %3558 = vmatmul.mubr.msk.bf16.vlgmr.msra.gmra.mxu1 %vm743_vm7, %v1647_v18 }
 0xb8f   :  { %v3559_v20 = vpop.f32.mrf.mxu1 }
 0xb90   :  { %v1706_v51 = vadd.f32 %v3559_v20, %v3176_v50 }
 0xb91   :  { %v1697_v52 = vpop.f32.mrf.mxu1 }
 0xb92   :  { %v1698_v55 = vadd.f32 %v3176_v50, %v1697_v52  ;;  %v1718_v10 = vmul.f32 0.70710677, %v1706_v51  ;;  %v1714_v29 = vmul.f32 0.5, %v1706_v51 }
 0xb93   :  { %v3560_v59 = vpop.f32.mrf.mxu1 }
 0xb94   :  { %v1716_v63 = vmul.f32 0.70710677, %v1698_v55  ;;  %v1709_v58 = vadd.f32 %v3560_v59, %v3176_v50  ;;  %v1712_v56 = vmul.f32 0.5, %v1698_v55  ;;  %v3189_v59 = vld [vmem:[%s4127_s4 + $0x38] sm:$0xff] }
 0xb95   :  { %v1700_v4 = vpop.f32.mrf.mxu1 }
 0xb96   :  { %3838 = verf.f32 %v1716_v63  ;;  %v1719_v54 = vmul.f32 0.70710677, %v1709_v58  ;;  %v1701_v0 = vadd.f32 %v3176_v50, %v1700_v4  ;;  %v1715_v30 = vmul.f32 0.5, %v1709_v58  ;;  %v3186_v58 = vld [vmem:[%s4127_s4 + $0x20] sm:$0xff]  ;;  %v3187_v4 = vld [vmem:[%s4127_s4 + $0x28] sm:$0xff] }
 0xb97   :  { %3840 = verf.f32 %v1718_v10  ;;  %v3188_v10 = vld [vmem:[%s4127_s4 + $0x30] sm:$0xff] }
 0xb98   :  { %3842 = verf.f32 %v1719_v54  ;;  %v1717_v36 = vmul.f32 0.70710677, %v1701_v0  ;;  %v1713_v38 = vmul.f32 0.5, %v1701_v0  ;;  %v1901_v63 = vpack.c.bf16 %v3189_v59, %v3188_v10 }
 0xb99   :  { %v1900_v54 = vpack.c.bf16 %v3187_v4, %v3186_v58  ;;  %v4696_v58 = vld [vmem:[%s5064_s5 + $0x38] sm:$0xff] }
 0xb9a   :  { %3844 = verf.f32 %v1717_v36  ;;  %3573 = vmatprep.subr.bf16.mxu1 %v1901_v63 }
 0xb9b   :  { %3574 = vmatpush3.bf16.msra.mxu1 %v1901_v63 }
 0xb9c   :  { %3575 = vmatprep.subr.bf16.mxu1 %v1900_v54 }
 0xb9f   :  { %3576 = vmatpush3.bf16.msra.mxu1 %v1900_v54  ;;  %v4700_v54 = vld [vmem:[%s5064_s5 + $0x40] sm:$0xff] }
 0xba3   :  { %v3839_v60 = vpop.eup %3838 }
 0xba4   :  { %v3841_v53 = vpop.eup %3840  ;;  %v1724_v34 = vadd.f32 1.0, %v3839_v60 }
 0xba5   :  { %v3843_v41 = vpop.eup %3842  ;;  %v1726_v42 = vadd.f32 1.0, %v3841_v53 }
 0xba6   :  { %v1727_v44 = vadd.f32 1.0, %v3843_v41  ;;  %v1728_v33 = vmul.f32 %v1724_v34, %v1712_v56 }
 0xba7   :  { %v3845_v43 = vpop.eup %3844  ;;  %v1730_v35 = vmul.f32 %v1726_v42, %v1714_v29 }
 0xba8   :  { %v1725_v37 = vadd.f32 1.0, %v3845_v43  ;;  %v1731_v48 = vmul.f32 %v1727_v44, %v1715_v30 }
 0xbaa   :  { %v1729_v57 = vmul.f32 %v1725_v37, %v1713_v38  ;;  %v1741_v1 = vpack.c.bf16 %v1731_v48, %v1730_v35  ;;  %v3184_v48 = vld [vmem:[%s4117_s20 + $0x1] ss:$0 sm:$0xff]  ;;  %s5075_s20 = sld [smem:[#allocation8_spill]] }
 0xbac   :  { %v1740_v27 = vpack.c.bf16 %v1729_v57, %v1728_v33 }
 0xbae   :  { %3569 = vmatprep.mubr.msk.bf16.mxu0 %vm1746_vm8, %v1740_v27  ;;  %v3185_v27 = vld [vmem:[%s4122_s27 + $0x1] ss:$0 sm:$0xff] }
 0xbaf   :  { %3570 = vmatmul.mubr.msk.bf16.vlgmr.msra.gmra.mxu0 %vm1746_vm8, %v1741_v1 }
 0xc6f   :  { %v3571_v26 = vpop.f32.mrf.mxu0 }
 0xc70   :  { %v1804_v28 = vadd.f32 %v3571_v26, %v4584_v62 }
 0xc71   :  { %v1787_v3 = vpop.f32.mrf.mxu0 }
 0xc72   :  { %v1802_v46 = vadd.f32 %v1787_v3, %v4582_v5  ;;  %v4642_v2 = vadd.f32 %v3181_v6, %v1804_v28 }
 0xc73   :  { %v3572_v32 = vpop.f32.mrf.mxu0 }
 0xc74   :  { %v4629_v9 = vadd.f32 %v3181_v6, %v1802_v46  ;;  %v1805_v19 = vadd.f32 %v3572_v32, %v4592_v21  ;;  %v1827_v62 = vsel %vm743_vm7, %v4642_v2, 0.0 }
 0xc75   :  { %v1790_v13 = vpop.f32.mrf.mxu0 }
 0xc76   :  { %v4633_v8 = vadd.f32 %v3181_v6, %v1805_v19  ;;  %v1803_v61 = vadd.f32 %v1790_v13, %v4590_v17  ;;  %v1821_v14 = vsel %vm743_vm7, %v4629_v9, 0.0 }
 0xc77   :  { %1822 = vadd.xlane.f32.xlu0 %v1821_v14 }
 0xc78   :  { %v4638_v15 = vadd.f32 %v3181_v6, %v1803_v61  ;;  %v1830_v5 = vsel %vm743_vm7, %v4633_v8, 0.0 }
 0xc79   :  { %1831 = vadd.xlane.f32.xlu1 %v1830_v5 }
 0xc7a   :  { %v1824_v21 = vsel %vm743_vm7, %v4638_v15, 0.0 }
 0xc7b   :  { %1825 = vadd.xlane.f32.xlu0 %v1824_v21 }
 0xc7f   :  { %1828 = vadd.xlane.f32.xlu0 %v1827_v62  ;;  %v3191_v62 = vld [vmem:[%s5063_s0 + $0x1] ss:$0 sm:$0xff] }
 0xd00   :  { %v1823_v17 = vpop.xlane.xlu0 %1822 }
 0xd01   :  { %v1833_v12 = vmul.f32 0.03125, %v1823_v17 }
 0xd02   :  { %v1832_v18 = vpop.xlane.xlu1 %1831 }
 0xd03   :  { %v1837_v22 = vsub.f32 %v4629_v9, %v1833_v12  ;;  %v1836_v7 = vmul.f32 0.03125, %v1832_v18 }
 0xd04   :  { %v1826_v24 = vpop.xlane.xlu0 %1825 }
 0xd05   :  { %v1834_v16 = vmul.f32 0.03125, %v1826_v24  ;;  %v1841_v23 = vmul.f32 %v1837_v22, %v1837_v22  ;;  %v1840_v45 = vsub.f32 %v4633_v8, %v1836_v7  ;;  %v4666_v24 = vld [vmem:[%s5064_s5 + $0x10] sm:$0xff] }
 0xd07   :  { %v1838_v25 = vsub.f32 %v4638_v15, %v1834_v16  ;;  %v1845_v40 = vsel %vm743_vm7, %v1841_v23, 0.0  ;;  %v1844_v20 = vmul.f32 %v1840_v45, %v1840_v45 }
 0xd08   :  { %1846 = vadd.xlane.f32.xlu0 %v1845_v40  ;;  %v1829_v39 = vpop.xlane.xlu0 %1828 }
 0xd09   :  { %v1835_v47 = vmul.f32 0.03125, %v1829_v39  ;;  %v1842_v31 = vmul.f32 %v1838_v25, %v1838_v25  ;;  %v1854_v52 = vsel %vm743_vm7, %v1844_v20, 0.0  ;;  %v4674_v39 = vld [vmem:[%s5064_s5] sm:$0xff] }
 0xd0b   :  { %v1839_v49 = vsub.f32 %v4642_v2, %v1835_v47  ;;  %v1848_v50 = vsel %vm743_vm7, %v1842_v31, 0.0  ;;  %v4678_v31 = vld [vmem:[%s5064_s5 + $0x20] sm:$0xff] }
 0xd0c   :  { %1849 = vadd.xlane.f32.xlu1 %v1848_v50  ;;  %v4682_v50 = vld [vmem:[%s5064_s5 + $0x50] sm:$0xff] }
 0xd0d   :  { %v1843_v51 = vmul.f32 %v1839_v49, %v1839_v49 }
 0xd0f   :  { %v1851_v55 = vsel %vm743_vm7, %v1843_v51, 0.0  ;;  %v4686_v51 = vld [vmem:[%s5064_s5 + $0x70] sm:$0xff] }
 0xd10   :  { %1855 = vadd.xlane.f32.xlu1 %v1854_v52  ;;  %1852 = vadd.xlane.f32.xlu0 %v1851_v55  ;;  %v4690_v55 = vld [vmem:[%s5064_s5 + $0x18] sm:$0xff] }
 0xd91   :  { %v1847_v0 = vpop.xlane.xlu0 %1846 }
 0xd92   :  { %v1857_v36 = vmul.f32 0.03125, %v1847_v0 }
 0xd94   :  { %v1861_v60 = vadd.f32 1e-05, %v1857_v36  ;;  %v4704_v36 = vld [vmem:[%s5064_s5 + $0x58] sm:$0xff] }
 0xd95   :  { %v1850_v53 = vpop.xlane.xlu1 %1849 }
 0xd96   :  { %3846 = vrsqrt.f32 %v1861_v60  ;;  %v1858_v41 = vmul.f32 0.03125, %v1850_v53  ;;  %v4708_v53 = vld [vmem:[%s5064_s5 + $0x60] sm:$0xff] }
 0xd98   :  { %v1862_v34 = vadd.f32 1e-05, %v1858_v41 }
 0xd99   :  { %v1856_v44 = vpop.xlane.xlu1 %1855  ;;  %v1853_v43 = vpop.xlane.xlu0 %1852 }
 0xd9a   :  { %3848 = vrsqrt.f32 %v1862_v34  ;;  %v1860_v42 = vmul.f32 0.03125, %v1856_v44  ;;  %v1859_v30 = vmul.f32 0.03125, %v1853_v43  ;;  %v4712_v34 = vld [vmem:[%s5064_s5 + $0x78] sm:$0xff] }
 0xd9c   :  { %v1864_v56 = vadd.f32 1e-05, %v1860_v42  ;;  %v1863_v38 = vadd.f32 1e-05, %v1859_v30  ;;  %v4720_v42 = vld [vmem:[%s5064_s5 + $0x8] sm:$0xff] }
 0xd9e   :  { %3850 = vrsqrt.f32 %v1864_v56 }
 0xd9f   :  { %3852 = vrsqrt.f32 %v1863_v38  ;;  %v4724_v38 = vld [vmem:[%s5064_s5 + $0x28] sm:$0xff] }
 0xda3   :  { %v3847_v37 = vpop.eup %3846 }
 0xda4   :  { %v1869_v29 = vmul.f32 %v3847_v37, %v1837_v22 }
 0xda6   :  { %v1879_v35 = vmul.f32 %v3184_v48, %v1869_v29 }
 0xda7   :  { %v3849_v33 = vpop.eup %3848 }
 0xda8   :  { %v1870_v57 = vmul.f32 %v3849_v33, %v1838_v25  ;;  %v1889_v6 = vadd.f32 %v3185_v27, %v1879_v35  ;;  %v4732_v35 = vld [vmem:[%s5064_s5 + $0x68] sm:$0xff] }
 0xdaa   :  { %v1880_v1 = vmul.f32 %v3184_v48, %v1870_v57 }
 0xdab   :  { %v3851_v26 = vpop.eup %3850 }
 0xdac   :  { %v3853_v3 = vpop.eup %3852  ;;  %v1872_v46 = vmul.f32 %v3851_v26, %v1840_v45  ;;  %v1890_v32 = vadd.f32 %v3185_v27, %v1880_v1  ;;  %v4670_v45 = vld [vmem:[%s5064_s5 + $0x30] sm:$0xff] }
 0xdad   :  { %v1871_v19 = vmul.f32 %v3853_v3, %v1839_v49 }
 0xdae   :  { %v1898_v13 = vpack.c.bf16 %v1890_v32, %v1889_v6  ;;  %v1882_v28 = vmul.f32 %v3184_v48, %v1872_v46 }
 0xdaf   :  { %v1881_v61 = vmul.f32 %v3184_v48, %v1871_v19  ;;  %v4728_v48 = vld [vmem:[%s5064_s5 + $0x48] sm:$0xff] }
 0xdb0   :  { %3577 = vmatprep.mubr.msk.bf16.mxu1 %vm743_vm7, %v1898_v13  ;;  %v1892_v14 = vadd.f32 %v3185_v27, %v1882_v28 }
 0xdb1   :  { %v1891_v5 = vadd.f32 %v3185_v27, %v1881_v61 }
 0xdb3   :  { %v1899_v21 = vpack.c.bf16 %v1892_v14, %v1891_v5 }
 0xdb5   :  { %3578 = vmatmul.mubr.msk.bf16.vlgmr.msra.gmra.mxu1 %vm743_vm7, %v1899_v21 }
 0xe75   :  { %v3579_v17 = vpop.f32.mrf.mxu1 }
 0xe76   :  { %v1959_v12 = vadd.f32 %v3579_v17, %v3191_v62  ;;  %v3954_v17 = vld [vmem:[%s5065_s13] sm:$0xff] }
 0xe77   :  { %v1950_v18 = vpop.f32.mrf.mxu1 }
 0xe78   :  { %v1951_v22 = vadd.f32 %v3191_v62, %v1950_v18  ;;  %v1967_v16 = vmul.f32 %v4666_v24, %v1959_v12  ;;  %v1971_v25 = vmul.f32 %v4670_v45, %v1959_v12  ;;  %v1975_v20 = vmul.f32 %v4682_v50, %v1959_v12 }
 0xe79   :  { %v3580_v7 = vpop.f32.mrf.mxu1  ;;  %v1979_v52 = vmul.f32 %v4686_v51, %v1959_v12 }
 0xe7a   :  { %v1962_v23 = vadd.f32 %v3580_v7, %v3191_v62  ;;  %v1965_v47 = vmul.f32 %v4674_v39, %v1951_v22  ;;  %v1969_v49 = vmul.f32 %v4678_v31, %v1951_v22  ;;  %v1973_v0 = vmul.f32 %v4700_v54, %v1951_v22 }
 0xe7b   :  { %v1953_v40 = vpop.f32.mrf.mxu1  ;;  %v1977_v41 = vmul.f32 %v4708_v53, %v1951_v22 }
 0xe7c   :  { %v1968_v10 = vmul.f32 %v4690_v55, %v1962_v23  ;;  %v1954_v59 = vadd.f32 %v3191_v62, %v1953_v40  ;;  %v4693_v63 = vpack.c.bf16 %v1962_v23, %v1959_v12  ;;  %v1972_v4 = vmul.f32 %v4696_v58, %v1962_v23 }
 0xe7d   :  { %v1976_v60 = vmul.f32 %v4704_v36, %v1962_v23  ;;  %v1980_v44 = vmul.f32 %v4712_v34, %v1962_v23  ;;  %v3955_v23 = vld [vmem:[%s5065_s13 + $0x18] sm:$0xff] }
 0xe7e   :  { %1995 = vrot.lane.b32.xlu0 %v4693_v63, %s4029_s9  ;;  %v4717_v43 = vpack.c.bf16 %v1954_v59, %v1951_v22  ;;  %v1966_v30 = vmul.f32 %v4720_v42, %v1954_v59  ;;  %v1982_v56 = vpack.c.bf16 %v1968_v10, %v1967_v16  ;;  %v1970_v37 = vmul.f32 %v4724_v38, %v1954_v59 }
 0xe7f   :  { %v1984_v29 = vpack.c.bf16 %v1972_v4, %v1971_v25  ;;  %v1974_v33 = vmul.f32 %v4728_v48, %v1954_v59  ;;  %v1986_v57 = vpack.c.bf16 %v1976_v60, %v1975_v20  ;;  %v1978_v27 = vmul.f32 %v4732_v35, %v1954_v59  ;;  %v3957_v4 = vld [vmem:[%s5065_s13 + $0x10] sm:$0xff] }
 0xe80   :  { %1993 = vrot.lane.b32.xlu1 %v4717_v43, %s4029_s9  ;;  %v1981_v1 = vpack.c.bf16 %v1966_v30, %v1965_v47  ;;  %v1983_v26 = vpack.c.bf16 %v1970_v37, %v1969_v49  ;;  %v1988_v3 = vpack.c.bf16 %v1980_v44, %v1979_v52  ;;  %v3956_v47 = vld [vmem:[%s5065_s13 + $0x8] sm:$0xff] }
 0xe81   :  { %v1985_v46 = vpack.c.bf16 %v1974_v33, %v1973_v0  ;;  %v1987_v6 = vpack.c.bf16 %v1978_v27, %v1977_v41  ;;  %v3959_v27 = vld [vmem:[%s5065_s13 + $0x28] sm:$0xff] }
 0xe82   :  { %3585 = vmatprep.mubr.msk.bf16.mxu1 %vm743_vm7, %v1981_v1 }
 0xef0   :  { %v1996_v32 = vpop.permute.xlu0 %1995 }
 0xef1   :  { %v2025_v19 = vsel %vm743_vm7, %v1996_v32, 0  ;;  %3708 = vmatprep.subr.msk.bf16.mxu1 %vm743_vm7, %v1996_v32 }
 0xef2   :  { %3582 = vmatpush3.bf16.xpose.msra.mxu1 %v2025_v19  ;;  %v1994_v13 = vpop.permute.xlu1 %1993 }
 0xef3   :  { %3709 = vmatprep.subr.msk.bf16.mxu1 %vm743_vm7, %v1994_v13  ;;  %v2022_v28 = vsel %vm743_vm7, %v1994_v13, 0  ;;  %v3961_v13 = vld [vmem:[%s5065_s13 + $0x38] sm:$0xff] }
 0xefa   :  { %3584 = vmatpush3.bf16.xpose.msra.mxu1 %v2022_v28 }
 0xf01   :  { %3586 = vmatmul.mubr.msk.bf16.vlgmr.msra.gmra.mxu1 %vm743_vm7, %v1982_v56 }
 0xf02   :  { %3589 = vmatprep.mubr.msk.bf16.mxu1 %vm743_vm7, %v1983_v26 }
 0xf09   :  { %3590 = vmatmul.mubr.msk.bf16.gmra.mxu1 %vm743_vm7, %v1984_v29  ;;  %v3958_v29 = vld [vmem:[%s5065_s13 + $0x20] sm:$0xff] }
 0xf0a   :  { %3593 = vmatprep.mubr.msk.bf16.mxu1 %vm743_vm7, %v1985_v46 }
 0xf11   :  { %3594 = vmatmul.mubr.msk.bf16.gmra.mxu1 %vm743_vm7, %v1986_v57 }
 0xf12   :  { %3597 = vmatprep.mubr.msk.bf16.mxu1 %vm743_vm7, %v1987_v6 }
 0xf19   :  { %3598 = vmatmul.mubr.msk.bf16.gmra.mxu1 %vm743_vm7, %v1988_v3  ;;  %v3960_v3 = vld [vmem:[%s5065_s13 + $0x30] sm:$0xff] }
 0xfc1   :  { %v3587_v61 = vpop.f32.mrf.mxu1 }
 0xfc2   :  { %v2126_v22 = vmul.f32 0.35355338, %v3587_v61 }
 0xfc3   :  { %v2061_v14 = vpop.f32.mrf.mxu1 }
 0xfc4   :  { %v2124_v5 = vmul.f32 0.35355338, %v2061_v14  ;;  %v4765_v0 = vadd.f32 %v3957_v4, %v2126_v22  ;;  %v3962_v22 = vld [vmem:[%s5065_s13 + $0x40] sm:$0xff] }
 0xfc5   :  { %v3588_v21 = vpop.f32.mrf.mxu1 }
 0xfc6   :  { %v2127_v62 = vmul.f32 0.35355338, %v3588_v21  ;;  %v4750_v12 = vadd.f32 %v3954_v17, %v2124_v5  ;;  %v2162_v37 = vsel %vm743_vm7, %v4765_v0, -inf }
 0xfc7   :  { %v2064_v18 = vpop.f32.mrf.mxu1 }
 0xfc8   :  { %v2125_v7 = vmul.f32 0.35355338, %v2064_v18  ;;  %v2156_v16 = vsel %vm743_vm7, %v4750_v12, -inf  ;;  %v4755_v25 = vadd.f32 %v3955_v23, %v2127_v62  ;;  %v3963_v23 = vld [vmem:[%s5065_s13 + $0x48] sm:$0xff] }
 0xfc9   :  { %2157 = vmax.xlane.f32.xlu1 %v2156_v16  ;;  %v3591_v40 = vpop.f32.mrf.mxu1 }
 0xfca   :  { %v4758_v49 = vadd.f32 %v3956_v47, %v2125_v7  ;;  %v2165_v10 = vsel %vm743_vm7, %v4755_v25, -inf  ;;  %v2130_v41 = vmul.f32 0.35355338, %v3591_v40 }
 0xfcb   :  { %v2077_v20 = vpop.f32.mrf.mxu1 }
 0xfcc   :  { %v2128_v52 = vmul.f32 0.35355338, %v2077_v20  ;;  %v2159_v59 = vsel %vm743_vm7, %v4758_v49, -inf  ;;  %v4776_v46 = vadd.f32 %v3960_v3, %v2130_v41  ;;  %v3964_v20 = vld [vmem:[%s5065_s13 + $0x50] sm:$0xff] }
 0xfcd   :  { %2166 = vmax.xlane.f32.xlu1 %v2165_v10  ;;  %2160 = vmax.xlane.f32.xlu0 %v2159_v59  ;;  %v3592_v60 = vpop.f32.mrf.mxu1 }
 0xfce   :  { %v2131_v30 = vmul.f32 0.35355338, %v3592_v60  ;;  %v4770_v33 = vadd.f32 %v3958_v29, %v2128_v52  ;;  %v2174_v21 = vsel %vm743_vm7, %v4776_v46, -inf  ;;  %v3965_v60 = vld [vmem:[%s5065_s13 + $0x58] sm:$0xff] }
 0xfcf   :  { %v2080_v44 = vpop.f32.mrf.mxu1 }
 0xfd0   :  { %v2129_v56 = vmul.f32 0.35355338, %v2080_v44  ;;  %v2168_v32 = vsel %vm743_vm7, %v4770_v33, -inf  ;;  %v4783_v28 = vadd.f32 %v3961_v13, %v2131_v30 }
 0xfd1   :  { %2163 = vmax.xlane.f32.xlu0 %v2162_v37  ;;  %v3595_v57 = vpop.f32.mrf.mxu1 }
 0xfd2   :  { %v4773_v1 = vadd.f32 %v3959_v27, %v2129_v56  ;;  %v2134_v14 = vmul.f32 0.35355338, %v3595_v57  ;;  %v2177_v18 = vsel %vm743_vm7, %v4783_v28, -inf }
 0xfd3   :  { %v2093_v26 = vpop.f32.mrf.mxu1 }
 0xfd4   :  { %v2132_v6 = vmul.f32 0.35355338, %v2093_v26  ;;  %v2171_v19 = vsel %vm743_vm7, %v4773_v1, -inf  ;;  %v4796_v52 = vadd.f32 %v3964_v20, %v2134_v14  ;;  %v3966_v26 = vld [vmem:[%s5065_s13 + $0x60] sm:$0xff] }
 0xfd5   :  { %2169 = vmax.xlane.f32.xlu0 %v2168_v32  ;;  %2172 = vmax.xlane.f32.xlu1 %v2171_v19  ;;  %v3596_v61 = vpop.f32.mrf.mxu1 }
 0xfd6   :  { %v2135_v62 = vmul.f32 0.35355338, %v3596_v61  ;;  %v4790_v7 = vadd.f32 %v3962_v22, %v2132_v6  ;;  %v2186_v37 = vsel %vm743_vm7, %v4796_v52, -inf  ;;  %v3967_v6 = vld [vmem:[%s5065_s13 + $0x68] sm:$0xff]  ;;  %v3968_v61 = vld [vmem:[%s5065_s13 + $0x70] sm:$0xff] }
 0xfd7   :  { %v2096_v5 = vpop.f32.mrf.mxu1 }
 0xfd8   :  { %v2133_v17 = vmul.f32 0.35355338, %v2096_v5  ;;  %v2180_v59 = vsel %vm743_vm7, %v4790_v7, -inf  ;;  %v4803_v41 = vadd.f32 %v3965_v60, %v2135_v62  ;;  %v3969_v5 = vld [vmem:[%s5065_s13 + $0x78] sm:$0xff] }
 0xfd9   :  { %2175 = vmax.xlane.f32.xlu0 %v2174_v21  ;;  %2178 = vmax.xlane.f32.xlu1 %v2177_v18  ;;  %v3599_v16 = vpop.f32.mrf.mxu1 }
 0xfda   :  { %v4793_v40 = vadd.f32 %v3963_v23, %v2133_v17  ;;  %v2138_v30 = vmul.f32 0.35355338, %v3599_v16  ;;  %v2189_v27 = vsel %vm743_vm7, %v4803_v41, -inf }
 0xfdb   :  { %v2109_v47 = vpop.f32.mrf.mxu1 }
 0xfdc   :  { %v2136_v10 = vmul.f32 0.35355338, %v2109_v47  ;;  %v2183_v4 = vsel %vm743_vm7, %v4793_v40, -inf  ;;  %v4820_v14 = vadd.f32 %v3968_v61, %v2138_v30 }
 0xfdd   :  { %2181 = vmax.xlane.f32.xlu0 %v2180_v59  ;;  %2184 = vmax.xlane.f32.xlu1 %v2183_v4  ;;  %v3600_v44 = vpop.f32.mrf.mxu1 }
 0xfde   :  { %v2139_v29 = vmul.f32 0.35355338, %v3600_v44  ;;  %v4810_v3 = vadd.f32 %v3966_v26, %v2136_v10  ;;  %v2198_v62 = vsel %vm743_vm7, %v4820_v14, -inf }
 0xfdf   :  { %v2112_v56 = vpop.f32.mrf.mxu1 }
 0xfe0   :  { %v2137_v57 = vmul.f32 0.35355338, %v2112_v56  ;;  %v2192_v19 = vsel %vm743_vm7, %v4810_v3, -inf  ;;  %v4823_v21 = vadd.f32 %v3969_v5, %v2139_v29 }
 0xfe1   :  { %2187 = vmax.xlane.f32.xlu0 %v2186_v37  ;;  %2190 = vmax.xlane.f32.xlu1 %v2189_v27 }
 0xfe2   :  { %v4813_v32 = vadd.f32 %v3967_v6, %v2137_v57  ;;  %v2201_v17 = vsel %vm743_vm7, %v4823_v21, -inf }
 0xfe4   :  { %v2195_v13 = vsel %vm743_vm7, %v4813_v32, -inf }
 0xfe5   :  { %2193 = vmax.xlane.f32.xlu0 %v2192_v19  ;;  %2196 = vmax.xlane.f32.xlu1 %v2195_v13 }
 0xfe9   :  { %2199 = vmax.xlane.f32.xlu0 %v2198_v62  ;;  %2202 = vmax.xlane.f32.xlu1 %v2201_v17 }
0x1052   :  { %v2158_v18 = vpop.xlane.xlu1 %2157 }
0x1053   :  { %v2204_v20 = vsub.f32 %v4750_v12, %v2158_v18 }
0x1055   :  { %v2220_v44 = vmul.f32 1.442695, %v2204_v20 }
0x1056   :  { %v2167_v22 = vpop.xlane.xlu1 %2166  ;;  %v2161_v16 = vpop.xlane.xlu0 %2160 }
0x1057   :  { %v2207_v23 = vsub.f32 %v4755_v25, %v2167_v22  ;;  %v2205_v47 = vsub.f32 %v4758_v49, %v2161_v16 }
0x1059   :  { %v2226_v10 = vmul.f32 1.442695, %v2207_v23  ;;  %v2222_v59 = vmul.f32 1.442695, %v2205_v47 }
0x105a   :  { %v2164_v4 = vpop.xlane.xlu0 %2163 }
0x105b   :  { %3854 = vpow2.f32 %v2226_v10  ;;  %v2206_v60 = vsub.f32 %v4765_v0, %v2164_v4 }
0x105c   :  { %3856 = vpow2.f32 %v2222_v59 }
0x105d   :  { %v2224_v30 = vmul.f32 1.442695, %v2206_v60 }
0x105e   :  { %v2170_v56 = vpop.xlane.xlu0 %2169  ;;  %v2173_v37 = vpop.xlane.xlu1 %2172 }
0x105f   :  { %3858 = vpow2.f32 %v2224_v30  ;;  %v2208_v29 = vsub.f32 %v4770_v33, %v2170_v56  ;;  %v2209_v25 = vsub.f32 %v4773_v1, %v2173_v37 }
0x1060   :  { %3860 = vpow2.f32 %v2220_v44 }
0x1061   :  { %v2228_v26 = vmul.f32 1.442695, %v2208_v29  ;;  %v2230_v19 = vmul.f32 1.442695, %v2209_v25 }
0x1062   :  { %v2176_v49 = vpop.xlane.xlu0 %2175  ;;  %v2179_v57 = vpop.xlane.xlu1 %2178 }
0x1063   :  { %v2210_v12 = vsub.f32 %v4776_v46, %v2176_v49  ;;  %v2211_v27 = vsub.f32 %v4783_v28, %v2179_v57 }
0x1065   :  { %v2232_v6 = vmul.f32 1.442695, %v2210_v12  ;;  %v2234_v0 = vmul.f32 1.442695, %v2211_v27 }
0x1066   :  { %v2182_v13 = vpop.xlane.xlu0 %2181  ;;  %v2185_v61 = vpop.xlane.xlu1 %2184 }
0x1067   :  { %3862 = vpow2.f32 %v2232_v6  ;;  %v2212_v33 = vsub.f32 %v4790_v7, %v2182_v13  ;;  %v2213_v46 = vsub.f32 %v4793_v40, %v2185_v61 }
0x1068   :  { %v4837_v5 = vpop.eup %3854  ;;  %3864 = vpow2.f32 %v2234_v0 }
0x1069   :  { %3866 = vpow2.f32 %v2228_v26  ;;  %v2261_v1 = vsel %vm743_vm7, %v4837_v5, 0.0  ;;  %v4842_v62 = vpop.eup %3856  ;;  %v2236_v23 = vmul.f32 1.442695, %v2212_v33  ;;  %v2238_v40 = vmul.f32 1.442695, %v2213_v46 }
0x106a   :  { %3868 = vpow2.f32 %v2230_v19  ;;  %v2188_v28 = vpop.xlane.xlu0 %2187  ;;  %v2191_v17 = vpop.xlane.xlu1 %2190  ;;  %2262 = vadd.xlane.f32.xlu1 %v2261_v1  ;;  %v2255_v10 = vsel %vm743_vm7, %v4842_v62, 0.0 }
0x106b   :  { %v2214_v18 = vsub.f32 %v4796_v52, %v2188_v28  ;;  %v2215_v22 = vsub.f32 %v4803_v41, %v2191_v17 }
0x106c   :  { %v4847_v16 = vpop.eup %3858 }
0x106d   :  { %v2240_v7 = vmul.f32 1.442695, %v2214_v18  ;;  %v2242_v47 = vmul.f32 1.442695, %v2215_v22  ;;  %v2258_v20 = vsel %vm743_vm7, %v4847_v16, 0.0  ;;  %v4853_v59 = vpop.eup %3860 }
0x106e   :  { %2259 = vadd.xlane.f32.xlu0 %v2258_v20  ;;  %v2194_v4 = vpop.xlane.xlu0 %2193  ;;  %2256 = vadd.xlane.f32.xlu1 %v2255_v10  ;;  %v2197_v52 = vpop.xlane.xlu1 %2196  ;;  %v2252_v41 = vsel %vm743_vm7, %v4853_v59, 0.0 }
0x106f   :  { %3870 = vpow2.f32 %v2240_v7  ;;  %v2216_v60 = vsub.f32 %v4810_v3, %v2194_v4  ;;  %v2217_v6 = vsub.f32 %v4813_v32, %v2197_v52 }
0x1070   :  { %3872 = vpow2.f32 %v2242_v47 }
0x1071   :  { %3874 = vpow2.f32 %v2236_v23  ;;  %v2244_v12 = vmul.f32 1.442695, %v2216_v60  ;;  %v2246_v1 = vmul.f32 1.442695, %v2217_v6 }
0x1072   :  { %3876 = vpow2.f32 %v2238_v40  ;;  %2253 = vadd.xlane.f32.xlu0 %v2252_v41  ;;  %v2200_v44 = vpop.xlane.xlu0 %2199  ;;  %v2203_v56 = vpop.xlane.xlu1 %2202 }
0x1073   :  { %v2218_v30 = vsub.f32 %v4820_v14, %v2200_v44  ;;  %v2219_v27 = vsub.f32 %v4823_v21, %v2203_v56 }
0x1074   :  { %v4859_v37 = vpop.eup %3862 }
0x1075   :  { %v4861_v29 = vpop.eup %3864  ;;  %v2248_v25 = vmul.f32 1.442695, %v2218_v30  ;;  %v2270_v49 = vsel %vm743_vm7, %v4859_v37, 0.0  ;;  %v2250_v0 = vmul.f32 1.442695, %v2219_v27 }
0x1076   :  { %v4865_v57 = vpop.eup %3866  ;;  %2271 = vadd.xlane.f32.xlu0 %v2270_v49  ;;  %v2273_v3 = vsel %vm743_vm7, %v4861_v29, 0.0 }
0x1077   :  { %v4870_v26 = vpop.eup %3868  ;;  %3878 = vpow2.f32 %v2248_v25  ;;  %2274 = vadd.xlane.f32.xlu1 %v2273_v3  ;;  %v2264_v14 = vsel %vm743_vm7, %v4865_v57, 0.0 }
0x1078   :  { %3880 = vpow2.f32 %v2244_v12  ;;  %v2267_v19 = vsel %vm743_vm7, %v4870_v26, 0.0 }
0x1079   :  { %3882 = vpow2.f32 %v2250_v0 }
0x107a   :  { %2265 = vadd.xlane.f32.xlu0 %v2264_v14  ;;  %3884 = vpow2.f32 %v2246_v1 }
0x107b   :  { %2268 = vadd.xlane.f32.xlu1 %v2267_v19 }
0x107c   :  { %v4877_v21 = vpop.eup %3870 }
0x107d   :  { %v4879_v13 = vpop.eup %3872  ;;  %v2282_v61 = vsel %vm743_vm7, %v4877_v21, 0.0 }
0x107e   :  { %v4883_v33 = vpop.eup %3874  ;;  %2283 = vadd.xlane.f32.xlu0 %v2282_v61  ;;  %v2285_v32 = vsel %vm743_vm7, %v4879_v13, 0.0 }
0x107f   :  { %v4887_v46 = vpop.eup %3876  ;;  %2286 = vadd.xlane.f32.xlu1 %v2285_v32  ;;  %v2276_v28 = vsel %vm743_vm7, %v4883_v33, 0.0 }
0x1080   :  { %v2279_v17 = vsel %vm743_vm7, %v4887_v46, 0.0 }
0x1082   :  { %2277 = vadd.xlane.f32.xlu0 %v2276_v28 }
0x1083   :  { %2280 = vadd.xlane.f32.xlu1 %v2279_v17 }
0x1084   :  { %v4893_v18 = vpop.eup %3878 }
0x1085   :  { %v2294_v22 = vsel %vm743_vm7, %v4893_v18, 0.0  ;;  %v4897_v23 = vpop.eup %3880 }
0x1086   :  { %v2288_v7 = vsel %vm743_vm7, %v4897_v23, 0.0  ;;  %v4901_v47 = vpop.eup %3882 }
0x1087   :  { %2295 = vadd.xlane.f32.xlu1 %v2294_v22  ;;  %v2297_v20 = vsel %vm743_vm7, %v4901_v47, 0.0  ;;  %v4905_v10 = vpop.eup %3884 }
0x1088   :  { %v2291_v40 = vsel %vm743_vm7, %v4905_v10, 0.0 }
0x108b   :  { %2289 = vadd.xlane.f32.xlu1 %v2288_v7 }
0x108f   :  { %2298 = vadd.xlane.f32.xlu1 %v2297_v20 }
0x1093   :  { %2292 = vadd.xlane.f32.xlu1 %v2291_v40 }
0x1098   :  { %2342 = vrot.lane.b32.xlu0 %v4693_v63, %s4030_s17 }
0x10a4   :  { %2340 = vrot.lane.b32.xlu1 %v4717_v43, %s4030_s17 }
0x10f3   :  { %v2263_v4 = vpop.xlane.xlu1 %2262 }
0x10f7   :  { %v2260_v52 = vpop.xlane.xlu0 %2259  ;;  %v2257_v41 = vpop.xlane.xlu1 %2256 }
0x10f8   :  { %3886 = vrcp.f32 %v2257_v41 }
0x10fb   :  { %v2254_v60 = vpop.xlane.xlu0 %2253 }
0x10fc   :  { %3888 = vrcp.f32 %v2254_v60 }
0x10fd   :  { %3890 = vrcp.f32 %v2260_v52 }
0x10ff   :  { %v2272_v44 = vpop.xlane.xlu0 %2271 }
0x1100   :  { %v2275_v30 = vpop.xlane.xlu1 %2274 }
0x1103   :  { %v2266_v56 = vpop.xlane.xlu0 %2265 }
0x1104   :  { %v2269_v25 = vpop.xlane.xlu1 %2268  ;;  %3892 = vrcp.f32 %v2266_v56 }
0x1105   :  { %v3887_v49 = vpop.eup %3886  ;;  %3894 = vrcp.f32 %v2269_v25 }
0x1106   :  { %v2317_v63 = vmul.f32 %v3887_v49, %v4842_v62  ;;  %3896 = vrcp.f32 %v2263_v4 }
0x1107   :  { %v2284_v12 = vpop.xlane.xlu0 %2283  ;;  %3898 = vrcp.f32 %v2272_v44 }
0x1108   :  { %v2287_v27 = vpop.xlane.xlu1 %2286  ;;  %3900 = vrcp.f32 %v2275_v30 }
0x1109   :  { %v3889_v3 = vpop.eup %3888 }
0x110a   :  { %v2316_v14 = vmul.f32 %v3889_v3, %v4853_v59  ;;  %v3891_v62 = vpop.eup %3890 }
0x110b   :  { %v2278_v6 = vpop.xlane.xlu0 %2277  ;;  %v2318_v7 = vmul.f32 %v3891_v62, %v4847_v16 }
0x110c   :  { %v2281_v43 = vpop.xlane.xlu1 %2280  ;;  %v2332_v0 = vpack.c.bf16 %v2317_v63, %v2316_v14  ;;  %3902 = vrcp.f32 %v2278_v6 }
0x110d   :  { %3904 = vrcp.f32 %v2281_v43 }
0x110e   :  { %3605 = vmatprep.mubr.msk.bf16.mxu0 %vm743_vm7, %v2332_v0  ;;  %3906 = vrcp.f32 %v2284_v12 }
0x110f   :  { %v2343_v19 = vpop.permute.xlu0 %2342  ;;  %3908 = vrcp.f32 %v2287_v27 }
0x1110   :  { %v2296_v61 = vpop.xlane.xlu1 %2295  ;;  %3601 = vmatprep.subr.bf16.mxu0 %v2343_v19 }
0x1111   :  { %3602 = vmatpush3.bf16.msra.mxu0 %v2343_v19  ;;  %v3893_v32 = vpop.eup %3892 }
0x1112   :  { %v3895_v17 = vpop.eup %3894  ;;  %v2320_v40 = vmul.f32 %v3893_v32, %v4865_v57  ;;  %v3211_v32 = vld [vmem:[%s5067_s25 + $0x28] sm:$0xff] }
0x1113   :  { %v3897_v22 = vpop.eup %3896  ;;  %v2321_v4 = vmul.f32 %v3895_v17, %v4870_v26 }
0x1114   :  { %v2290_v1 = vpop.xlane.xlu1 %2289  ;;  %v2319_v52 = vmul.f32 %v3897_v22, %v4837_v5  ;;  %v3899_v41 = vpop.eup %3898 }
0x1115   :  { %v3901_v60 = vpop.eup %3900  ;;  %v2334_v56 = vpack.c.bf16 %v2321_v4, %v2320_v40  ;;  %v2322_v16 = vmul.f32 %v3899_v41, %v4859_v37 }
0x1116   :  { %v2333_v44 = vpack.c.bf16 %v2319_v52, %v2318_v7  ;;  %v2323_v57 = vmul.f32 %v3901_v60, %v4861_v29 }
0x1118   :  { %v2299_v59 = vpop.xlane.xlu1 %2298  ;;  %v2335_v12 = vpack.c.bf16 %v2323_v57, %v2322_v16 }
0x1119   :  { %v3903_v30 = vpop.eup %3902 }
0x111a   :  { %v3905_v25 = vpop.eup %3904  ;;  %v2324_v26 = vmul.f32 %v3903_v30, %v4883_v33 }
0x111b   :  { %v2325_v5 = vmul.f32 %v3905_v25, %v4887_v46  ;;  %v3907_v49 = vpop.eup %3906 }
0x111c   :  { %v2293_v28 = vpop.xlane.xlu1 %2292  ;;  %v3909_v27 = vpop.eup %3908  ;;  %v2326_v37 = vmul.f32 %v3907_v49, %v4877_v21 }
0x111d   :  { %3910 = vrcp.f32 %v2293_v28  ;;  %v2336_v3 = vpack.c.bf16 %v2325_v5, %v2324_v26  ;;  %v2327_v29 = vmul.f32 %v3909_v27, %v4879_v13 }
0x111e   :  { %3912 = vrcp.f32 %v2290_v1  ;;  %v3212_v1 = vld [vmem:[%s5067_s25 + $0x30] sm:$0xff] }
0x111f   :  { %3914 = vrcp.f32 %v2299_v59  ;;  %v2337_v6 = vpack.c.bf16 %v2327_v29, %v2326_v37  ;;  %v3210_v59 = vld [vmem:[%s5067_s25 + $0x20] sm:$0xff] }
0x1120   :  { %v2341_v20 = vpop.permute.xlu1 %2340  ;;  %3916 = vrcp.f32 %v2296_v61  ;;  %v2575_v28 = vpack.c.bf16 %v3211_v32, %v3210_v59 }
0x1121   :  { %3603 = vmatprep.subr.bf16.mxu0 %v2341_v20 }
0x1122   :  { %3604 = vmatpush3.bf16.msra.mxu0 %v2341_v20 }
0x1125   :  { %3606 = vmatmul.mubr.msk.bf16.vlgmr.msra.gmra.mxu0 %vm743_vm7, %v2333_v44 }
0x1126   :  { %3609 = vmatprep.mubr.msk.bf16.mxu0 %vm743_vm7, %v2334_v56 }
0x112a   :  { %v3911_v14 = vpop.eup %3910 }
0x112b   :  { %v3913_v63 = vpop.eup %3912  ;;  %v2329_v33 = vmul.f32 %v3911_v14, %v4905_v10  ;;  %v3970_v10 = vld [vmem:[%s5066_s21] sm:$0xff] }
0x112c   :  { %v2328_v46 = vmul.f32 %v3913_v63, %v4897_v23  ;;  %v3915_v43 = vpop.eup %3914  ;;  %v3213_v23 = vld [vmem:[%s5067_s25 + $0x38] sm:$0xff] }
0x112d   :  { %3610 = vmatmul.mubr.msk.bf16.gmra.mxu0 %vm743_vm7, %v2335_v12  ;;  %v3917_v19 = vpop.eup %3916  ;;  %v2331_v21 = vmul.f32 %v3915_v43, %v4901_v47  ;;  %v2576_v62 = vpack.c.bf16 %v3213_v23, %v3212_v1 }
0x112e   :  { %3613 = vmatprep.mubr.msk.bf16.mxu0 %vm743_vm7, %v2336_v3  ;;  %v2338_v0 = vpack.c.bf16 %v2329_v33, %v2328_v46  ;;  %v2330_v61 = vmul.f32 %v3917_v19, %v4893_v18 }
0x112f   :  { %3659 = vmatprep.subr.bf16.mxu1 %v2576_v62 }
0x1130   :  { %v2339_v13 = vpack.c.bf16 %v2331_v21, %v2330_v61  ;;  %3660 = vmatpush3.bf16.msra.mxu1 %v2576_v62 }
0x1131   :  { %3661 = vmatprep.subr.bf16.mxu1 %v2575_v28 }
0x1134   :  { %3662 = vmatpush3.bf16.msra.mxu1 %v2575_v28 }
0x1135   :  { %3614 = vmatmul.mubr.msk.bf16.gmra.mxu0 %vm743_vm7, %v2337_v6  ;;  %v3217_v6 = vld [vmem:[%s5068_s29 + $0x1] ss:$0 sm:$0xff] }
0x1136   :  { %3617 = vmatprep.mubr.msk.bf16.mxu0 %vm743_vm7, %v2338_v0 }
0x113d   :  { %3618 = vmatmul.mubr.msk.bf16.gmra.mxu0 %vm743_vm7, %v2339_v13 }
0x113e   :  { %3653 = vmatprep.mubr.f32.mxu0 %v3970_v10 }
0x11e5   :  { %v3607_v17 = vpop.f32.mrf.mxu0 }
0x11e7   :  { %v2404_v22 = vpop.f32.mrf.mxu0 }
0x11e9   :  { %v3608_v47 = vpop.f32.mrf.mxu0 }
0x11eb   :  { %v2407_v7 = vpop.f32.mrf.mxu0 }
0x11ed   :  { %v3611_v18 = vpop.f32.mrf.mxu0 }
0x11ef   :  { %v2420_v20 = vpop.f32.mrf.mxu0 }
0x11f1   :  { %v3612_v40 = vpop.f32.mrf.mxu0 }
0x11f3   :  { %v2423_v4 = vpop.f32.mrf.mxu0 }
0x11f5   :  { %v3615_v52 = vpop.f32.mrf.mxu0 }
0x11f6   :  { %v2477_v27 = vmul.f32 %v4682_v50, %v3615_v52  ;;  %v2472_v50 = vmul.f32 %v4724_v38, %v2423_v4  ;;  %v2467_v38 = vmul.f32 %v4674_v39, %v2404_v22 }
0x11f7   :  { %v2436_v41 = vpop.f32.mrf.mxu0 }
0x11f9   :  { %v3616_v60 = vpop.f32.mrf.mxu0 }
0x11fa   :  { %v2478_v12 = vmul.f32 %v4704_v36, %v3616_v60  ;;  %v2473_v36 = vmul.f32 %v4670_v45, %v3611_v18  ;;  %v2468_v45 = vmul.f32 %v4720_v42, %v2407_v7 }
0x11fb   :  { %v2439_v44 = vpop.f32.mrf.mxu0 }
0x11fd   :  { %v3619_v30 = vpop.f32.mrf.mxu0 }
0x11fe   :  { %v2481_v26 = vmul.f32 %v4686_v51, %v3619_v30  ;;  %v2476_v51 = vmul.f32 %v4728_v48, %v2439_v44  ;;  %v2471_v48 = vmul.f32 %v4678_v31, %v2420_v20  ;;  %v3971_v31 = vld [vmem:[%s5066_s21 + $0x8] sm:$0xff] }
0x11ff   :  { %v2452_v56 = vpop.f32.mrf.mxu0 }
0x1200   :  { %v2479_v49 = vmul.f32 %v4708_v53, %v2452_v56  ;;  %v2474_v53 = vmul.f32 %v4696_v58, %v3612_v40  ;;  %v2469_v58 = vmul.f32 %v4666_v24, %v3607_v17 }
0x1201   :  { %v3620_v25 = vpop.f32.mrf.mxu0 }
0x1202   :  { %v2482_v16 = vmul.f32 %v4712_v34, %v3620_v25  ;;  %v2475_v34 = vmul.f32 %v4700_v54, %v2436_v41  ;;  %v2470_v54 = vmul.f32 %v4690_v55, %v3608_v47  ;;  %v3972_v55 = vld [vmem:[%s5066_s21 + $0x10] sm:$0xff] }
0x1203   :  { %v2455_v57 = vpop.f32.mrf.mxu0 }
0x1204   :  { %3621 = vmatprep.subr.mxu0 %v2482_v16  ;;  %v2480_v5 = vmul.f32 %v4732_v35, %v2455_v57  ;;  %v3973_v35 = vld [vmem:[%s5066_s21 + $0x18] sm:$0xff] }
0x1205   :  { %3622 = vmatpush3.msra.mxu0 %v2482_v16  ;;  %v3224_v16 = vld [vmem:[%s5069_s24 + $0x30] sm:$0xff]  ;;  %v3225_v57 = vld [vmem:[%s5069_s24 + $0x38] sm:$0xff] }
0x1206   :  { %3623 = vmatprep.subr.mxu0 %v2481_v26 }
0x1207   :  { %3624 = vmatpush3.msra.mxu0 %v2481_v26  ;;  %v2732_v26 = vpack.c.bf16 %v3225_v57, %v3224_v16 }
0x1208   :  { %3625 = vmatprep.subr.mxu0 %v2480_v5 }
0x1209   :  { %3626 = vmatpush3.msra.mxu0 %v2480_v5  ;;  %v3222_v5 = vld [vmem:[%s5069_s24 + $0x20] sm:$0xff] }
0x120a   :  { %3627 = vmatprep.subr.mxu0 %v2479_v49 }
0x120b   :  { %3628 = vmatpush3.msra.mxu0 %v2479_v49  ;;  %v3223_v49 = vld [vmem:[%s5069_s24 + $0x28] sm:$0xff] }
0x120c   :  { %3629 = vmatprep.subr.mxu0 %v2478_v12 }
0x120d   :  { %3630 = vmatpush3.msra.mxu0 %v2478_v12  ;;  %v2731_v12 = vpack.c.bf16 %v3223_v49, %v3222_v5 }
0x120e   :  { %3631 = vmatprep.subr.mxu0 %v2477_v27 }
0x120f   :  { %3632 = vmatpush3.msra.mxu0 %v2477_v27 }
0x1210   :  { %3633 = vmatprep.subr.mxu0 %v2476_v51 }
0x1211   :  { %3634 = vmatpush3.msra.mxu0 %v2476_v51 }
0x1212   :  { %3635 = vmatprep.subr.mxu0 %v2475_v34 }
0x1213   :  { %3636 = vmatpush3.msra.mxu0 %v2475_v34 }
0x1214   :  { %3637 = vmatprep.subr.mxu0 %v2474_v53 }
0x1215   :  { %3638 = vmatpush3.msra.mxu0 %v2474_v53 }
0x1216   :  { %3639 = vmatprep.subr.mxu0 %v2473_v36 }
0x1217   :  { %3640 = vmatpush3.msra.mxu0 %v2473_v36 }
0x1218   :  { %3641 = vmatprep.subr.mxu0 %v2472_v50 }
0x1219   :  { %3642 = vmatpush3.msra.mxu0 %v2472_v50 }
0x121a   :  { %3643 = vmatprep.subr.mxu0 %v2471_v48 }
0x121b   :  { %3644 = vmatpush3.msra.mxu0 %v2471_v48 }
0x121c   :  { %3645 = vmatprep.subr.mxu0 %v2470_v54 }
0x121d   :  { %3646 = vmatpush3.msra.mxu0 %v2470_v54 }
0x121e   :  { %3647 = vmatprep.subr.mxu0 %v2469_v58 }
0x121f   :  { %3648 = vmatpush3.msra.mxu0 %v2469_v58 }
0x1220   :  { %3649 = vmatprep.subr.mxu0 %v2468_v45 }
0x1221   :  { %3650 = vmatpush3.msra.mxu0 %v2468_v45 }
0x1222   :  { %3651 = vmatprep.subr.mxu0 %v2467_v38 }
0x1223   :  { %3652 = vmatpush3.msra.mxu0 %v2467_v38 }
0x1224   :  { %3654 = vmatmul.mubr.f32.vlgmr.msra.gmra.mxu0 %v3971_v31  ;;  %3667 = vmatprep.subr.bf16.mxu0 %v2732_v26 }
0x1225   :  { %3656 = vmatprep.mubr.f32.mxu0 %v3972_v55  ;;  %3668 = vmatpush3.bf16.msra.mxu0 %v2732_v26 }
0x1226   :  { %3669 = vmatprep.subr.bf16.mxu0 %v2731_v12 }
0x1228   :  { %3657 = vmatmul.mubr.f32.gmra.mxu0 %v3973_v35 }
0x1229   :  { %3670 = vmatpush3.bf16.msra.mxu0 %v2731_v12 }
0x12e4   :  { %v3655_v24 = vpop.f32.mrf.mxu0 }
0x12e6   :  { %v2549_v3 = vpop.f32.mrf.mxu0 }
0x12e7   :  { %v2573_v14 = vpack.c.bf16 %v3655_v24, %v2549_v3  ;;  %v3220_v24 = vld [vmem:[%s5070_s30 + $0x1] ss:$0 sm:$0xff] }
0x12e8   :  { %v3658_v63 = vpop.f32.mrf.mxu0 }
0x12e9   :  { %3663 = vmatprep.mubr.msk.bf16.mxu1 %vm743_vm7, %v2573_v14 }
0x12ea   :  { %v2559_v42 = vpop.f32.mrf.mxu0 }
0x12eb   :  { %v2574_v37 = vpack.c.bf16 %v3658_v63, %v2559_v42  ;;  %v3221_v42 = vld [vmem:[%s5071_s6 + $0x1] ss:$0 sm:$0xff] }
0x12ed   :  { %3664 = vmatmul.mubr.msk.bf16.vlgmr.msra.gmra.mxu1 %vm743_vm7, %v2574_v37 }
0x13ad   :  { %v3665_v39 = vpop.f32.mrf.mxu1 }
0x13ae   :  { %v2634_v33 = vadd.f32 %v3665_v39, %v4642_v2 }
0x13af   :  { %v2617_v29 = vpop.f32.mrf.mxu1 }
0x13b0   :  { %v2632_v46 = vadd.f32 %v2617_v29, %v4629_v9  ;;  %v4968_v21 = vadd.f32 %v3217_v6, %v2634_v33 }
0x13b1   :  { %v3666_v43 = vpop.f32.mrf.mxu1 }
0x13b2   :  { %v4966_v0 = vadd.f32 %v3217_v6, %v2632_v46  ;;  %v2635_v61 = vadd.f32 %v3666_v43, %v4633_v8  ;;  %v2658_v9 = vsel %vm743_vm7, %v4968_v21, 0.0 }
0x13b3   :  { %v2620_v19 = vpop.f32.mrf.mxu1 }
0x13b4   :  { %v2633_v13 = vadd.f32 %v2620_v19, %v4638_v15  ;;  %v2652_v10 = vsel %vm743_vm7, %v4966_v0, 0.0  ;;  %v4976_v2 = vadd.f32 %v3217_v6, %v2635_v61 }
0x13b5   :  { %2653 = vadd.xlane.f32.xlu0 %v2652_v10 }
0x13b6   :  { %v4974_v1 = vadd.f32 %v3217_v6, %v2633_v13  ;;  %v2661_v8 = vsel %vm743_vm7, %v4976_v2, 0.0 }
0x13b8   :  { %v2655_v23 = vsel %vm743_vm7, %v4974_v1, 0.0 }
0x13b9   :  { %2659 = vadd.xlane.f32.xlu0 %v2658_v9  ;;  %2656 = vadd.xlane.f32.xlu1 %v2655_v23 }
0x13bd   :  { %2662 = vadd.xlane.f32.xlu0 %v2661_v8  ;;  %v3236_v8 = vld [vmem:[%s5072_s12 + $0x70] sm:$0xff] }
0x143e   :  { %v2654_v15 = vpop.xlane.xlu0 %2653 }
0x143f   :  { %v2664_v59 = vmul.f32 0.03125, %v2654_v15  ;;  %v3237_v15 = vld [vmem:[%s5072_s12 + $0x78] sm:$0xff] }
0x1441   :  { %v2668_v62 = vsub.f32 %v4966_v0, %v2664_v59  ;;  %v2830_v59 = vpack.c.bf16 %v3237_v15, %v3236_v8 }
0x1442   :  { %v2660_v32 = vpop.xlane.xlu0 %2659  ;;  %v2657_v28 = vpop.xlane.xlu1 %2656 }
0x1443   :  { %v2666_v17 = vmul.f32 0.03125, %v2660_v32  ;;  %v2665_v22 = vmul.f32 0.03125, %v2657_v28  ;;  %v2672_v47 = vmul.f32 %v2668_v62, %v2668_v62  ;;  %3675 = vmatprep.subr.bf16.mxu1 %v2830_v59  ;;  %v3235_v32 = vld [vmem:[%s5072_s12 + $0x68] sm:$0xff] }
0x1444   :  { %3676 = vmatpush3.bf16.msra.mxu1 %v2830_v59 }
0x1445   :  { %v2670_v7 = vsub.f32 %v4968_v21, %v2666_v17  ;;  %v2669_v18 = vsub.f32 %v4974_v1, %v2665_v22  ;;  %v2676_v20 = vsel %vm743_vm7, %v2672_v47, 0.0  ;;  %v3232_v17 = vld [vmem:[%s5072_s12 + $0x50] sm:$0xff]  ;;  %v3233_v22 = vld [vmem:[%s5072_s12 + $0x58] sm:$0xff] }
0x1446   :  { %2677 = vadd.xlane.f32.xlu0 %v2676_v20  ;;  %v2663_v40 = vpop.xlane.xlu0 %2662  ;;  %v2828_v47 = vpack.c.bf16 %v3233_v22, %v3232_v17 }
0x1447   :  { %v2667_v4 = vmul.f32 0.03125, %v2663_v40  ;;  %v2673_v52 = vmul.f32 %v2669_v18, %v2669_v18  ;;  %v2674_v44 = vmul.f32 %v2670_v7, %v2670_v7  ;;  %v3227_v40 = vld [vmem:[%s5073_s15 + $0x1] ss:$0 sm:$0xff] }
0x1449   :  { %v2671_v41 = vsub.f32 %v4976_v2, %v2667_v4  ;;  %v2679_v60 = vsel %vm743_vm7, %v2673_v52, 0.0  ;;  %v2682_v25 = vsel %vm743_vm7, %v2674_v44, 0.0 }
0x144a   :  { %2680 = vadd.xlane.f32.xlu0 %v2679_v60 }
0x144b   :  { %v2675_v30 = vmul.f32 %v2671_v41, %v2671_v41 }
0x144d   :  { %v2685_v56 = vsel %vm743_vm7, %v2675_v30, 0.0 }
0x144e   :  { %2686 = vadd.xlane.f32.xlu1 %v2685_v56  ;;  %2683 = vadd.xlane.f32.xlu0 %v2682_v25 }
0x14cf   :  { %v2678_v27 = vpop.xlane.xlu0 %2677 }
0x14d0   :  { %v2688_v51 = vmul.f32 0.03125, %v2678_v27 }
0x14d2   :  { %v2692_v34 = vadd.f32 1e-05, %v2688_v51 }
0x14d3   :  { %v2681_v53 = vpop.xlane.xlu0 %2680 }
0x14d4   :  { %3918 = vrsqrt.f32 %v2692_v34  ;;  %v2689_v36 = vmul.f32 0.03125, %v2681_v53 }
0x14d6   :  { %v2693_v50 = vadd.f32 1e-05, %v2689_v36 }
0x14d7   :  { %v2684_v48 = vpop.xlane.xlu0 %2683  ;;  %v2687_v54 = vpop.xlane.xlu1 %2686 }
0x14d8   :  { %3920 = vrsqrt.f32 %v2693_v50  ;;  %v2690_v58 = vmul.f32 0.03125, %v2684_v48  ;;  %v2691_v45 = vmul.f32 0.03125, %v2687_v54 }
0x14da   :  { %v2694_v38 = vadd.f32 1e-05, %v2690_v58  ;;  %v2695_v31 = vadd.f32 1e-05, %v2691_v45 }
0x14dc   :  { %3922 = vrsqrt.f32 %v2694_v38 }
0x14dd   :  { %3924 = vrsqrt.f32 %v2695_v31 }
0x14e1   :  { %v3919_v55 = vpop.eup %3918 }
0x14e2   :  { %v2700_v35 = vmul.f32 %v3919_v55, %v2668_v62  ;;  %v3234_v62 = vld [vmem:[%s5072_s12 + $0x60] sm:$0xff] }
0x14e3   :  { %v2829_v28 = vpack.c.bf16 %v3235_v32, %v3234_v62 }
0x14e4   :  { %v2710_v63 = vmul.f32 %v3220_v24, %v2700_v35 }
0x14e5   :  { %v3921_v3 = vpop.eup %3920  ;;  %3677 = vmatprep.subr.bf16.mxu1 %v2829_v28 }
0x14e6   :  { %v2701_v14 = vmul.f32 %v3921_v3, %v2669_v18  ;;  %v2720_v46 = vadd.f32 %v3221_v42, %v2710_v63  ;;  %3678 = vmatpush3.bf16.msra.mxu1 %v2829_v28  ;;  %v3231_v18 = vld [vmem:[%s5072_s12 + $0x48] sm:$0xff] }
0x14e7   :  { %3679 = vmatprep.subr.bf16.mxu1 %v2828_v47 }
0x14e8   :  { %v2711_v37 = vmul.f32 %v3220_v24, %v2701_v14  ;;  %v2902_v14 = vld [vmem:[%s5075_s20] sm:$0xff] }
0x14e9   :  { %v3923_v39 = vpop.eup %3922 }
0x14ea   :  { %v3925_v29 = vpop.eup %3924  ;;  %v2702_v33 = vmul.f32 %v3923_v39, %v2670_v7  ;;  %v2721_v6 = vadd.f32 %v3221_v42, %v2711_v37  ;;  %3680 = vmatpush3.bf16.msra.mxu1 %v2828_v47  ;;  %v3230_v7 = vld [vmem:[%s5072_s12 + $0x40] sm:$0xff] }
0x14eb   :  { %v2703_v43 = vmul.f32 %v3925_v29, %v2671_v41  ;;  %v2827_v20 = vpack.c.bf16 %v3231_v18, %v3230_v7  ;;  %v3031_v7 = vld [vmem:[%s4187_s3 + $0x10] sm:$0xff]  ;;  %v3032_v18 = vld [vmem:[%s4187_s3 + $0x18] sm:$0xff] }
0x14ec   :  { %v2712_v19 = vmul.f32 %v3220_v24, %v2702_v33  ;;  %v2729_v61 = vpack.c.bf16 %v2721_v6, %v2720_v46  ;;  %v3241_v33 = vld [vmem:[%s5074_s16 + $0x1] ss:$0 sm:$0xff] }
0x14ed   :  { %v2713_v13 = vmul.f32 %v3220_v24, %v2703_v43  ;;  %3681 = vmatprep.subr.bf16.mxu1 %v2827_v20 }
0x14ee   :  { %v2722_v10 = vadd.f32 %v3221_v42, %v2712_v19  ;;  %3671 = vmatprep.mubr.msk.bf16.mxu0 %vm743_vm7, %v2729_v61  ;;  %3682 = vmatpush3.bf16.msra.mxu1 %v2827_v20  ;;  %v3035_v20 = vpack.c.bf16 %v3032_v18, %v3031_v7 }
0x14ef   :  { %v2723_v9 = vadd.f32 %v3221_v42, %v2713_v13 }
0x14f1   :  { %v2730_v23 = vpack.c.bf16 %v2723_v9, %v2722_v10 }
0x14f3   :  { %3672 = vmatmul.mubr.msk.bf16.vlgmr.msra.gmra.mxu0 %vm743_vm7, %v2730_v23 }
0x14f4   :  { %3695 = vmatprep.mubr.msk.f32.mxu0 %vm743_vm7, %v2902_v14 }
0x15b3   :  { %v3673_v4 = vpop.f32.mrf.mxu0 }
0x15b4   :  { %v2790_v52 = vadd.f32 %v3673_v4, %v3227_v40  ;;  %v3030_v4 = vld [vmem:[%s4187_s3 + $0x8] sm:$0xff] }
0x15b5   :  { %v2781_v41 = vpop.f32.mrf.mxu0 }
0x15b6   :  { %v2782_v60 = vadd.f32 %v3227_v40, %v2781_v41  ;;  %v2802_v44 = vmul.f32 0.70710677, %v2790_v52  ;;  %v2798_v45 = vmul.f32 0.5, %v2790_v52 }
0x15b7   :  { %v3674_v30 = vpop.f32.mrf.mxu0 }
0x15b8   :  { %v2800_v56 = vmul.f32 0.70710677, %v2782_v60  ;;  %v2793_v25 = vadd.f32 %v3674_v30, %v3227_v40  ;;  %v2796_v48 = vmul.f32 0.5, %v2782_v60 }
0x15b9   :  { %v2784_v16 = vpop.f32.mrf.mxu0 }
0x15ba   :  { %3926 = verf.f32 %v2800_v56  ;;  %v2803_v57 = vmul.f32 0.70710677, %v2793_v25  ;;  %v2785_v26 = vadd.f32 %v3227_v40, %v2784_v16  ;;  %v2799_v50 = vmul.f32 0.5, %v2793_v25  ;;  %v3029_v40 = vld [vmem:[%s4187_s3] sm:$0xff]  ;;  %s4031_s3 = smov [#allocation2]  }
0x15bb   :  { %3928 = verf.f32 %v2802_v44  ;;  %v3034_v52 = vpack.c.bf16 %v3030_v4, %v3029_v40  ;;  %s3087_s27 = sshll.u32 %s4031_s3, 4  ;;  %s3088_s27 = int_to_ptr.vmem [resolvable:$true] %s3087_s27 }
0x15bc   :  { %3930 = verf.f32 %v2803_v57  ;;  %v2801_v5 = vmul.f32 0.70710677, %v2785_v26  ;;  %v2797_v54 = vmul.f32 0.5, %v2785_v26  ;;  %v3244_v57 = vld [vmem:[%s4177_s14] ss:$0 sm:$0xff]  ;;  %s3974_s14 = scalar_lea.vmem %s3088_s27, 256  ;;  %p3979_p1 = scmp.lt.s32.totalorder %s3088_s27, %s3088_s27 }
0x15bd   :  { %p3975_p0 = scmp.ne.s32.totalorder %s3088_s27, %s3974_s14  ;;  %p3980_p2 = scmp.lt.s32.totalorder %s3974_s14, %s3974_s14 }
0x15be   :  { %3932 = verf.f32 %v2801_v5 }
0x15bf   :  { %p3981_p3 = por %p3980_p2, %p3979_p1 }
0x15c1   :  { %p3982_p4 = pnand %p3981_p3, %p3975_p0 }
0x15c7   :  { %v3927_v49 = vpop.eup %3926 }
0x15c8   :  { %v3929_v12 = vpop.eup %3928  ;;  %v2808_v51 = vadd.f32 1.0, %v3927_v49 }
0x15c9   :  { %v3931_v27 = vpop.eup %3930  ;;  %v2810_v36 = vadd.f32 1.0, %v3929_v12 }
0x15ca   :  { %v2811_v34 = vadd.f32 1.0, %v3931_v27  ;;  %v2812_v31 = vmul.f32 %v2808_v51, %v2796_v48  ;;  %v3245_v27 = vld [vmem:[%s4182_s8] ss:$0 sm:$0xff] }
0x15cb   :  { %v3933_v53 = vpop.eup %3932  ;;  %v2814_v35 = vmul.f32 %v2810_v36, %v2798_v45 }
0x15cc   :  { %v2809_v58 = vadd.f32 1.0, %v3933_v53  ;;  %v2815_v38 = vmul.f32 %v2811_v34, %v2799_v50 }
0x15ce   :  { %v2813_v55 = vmul.f32 %v2809_v58, %v2797_v54  ;;  %v2826_v3 = vpack.c.bf16 %v2815_v38, %v2814_v35 }
0x15d0   :  { %v2825_v24 = vpack.c.bf16 %v2813_v55, %v2812_v31 }
0x15d2   :  { %3683 = vmatprep.mubr.msk.bf16.mxu1 %vm1746_vm8, %v2825_v24 }
0x15d3   :  { %3684 = vmatmul.mubr.msk.bf16.vlgmr.msra.gmra.mxu1 %vm1746_vm8, %v2826_v3 }
0x1693   :  { %v3685_v63 = vpop.f32.mrf.mxu1 }
0x1694   :  { %v2888_v39 = vadd.f32 %v3685_v63, %v4968_v21  ;;  %v2903_v21 = vld [vmem:[%s5075_s20 + $0x8] sm:$0xff] }
0x1695   :  { %v2871_v42 = vpop.f32.mrf.mxu1 }
0x1696   :  { %v2900_v19 = vadd.f32 %v3241_v33, %v2888_v39  ;;  %v2886_v61 = vadd.f32 %v2871_v42, %v4966_v0 }
0x1697   :  { %v3686_v37 = vpop.f32.mrf.mxu1 }
0x1698   :  { %v2889_v29 = vadd.f32 %v3686_v37, %v4976_v2  ;;  %v2898_v10 = vadd.f32 %v3241_v33, %v2886_v61 }
0x1699   :  { %v2874_v46 = vpop.f32.mrf.mxu1 }
0x169a   :  { %v2901_v6 = vadd.f32 %v3241_v33, %v2889_v29  ;;  %v2887_v43 = vadd.f32 %v2874_v46, %v4974_v1 }
0x169c   :  { %3687 = vmatprep.subr.mxu0 %v2901_v6  ;;  %v2899_v13 = vadd.f32 %v3241_v33, %v2887_v43 }
0x169d   :  { %3688 = vmatpush3.msra.mxu0 %v2901_v6 }
0x169e   :  { %3689 = vmatprep.subr.mxu0 %v2900_v19 }
0x169f   :  { %3690 = vmatpush3.msra.mxu0 %v2900_v19 }
0x16a0   :  { %3691 = vmatprep.subr.mxu0 %v2899_v13 }
0x16a1   :  { %3692 = vmatpush3.msra.mxu0 %v2899_v13 }
0x16a2   :  { %3693 = vmatprep.subr.mxu0 %v2898_v10 }
0x16a3   :  { %3694 = vmatpush3.msra.mxu0 %v2898_v10 }
0x16a4   :  { %3696 = vmatmul.mubr.msk.f32.vlgmr.msra.gmra.mxu0 %vm743_vm7, %v2903_v21  ;;  %3698 = vmatprep.subr.bf16.mxu0 %v4027_v11 }
0x16a5   :  { %3702 = vmatprep.mubr.msk.bf16.mxu0 %vm4028_vm0, %v4027_v11  ;;  %3699 = vmatpush3.bf16.msra.mxu0 %v3035_v20 }
0x16a6   :  { %3700 = vmatprep.subr.bf16.mxu0 %v4027_v11 }
0x16a9   :  { %3701 = vmatpush3.bf16.msra.mxu0 %v3034_v52 }
0x1764   :  { %v3697_v1 = vpop.f32.mrf.mxu0 }
0x1765   :  { %v2990_v0 = vsel %vm743_vm7, %v3697_v1, 0.0 }
0x1766   :  { %2991 = vadd.xlane.f32.xlu1 %v2990_v0  ;;  %v2976_v2 = vpop.f32.mrf.mxu0 }
0x1767   :  { %v2987_v9 = vsel %vm743_vm7, %v2976_v2, 0.0 }
0x1768   :  { %2988 = vadd.xlane.f32.xlu0 %v2987_v9 }
0x17ef   :  { %v2992_v23 = vpop.xlane.xlu1 %2991 }
0x17f0   :  { %v2994_v8 = vmul.f32 0.03125, %v2992_v23 }
0x17f1   :  { %v2989_v15 = vpop.xlane.xlu0 %2988 }
0x17f2   :  { %v2996_v59 = vsub.f32 %v3697_v1, %v2994_v8  ;;  %v2993_v62 = vmul.f32 0.03125, %v2989_v15 }
0x17f4   :  { %v2995_v32 = vsub.f32 %v2976_v2, %v2993_v62  ;;  %v2998_v28 = vmul.f32 %v2996_v59, %v2996_v59 }
0x17f6   :  { %v3002_v17 = vsel %vm743_vm7, %v2998_v28, 0.0  ;;  %v2997_v22 = vmul.f32 %v2995_v32, %v2995_v32 }
0x17f7   :  { %3003 = vadd.xlane.f32.xlu1 %v3002_v17 }
0x17f8   :  { %v2999_v47 = vsel %vm743_vm7, %v2997_v22, 0.0 }
0x17f9   :  { %3000 = vadd.xlane.f32.xlu0 %v2999_v47 }
0x1880   :  { %v3004_v41 = vpop.xlane.xlu1 %3003 }
0x1881   :  { %v3006_v60 = vmul.f32 0.03125, %v3004_v41 }
0x1882   :  { %v3001_v44 = vpop.xlane.xlu0 %3000 }
0x1883   :  { %v3008_v30 = vadd.f32 1e-05, %v3006_v60  ;;  %v3005_v56 = vmul.f32 0.03125, %v3001_v44 }
0x1885   :  { %3934 = vrsqrt.f32 %v3008_v30  ;;  %v3007_v25 = vadd.f32 1e-05, %v3005_v56 }
0x1887   :  { %3936 = vrsqrt.f32 %v3007_v25 }
0x1892   :  { %v3935_v16 = vpop.eup %3934 }
0x1893   :  { %v3012_v26 = vmul.f32 %v3935_v16, %v2996_v59 }
0x1894   :  { %v3937_v5 = vpop.eup %3936 }
0x1895   :  { %v3011_v49 = vmul.f32 %v3937_v5, %v2995_v32  ;;  %v3020_v12 = vmul.f32 %v3244_v57, %v3012_v26 }
0x1897   :  { %v3019_v51 = vmul.f32 %v3244_v57, %v3011_v49  ;;  %v3028_v11 = vadd.f32 %v3245_v27, %v3020_v12 }
0x1899   :  { %v3027_v34 = vadd.f32 %v3245_v27, %v3019_v51 }
0x189b   :  { %v3033_v53 = vpack.c.bf16 %v3028_v11, %v3027_v34 }
0x189d   :  { %3703 = vmatmul.mubr.msk.bf16.vlgmr.msra.gmra.mxu0 %vm743_vm7, %v3033_v53 }
0x195d   :  { %v3073_v36 = vpop.f32.mrf.mxu0 }
0x195e   :  { %3080 = vst [vmem:[#allocation2] sm:$0xff] %v3073_v36 }
0x195f   :  { %v3704_v50 = vpop.f32.mrf.mxu0 }
0x1961   :  { %v3076_v48 = vpop.f32.mrf.mxu0 }
0x1962   :  { %3081 = vst [vmem:[#allocation2 + $0x8] sm:$0xff] %v3076_v48 }
0x1963   :  { %v3705_v54 = vpop.f32.mrf.mxu0 }
0x1964   :  { %3985 = shalt.err (!%p3982_p4)
}
0x1965   :  { %s4032_s8 = smov 128   ;;  %s4033_s4 = smov 8  }
0x1966   :  { %3093 = dma.vmem_to_hbm [thread:$0]  %s3088_s27, 256, %s4192_s19, [#allocation3], %s4032_s8, %s4032_s8, %s4033_s4  }
0x1967   :  { %3994 = dma.done.wait [#allocation3], 256  }
0x1968   :  { %3995 = vsyncadd [#allocation3], 4294967040 }
0x1969   :  { %3097 = vsyncpa [#allocation3], 1 }

// kernel: tpu_custom_call.1
= control target key start
LH: loop header
LB: loop body
LE: loop exit
PB: predicated region body
PF: predicated region fallthrough
CT: control target
= control target key end

     0   :  { %s3996_s6 = smov 1   ;;  %s3997_s10 = smov 2   ;;  %s5036_s0 = inlined_call_operand.smem [shape: u32[31], index: -1, kind: input, shape index: {}] }
   0x1   :  { %s4042_s5 = sld [smem:[%s5036_s0]]   ;;  %s3998_s14 = smov 3  }
   0x2   :  { %s4047_s9 = sld [smem:[%s5036_s0 + %s3996_s6]]   ;;  %s3999_s18 = smov 4  }
   0x3   :  { %s4052_s13 = sld [smem:[%s5036_s0 + %s3997_s10]]   ;;  %s4000_s22 = smov 5  }
   0x4   :  { %s4057_s17 = sld [smem:[%s5036_s0 + %s3998_s14]]   ;;  %s4001_s26 = smov 6  }
   0x5   :  { %s4062_s21 = sld [smem:[%s5036_s0 + %s3999_s18]]   ;;  %s4002_s30 = smov 7  }
   0x6   :  { %s4067_s25 = sld [smem:[%s5036_s0 + %s4000_s22]]   ;;  %s4003_s4 = smov 8  }
   0x7   :  { %s4072_s29 = sld [smem:[%s5036_s0 + %s4001_s26]]   ;;  %s4004_s10 = smov 9  }
   0x8   :  { %s4077_s3 = sld [smem:[%s5036_s0 + %s4002_s30]]   ;;  %s4005_s15 = smov 10  }
   0x9   :  { %s4082_s8 = sld [smem:[%s5036_s0 + %s4003_s4]]   ;;  %s4006_s20 = smov 11  }
   0xa   :  { %s4087_s14 = sld [smem:[%s5036_s0 + %s4004_s10]]   ;;  %s4007_s26 = smov 12  }
   0xb   :  { %s4092_s19 = sld [smem:[%s5036_s0 + %s4005_s15]]   ;;  %s4008_s1 = smov 13  }
   0xc   :  { %s4097_s24 = sld [smem:[%s5036_s0 + %s4006_s20]]   ;;  %s4009_s7 = smov 14  }
   0xd   :  { %s4102_s30 = sld [smem:[%s5036_s0 + %s4007_s26]]   ;;  %s4010_s15 = smov 15  }
   0xe   :  { %5050 = sst [smem:[#allocation5_spill]] %s4077_s3  ;;  %s4011_s22 = smov 16  }
   0xf   :  { %5051 = sst [smem:[#allocation6_spill]] %s4082_s8  ;;  %s4012_s28 = smov 17  }
  0x10   :  { %5052 = sst [smem:[#allocation7_spill]] %s4087_s14 }
  0x11   :  { %5053 = sst [smem:[#allocation8_spill]] %s4092_s19 }
  0x12   :  { %s4107_s6 = sld [smem:[%s5036_s0 + %s4008_s1]]  }
  0x13   :  { %s4112_s12 = sld [smem:[%s5036_s0 + %s4009_s7]]   ;;  %s4013_s7 = smov 18  }
  0x14   :  { %s4117_s20 = sld [smem:[%s5036_s0 + %s4010_s15]]   ;;  %s4014_s15 = smov 19  }
  0x15   :  { %s4122_s27 = sld [smem:[%s5036_s0 + %s4011_s22]]   ;;  %s4015_s22 = smov 20  }
  0x16   :  { %s4127_s4 = sld [smem:[%s5036_s0 + %s4012_s28]]   ;;  %s4016_s28 = smov 21  }
  0x17   :  { %s4132_s19 = sld [smem:[%s5036_s0 + %s4013_s7]]   ;;  %s4017_s7 = smov 22  }
  0x18   :  { %s4137_s14 = sld [smem:[%s5036_s0 + %s4014_s15]]   ;;  %s4018_s15 = smov 23  }
  0x19   :  { %s4142_s8 = sld [smem:[%s5036_s0 + %s4015_s22]]   ;;  %s4019_s22 = smov 24  }
  0x1a   :  { %s4147_s3 = sld [smem:[%s5036_s0 + %s4016_s28]]   ;;  %s4020_s28 = smov 25  }
  0x1d   :  { %5054 = sst [smem:[#allocation9_spill]] %s4132_s19 }
  0x1e   :  { %5055 = sst [smem:[#allocation10_spill]] %s4137_s14 }
  0x1f   :  { %5056 = sst [smem:[#allocation11_spill]] %s4142_s8 }
  0x20   :  { %5057 = sst [smem:[#allocation12_spill]] %s4147_s3 }
  0x21   :  { %s4152_s19 = sld [smem:[%s5036_s0 + %s4017_s7]]   ;;  %s4021_s7 = smov 26  }
  0x22   :  { %s4157_s14 = sld [smem:[%s5036_s0 + %s4018_s15]]   ;;  %s4022_s15 = smov 27  }
  0x23   :  { %s4162_s8 = sld [smem:[%s5036_s0 + %s4019_s22]]   ;;  %s4023_s22 = smov 28  }
  0x24   :  { %s4167_s3 = sld [smem:[%s5036_s0 + %s4020_s28]]   ;;  %s4024_s28 = smov 29  }
  0x27   :  { %5058 = sst [smem:[#allocation13_spill]] %s4152_s19 }
  0x28   :  { %5059 = sst [smem:[#allocation14_spill]] %s4157_s14 }
  0x29   :  { %5060 = sst [smem:[#allocation15_spill]] %s4162_s8 }
  0x2a   :  { %5061 = sst [smem:[#allocation16_spill]] %s4167_s3 }
  0x2b   :  { %s4172_s19 = sld [smem:[%s5036_s0 + %s4021_s7]]   ;;  %s4025_s7 = smov 30  }
  0x2c   :  { %s4177_s14 = sld [smem:[%s5036_s0 + %s4022_s15]]  }
  0x2d   :  { %s4182_s8 = sld [smem:[%s5036_s0 + %s4023_s22]]  }
  0x2e   :  { %s4187_s3 = sld [smem:[%s5036_s0 + %s4024_s28]]  }
  0x31   :  { %5062 = sst [smem:[#allocation17_spill]] %s4172_s19 }
  0x32   :  { %s4192_s19 = sld [smem:[%s5036_s0 + %s4025_s7]]  }
  0x33   :  { %v188_v0 = vld [vmem:[%s4047_s9] sm:$0xff]  ;;  %v4026_v2 = vmov 0   ;;  %v131_v4 = vld [vmem:[%s4097_s24 + $0x8] sm:$0xff]  ;;  %v4027_v11 = vmov 0.0   ;;  %vm4028_vm0 = vmmov 0  }
  0x34   :  { %v289_v1 = vld [vmem:[%s4052_s13] sm:$0xff]  ;;  %3748 = vset.pattern.permute.xlu0 %v4026_v2  ;;  %3749 = vset.pattern.permute.xlu1 %v4026_v2  ;;  %v129_v7 = vld [vmem:[%s4042_s5 + $0x8] sm:$0xff] }
  0x35   :  { %v130_v3 = vld [vmem:[%s4097_s24] sm:$0xff]  ;;  %193 = vperm.xlu0 %3748, %v188_v0   ;;  %292 = vperm.xlu1 %3749, %v289_v1   ;;  %v205_v8 = vld [vmem:[%s4107_s6 + $0x8] sm:$0xff] }
  0x36   :  { %v133_v5 = vpack.c.bf16 %v131_v4, %v130_v3  ;;  %v128_v6 = vld [vmem:[%s4042_s5] sm:$0xff]  ;;  %v189_v9 = vld [vmem:[%s4047_s9 + $0x8] sm:$0xff]  ;;  %3403 = vmatprep.subr.bf16.mxu0 %v4027_v11  ;;  %3405 = vmatprep.mubr.msk.bf16.mxu0 %vm4028_vm0, %v4027_v11 }
  0x37   :  { %v290_v10 = vld [vmem:[%s4052_s13 + $0x8] sm:$0xff]  ;;  %v132_v12 = vpack.c.bf16 %v129_v7, %v128_v6 }
  0x38   :  { %66 = vsyncpa [#allocation3], 0  ;;  %3404 = vmatpush3.bf16.msra.mxu0 %v133_v5  ;;  %vm141_vm1 = vcmask 130048   ;;  %3409 = vmatprep.subr.mxu1 %v205_v8  ;;  %v204_v13 = vld [vmem:[%s4107_s6] sm:$0xff]  ;;  %v306_v15 = vld [vmem:[%s4112_s12 + $0x18] sm:$0xff]  ;;  %v190_v19 = vlaneseq  ;;  %vm308_vm2 = vcmask 326656  }
  0x39   :  { %v307_v14 = vld [vmem:[%s4112_s12 + $0x20] sm:$0xff]  ;;  %3410 = vmatpush3.msra.mxu1 %v205_v8  ;;  %196 = vperm.xlu0 %3748, %v189_v9   ;;  %v305_v16 = vld [vmem:[%s4112_s12 + $0x10] sm:$0xff]  ;;  %v304_v17 = vld [vmem:[%s4112_s12 + $0x8] sm:$0xff]  ;;  %vm743_vm7 = vcmask 261120   ;;  %s5063_s0 = sld [smem:[#allocation9_spill]]  ;;  %s4029_s9 = smov 96  }
  0x3a   :  { %3416 = vmatprep.subr.mxu0 %v307_v14  ;;  %295 = vperm.xlu1 %3749, %v290_v10   ;;  %v303_v18 = vld [vmem:[%s4112_s12] sm:$0xff]  ;;  %v191_v20 = vand.u32 127, %v190_v19  ;;  %v593_v41 = vld [vmem:[%s4067_s25 + $0x8] sm:$0xff]  ;;  %v594_v43 = vld [vmem:[%s4067_s25 + $0x10] sm:$0xff]  ;;  %s5064_s5 = sld [smem:[#allocation5_spill]]  ;;  %vm1746_vm8 = vcmask 523264  }
  0x3b   :  { %3406 = vmatmul.mubr.msk.bf16.vlgmr.msra.gmra.mxu0 %vm141_vm1, %v132_v12  ;;  %3411 = vmatprep.subr.mxu1 %v204_v13  ;;  %v394_v33 = vld [vmem:[%s4062_s21] sm:$0xff]  ;;  %v595_v44 = vld [vmem:[%s4067_s25 + $0x18] sm:$0xff]  ;;  %v395_v48 = vld [vmem:[%s4062_s21 + $0x8] sm:$0xff]  ;;  %s5065_s13 = sld [smem:[#allocation6_spill]] }
  0x3c   :  { %3412 = vmatpush3.msra.mxu1 %v204_v13  ;;  %3417 = vmatpush3.msra.mxu0 %v307_v14  ;;  %v592_v34 = vld [vmem:[%s4067_s25] sm:$0xff]  ;;  %v396_v49 = vld [vmem:[%s4062_s21 + $0x10] sm:$0xff]  ;;  %v397_v51 = vld [vmem:[%s4062_s21 + $0x18] sm:$0xff]  ;;  %s5066_s21 = sld [smem:[#allocation7_spill]] }
  0x3d   :  { %3418 = vmatprep.subr.mxu0 %v306_v15  ;;  %v3128_v35 = vld [vmem:[%s4102_s30] ss:$0 sm:$0xff]  ;;  %v391_v53 = vld [vmem:[%s4057_s17 + $0x8] sm:$0xff]  ;;  %v392_v54 = vld [vmem:[%s4057_s17 + $0x10] sm:$0xff]  ;;  %s5067_s25 = sld [smem:[#allocation10_spill]] }
  0x3e   :  { %3419 = vmatpush3.msra.mxu0 %v306_v15  ;;  %v390_v52 = vld [vmem:[%s4057_s17] sm:$0xff]  ;;  %v393_v55 = vld [vmem:[%s4057_s17 + $0x18] sm:$0xff]  ;;  %v698_v0 = vld [vmem:[%s4072_s29 + $0x8] sm:$0xff]  ;;  %s4030_s17 = smov 64   ;;  %s5069_s24 = sld [smem:[#allocation14_spill]] }
  0x3f   :  { %3420 = vmatprep.subr.mxu0 %v305_v16  ;;  %v697_v4 = vld [vmem:[%s4072_s29] sm:$0xff]  ;;  %s5070_s30 = sld [smem:[#allocation12_spill]] }
  0x40   :  { %3421 = vmatpush3.msra.mxu0 %v305_v16  ;;  %v699_v16 = vld [vmem:[%s4072_s29 + $0x10] sm:$0xff]  ;;  %s5071_s6 = sld [smem:[#allocation13_spill]] }
  0x41   :  { %3422 = vmatprep.subr.mxu0 %v304_v17  ;;  %s5072_s12 = sld [smem:[#allocation16_spill]] }
  0x42   :  { %3423 = vmatpush3.msra.mxu0 %v304_v17  ;;  %s5073_s15 = sld [smem:[#allocation15_spill]] }
  0x43   :  { %3424 = vmatprep.subr.mxu0 %v303_v18  ;;  %s5074_s16 = sld [smem:[#allocation17_spill]] }
  0x44   :  { %3425 = vmatpush3.msra.mxu0 %v303_v18 }
  0xb0   :  { %v194_v21 = vpop.permute.xlu0 %193  ;;  %v293_v22 = vpop.permute.xlu1 %292 }
  0xb1   :  { %vm198_vm3 = vcmp.eq.s32.totalorder %v194_v21, %v191_v20  ;;  %vm297_vm4 = vcmp.eq.s32.totalorder %v293_v22, %v191_v20 }
  0xb2   :  { %v3130_v23 = vsel %vm198_vm3, 1.0, %v4027_v11  ;;  %v3134_v24 = vsel %vm297_vm4, 1.0, %v4027_v11 }
  0xb3   :  { %3413 = vmatprep.mubr.msk.f32.mxu1 %vm141_vm1, %v3130_v23  ;;  %3426 = vmatprep.mubr.msk.f32.mxu0 %vm308_vm2, %v3134_v24 }
  0xb4   :  { %v197_v25 = vpop.permute.xlu0 %196 }
  0xb5   :  { %v296_v26 = vpop.permute.xlu1 %295  ;;  %vm199_vm5 = vcmp.eq.s32.totalorder %v197_v25, %v191_v20 }
  0xb6   :  { %vm298_vm6 = vcmp.eq.s32.totalorder %v296_v26, %v191_v20  ;;  %v3131_v27 = vsel %vm199_vm5, 1.0, %v4027_v11  ;;  %v700_v20 = vld [vmem:[%s4072_s29 + $0x18] sm:$0xff]  ;;  %s5068_s29 = sld [smem:[#allocation11_spill]] }
  0xb7   :  { %v3135_v28 = vsel %vm298_vm6, 1.0, %v4027_v11  ;;  %3414 = vmatmul.mubr.msk.f32.vlgmr.msra.gmra.mxu1 %vm141_vm1, %v3131_v27 }
  0xb8   :  { %3427 = vmatmul.mubr.msk.f32.vlgmr.msra.gmra.mxu0 %vm308_vm2, %v3135_v28  ;;  %3433 = vmatprep.mubr.msk.f32.mxu1 %vm141_vm1, %v394_v33 }
  0xb9   :  { %3453 = vmatprep.mubr.msk.f32.mxu0 %vm141_vm1, %v592_v34 }
  0xfb   :  { %v179_v29 = vpop.f32.mrf.mxu0 }
  0xfc   :  { %v180_v42 = vadd.f32 %v3128_v35, %v179_v29 }
  0xfd   :  { %v3407_v30 = vpop.f32.mrf.mxu0 }
  0xff   :  { %v182_v31 = vpop.f32.mrf.mxu0 }
 0x100   :  { %v183_v36 = vadd.f32 %v3128_v35, %v182_v31 }
 0x101   :  { %v3408_v32 = vpop.f32.mrf.mxu0 }
 0x177   :  { %v3415_v37 = vpop.f32.mrf.mxu1 }
 0x178   :  { %v3428_v38 = vpop.f32.mrf.mxu0  ;;  %3750 = vtanh.f32 %v3415_v37 }
 0x179   :  { %3449 = vmatprep.subr.mxu0 %v3428_v38  ;;  %3752 = vtanh.f32 %v183_v36  ;;  %v278_v39 = vpop.f32.mrf.mxu1 }
 0x17a   :  { %v381_v40 = vpop.f32.mrf.mxu0  ;;  %3450 = vmatpush3.msra.mxu0 %v3428_v38  ;;  %3754 = vtanh.f32 %v278_v39 }
 0x17b   :  { %3451 = vmatprep.subr.mxu0 %v381_v40  ;;  %3756 = vtanh.f32 %v180_v42 }
 0x17c   :  { %3452 = vmatpush3.msra.mxu0 %v381_v40 }
 0x17d   :  { %3454 = vmatmul.mubr.msk.f32.vlgmr.msra.gmra.mxu0 %vm141_vm1, %v593_v41 }
 0x17e   :  { %3456 = vmatprep.mubr.msk.f32.mxu0 %vm141_vm1, %v594_v43 }
 0x181   :  { %3457 = vmatmul.mubr.msk.f32.gmra.mxu0 %vm141_vm1, %v595_v44 }
 0x185   :  { %v3751_v45 = vpop.eup %3750 }
 0x186   :  { %v3753_v46 = vpop.eup %3752  ;;  %3429 = vmatprep.subr.mxu1 %v3751_v45 }
 0x187   :  { %v3755_v47 = vpop.eup %3754  ;;  %3430 = vmatpush3.msra.mxu1 %v3751_v45  ;;  %v819_v45 = vld [vmem:[%s4127_s4 + $0x10] sm:$0xff] }
 0x188   :  { %3431 = vmatprep.subr.mxu1 %v3755_v47  ;;  %v3757_v50 = vpop.eup %3756 }
 0x189   :  { %3432 = vmatpush3.msra.mxu1 %v3755_v47 }
 0x18a   :  { %3434 = vmatmul.mubr.msk.f32.vlgmr.msra.gmra.mxu1 %vm141_vm1, %v395_v48  ;;  %3439 = vmatprep.subr.mxu1 %v3753_v46  ;;  %v817_v48 = vld [vmem:[%s4127_s4] sm:$0xff] }
 0x18b   :  { %3440 = vmatpush3.msra.mxu1 %v3753_v46  ;;  %3436 = vmatprep.mubr.msk.f32.mxu1 %vm141_vm1, %v396_v49  ;;  %v820_v46 = vld [vmem:[%s4127_s4 + $0x18] sm:$0xff]  ;;  %v818_v49 = vld [vmem:[%s4127_s4 + $0x8] sm:$0xff] }
 0x18c   :  { %3441 = vmatprep.subr.mxu1 %v3757_v50  ;;  %v824_v47 = vpack.c.bf16 %v820_v46, %v819_v45  ;;  %v4320_v46 = vld [vmem:[%s5064_s5 + $0x8] sm:$0xff] }
 0x18d   :  { %3442 = vmatpush3.msra.mxu1 %v3757_v50  ;;  %v823_v50 = vpack.c.bf16 %v818_v49, %v817_v48  ;;  %v4324_v48 = vld [vmem:[%s5064_s5 + $0x28] sm:$0xff] }
 0x18e   :  { %3437 = vmatmul.mubr.msk.f32.gmra.mxu1 %vm141_vm1, %v397_v51  ;;  %3459 = vmatprep.subr.bf16.mxu1 %v824_v47 }
 0x18f   :  { %3443 = vmatprep.mubr.msk.f32.mxu1 %vm141_vm1, %v390_v52 }
 0x192   :  { %3444 = vmatmul.mubr.msk.f32.vlgmr.msra.gmra.mxu1 %vm141_vm1, %v391_v53 }
 0x193   :  { %3446 = vmatprep.mubr.msk.f32.mxu1 %vm141_vm1, %v392_v54  ;;  %3460 = vmatpush3.bf16.msra.mxu1 %v824_v47 }
 0x194   :  { %3461 = vmatprep.subr.bf16.mxu1 %v823_v50 }
 0x196   :  { %3447 = vmatmul.mubr.msk.f32.gmra.mxu1 %vm141_vm1, %v393_v55 }
 0x197   :  { %3462 = vmatpush3.bf16.msra.mxu1 %v823_v50 }
 0x23d   :  { %v3455_v59 = vpop.f32.mrf.mxu0 }
 0x23f   :  { %v674_v62 = vpop.f32.mrf.mxu0 }
 0x241   :  { %v3458_v6 = vpop.f32.mrf.mxu0 }
 0x243   :  { %v684_v15 = vpop.f32.mrf.mxu0 }
 0x24a   :  { %v3435_v56 = vpop.f32.mrf.mxu1 }
 0x24c   :  { %v476_v57 = vpop.f32.mrf.mxu1 }
 0x24e   :  { %v3438_v58 = vpop.f32.mrf.mxu1 }
 0x250   :  { %v486_v60 = vpop.f32.mrf.mxu1 }
 0x252   :  { %v3445_v61 = vpop.f32.mrf.mxu1 }
 0x253   :  { %v579_v63 = vadd.f32 %v3445_v61, %v3435_v56 }
 0x254   :  { %v573_v1 = vpop.f32.mrf.mxu1 }
 0x255   :  { %v694_v2 = vadd.f32 %v3455_v59, %v579_v63  ;;  %v574_v3 = vadd.f32 %v573_v1, %v476_v57 }
 0x256   :  { %v3448_v5 = vpop.f32.mrf.mxu1 }
 0x257   :  { %v4246_v7 = vadd.f32 %v698_v0, %v694_v2  ;;  %v693_v8 = vadd.f32 %v674_v62, %v574_v3  ;;  %v589_v9 = vadd.f32 %v3448_v5, %v3438_v58  ;;  %v3150_v0 = vld [vmem:[%s4117_s20] ss:$0 sm:$0xff] }
 0x258   :  { %v583_v10 = vpop.f32.mrf.mxu1  ;;  %v3151_v5 = vld [vmem:[%s4122_s27] ss:$0 sm:$0xff] }
 0x259   :  { %v4248_v12 = vadd.f32 %v697_v4, %v693_v8  ;;  %v584_v13 = vadd.f32 %v583_v10, %v486_v60  ;;  %v747_v14 = vsel %vm743_vm7, %v4246_v7, 0.0  ;;  %v696_v17 = vadd.f32 %v3458_v6, %v589_v9 }
 0x25a   :  { %748 = vadd.xlane.f32.xlu1 %v747_v14 }
 0x25b   :  { %v695_v18 = vadd.f32 %v684_v15, %v584_v13  ;;  %v744_v19 = vsel %vm743_vm7, %v4248_v12, 0.0  ;;  %v4258_v22 = vadd.f32 %v700_v20, %v696_v17 }
 0x25c   :  { %745 = vadd.xlane.f32.xlu0 %v744_v19 }
 0x25d   :  { %v4256_v21 = vadd.f32 %v699_v16, %v695_v18  ;;  %v753_v24 = vsel %vm743_vm7, %v4258_v22, 0.0 }
 0x25f   :  { %v750_v23 = vsel %vm743_vm7, %v4256_v21, 0.0 }
 0x260   :  { %751 = vadd.xlane.f32.xlu0 %v750_v23 }
 0x264   :  { %754 = vadd.xlane.f32.xlu0 %v753_v24  ;;  %v3152_v24 = vld [vmem:[%s5063_s0] ss:$0 sm:$0xff] }
 0x2e3   :  { %v749_v25 = vpop.xlane.xlu1 %748 }
 0x2e4   :  { %v758_v26 = vmul.f32 0.03125, %v749_v25 }
 0x2e5   :  { %v746_v27 = vpop.xlane.xlu0 %745 }
 0x2e6   :  { %v762_v28 = vsub.f32 %v4246_v7, %v758_v26  ;;  %v757_v29 = vmul.f32 0.03125, %v746_v27  ;;  %v4282_v27 = vld [vmem:[%s5064_s5 + $0x10] sm:$0xff] }
 0x2e8   :  { %v761_v30 = vsub.f32 %v4248_v12, %v757_v29  ;;  %v766_v31 = vmul.f32 %v762_v28, %v762_v28  ;;  %v4285_v29 = vld [vmem:[%s5064_s5 + $0x30] sm:$0xff] }
 0x2e9   :  { %v752_v32 = vpop.xlane.xlu0 %751 }
 0x2ea   :  { %v759_v33 = vmul.f32 0.03125, %v752_v32  ;;  %v772_v34 = vsel %vm743_vm7, %v766_v31, 0.0  ;;  %v765_v35 = vmul.f32 %v761_v30, %v761_v30  ;;  %v4291_v32 = vld [vmem:[%s5064_s5] sm:$0xff] }
 0x2eb   :  { %773 = vadd.xlane.f32.xlu0 %v772_v34  ;;  %v4297_v34 = vld [vmem:[%s5064_s5 + $0x70] sm:$0xff] }
 0x2ec   :  { %v763_v36 = vsub.f32 %v4256_v21, %v759_v33  ;;  %v769_v37 = vsel %vm743_vm7, %v765_v35, 0.0  ;;  %v4294_v33 = vld [vmem:[%s5064_s5 + $0x20] sm:$0xff]  ;;  %v4300_v35 = vld [vmem:[%s5064_s5 + $0x18] sm:$0xff] }
 0x2ed   :  { %770 = vadd.xlane.f32.xlu1 %v769_v37  ;;  %v755_v38 = vpop.xlane.xlu0 %754  ;;  %v4303_v37 = vld [vmem:[%s5064_s5 + $0x38] sm:$0xff] }
 0x2ee   :  { %v760_v39 = vmul.f32 0.03125, %v755_v38  ;;  %v767_v40 = vmul.f32 %v763_v36, %v763_v36  ;;  %v4306_v38 = vld [vmem:[%s5064_s5 + $0x40] sm:$0xff] }
 0x2f0   :  { %v764_v41 = vsub.f32 %v4258_v22, %v760_v39  ;;  %v775_v42 = vsel %vm743_vm7, %v767_v40, 0.0 }
 0x2f1   :  { %776 = vadd.xlane.f32.xlu1 %v775_v42  ;;  %v4311_v42 = vld [vmem:[%s5064_s5 + $0x58] sm:$0xff] }
 0x2f2   :  { %v768_v43 = vmul.f32 %v764_v41, %v764_v41 }
 0x2f4   :  { %v778_v44 = vsel %vm743_vm7, %v768_v43, 0.0  ;;  %v4314_v43 = vld [vmem:[%s5064_s5 + $0x60] sm:$0xff] }
 0x2f5   :  { %779 = vadd.xlane.f32.xlu0 %v778_v44  ;;  %v4317_v44 = vld [vmem:[%s5064_s5 + $0x78] sm:$0xff] }
 0x374   :  { %v774_v51 = vpop.xlane.xlu0 %773 }
 0x375   :  { %v782_v52 = vmul.f32 0.03125, %v774_v51 }
 0x376   :  { %v771_v53 = vpop.xlane.xlu1 %770 }
 0x377   :  { %v786_v54 = vadd.f32 1e-05, %v782_v52  ;;  %v781_v55 = vmul.f32 0.03125, %v771_v53 }
 0x379   :  { %3758 = vrsqrt.f32 %v786_v54  ;;  %v785_v56 = vadd.f32 1e-05, %v781_v55 }
 0x37a   :  { %v777_v57 = vpop.xlane.xlu1 %776 }
 0x37b   :  { %3760 = vrsqrt.f32 %v785_v56  ;;  %v783_v58 = vmul.f32 0.03125, %v777_v57  ;;  %v4334_v56 = vld [vmem:[%s5064_s5 + $0x48] sm:$0xff] }
 0x37c   :  { %v4337_v57 = vld [vmem:[%s5064_s5 + $0x68] sm:$0xff] }
 0x37d   :  { %v787_v59 = vadd.f32 1e-05, %v783_v58 }
 0x37e   :  { %v780_v60 = vpop.xlane.xlu0 %779 }
 0x37f   :  { %3762 = vrsqrt.f32 %v787_v59  ;;  %v784_v61 = vmul.f32 0.03125, %v780_v60 }
 0x381   :  { %v788_v62 = vadd.f32 1e-05, %v784_v61 }
 0x383   :  { %3764 = vrsqrt.f32 %v788_v62 }
 0x386   :  { %v3759_v63 = vpop.eup %3758 }
 0x387   :  { %v794_v1 = vmul.f32 %v3759_v63, %v762_v28 }
 0x388   :  { %v3761_v2 = vpop.eup %3760 }
 0x389   :  { %v793_v3 = vmul.f32 %v3761_v2, %v761_v30  ;;  %v804_v4 = vmul.f32 %v3150_v0, %v794_v1  ;;  %v4288_v30 = vld [vmem:[%s5064_s5 + $0x50] sm:$0xff] }
 0x38b   :  { %v803_v6 = vmul.f32 %v3150_v0, %v793_v3  ;;  %v814_v13 = vadd.f32 %v3151_v5, %v804_v4 }
 0x38c   :  { %v3763_v8 = vpop.eup %3762 }
 0x38d   :  { %v795_v9 = vmul.f32 %v3763_v8, %v763_v36  ;;  %v813_v10 = vadd.f32 %v3151_v5, %v803_v6 }
 0x38f   :  { %v821_v14 = vpack.c.bf16 %v814_v13, %v813_v10  ;;  %v805_v17 = vmul.f32 %v3150_v0, %v795_v9 }
 0x390   :  { %v3765_v15 = vpop.eup %3764 }
 0x391   :  { %v796_v16 = vmul.f32 %v3765_v15, %v764_v41  ;;  %3463 = vmatprep.mubr.msk.bf16.mxu1 %vm743_vm7, %v821_v14  ;;  %v815_v19 = vadd.f32 %v3151_v5, %v805_v17 }
 0x393   :  { %v806_v18 = vmul.f32 %v3150_v0, %v796_v16 }
 0x395   :  { %v816_v20 = vadd.f32 %v3151_v5, %v806_v18 }
 0x397   :  { %v822_v23 = vpack.c.bf16 %v816_v20, %v815_v19  ;;  %v723_v19 = vld [vmem:[%s5065_s13 + $0x10] sm:$0xff] }
 0x399   :  { %3464 = vmatmul.mubr.msk.bf16.vlgmr.msra.gmra.mxu1 %vm743_vm7, %v822_v23 }
 0x459   :  { %v3465_v25 = vpop.f32.mrf.mxu1 }
 0x45a   :  { %v881_v26 = vadd.f32 %v3465_v25, %v3152_v24 }
 0x45b   :  { %v872_v28 = vpop.f32.mrf.mxu1 }
 0x45c   :  { %v873_v31 = vadd.f32 %v3152_v24, %v872_v28  ;;  %v889_v39 = vmul.f32 %v881_v26, %v4282_v27  ;;  %v893_v41 = vmul.f32 %v881_v26, %v4285_v29  ;;  %v897_v50 = vmul.f32 %v881_v26, %v4288_v30 }
 0x45d   :  { %v3466_v36 = vpop.f32.mrf.mxu1  ;;  %v901_v51 = vmul.f32 %v881_v26, %v4297_v34 }
 0x45e   :  { %v884_v40 = vadd.f32 %v3466_v36, %v3152_v24  ;;  %v887_v47 = vmul.f32 %v873_v31, %v4291_v32  ;;  %v891_v49 = vmul.f32 %v873_v31, %v4294_v33  ;;  %v895_v58 = vmul.f32 %v873_v31, %v4306_v38 }
 0x45f   :  { %v875_v45 = vpop.f32.mrf.mxu1  ;;  %v899_v60 = vmul.f32 %v873_v31, %v4314_v43 }
 0x460   :  { %v890_v52 = vmul.f32 %v884_v40, %v4300_v35  ;;  %v876_v53 = vadd.f32 %v3152_v24, %v875_v45  ;;  %v4330_v54 = vpack.c.bf16 %v884_v40, %v881_v26  ;;  %v894_v55 = vmul.f32 %v884_v40, %v4303_v37  ;;  %v721_v24 = vld [vmem:[%s5065_s13] sm:$0xff] }
 0x461   :  { %v898_v59 = vmul.f32 %v884_v40, %v4311_v42  ;;  %v902_v61 = vmul.f32 %v884_v40, %v4317_v44  ;;  %v722_v40 = vld [vmem:[%s5065_s13 + $0x8] sm:$0xff] }
 0x462   :  { %v904_v62 = vpack.c.bf16 %v890_v52, %v889_v39  ;;  %917 = vrot.lane.b32.xlu1 %v4330_v54, %s4029_s9  ;;  %v4345_v63 = vpack.c.bf16 %v876_v53, %v873_v31  ;;  %v888_v0 = vmul.f32 %v876_v53, %v4320_v46  ;;  %v892_v1 = vmul.f32 %v876_v53, %v4324_v48 }
 0x463   :  { %v906_v2 = vpack.c.bf16 %v894_v55, %v893_v41  ;;  %v896_v3 = vmul.f32 %v876_v53, %v4334_v56  ;;  %v908_v4 = vpack.c.bf16 %v898_v59, %v897_v50  ;;  %v900_v5 = vmul.f32 %v876_v53, %v4337_v57  ;;  %v724_v50 = vld [vmem:[%s5065_s13 + $0x18] sm:$0xff] }
 0x464   :  { %915 = vrot.lane.b32.xlu0 %v4345_v63, %s4029_s9  ;;  %v903_v6 = vpack.c.bf16 %v888_v0, %v887_v47  ;;  %v905_v8 = vpack.c.bf16 %v892_v1, %v891_v49  ;;  %v910_v9 = vpack.c.bf16 %v902_v61, %v901_v51  ;;  %v727_v49 = vld [vmem:[%s5065_s13 + $0x30] sm:$0xff] }
 0x465   :  { %v907_v10 = vpack.c.bf16 %v896_v3, %v895_v58  ;;  %v909_v13 = vpack.c.bf16 %v900_v5, %v899_v60  ;;  %v725_v58 = vld [vmem:[%s5065_s13 + $0x20] sm:$0xff] }
 0x466   :  { %3471 = vmatprep.mubr.msk.bf16.mxu0 %vm743_vm7, %v903_v6 }
 0x4d4   :  { %v918_v14 = vpop.permute.xlu1 %917 }
 0x4d5   :  { %v947_v15 = vsel %vm743_vm7, %v918_v14, 0  ;;  %3706 = vmatprep.subr.msk.bf16.mxu0 %vm743_vm7, %v918_v14 }
 0x4d6   :  { %3468 = vmatpush3.bf16.xpose.msra.mxu0 %v947_v15  ;;  %v916_v16 = vpop.permute.xlu0 %915 }
 0x4d7   :  { %3707 = vmatprep.subr.msk.bf16.mxu0 %vm743_vm7, %v916_v16  ;;  %v944_v17 = vsel %vm743_vm7, %v916_v16, 0 }
 0x4de   :  { %3470 = vmatpush3.bf16.xpose.msra.mxu0 %v944_v17 }
 0x4e5   :  { %3472 = vmatmul.mubr.msk.bf16.vlgmr.msra.gmra.mxu0 %vm743_vm7, %v904_v62 }
 0x4e6   :  { %3475 = vmatprep.mubr.msk.bf16.mxu0 %vm743_vm7, %v905_v8 }
 0x4ed   :  { %3476 = vmatmul.mubr.msk.bf16.gmra.mxu0 %vm743_vm7, %v906_v2 }
 0x4ee   :  { %3479 = vmatprep.mubr.msk.bf16.mxu0 %vm743_vm7, %v907_v10  ;;  %v731_v10 = vld [vmem:[%s5065_s13 + $0x50] sm:$0xff] }
 0x4f5   :  { %3480 = vmatmul.mubr.msk.bf16.gmra.mxu0 %vm743_vm7, %v908_v4  ;;  %v726_v4 = vld [vmem:[%s5065_s13 + $0x28] sm:$0xff] }
 0x4f6   :  { %3483 = vmatprep.mubr.msk.bf16.mxu0 %vm743_vm7, %v909_v13  ;;  %v728_v13 = vld [vmem:[%s5065_s13 + $0x38] sm:$0xff] }
 0x4fd   :  { %3484 = vmatmul.mubr.msk.bf16.gmra.mxu0 %vm743_vm7, %v910_v9 }
 0x5a5   :  { %v3473_v18 = vpop.f32.mrf.mxu0 }
 0x5a6   :  { %v1048_v20 = vmul.f32 0.35355338, %v3473_v18  ;;  %v729_v18 = vld [vmem:[%s5065_s13 + $0x40] sm:$0xff] }
 0x5a7   :  { %v983_v23 = vpop.f32.mrf.mxu0 }
 0x5a8   :  { %v1046_v25 = vmul.f32 0.35355338, %v983_v23  ;;  %v4367_v26 = vadd.f32 %v1048_v20, %v723_v19 }
 0x5a9   :  { %v3474_v28 = vpop.f32.mrf.mxu0 }
 0x5aa   :  { %v1084_v31 = vsel %vm743_vm7, %v4367_v26, -inf  ;;  %v4371_v36 = vadd.f32 %v1046_v25, %v721_v24  ;;  %v1049_v41 = vmul.f32 0.35355338, %v3474_v28 }
 0x5ab   :  { %1085 = vmax.xlane.f32.xlu1 %v1084_v31  ;;  %v986_v39 = vpop.f32.mrf.mxu0 }
 0x5ac   :  { %v1047_v45 = vmul.f32 0.35355338, %v986_v39  ;;  %v1078_v52 = vsel %vm743_vm7, %v4371_v36, -inf  ;;  %v4385_v62 = vadd.f32 %v1049_v41, %v724_v50  ;;  %v735_v50 = vld [vmem:[%s5065_s13 + $0x70] sm:$0xff] }
 0x5ad   :  { %v3477_v47 = vpop.f32.mrf.mxu0 }
 0x5ae   :  { %v1052_v51 = vmul.f32 0.35355338, %v3477_v47  ;;  %v4378_v53 = vadd.f32 %v1047_v45, %v722_v40  ;;  %v1087_v8 = vsel %vm743_vm7, %v4385_v62, -inf  ;;  %v730_v40 = vld [vmem:[%s5065_s13 + $0x48] sm:$0xff] }
 0x5af   :  { %1079 = vmax.xlane.f32.xlu1 %v1078_v52  ;;  %v999_v55 = vpop.f32.mrf.mxu0 }
 0x5b0   :  { %v1050_v59 = vmul.f32 0.35355338, %v999_v55  ;;  %v1081_v60 = vsel %vm743_vm7, %v4378_v53, -inf  ;;  %v4383_v61 = vadd.f32 %v1052_v51, %v727_v49  ;;  %v732_v51 = vld [vmem:[%s5065_s13 + $0x58] sm:$0xff] }
 0x5b1   :  { %1082 = vmax.xlane.f32.xlu0 %v1081_v60  ;;  %v3478_v0 = vpop.f32.mrf.mxu0  ;;  %v733_v60 = vld [vmem:[%s5065_s13 + $0x60] sm:$0xff] }
 0x5b2   :  { %v1096_v1 = vsel %vm743_vm7, %v4383_v61, -inf  ;;  %v4389_v2 = vadd.f32 %v1050_v59, %v725_v58  ;;  %v1053_v5 = vmul.f32 0.35355338, %v3478_v0 }
 0x5b3   :  { %1097 = vmax.xlane.f32.xlu1 %v1096_v1  ;;  %v1002_v3 = vpop.f32.mrf.mxu0 }
 0x5b4   :  { %v1051_v6 = vmul.f32 0.35355338, %v1002_v3  ;;  %v1090_v15 = vsel %vm743_vm7, %v4389_v2, -inf  ;;  %v4405_v24 = vadd.f32 %v1053_v5, %v728_v13 }
 0x5b5   :  { %1088 = vmax.xlane.f32.xlu0 %v1087_v8  ;;  %v3481_v9 = vpop.f32.mrf.mxu0 }
 0x5b6   :  { %v1056_v14 = vmul.f32 0.35355338, %v3481_v9  ;;  %v4398_v16 = vadd.f32 %v1051_v6, %v726_v4  ;;  %v1099_v47 = vsel %vm743_vm7, %v4405_v24, -inf }
 0x5b7   :  { %1091 = vmax.xlane.f32.xlu1 %v1090_v15  ;;  %v1015_v17 = vpop.f32.mrf.mxu0 }
 0x5b8   :  { %v1054_v19 = vmul.f32 0.35355338, %v1015_v17  ;;  %v1093_v20 = vsel %vm743_vm7, %v4398_v16, -inf  ;;  %v4403_v23 = vadd.f32 %v1056_v14, %v731_v10  ;;  %v734_v10 = vld [vmem:[%s5065_s13 + $0x68] sm:$0xff]  ;;  %v736_v17 = vld [vmem:[%s5065_s13 + $0x78] sm:$0xff] }
 0x5b9   :  { %1094 = vmax.xlane.f32.xlu0 %v1093_v20  ;;  %v3482_v25 = vpop.f32.mrf.mxu0 }
 0x5ba   :  { %v1108_v28 = vsel %vm743_vm7, %v4403_v23, -inf  ;;  %v4409_v31 = vadd.f32 %v1054_v19, %v729_v18  ;;  %v1057_v41 = vmul.f32 0.35355338, %v3482_v25 }
 0x5bb   :  { %1109 = vmax.xlane.f32.xlu1 %v1108_v28  ;;  %v1018_v39 = vpop.f32.mrf.mxu0 }
 0x5bc   :  { %v1055_v45 = vmul.f32 0.35355338, %v1018_v39  ;;  %v1102_v55 = vsel %vm743_vm7, %v4409_v31, -inf  ;;  %v4425_v4 = vadd.f32 %v1057_v41, %v732_v51 }
 0x5bd   :  { %1100 = vmax.xlane.f32.xlu0 %v1099_v47  ;;  %v3485_v49 = vpop.f32.mrf.mxu0 }
 0x5be   :  { %v1060_v52 = vmul.f32 0.35355338, %v3485_v49  ;;  %v4418_v58 = vadd.f32 %v1055_v45, %v730_v40  ;;  %v1111_v15 = vsel %vm743_vm7, %v4425_v4, -inf }
 0x5bf   :  { %1103 = vmax.xlane.f32.xlu1 %v1102_v55  ;;  %v1031_v59 = vpop.f32.mrf.mxu0 }
 0x5c0   :  { %v1058_v0 = vmul.f32 0.35355338, %v1031_v59  ;;  %v1105_v1 = vsel %vm743_vm7, %v4418_v58, -inf  ;;  %v4423_v3 = vadd.f32 %v1060_v52, %v735_v50 }
 0x5c1   :  { %1106 = vmax.xlane.f32.xlu0 %v1105_v1  ;;  %v3486_v5 = vpop.f32.mrf.mxu0 }
 0x5c2   :  { %v1120_v6 = vsel %vm743_vm7, %v4423_v3, -inf  ;;  %v4429_v8 = vadd.f32 %v1058_v0, %v733_v60  ;;  %v1061_v13 = vmul.f32 0.35355338, %v3486_v5 }
 0x5c3   :  { %1121 = vmax.xlane.f32.xlu1 %v1120_v6  ;;  %v1034_v9 = vpop.f32.mrf.mxu0 }
 0x5c4   :  { %v1059_v14 = vmul.f32 0.35355338, %v1034_v9  ;;  %v1114_v18 = vsel %vm743_vm7, %v4429_v8, -inf  ;;  %v4441_v25 = vadd.f32 %v1061_v13, %v736_v17 }
 0x5c5   :  { %1112 = vmax.xlane.f32.xlu0 %v1111_v15 }
 0x5c6   :  { %v4437_v19 = vadd.f32 %v1059_v14, %v734_v10  ;;  %v1123_v28 = vsel %vm743_vm7, %v4441_v25, -inf }
 0x5c7   :  { %1115 = vmax.xlane.f32.xlu1 %v1114_v18 }
 0x5c8   :  { %v1117_v20 = vsel %vm743_vm7, %v4437_v19, -inf }
 0x5c9   :  { %1118 = vmax.xlane.f32.xlu0 %v1117_v20 }
 0x5cd   :  { %1124 = vmax.xlane.f32.xlu0 %v1123_v28 }
 0x5d8   :  { %1264 = vrot.lane.b32.xlu1 %v4330_v54, %s4030_s17 }
 0x634   :  { %v1086_v39 = vpop.xlane.xlu1 %1085 }
 0x635   :  { %v1128_v40 = vsub.f32 %v4367_v26, %v1086_v39 }
 0x637   :  { %v1146_v41 = vmul.f32 1.442695, %v1128_v40 }
 0x638   :  { %v1080_v45 = vpop.xlane.xlu1 %1079 }
 0x639   :  { %3766 = vpow2.f32 %v1146_v41  ;;  %v1126_v47 = vsub.f32 %v4371_v36, %v1080_v45 }
 0x63a   :  { %v1083_v49 = vpop.xlane.xlu0 %1082 }
 0x63b   :  { %v1142_v50 = vmul.f32 1.442695, %v1126_v47  ;;  %v1127_v51 = vsub.f32 %v4378_v53, %v1083_v49 }
 0x63c   :  { %v1098_v52 = vpop.xlane.xlu1 %1097 }
 0x63d   :  { %3768 = vpow2.f32 %v1142_v50  ;;  %v1132_v55 = vsub.f32 %v4383_v61, %v1098_v52  ;;  %v1144_v0 = vmul.f32 1.442695, %v1127_v51 }
 0x63e   :  { %v1089_v59 = vpop.xlane.xlu0 %1088 }
 0x63f   :  { %v1154_v60 = vmul.f32 1.442695, %v1132_v55  ;;  %v1129_v54 = vsub.f32 %v4385_v62, %v1089_v59 }
 0x640   :  { %v1092_v1 = vpop.xlane.xlu1 %1091 }
 0x641   :  { %3770 = vpow2.f32 %v1154_v60  ;;  %v1148_v26 = vmul.f32 1.442695, %v1129_v54  ;;  %v1130_v5 = vsub.f32 %v4389_v2, %v1092_v1 }
 0x642   :  { %v1095_v6 = vpop.xlane.xlu0 %1094 }
 0x643   :  { %3772 = vpow2.f32 %v1148_v26  ;;  %v1150_v36 = vmul.f32 1.442695, %v1130_v5  ;;  %v1131_v53 = vsub.f32 %v4398_v16, %v1095_v6 }
 0x644   :  { %3774 = vpow2.f32 %v1144_v0  ;;  %v1110_v9 = vpop.xlane.xlu1 %1109 }
 0x645   :  { %3776 = vpow2.f32 %v1150_v36  ;;  %v1136_v61 = vsub.f32 %v4403_v23, %v1110_v9  ;;  %v1152_v2 = vmul.f32 1.442695, %v1131_v53 }
 0x646   :  { %v4455_v10 = vpop.eup %3766  ;;  %v1101_v13 = vpop.xlane.xlu0 %1100 }
 0x647   :  { %v1162_v62 = vmul.f32 1.442695, %v1136_v61  ;;  %v1133_v14 = vsub.f32 %v4405_v24, %v1101_v13  ;;  %v1180_v15 = vsel %vm743_vm7, %v4455_v10, 0.0 }
 0x648   :  { %v1104_v17 = vpop.xlane.xlu1 %1103  ;;  %1181 = vadd.xlane.f32.xlu1 %v1180_v15 }
 0x649   :  { %3778 = vpow2.f32 %v1162_v62  ;;  %v1156_v18 = vmul.f32 1.442695, %v1133_v14  ;;  %v1134_v16 = vsub.f32 %v4409_v31, %v1104_v17 }
 0x64a   :  { %v4461_v20 = vpop.eup %3768  ;;  %v1107_v28 = vpop.xlane.xlu0 %1106 }
 0x64b   :  { %3780 = vpow2.f32 %v1156_v18  ;;  %v1158_v23 = vmul.f32 1.442695, %v1134_v16  ;;  %v1174_v39 = vsel %vm743_vm7, %v4461_v20, 0.0  ;;  %v1135_v40 = vsub.f32 %v4418_v58, %v1107_v28 }
 0x64c   :  { %3782 = vpow2.f32 %v1152_v2  ;;  %v1122_v24 = vpop.xlane.xlu1 %1121  ;;  %1175 = vadd.xlane.f32.xlu1 %v1174_v39 }
 0x64d   :  { %3784 = vpow2.f32 %v1158_v23  ;;  %v1160_v52 = vmul.f32 1.442695, %v1135_v40  ;;  %v1140_v55 = vsub.f32 %v4423_v3, %v1122_v24 }
 0x64e   :  { %v4466_v41 = vpop.eup %3770  ;;  %v1113_v45 = vpop.xlane.xlu0 %1112 }
 0x64f   :  { %v1137_v47 = vsub.f32 %v4425_v4, %v1113_v45  ;;  %v1192_v31 = vsel %vm743_vm7, %v4466_v41, 0.0  ;;  %v1170_v1 = vmul.f32 1.442695, %v1140_v55 }
 0x650   :  { %v4471_v49 = vpop.eup %3772  ;;  %1193 = vadd.xlane.f32.xlu1 %v1192_v31  ;;  %v1116_v50 = vpop.xlane.xlu1 %1115 }
 0x651   :  { %v4473_v51 = vpop.eup %3774  ;;  %v1164_v59 = vmul.f32 1.442695, %v1137_v47  ;;  %v1183_v58 = vsel %vm743_vm7, %v4471_v49, 0.0  ;;  %v1138_v26 = vsub.f32 %v4429_v8, %v1116_v50 }
 0x652   :  { %v4478_v60 = vpop.eup %3776  ;;  %1184 = vadd.xlane.f32.xlu0 %v1183_v58  ;;  %v1119_v54 = vpop.xlane.xlu0 %1118  ;;  %v1177_v3 = vsel %vm743_vm7, %v4473_v51, 0.0 }
 0x653   :  { %3786 = vpow2.f32 %v1164_v59  ;;  %v1186_v4 = vsel %vm743_vm7, %v4478_v60, 0.0  ;;  %v1166_v9 = vmul.f32 1.442695, %v1138_v26  ;;  %v1139_v8 = vsub.f32 %v4437_v19, %v1119_v54 }
 0x654   :  { %1187 = vadd.xlane.f32.xlu1 %v1186_v4  ;;  %v1265_v0 = vpop.permute.xlu1 %1264  ;;  %3788 = vpow2.f32 %v1160_v52 }
 0x655   :  { %3487 = vmatprep.subr.bf16.mxu1 %v1265_v0  ;;  %3790 = vpow2.f32 %v1170_v1  ;;  %v1168_v15 = vmul.f32 1.442695, %v1139_v8 }
 0x656   :  { %v4485_v5 = vpop.eup %3778  ;;  %3488 = vmatpush3.bf16.msra.mxu1 %v1265_v0  ;;  %1178 = vadd.xlane.f32.xlu0 %v1177_v3  ;;  %v1125_v62 = vpop.xlane.xlu0 %1124  ;;  %3792 = vpow2.f32 %v1166_v9 }
 0x657   :  { %v1204_v6 = vsel %vm743_vm7, %v4485_v5, 0.0  ;;  %v1141_v2 = vsub.f32 %v4441_v25, %v1125_v62  ;;  %3794 = vpow2.f32 %v1168_v15 }
 0x658   :  { %v4489_v36 = vpop.eup %3780  ;;  %1205 = vadd.xlane.f32.xlu1 %v1204_v6 }
 0x659   :  { %v4491_v53 = vpop.eup %3782  ;;  %v1195_v61 = vsel %vm743_vm7, %v4489_v36, 0.0  ;;  %v1172_v18 = vmul.f32 1.442695, %v1141_v2 }
 0x65a   :  { %v4496_v13 = vpop.eup %3784  ;;  %1196 = vadd.xlane.f32.xlu0 %v1195_v61  ;;  %v1189_v17 = vsel %vm743_vm7, %v4491_v53, 0.0 }
 0x65b   :  { %v1198_v14 = vsel %vm743_vm7, %v4496_v13, 0.0  ;;  %3796 = vpow2.f32 %v1172_v18 }
 0x65c   :  { %1199 = vadd.xlane.f32.xlu1 %v1198_v14 }
 0x65e   :  { %1190 = vadd.xlane.f32.xlu0 %v1189_v17 }
 0x660   :  { %v4503_v19 = vpop.eup %3786 }
 0x661   :  { %v1207_v16 = vsel %vm743_vm7, %v4503_v19, 0.0  ;;  %v4507_v28 = vpop.eup %3788 }
 0x662   :  { %1208 = vadd.xlane.f32.xlu0 %v1207_v16  ;;  %v1201_v23 = vsel %vm743_vm7, %v4507_v28, 0.0  ;;  %v4511_v39 = vpop.eup %3790 }
 0x663   :  { %v1216_v25 = vsel %vm743_vm7, %v4511_v39, 0.0  ;;  %v4515_v24 = vpop.eup %3792 }
 0x664   :  { %v1210_v40 = vsel %vm743_vm7, %v4515_v24, 0.0  ;;  %v4521_v45 = vpop.eup %3794 }
 0x665   :  { %v1213_v47 = vsel %vm743_vm7, %v4521_v45, 0.0 }
 0x666   :  { %1202 = vadd.xlane.f32.xlu0 %v1201_v23 }
 0x668   :  { %v4525_v31 = vpop.eup %3796 }
 0x669   :  { %v1219_v50 = vsel %vm743_vm7, %v4525_v31, 0.0 }
 0x66a   :  { %1217 = vadd.xlane.f32.xlu0 %v1216_v25 }
 0x66d   :  { %1262 = vrot.lane.b32.xlu1 %v4345_v63, %s4030_s17 }
 0x66e   :  { %1211 = vadd.xlane.f32.xlu0 %v1210_v40 }
 0x672   :  { %1214 = vadd.xlane.f32.xlu0 %v1213_v47 }
 0x676   :  { %1220 = vadd.xlane.f32.xlu0 %v1219_v50 }
 0x6d1   :  { %v1182_v52 = vpop.xlane.xlu1 %1181 }
 0x6d5   :  { %v1176_v55 = vpop.xlane.xlu1 %1175 }
 0x6d9   :  { %v1194_v59 = vpop.xlane.xlu1 %1193 }
 0x6db   :  { %v1185_v63 = vpop.xlane.xlu0 %1184 }
 0x6dc   :  { %3798 = vrcp.f32 %v1185_v63 }
 0x6dd   :  { %v1188_v58 = vpop.xlane.xlu1 %1187  ;;  %3800 = vrcp.f32 %v1176_v55 }
 0x6de   :  { %3802 = vrcp.f32 %v1182_v52 }
 0x6df   :  { %v1179_v4 = vpop.xlane.xlu0 %1178 }
 0x6e0   :  { %3804 = vrcp.f32 %v1179_v4 }
 0x6e1   :  { %v1206_v54 = vpop.xlane.xlu1 %1205 }
 0x6e3   :  { %v1197_v0 = vpop.xlane.xlu0 %1196 }
 0x6e4   :  { %3806 = vrcp.f32 %v1197_v0 }
 0x6e5   :  { %v1200_v1 = vpop.xlane.xlu1 %1199  ;;  %3808 = vrcp.f32 %v1188_v58 }
 0x6e6   :  { %3810 = vrcp.f32 %v1194_v59 }
 0x6e7   :  { %v1191_v26 = vpop.xlane.xlu0 %1190 }
 0x6e8   :  { %3812 = vrcp.f32 %v1191_v26 }
 0x6e9   :  { %v1263_v3 = vpop.permute.xlu1 %1262  ;;  %v3799_v6 = vpop.eup %3798 }
 0x6ea   :  { %3489 = vmatprep.subr.bf16.mxu1 %v1263_v3  ;;  %v3801_v9 = vpop.eup %3800  ;;  %v1241_v14 = vmul.f32 %v3799_v6, %v4471_v49 }
 0x6eb   :  { %3490 = vmatpush3.bf16.msra.mxu1 %v1263_v3  ;;  %v1209_v8 = vpop.xlane.xlu0 %1208  ;;  %v3803_v61 = vpop.eup %3802  ;;  %v1238_v15 = vmul.f32 %v3801_v9, %v4461_v20 }
 0x6ec   :  { %3814 = vrcp.f32 %v1209_v8  ;;  %v1240_v18 = vmul.f32 %v3803_v61, %v4455_v10 }
 0x6ed   :  { %v3805_v62 = vpop.eup %3804  ;;  %3816 = vrcp.f32 %v1200_v1 }
 0x6ee   :  { %v1239_v2 = vmul.f32 %v3805_v62, %v4473_v51  ;;  %3818 = vrcp.f32 %v1206_v54  ;;  %v1255_v23 = vpack.c.bf16 %v1241_v14, %v1240_v18  ;;  %v1493_v18 = vld [vmem:[%s5067_s25 + $0x18] sm:$0xff] }
 0x6ef   :  { %v1203_v17 = vpop.xlane.xlu0 %1202 }
 0x6f0   :  { %3820 = vrcp.f32 %v1203_v17  ;;  %v1254_v16 = vpack.c.bf16 %v1239_v2, %v1238_v15  ;;  %v737_v2 = vld [vmem:[%s5066_s21] sm:$0xff]  ;;  %v1492_v17 = vld [vmem:[%s5067_s25 + $0x10] sm:$0xff] }
 0x6f1   :  { %v3807_v25 = vpop.eup %3806 }
 0x6f2   :  { %3491 = vmatprep.mubr.msk.bf16.mxu1 %vm743_vm7, %v1254_v16  ;;  %v3809_v40 = vpop.eup %3808  ;;  %v1245_v20 = vmul.f32 %v3807_v25, %v4489_v36  ;;  %v1497_v16 = vpack.c.bf16 %v1493_v18, %v1492_v17 }
 0x6f3   :  { %3492 = vmatmul.mubr.msk.bf16.vlgmr.msra.gmra.mxu1 %vm743_vm7, %v1255_v23  ;;  %v1218_v47 = vpop.xlane.xlu0 %1217  ;;  %v3811_v49 = vpop.eup %3810  ;;  %v1242_v51 = vmul.f32 %v3809_v40, %v4478_v60  ;;  %v1491_v23 = vld [vmem:[%s5067_s25 + $0x8] sm:$0xff] }
 0x6f4   :  { %v1244_v10 = vmul.f32 %v3811_v49, %v4466_v41  ;;  %3545 = vmatprep.subr.bf16.mxu0 %v1497_v16 }
 0x6f5   :  { %v3813_v50 = vpop.eup %3812  ;;  %3546 = vmatpush3.bf16.msra.mxu0 %v1497_v16 }
 0x6f6   :  { %v1243_v52 = vmul.f32 %v3813_v50, %v4491_v53  ;;  %v1257_v63 = vpack.c.bf16 %v1245_v20, %v1244_v10 }
 0x6f7   :  { %v1212_v55 = vpop.xlane.xlu0 %1211 }
 0x6f8   :  { %v1256_v59 = vpack.c.bf16 %v1243_v52, %v1242_v51  ;;  %3822 = vrcp.f32 %v1212_v55 }
 0x6f9   :  { %v3815_v58 = vpop.eup %3814 }
 0x6fa   :  { %3495 = vmatprep.mubr.msk.bf16.mxu1 %vm743_vm7, %v1256_v59  ;;  %v3817_v4 = vpop.eup %3816  ;;  %v1249_v60 = vmul.f32 %v3815_v58, %v4503_v19 }
 0x6fb   :  { %3496 = vmatmul.mubr.msk.bf16.gmra.mxu1 %vm743_vm7, %v1257_v63  ;;  %v1215_v54 = vpop.xlane.xlu0 %1214  ;;  %v3819_v0 = vpop.eup %3818  ;;  %v1246_v53 = vmul.f32 %v3817_v4, %v4496_v13 }
 0x6fc   :  { %3824 = vrcp.f32 %v1215_v54  ;;  %v1248_v26 = vmul.f32 %v3819_v0, %v4485_v5 }
 0x6fd   :  { %v3821_v36 = vpop.eup %3820  ;;  %3826 = vrcp.f32 %v1218_v47 }
 0x6fe   :  { %v1247_v41 = vmul.f32 %v3821_v36, %v4507_v28  ;;  %v1259_v6 = vpack.c.bf16 %v1249_v60, %v1248_v26 }
 0x6ff   :  { %v1221_v1 = vpop.xlane.xlu0 %1220 }
 0x700   :  { %3828 = vrcp.f32 %v1221_v1  ;;  %v1258_v3 = vpack.c.bf16 %v1247_v41, %v1246_v53 }
 0x702   :  { %3499 = vmatprep.mubr.msk.bf16.mxu1 %vm743_vm7, %v1258_v3 }
 0x703   :  { %3500 = vmatmul.mubr.msk.bf16.gmra.mxu1 %vm743_vm7, %v1259_v6 }
 0x705   :  { %v3823_v9 = vpop.eup %3822 }
 0x706   :  { %v1250_v13 = vmul.f32 %v3823_v9, %v4515_v24  ;;  %v1490_v24 = vld [vmem:[%s5067_s25] sm:$0xff] }
 0x709   :  { %v3825_v19 = vpop.eup %3824 }
 0x70a   :  { %v1251_v28 = vmul.f32 %v3825_v19, %v4521_v45  ;;  %v3827_v8 = vpop.eup %3826  ;;  %v1496_v45 = vpack.c.bf16 %v1491_v23, %v1490_v24 }
 0x70b   :  { %v1252_v62 = vmul.f32 %v3827_v8, %v4511_v39 }
 0x70c   :  { %v1260_v5 = vpack.c.bf16 %v1251_v28, %v1250_v13  ;;  %3547 = vmatprep.subr.bf16.mxu0 %v1496_v45  ;;  %v3173_v28 = vld [vmem:[%s5068_s29] ss:$0 sm:$0xff] }
 0x70d   :  { %v3829_v61 = vpop.eup %3828  ;;  %3548 = vmatpush3.bf16.msra.mxu0 %v1496_v45 }
 0x70e   :  { %3503 = vmatprep.mubr.msk.bf16.mxu1 %vm743_vm7, %v1260_v5  ;;  %v1253_v14 = vmul.f32 %v3829_v61, %v4525_v31 }
 0x710   :  { %v1261_v15 = vpack.c.bf16 %v1253_v14, %v1252_v62 }
 0x712   :  { %3504 = vmatmul.mubr.msk.bf16.gmra.mxu1 %vm743_vm7, %v1261_v15 }
 0x713   :  { %3539 = vmatprep.mubr.f32.mxu1 %v737_v2 }
 0x7b3   :  { %v3493_v25 = vpop.f32.mrf.mxu1 }
 0x7b5   :  { %v1326_v40 = vpop.f32.mrf.mxu1 }
 0x7b7   :  { %v3494_v39 = vpop.f32.mrf.mxu1 }
 0x7b9   :  { %v1329_v47 = vpop.f32.mrf.mxu1 }
 0x7bb   :  { %v3497_v31 = vpop.f32.mrf.mxu1 }
 0x7bd   :  { %v1342_v49 = vpop.f32.mrf.mxu1 }
 0x7bf   :  { %v3498_v50 = vpop.f32.mrf.mxu1 }
 0x7c1   :  { %v1345_v20 = vpop.f32.mrf.mxu1 }
 0x7c3   :  { %v3501_v51 = vpop.f32.mrf.mxu1 }
 0x7c4   :  { %v1399_v41 = vmul.f32 %v3501_v51, %v4288_v30  ;;  %v1394_v30 = vmul.f32 %v1345_v20, %v4324_v48  ;;  %v1389_v48 = vmul.f32 %v1326_v40, %v4291_v32 }
 0x7c5   :  { %v1358_v52 = vpop.f32.mrf.mxu1 }
 0x7c7   :  { %v3502_v55 = vpop.f32.mrf.mxu1 }
 0x7c8   :  { %v1400_v53 = vmul.f32 %v3502_v55, %v4311_v42  ;;  %v1395_v42 = vmul.f32 %v3497_v31, %v4285_v29  ;;  %v1390_v29 = vmul.f32 %v1329_v47, %v4320_v46 }
 0x7c9   :  { %v1361_v10 = vpop.f32.mrf.mxu1 }
 0x7d2   :  { %v3505_v59 = vpop.f32.mrf.mxu1 }
 0x7d3   :  { %v1403_v0 = vmul.f32 %v3505_v59, %v4297_v34  ;;  %v1398_v34 = vmul.f32 %v1361_v10, %v4334_v56  ;;  %v1393_v56 = vmul.f32 %v1342_v49, %v4294_v33  ;;  %v738_v33 = vld [vmem:[%s5066_s21 + $0x8] sm:$0xff] }
 0x7d4   :  { %v1374_v63 = vpop.f32.mrf.mxu1 }
 0x7d5   :  { %v1401_v60 = vmul.f32 %v1374_v63, %v4314_v43  ;;  %v1396_v43 = vmul.f32 %v3498_v50, %v4303_v37  ;;  %v1391_v37 = vmul.f32 %v3493_v25, %v4282_v27 }
 0x7d6   :  { %v3506_v58 = vpop.f32.mrf.mxu1 }
 0x7d7   :  { %v1404_v4 = vmul.f32 %v3506_v58, %v4317_v44  ;;  %v1397_v44 = vmul.f32 %v1358_v52, %v4306_v38  ;;  %v1392_v38 = vmul.f32 %v3494_v39, %v4300_v35  ;;  %v740_v35 = vld [vmem:[%s5066_s21 + $0x18] sm:$0xff] }
 0x7d8   :  { %v1377_v54 = vpop.f32.mrf.mxu1 }
 0x7d9   :  { %3507 = vmatprep.subr.mxu1 %v1404_v4  ;;  %v1402_v36 = vmul.f32 %v1377_v54, %v4337_v57  ;;  %v739_v57 = vld [vmem:[%s5066_s21 + $0x10] sm:$0xff]  ;;  %v1645_v54 = vld [vmem:[%s5069_s24 + $0x18] sm:$0xff] }
 0x7da   :  { %3508 = vmatpush3.msra.mxu1 %v1404_v4  ;;  %v1644_v4 = vld [vmem:[%s5069_s24 + $0x10] sm:$0xff] }
 0x7db   :  { %3509 = vmatprep.subr.mxu1 %v1403_v0 }
 0x7dc   :  { %3510 = vmatpush3.msra.mxu1 %v1403_v0  ;;  %v1649_v0 = vpack.c.bf16 %v1645_v54, %v1644_v4 }
 0x7dd   :  { %3511 = vmatprep.subr.mxu1 %v1402_v36 }
 0x7de   :  { %3512 = vmatpush3.msra.mxu1 %v1402_v36  ;;  %v1642_v36 = vld [vmem:[%s5069_s24] sm:$0xff] }
 0x7df   :  { %3513 = vmatprep.subr.mxu1 %v1401_v60 }
 0x7e0   :  { %3514 = vmatpush3.msra.mxu1 %v1401_v60  ;;  %v1643_v60 = vld [vmem:[%s5069_s24 + $0x8] sm:$0xff] }
 0x7e1   :  { %3515 = vmatprep.subr.mxu1 %v1400_v53 }
 0x7e2   :  { %3516 = vmatpush3.msra.mxu1 %v1400_v53  ;;  %v1648_v53 = vpack.c.bf16 %v1643_v60, %v1642_v36 }
 0x7e3   :  { %3517 = vmatprep.subr.mxu1 %v1399_v41 }
 0x7e4   :  { %3518 = vmatpush3.msra.mxu1 %v1399_v41 }
 0x7e5   :  { %3519 = vmatprep.subr.mxu1 %v1398_v34 }
 0x7e6   :  { %3520 = vmatpush3.msra.mxu1 %v1398_v34 }
 0x7e7   :  { %3521 = vmatprep.subr.mxu1 %v1397_v44 }
 0x7e8   :  { %3522 = vmatpush3.msra.mxu1 %v1397_v44 }
 0x7e9   :  { %3523 = vmatprep.subr.mxu1 %v1396_v43 }
 0x7ea   :  { %3524 = vmatpush3.msra.mxu1 %v1396_v43 }
 0x7eb   :  { %3525 = vmatprep.subr.mxu1 %v1395_v42 }
 0x7ec   :  { %3526 = vmatpush3.msra.mxu1 %v1395_v42 }
 0x7ed   :  { %3527 = vmatprep.subr.mxu1 %v1394_v30 }
 0x7ee   :  { %3528 = vmatpush3.msra.mxu1 %v1394_v30 }
 0x7ef   :  { %3529 = vmatprep.subr.mxu1 %v1393_v56 }
 0x7f0   :  { %3530 = vmatpush3.msra.mxu1 %v1393_v56 }
 0x7f1   :  { %3531 = vmatprep.subr.mxu1 %v1392_v38 }
 0x7f2   :  { %3532 = vmatpush3.msra.mxu1 %v1392_v38 }
 0x7f3   :  { %3533 = vmatprep.subr.mxu1 %v1391_v37 }
 0x7f4   :  { %3534 = vmatpush3.msra.mxu1 %v1391_v37 }
 0x7f5   :  { %3535 = vmatprep.subr.mxu1 %v1390_v29 }
 0x7f6   :  { %3536 = vmatpush3.msra.mxu1 %v1390_v29 }
 0x7f7   :  { %3537 = vmatprep.subr.mxu1 %v1389_v48 }
 0x7f8   :  { %3538 = vmatpush3.msra.mxu1 %v1389_v48 }
 0x7f9   :  { %3540 = vmatmul.mubr.f32.vlgmr.msra.gmra.mxu1 %v738_v33  ;;  %3553 = vmatprep.subr.bf16.mxu1 %v1649_v0 }
 0x7fa   :  { %3542 = vmatprep.mubr.f32.mxu1 %v739_v57  ;;  %3554 = vmatpush3.bf16.msra.mxu1 %v1649_v0 }
 0x7fb   :  { %3555 = vmatprep.subr.bf16.mxu1 %v1648_v53 }
 0x7fd   :  { %3543 = vmatmul.mubr.f32.gmra.mxu1 %v740_v35 }
 0x7fe   :  { %3556 = vmatpush3.bf16.msra.mxu1 %v1648_v53 }
 0x8b9   :  { %v3541_v27 = vpop.f32.mrf.mxu1 }
 0x8bb   :  { %v1471_v1 = vpop.f32.mrf.mxu1 }
 0x8bc   :  { %v1494_v26 = vpack.c.bf16 %v3541_v27, %v1471_v1 }
 0x8bd   :  { %v3544_v3 = vpop.f32.mrf.mxu1 }
 0x8be   :  { %3549 = vmatprep.mubr.msk.bf16.mxu0 %vm743_vm7, %v1494_v26  ;;  %v3174_v26 = vld [vmem:[%s5070_s30] ss:$0 sm:$0xff] }
 0x8bf   :  { %v1481_v46 = vpop.f32.mrf.mxu1 }
 0x8c0   :  { %v1495_v6 = vpack.c.bf16 %v3544_v3, %v1481_v46 }
 0x8c2   :  { %3550 = vmatmul.mubr.msk.bf16.vlgmr.msra.gmra.mxu0 %vm743_vm7, %v1495_v6 }
 0x982   :  { %v3551_v32 = vpop.f32.mrf.mxu0 }
 0x983   :  { %v1555_v19 = vadd.f32 %v3551_v32, %v4256_v21 }
 0x984   :  { %v1538_v9 = vpop.f32.mrf.mxu0 }
 0x985   :  { %v1553_v13 = vadd.f32 %v1538_v9, %v4248_v12  ;;  %v4584_v62 = vadd.f32 %v3173_v28, %v1555_v19  ;;  %v3175_v19 = vld [vmem:[%s5071_s6] ss:$0 sm:$0xff] }
 0x986   :  { %v3552_v8 = vpop.f32.mrf.mxu0 }
 0x987   :  { %v4582_v5 = vadd.f32 %v3173_v28, %v1553_v13  ;;  %v1556_v14 = vadd.f32 %v3552_v8, %v4258_v22  ;;  %v1576_v12 = vsel %vm743_vm7, %v4584_v62, 0.0 }
 0x988   :  { %v1541_v61 = vpop.f32.mrf.mxu0 }
 0x989   :  { %v1554_v15 = vadd.f32 %v1541_v61, %v4246_v7  ;;  %v1570_v2 = vsel %vm743_vm7, %v4582_v5, 0.0  ;;  %v4592_v21 = vadd.f32 %v3173_v28, %v1556_v14 }
 0x98a   :  { %1571 = vadd.xlane.f32.xlu0 %v1570_v2 }
 0x98b   :  { %v4590_v17 = vadd.f32 %v3173_v28, %v1554_v15  ;;  %v1579_v22 = vsel %vm743_vm7, %v4592_v21, 0.0 }
 0x98d   :  { %v1573_v18 = vsel %vm743_vm7, %v4590_v17, 0.0 }
 0x98e   :  { %1577 = vadd.xlane.f32.xlu0 %v1576_v12  ;;  %1574 = vadd.xlane.f32.xlu1 %v1573_v18 }
 0x992   :  { %1580 = vadd.xlane.f32.xlu0 %v1579_v22  ;;  %v1738_v22 = vld [vmem:[%s5072_s12 + $0x30] sm:$0xff] }
 0xa13   :  { %v1572_v7 = vpop.xlane.xlu0 %1571 }
 0xa14   :  { %v1582_v24 = vmul.f32 0.03125, %v1572_v7  ;;  %v1739_v7 = vld [vmem:[%s5072_s12 + $0x38] sm:$0xff] }
 0xa16   :  { %v1586_v25 = vsub.f32 %v4582_v5, %v1582_v24  ;;  %v1745_v24 = vpack.c.bf16 %v1739_v7, %v1738_v22 }
 0xa17   :  { %v1578_v16 = vpop.xlane.xlu0 %1577  ;;  %v1575_v23 = vpop.xlane.xlu1 %1574 }
 0xa18   :  { %v1584_v45 = vmul.f32 0.03125, %v1578_v16  ;;  %v1583_v39 = vmul.f32 0.03125, %v1575_v23  ;;  %v1590_v51 = vmul.f32 %v1586_v25, %v1586_v25  ;;  %3561 = vmatprep.subr.bf16.mxu0 %v1745_v24  ;;  %v1736_v16 = vld [vmem:[%s5072_s12 + $0x20] sm:$0xff]  ;;  %v1737_v23 = vld [vmem:[%s5072_s12 + $0x28] sm:$0xff] }
 0xa19   :  { %3562 = vmatpush3.bf16.msra.mxu0 %v1745_v24 }
 0xa1a   :  { %v1588_v40 = vsub.f32 %v4584_v62, %v1584_v45  ;;  %v1587_v49 = vsub.f32 %v4590_v17, %v1583_v39  ;;  %v1594_v55 = vsel %vm743_vm7, %v1590_v51, 0.0  ;;  %v1744_v45 = vpack.c.bf16 %v1737_v23, %v1736_v16 }
 0xa1b   :  { %v1581_v47 = vpop.xlane.xlu0 %1580 }
 0xa1c   :  { %v1592_v31 = vmul.f32 %v1588_v40, %v1588_v40  ;;  %v1585_v50 = vmul.f32 0.03125, %v1581_v47  ;;  %v1591_v10 = vmul.f32 %v1587_v49, %v1587_v49  ;;  %3563 = vmatprep.subr.bf16.mxu0 %v1744_v45  ;;  %v1732_v47 = vld [vmem:[%s5072_s12] sm:$0xff] }
 0xa1d   :  { %3564 = vmatpush3.bf16.msra.mxu0 %v1744_v45 }
 0xa1e   :  { %v1600_v20 = vsel %vm743_vm7, %v1592_v31, 0.0  ;;  %v1589_v52 = vsub.f32 %v4592_v21, %v1585_v50  ;;  %v1597_v59 = vsel %vm743_vm7, %v1591_v10, 0.0  ;;  %v1733_v31 = vld [vmem:[%s5072_s12 + $0x8] sm:$0xff]  ;;  %v3176_v50 = vld [vmem:[%s5073_s15] ss:$0 sm:$0xff] }
 0xa1f   :  { %1601 = vadd.xlane.f32.xlu0 %v1600_v20 }
 0xa20   :  { %v1593_v63 = vmul.f32 %v1589_v52, %v1589_v52 }
 0xa22   :  { %v1603_v58 = vsel %vm743_vm7, %v1593_v63, 0.0 }
 0xa23   :  { %1595 = vadd.xlane.f32.xlu0 %v1594_v55 }
 0xa27   :  { %1598 = vadd.xlane.f32.xlu0 %v1597_v59 }
 0xa2b   :  { %1604 = vadd.xlane.f32.xlu0 %v1603_v58 }
 0xaa8   :  { %v1602_v41 = vpop.xlane.xlu0 %1601 }
 0xaa9   :  { %v1608_v34 = vmul.f32 0.03125, %v1602_v41 }
 0xaab   :  { %v1612_v42 = vadd.f32 1e-05, %v1608_v34 }
 0xaac   :  { %v1596_v44 = vpop.xlane.xlu0 %1595 }
 0xaad   :  { %v1606_v43 = vmul.f32 0.03125, %v1596_v44 }
 0xaaf   :  { %v1610_v30 = vadd.f32 1e-05, %v1606_v43 }
 0xab0   :  { %v1599_v56 = vpop.xlane.xlu0 %1598 }
 0xab1   :  { %3830 = vrsqrt.f32 %v1610_v30  ;;  %v1607_v38 = vmul.f32 0.03125, %v1599_v56 }
 0xab2   :  { %3832 = vrsqrt.f32 %v1612_v42 }
 0xab3   :  { %v1611_v37 = vadd.f32 1e-05, %v1607_v38 }
 0xab4   :  { %v1605_v29 = vpop.xlane.xlu0 %1604 }
 0xab5   :  { %3834 = vrsqrt.f32 %v1611_v37  ;;  %v1609_v48 = vmul.f32 0.03125, %v1605_v29 }
 0xab7   :  { %v1613_v33 = vadd.f32 1e-05, %v1609_v48 }
 0xab9   :  { %3836 = vrsqrt.f32 %v1613_v33 }
 0xabe   :  { %v3831_v57 = vpop.eup %3830 }
 0xabf   :  { %v1618_v35 = vmul.f32 %v3831_v57, %v1586_v25  ;;  %v3833_v27 = vpop.eup %3832  ;;  %v1734_v25 = vld [vmem:[%s5072_s12 + $0x10] sm:$0xff] }
 0xac0   :  { %v1620_v3 = vmul.f32 %v3833_v27, %v1588_v40  ;;  %v1735_v40 = vld [vmem:[%s5072_s12 + $0x18] sm:$0xff] }
 0xac1   :  { %v1628_v6 = vmul.f32 %v3174_v26, %v1618_v35  ;;  %v1743_v39 = vpack.c.bf16 %v1735_v40, %v1734_v25 }
 0xac2   :  { %v3835_v1 = vpop.eup %3834  ;;  %v1630_v28 = vmul.f32 %v3174_v26, %v1620_v3 }
 0xac3   :  { %v1619_v46 = vmul.f32 %v3835_v1, %v1587_v49  ;;  %v1638_v8 = vadd.f32 %v3175_v19, %v1628_v6  ;;  %3565 = vmatprep.subr.bf16.mxu0 %v1743_v39  ;;  %v1742_v49 = vpack.c.bf16 %v1733_v31, %v1732_v47  ;;  %v3181_v6 = vld [vmem:[%s5074_s16] ss:$0 sm:$0xff] }
 0xac4   :  { %v1640_v2 = vadd.f32 %v3175_v19, %v1630_v28  ;;  %3566 = vmatpush3.bf16.msra.mxu0 %v1743_v39 }
 0xac5   :  { %v1629_v32 = vmul.f32 %v3174_v26, %v1619_v46  ;;  %3567 = vmatprep.subr.bf16.mxu0 %v1742_v49 }
 0xac6   :  { %v3837_v9 = vpop.eup %3836 }
 0xac7   :  { %v1621_v13 = vmul.f32 %v3837_v9, %v1589_v52  ;;  %v1639_v61 = vadd.f32 %v3175_v19, %v1629_v32 }
 0xac8   :  { %3568 = vmatpush3.bf16.msra.mxu0 %v1742_v49 }
 0xac9   :  { %v1631_v14 = vmul.f32 %v3174_v26, %v1621_v13  ;;  %v1646_v15 = vpack.c.bf16 %v1639_v61, %v1638_v8 }
 0xacb   :  { %v1641_v12 = vadd.f32 %v3175_v19, %v1631_v14  ;;  %3557 = vmatprep.mubr.msk.bf16.mxu1 %vm743_vm7, %v1646_v15 }
 0xacd   :  { %v1647_v18 = vpack.c.bf16 %v1641_v12, %v1640_v2 }
 0xacf   :  { %3558 = vmatmul.mubr.msk.bf16.vlgmr.msra.gmra.mxu1 %vm743_vm7, %v1647_v18 }
 0xb8f   :  { %v3559_v20 = vpop.f32.mrf.mxu1 }
 0xb90   :  { %v1706_v51 = vadd.f32 %v3559_v20, %v3176_v50 }
 0xb91   :  { %v1697_v52 = vpop.f32.mrf.mxu1 }
 0xb92   :  { %v1698_v55 = vadd.f32 %v3176_v50, %v1697_v52  ;;  %v1718_v10 = vmul.f32 0.70710677, %v1706_v51  ;;  %v1714_v29 = vmul.f32 0.5, %v1706_v51 }
 0xb93   :  { %v3560_v59 = vpop.f32.mrf.mxu1 }
 0xb94   :  { %v1716_v63 = vmul.f32 0.70710677, %v1698_v55  ;;  %v1709_v58 = vadd.f32 %v3560_v59, %v3176_v50  ;;  %v1712_v56 = vmul.f32 0.5, %v1698_v55  ;;  %v3189_v59 = vld [vmem:[%s4127_s4 + $0x38] sm:$0xff] }
 0xb95   :  { %v1700_v4 = vpop.f32.mrf.mxu1 }
 0xb96   :  { %3838 = verf.f32 %v1716_v63  ;;  %v1719_v54 = vmul.f32 0.70710677, %v1709_v58  ;;  %v1701_v0 = vadd.f32 %v3176_v50, %v1700_v4  ;;  %v1715_v30 = vmul.f32 0.5, %v1709_v58  ;;  %v3186_v58 = vld [vmem:[%s4127_s4 + $0x20] sm:$0xff]  ;;  %v3187_v4 = vld [vmem:[%s4127_s4 + $0x28] sm:$0xff] }
 0xb97   :  { %3840 = verf.f32 %v1718_v10  ;;  %v3188_v10 = vld [vmem:[%s4127_s4 + $0x30] sm:$0xff] }
 0xb98   :  { %3842 = verf.f32 %v1719_v54  ;;  %v1717_v36 = vmul.f32 0.70710677, %v1701_v0  ;;  %v1713_v38 = vmul.f32 0.5, %v1701_v0  ;;  %v1901_v63 = vpack.c.bf16 %v3189_v59, %v3188_v10 }
 0xb99   :  { %v1900_v54 = vpack.c.bf16 %v3187_v4, %v3186_v58  ;;  %v4696_v58 = vld [vmem:[%s5064_s5 + $0x38] sm:$0xff] }
 0xb9a   :  { %3844 = verf.f32 %v1717_v36  ;;  %3573 = vmatprep.subr.bf16.mxu1 %v1901_v63 }
 0xb9b   :  { %3574 = vmatpush3.bf16.msra.mxu1 %v1901_v63 }
 0xb9c   :  { %3575 = vmatprep.subr.bf16.mxu1 %v1900_v54 }
 0xb9f   :  { %3576 = vmatpush3.bf16.msra.mxu1 %v1900_v54  ;;  %v4700_v54 = vld [vmem:[%s5064_s5 + $0x40] sm:$0xff] }
 0xba3   :  { %v3839_v60 = vpop.eup %3838 }
 0xba4   :  { %v3841_v53 = vpop.eup %3840  ;;  %v1724_v34 = vadd.f32 1.0, %v3839_v60 }
 0xba5   :  { %v3843_v41 = vpop.eup %3842  ;;  %v1726_v42 = vadd.f32 1.0, %v3841_v53 }
 0xba6   :  { %v1727_v44 = vadd.f32 1.0, %v3843_v41  ;;  %v1728_v33 = vmul.f32 %v1724_v34, %v1712_v56 }
 0xba7   :  { %v3845_v43 = vpop.eup %3844  ;;  %v1730_v35 = vmul.f32 %v1726_v42, %v1714_v29 }
 0xba8   :  { %v1725_v37 = vadd.f32 1.0, %v3845_v43  ;;  %v1731_v48 = vmul.f32 %v1727_v44, %v1715_v30 }
 0xbaa   :  { %v1729_v57 = vmul.f32 %v1725_v37, %v1713_v38  ;;  %v1741_v1 = vpack.c.bf16 %v1731_v48, %v1730_v35  ;;  %v3184_v48 = vld [vmem:[%s4117_s20 + $0x1] ss:$0 sm:$0xff]  ;;  %s5075_s20 = sld [smem:[#allocation8_spill]] }
 0xbac   :  { %v1740_v27 = vpack.c.bf16 %v1729_v57, %v1728_v33 }
 0xbae   :  { %3569 = vmatprep.mubr.msk.bf16.mxu0 %vm1746_vm8, %v1740_v27  ;;  %v3185_v27 = vld [vmem:[%s4122_s27 + $0x1] ss:$0 sm:$0xff] }
 0xbaf   :  { %3570 = vmatmul.mubr.msk.bf16.vlgmr.msra.gmra.mxu0 %vm1746_vm8, %v1741_v1 }
 0xc6f   :  { %v3571_v26 = vpop.f32.mrf.mxu0 }
 0xc70   :  { %v1804_v28 = vadd.f32 %v3571_v26, %v4584_v62 }
 0xc71   :  { %v1787_v3 = vpop.f32.mrf.mxu0 }
 0xc72   :  { %v1802_v46 = vadd.f32 %v1787_v3, %v4582_v5  ;;  %v4642_v2 = vadd.f32 %v3181_v6, %v1804_v28 }
 0xc73   :  { %v3572_v32 = vpop.f32.mrf.mxu0 }
 0xc74   :  { %v4629_v9 = vadd.f32 %v3181_v6, %v1802_v46  ;;  %v1805_v19 = vadd.f32 %v3572_v32, %v4592_v21  ;;  %v1827_v62 = vsel %vm743_vm7, %v4642_v2, 0.0 }
 0xc75   :  { %v1790_v13 = vpop.f32.mrf.mxu0 }
 0xc76   :  { %v4633_v8 = vadd.f32 %v3181_v6, %v1805_v19  ;;  %v1803_v61 = vadd.f32 %v1790_v13, %v4590_v17  ;;  %v1821_v14 = vsel %vm743_vm7, %v4629_v9, 0.0 }
 0xc77   :  { %1822 = vadd.xlane.f32.xlu0 %v1821_v14 }
 0xc78   :  { %v4638_v15 = vadd.f32 %v3181_v6, %v1803_v61  ;;  %v1830_v5 = vsel %vm743_vm7, %v4633_v8, 0.0 }
 0xc79   :  { %1831 = vadd.xlane.f32.xlu1 %v1830_v5 }
 0xc7a   :  { %v1824_v21 = vsel %vm743_vm7, %v4638_v15, 0.0 }
 0xc7b   :  { %1825 = vadd.xlane.f32.xlu0 %v1824_v21 }
 0xc7f   :  { %1828 = vadd.xlane.f32.xlu0 %v1827_v62  ;;  %v3191_v62 = vld [vmem:[%s5063_s0 + $0x1] ss:$0 sm:$0xff] }
 0xd00   :  { %v1823_v17 = vpop.xlane.xlu0 %1822 }
 0xd01   :  { %v1833_v12 = vmul.f32 0.03125, %v1823_v17 }
 0xd02   :  { %v1832_v18 = vpop.xlane.xlu1 %1831 }
 0xd03   :  { %v1837_v22 = vsub.f32 %v4629_v9, %v1833_v12  ;;  %v1836_v7 = vmul.f32 0.03125, %v1832_v18 }
 0xd04   :  { %v1826_v24 = vpop.xlane.xlu0 %1825 }
 0xd05   :  { %v1834_v16 = vmul.f32 0.03125, %v1826_v24  ;;  %v1841_v23 = vmul.f32 %v1837_v22, %v1837_v22  ;;  %v1840_v45 = vsub.f32 %v4633_v8, %v1836_v7  ;;  %v4666_v24 = vld [vmem:[%s5064_s5 + $0x10] sm:$0xff] }
 0xd07   :  { %v1838_v25 = vsub.f32 %v4638_v15, %v1834_v16  ;;  %v1845_v40 = vsel %vm743_vm7, %v1841_v23, 0.0  ;;  %v1844_v20 = vmul.f32 %v1840_v45, %v1840_v45 }
 0xd08   :  { %1846 = vadd.xlane.f32.xlu0 %v1845_v40  ;;  %v1829_v39 = vpop.xlane.xlu0 %1828 }
 0xd09   :  { %v1835_v47 = vmul.f32 0.03125, %v1829_v39  ;;  %v1842_v31 = vmul.f32 %v1838_v25, %v1838_v25  ;;  %v1854_v52 = vsel %vm743_vm7, %v1844_v20, 0.0  ;;  %v4674_v39 = vld [vmem:[%s5064_s5] sm:$0xff] }
 0xd0b   :  { %v1839_v49 = vsub.f32 %v4642_v2, %v1835_v47  ;;  %v1848_v50 = vsel %vm743_vm7, %v1842_v31, 0.0  ;;  %v4678_v31 = vld [vmem:[%s5064_s5 + $0x20] sm:$0xff] }
 0xd0c   :  { %1849 = vadd.xlane.f32.xlu1 %v1848_v50  ;;  %v4682_v50 = vld [vmem:[%s5064_s5 + $0x50] sm:$0xff] }
 0xd0d   :  { %v1843_v51 = vmul.f32 %v1839_v49, %v1839_v49 }
 0xd0f   :  { %v1851_v55 = vsel %vm743_vm7, %v1843_v51, 0.0  ;;  %v4686_v51 = vld [vmem:[%s5064_s5 + $0x70] sm:$0xff] }
 0xd10   :  { %1855 = vadd.xlane.f32.xlu1 %v1854_v52  ;;  %1852 = vadd.xlane.f32.xlu0 %v1851_v55  ;;  %v4690_v55 = vld [vmem:[%s5064_s5 + $0x18] sm:$0xff] }
 0xd91   :  { %v1847_v0 = vpop.xlane.xlu0 %1846 }
 0xd92   :  { %v1857_v36 = vmul.f32 0.03125, %v1847_v0 }
 0xd94   :  { %v1861_v60 = vadd.f32 1e-05, %v1857_v36  ;;  %v4704_v36 = vld [vmem:[%s5064_s5 + $0x58] sm:$0xff] }
 0xd95   :  { %v1850_v53 = vpop.xlane.xlu1 %1849 }
 0xd96   :  { %3846 = vrsqrt.f32 %v1861_v60  ;;  %v1858_v41 = vmul.f32 0.03125, %v1850_v53  ;;  %v4708_v53 = vld [vmem:[%s5064_s5 + $0x60] sm:$0xff] }
 0xd98   :  { %v1862_v34 = vadd.f32 1e-05, %v1858_v41 }
 0xd99   :  { %v1856_v44 = vpop.xlane.xlu1 %1855  ;;  %v1853_v43 = vpop.xlane.xlu0 %1852 }
 0xd9a   :  { %3848 = vrsqrt.f32 %v1862_v34  ;;  %v1860_v42 = vmul.f32 0.03125, %v1856_v44  ;;  %v1859_v30 = vmul.f32 0.03125, %v1853_v43  ;;  %v4712_v34 = vld [vmem:[%s5064_s5 + $0x78] sm:$0xff] }
 0xd9c   :  { %v1864_v56 = vadd.f32 1e-05, %v1860_v42  ;;  %v1863_v38 = vadd.f32 1e-05, %v1859_v30  ;;  %v4720_v42 = vld [vmem:[%s5064_s5 + $0x8] sm:$0xff] }
 0xd9e   :  { %3850 = vrsqrt.f32 %v1864_v56 }
 0xd9f   :  { %3852 = vrsqrt.f32 %v1863_v38  ;;  %v4724_v38 = vld [vmem:[%s5064_s5 + $0x28] sm:$0xff] }
 0xda3   :  { %v3847_v37 = vpop.eup %3846 }
 0xda4   :  { %v1869_v29 = vmul.f32 %v3847_v37, %v1837_v22 }
 0xda6   :  { %v1879_v35 = vmul.f32 %v3184_v48, %v1869_v29 }
 0xda7   :  { %v3849_v33 = vpop.eup %3848 }
 0xda8   :  { %v1870_v57 = vmul.f32 %v3849_v33, %v1838_v25  ;;  %v1889_v6 = vadd.f32 %v3185_v27, %v1879_v35  ;;  %v4732_v35 = vld [vmem:[%s5064_s5 + $0x68] sm:$0xff] }
 0xdaa   :  { %v1880_v1 = vmul.f32 %v3184_v48, %v1870_v57 }
 0xdab   :  { %v3851_v26 = vpop.eup %3850 }
 0xdac   :  { %v3853_v3 = vpop.eup %3852  ;;  %v1872_v46 = vmul.f32 %v3851_v26, %v1840_v45  ;;  %v1890_v32 = vadd.f32 %v3185_v27, %v1880_v1  ;;  %v4670_v45 = vld [vmem:[%s5064_s5 + $0x30] sm:$0xff] }
 0xdad   :  { %v1871_v19 = vmul.f32 %v3853_v3, %v1839_v49 }
 0xdae   :  { %v1898_v13 = vpack.c.bf16 %v1890_v32, %v1889_v6  ;;  %v1882_v28 = vmul.f32 %v3184_v48, %v1872_v46 }
 0xdaf   :  { %v1881_v61 = vmul.f32 %v3184_v48, %v1871_v19  ;;  %v4728_v48 = vld [vmem:[%s5064_s5 + $0x48] sm:$0xff] }
 0xdb0   :  { %3577 = vmatprep.mubr.msk.bf16.mxu1 %vm743_vm7, %v1898_v13  ;;  %v1892_v14 = vadd.f32 %v3185_v27, %v1882_v28 }
 0xdb1   :  { %v1891_v5 = vadd.f32 %v3185_v27, %v1881_v61 }
 0xdb3   :  { %v1899_v21 = vpack.c.bf16 %v1892_v14, %v1891_v5 }
 0xdb5   :  { %3578 = vmatmul.mubr.msk.bf16.vlgmr.msra.gmra.mxu1 %vm743_vm7, %v1899_v21 }
 0xe75   :  { %v3579_v17 = vpop.f32.mrf.mxu1 }
 0xe76   :  { %v1959_v12 = vadd.f32 %v3579_v17, %v3191_v62  ;;  %v3954_v17 = vld [vmem:[%s5065_s13] sm:$0xff] }
 0xe77   :  { %v1950_v18 = vpop.f32.mrf.mxu1 }
 0xe78   :  { %v1951_v22 = vadd.f32 %v3191_v62, %v1950_v18  ;;  %v1967_v16 = vmul.f32 %v4666_v24, %v1959_v12  ;;  %v1971_v25 = vmul.f32 %v4670_v45, %v1959_v12  ;;  %v1975_v20 = vmul.f32 %v4682_v50, %v1959_v12 }
 0xe79   :  { %v3580_v7 = vpop.f32.mrf.mxu1  ;;  %v1979_v52 = vmul.f32 %v4686_v51, %v1959_v12 }
 0xe7a   :  { %v1962_v23 = vadd.f32 %v3580_v7, %v3191_v62  ;;  %v1965_v47 = vmul.f32 %v4674_v39, %v1951_v22  ;;  %v1969_v49 = vmul.f32 %v4678_v31, %v1951_v22  ;;  %v1973_v0 = vmul.f32 %v4700_v54, %v1951_v22 }
 0xe7b   :  { %v1953_v40 = vpop.f32.mrf.mxu1  ;;  %v1977_v41 = vmul.f32 %v4708_v53, %v1951_v22 }
 0xe7c   :  { %v1968_v10 = vmul.f32 %v4690_v55, %v1962_v23  ;;  %v1954_v59 = vadd.f32 %v3191_v62, %v1953_v40  ;;  %v4693_v63 = vpack.c.bf16 %v1962_v23, %v1959_v12  ;;  %v1972_v4 = vmul.f32 %v4696_v58, %v1962_v23 }
 0xe7d   :  { %v1976_v60 = vmul.f32 %v4704_v36, %v1962_v23  ;;  %v1980_v44 = vmul.f32 %v4712_v34, %v1962_v23  ;;  %v3955_v23 = vld [vmem:[%s5065_s13 + $0x18] sm:$0xff] }
 0xe7e   :  { %1995 = vrot.lane.b32.xlu0 %v4693_v63, %s4029_s9  ;;  %v4717_v43 = vpack.c.bf16 %v1954_v59, %v1951_v22  ;;  %v1966_v30 = vmul.f32 %v4720_v42, %v1954_v59  ;;  %v1982_v56 = vpack.c.bf16 %v1968_v10, %v1967_v16  ;;  %v1970_v37 = vmul.f32 %v4724_v38, %v1954_v59 }
 0xe7f   :  { %v1984_v29 = vpack.c.bf16 %v1972_v4, %v1971_v25  ;;  %v1974_v33 = vmul.f32 %v4728_v48, %v1954_v59  ;;  %v1986_v57 = vpack.c.bf16 %v1976_v60, %v1975_v20  ;;  %v1978_v27 = vmul.f32 %v4732_v35, %v1954_v59  ;;  %v3957_v4 = vld [vmem:[%s5065_s13 + $0x10] sm:$0xff] }
 0xe80   :  { %1993 = vrot.lane.b32.xlu1 %v4717_v43, %s4029_s9  ;;  %v1981_v1 = vpack.c.bf16 %v1966_v30, %v1965_v47  ;;  %v1983_v26 = vpack.c.bf16 %v1970_v37, %v1969_v49  ;;  %v1988_v3 = vpack.c.bf16 %v1980_v44, %v1979_v52  ;;  %v3956_v47 = vld [vmem:[%s5065_s13 + $0x8] sm:$0xff] }
 0xe81   :  { %v1985_v46 = vpack.c.bf16 %v1974_v33, %v1973_v0  ;;  %v1987_v6 = vpack.c.bf16 %v1978_v27, %v1977_v41  ;;  %v3959_v27 = vld [vmem:[%s5065_s13 + $0x28] sm:$0xff] }
 0xe82   :  { %3585 = vmatprep.mubr.msk.bf16.mxu1 %vm743_vm7, %v1981_v1 }
 0xef0   :  { %v1996_v32 = vpop.permute.xlu0 %1995 }
 0xef1   :  { %v2025_v19 = vsel %vm743_vm7, %v1996_v32, 0  ;;  %3708 = vmatprep.subr.msk.bf16.mxu1 %vm743_vm7, %v1996_v32 }
 0xef2   :  { %3582 = vmatpush3.bf16.xpose.msra.mxu1 %v2025_v19  ;;  %v1994_v13 = vpop.permute.xlu1 %1993 }
 0xef3   :  { %3709 = vmatprep.subr.msk.bf16.mxu1 %vm743_vm7, %v1994_v13  ;;  %v2022_v28 = vsel %vm743_vm7, %v1994_v13, 0  ;;  %v3961_v13 = vld [vmem:[%s5065_s13 + $0x38] sm:$0xff] }
 0xefa   :  { %3584 = vmatpush3.bf16.xpose.msra.mxu1 %v2022_v28 }
 0xf01   :  { %3586 = vmatmul.mubr.msk.bf16.vlgmr.msra.gmra.mxu1 %vm743_vm7, %v1982_v56 }
 0xf02   :  { %3589 = vmatprep.mubr.msk.bf16.mxu1 %vm743_vm7, %v1983_v26 }
 0xf09   :  { %3590 = vmatmul.mubr.msk.bf16.gmra.mxu1 %vm743_vm7, %v1984_v29  ;;  %v3958_v29 = vld [vmem:[%s5065_s13 + $0x20] sm:$0xff] }
 0xf0a   :  { %3593 = vmatprep.mubr.msk.bf16.mxu1 %vm743_vm7, %v1985_v46 }
 0xf11   :  { %3594 = vmatmul.mubr.msk.bf16.gmra.mxu1 %vm743_vm7, %v1986_v57 }
 0xf12   :  { %3597 = vmatprep.mubr.msk.bf16.mxu1 %vm743_vm7, %v1987_v6 }
 0xf19   :  { %3598 = vmatmul.mubr.msk.bf16.gmra.mxu1 %vm743_vm7, %v1988_v3  ;;  %v3960_v3 = vld [vmem:[%s5065_s13 + $0x30] sm:$0xff] }
 0xfc1   :  { %v3587_v61 = vpop.f32.mrf.mxu1 }
 0xfc2   :  { %v2126_v22 = vmul.f32 0.35355338, %v3587_v61 }
 0xfc3   :  { %v2061_v14 = vpop.f32.mrf.mxu1 }
 0xfc4   :  { %v2124_v5 = vmul.f32 0.35355338, %v2061_v14  ;;  %v4765_v0 = vadd.f32 %v3957_v4, %v2126_v22  ;;  %v3962_v22 = vld [vmem:[%s5065_s13 + $0x40] sm:$0xff] }
 0xfc5   :  { %v3588_v21 = vpop.f32.mrf.mxu1 }
 0xfc6   :  { %v2127_v62 = vmul.f32 0.35355338, %v3588_v21  ;;  %v4750_v12 = vadd.f32 %v3954_v17, %v2124_v5  ;;  %v2162_v37 = vsel %vm743_vm7, %v4765_v0, -inf }
 0xfc7   :  { %v2064_v18 = vpop.f32.mrf.mxu1 }
 0xfc8   :  { %v2125_v7 = vmul.f32 0.35355338, %v2064_v18  ;;  %v2156_v16 = vsel %vm743_vm7, %v4750_v12, -inf  ;;  %v4755_v25 = vadd.f32 %v3955_v23, %v2127_v62  ;;  %v3963_v23 = vld [vmem:[%s5065_s13 + $0x48] sm:$0xff] }
 0xfc9   :  { %2157 = vmax.xlane.f32.xlu1 %v2156_v16  ;;  %v3591_v40 = vpop.f32.mrf.mxu1 }
 0xfca   :  { %v4758_v49 = vadd.f32 %v3956_v47, %v2125_v7  ;;  %v2165_v10 = vsel %vm743_vm7, %v4755_v25, -inf  ;;  %v2130_v41 = vmul.f32 0.35355338, %v3591_v40 }
 0xfcb   :  { %v2077_v20 = vpop.f32.mrf.mxu1 }
 0xfcc   :  { %v2128_v52 = vmul.f32 0.35355338, %v2077_v20  ;;  %v2159_v59 = vsel %vm743_vm7, %v4758_v49, -inf  ;;  %v4776_v46 = vadd.f32 %v3960_v3, %v2130_v41  ;;  %v3964_v20 = vld [vmem:[%s5065_s13 + $0x50] sm:$0xff] }
 0xfcd   :  { %2166 = vmax.xlane.f32.xlu1 %v2165_v10  ;;  %2160 = vmax.xlane.f32.xlu0 %v2159_v59  ;;  %v3592_v60 = vpop.f32.mrf.mxu1 }
 0xfce   :  { %v2131_v30 = vmul.f32 0.35355338, %v3592_v60  ;;  %v4770_v33 = vadd.f32 %v3958_v29, %v2128_v52  ;;  %v2174_v21 = vsel %vm743_vm7, %v4776_v46, -inf  ;;  %v3965_v60 = vld [vmem:[%s5065_s13 + $0x58] sm:$0xff] }
 0xfcf   :  { %v2080_v44 = vpop.f32.mrf.mxu1 }
 0xfd0   :  { %v2129_v56 = vmul.f32 0.35355338, %v2080_v44  ;;  %v2168_v32 = vsel %vm743_vm7, %v4770_v33, -inf  ;;  %v4783_v28 = vadd.f32 %v3961_v13, %v2131_v30 }
 0xfd1   :  { %2163 = vmax.xlane.f32.xlu0 %v2162_v37  ;;  %v3595_v57 = vpop.f32.mrf.mxu1 }
 0xfd2   :  { %v4773_v1 = vadd.f32 %v3959_v27, %v2129_v56  ;;  %v2134_v14 = vmul.f32 0.35355338, %v3595_v57  ;;  %v2177_v18 = vsel %vm743_vm7, %v4783_v28, -inf }
 0xfd3   :  { %v2093_v26 = vpop.f32.mrf.mxu1 }
 0xfd4   :  { %v2132_v6 = vmul.f32 0.35355338, %v2093_v26  ;;  %v2171_v19 = vsel %vm743_vm7, %v4773_v1, -inf  ;;  %v4796_v52 = vadd.f32 %v3964_v20, %v2134_v14  ;;  %v3966_v26 = vld [vmem:[%s5065_s13 + $0x60] sm:$0xff] }
 0xfd5   :  { %2169 = vmax.xlane.f32.xlu0 %v2168_v32  ;;  %2172 = vmax.xlane.f32.xlu1 %v2171_v19  ;;  %v3596_v61 = vpop.f32.mrf.mxu1 }
 0xfd6   :  { %v2135_v62 = vmul.f32 0.35355338, %v3596_v61  ;;  %v4790_v7 = vadd.f32 %v3962_v22, %v2132_v6  ;;  %v2186_v37 = vsel %vm743_vm7, %v4796_v52, -inf  ;;  %v3967_v6 = vld [vmem:[%s5065_s13 + $0x68] sm:$0xff]  ;;  %v3968_v61 = vld [vmem:[%s5065_s13 + $0x70] sm:$0xff] }
 0xfd7   :  { %v2096_v5 = vpop.f32.mrf.mxu1 }
 0xfd8   :  { %v2133_v17 = vmul.f32 0.35355338, %v2096_v5  ;;  %v2180_v59 = vsel %vm743_vm7, %v4790_v7, -inf  ;;  %v4803_v41 = vadd.f32 %v3965_v60, %v2135_v62  ;;  %v3969_v5 = vld [vmem:[%s5065_s13 + $0x78] sm:$0xff] }
 0xfd9   :  { %2175 = vmax.xlane.f32.xlu0 %v2174_v21  ;;  %2178 = vmax.xlane.f32.xlu1 %v2177_v18  ;;  %v3599_v16 = vpop.f32.mrf.mxu1 }
 0xfda   :  { %v4793_v40 = vadd.f32 %v3963_v23, %v2133_v17  ;;  %v2138_v30 = vmul.f32 0.35355338, %v3599_v16  ;;  %v2189_v27 = vsel %vm743_vm7, %v4803_v41, -inf }
 0xfdb   :  { %v2109_v47 = vpop.f32.mrf.mxu1 }
 0xfdc   :  { %v2136_v10 = vmul.f32 0.35355338, %v2109_v47  ;;  %v2183_v4 = vsel %vm743_vm7, %v4793_v40, -inf  ;;  %v4820_v14 = vadd.f32 %v3968_v61, %v2138_v30 }
 0xfdd   :  { %2181 = vmax.xlane.f32.xlu0 %v2180_v59  ;;  %2184 = vmax.xlane.f32.xlu1 %v2183_v4  ;;  %v3600_v44 = vpop.f32.mrf.mxu1 }
 0xfde   :  { %v2139_v29 = vmul.f32 0.35355338, %v3600_v44  ;;  %v4810_v3 = vadd.f32 %v3966_v26, %v2136_v10  ;;  %v2198_v62 = vsel %vm743_vm7, %v4820_v14, -inf }
 0xfdf   :  { %v2112_v56 = vpop.f32.mrf.mxu1 }
 0xfe0   :  { %v2137_v57 = vmul.f32 0.35355338, %v2112_v56  ;;  %v2192_v19 = vsel %vm743_vm7, %v4810_v3, -inf  ;;  %v4823_v21 = vadd.f32 %v3969_v5, %v2139_v29 }
 0xfe1   :  { %2187 = vmax.xlane.f32.xlu0 %v2186_v37  ;;  %2190 = vmax.xlane.f32.xlu1 %v2189_v27 }
 0xfe2   :  { %v4813_v32 = vadd.f32 %v3967_v6, %v2137_v57  ;;  %v2201_v17 = vsel %vm743_vm7, %v4823_v21, -inf }
 0xfe4   :  { %v2195_v13 = vsel %vm743_vm7, %v4813_v32, -inf }
 0xfe5   :  { %2193 = vmax.xlane.f32.xlu0 %v2192_v19  ;;  %2196 = vmax.xlane.f32.xlu1 %v2195_v13 }
 0xfe9   :  { %2199 = vmax.xlane.f32.xlu0 %v2198_v62  ;;  %2202 = vmax.xlane.f32.xlu1 %v2201_v17 }
0x1052   :  { %v2158_v18 = vpop.xlane.xlu1 %2157 }
0x1053   :  { %v2204_v20 = vsub.f32 %v4750_v12, %v2158_v18 }
0x1055   :  { %v2220_v44 = vmul.f32 1.442695, %v2204_v20 }
0x1056   :  { %v2167_v22 = vpop.xlane.xlu1 %2166  ;;  %v2161_v16 = vpop.xlane.xlu0 %2160 }
0x1057   :  { %v2207_v23 = vsub.f32 %v4755_v25, %v2167_v22  ;;  %v2205_v47 = vsub.f32 %v4758_v49, %v2161_v16 }
0x1059   :  { %v2226_v10 = vmul.f32 1.442695, %v2207_v23  ;;  %v2222_v59 = vmul.f32 1.442695, %v2205_v47 }
0x105a   :  { %v2164_v4 = vpop.xlane.xlu0 %2163 }
0x105b   :  { %3854 = vpow2.f32 %v2226_v10  ;;  %v2206_v60 = vsub.f32 %v4765_v0, %v2164_v4 }
0x105c   :  { %3856 = vpow2.f32 %v2222_v59 }
0x105d   :  { %v2224_v30 = vmul.f32 1.442695, %v2206_v60 }
0x105e   :  { %v2170_v56 = vpop.xlane.xlu0 %2169  ;;  %v2173_v37 = vpop.xlane.xlu1 %2172 }
0x105f   :  { %3858 = vpow2.f32 %v2224_v30  ;;  %v2208_v29 = vsub.f32 %v4770_v33, %v2170_v56  ;;  %v2209_v25 = vsub.f32 %v4773_v1, %v2173_v37 }
0x1060   :  { %3860 = vpow2.f32 %v2220_v44 }
0x1061   :  { %v2228_v26 = vmul.f32 1.442695, %v2208_v29  ;;  %v2230_v19 = vmul.f32 1.442695, %v2209_v25 }
0x1062   :  { %v2176_v49 = vpop.xlane.xlu0 %2175  ;;  %v2179_v57 = vpop.xlane.xlu1 %2178 }
0x1063   :  { %v2210_v12 = vsub.f32 %v4776_v46, %v2176_v49  ;;  %v2211_v27 = vsub.f32 %v4783_v28, %v2179_v57 }
0x1065   :  { %v2232_v6 = vmul.f32 1.442695, %v2210_v12  ;;  %v2234_v0 = vmul.f32 1.442695, %v2211_v27 }
0x1066   :  { %v2182_v13 = vpop.xlane.xlu0 %2181  ;;  %v2185_v61 = vpop.xlane.xlu1 %2184 }
0x1067   :  { %3862 = vpow2.f32 %v2232_v6  ;;  %v2212_v33 = vsub.f32 %v4790_v7, %v2182_v13  ;;  %v2213_v46 = vsub.f32 %v4793_v40, %v2185_v61 }
0x1068   :  { %v4837_v5 = vpop.eup %3854  ;;  %3864 = vpow2.f32 %v2234_v0 }
0x1069   :  { %3866 = vpow2.f32 %v2228_v26  ;;  %v2261_v1 = vsel %vm743_vm7, %v4837_v5, 0.0  ;;  %v4842_v62 = vpop.eup %3856  ;;  %v2236_v23 = vmul.f32 1.442695, %v2212_v33  ;;  %v2238_v40 = vmul.f32 1.442695, %v2213_v46 }
0x106a   :  { %3868 = vpow2.f32 %v2230_v19  ;;  %v2188_v28 = vpop.xlane.xlu0 %2187  ;;  %v2191_v17 = vpop.xlane.xlu1 %2190  ;;  %2262 = vadd.xlane.f32.xlu1 %v2261_v1  ;;  %v2255_v10 = vsel %vm743_vm7, %v4842_v62, 0.0 }
0x106b   :  { %v2214_v18 = vsub.f32 %v4796_v52, %v2188_v28  ;;  %v2215_v22 = vsub.f32 %v4803_v41, %v2191_v17 }
0x106c   :  { %v4847_v16 = vpop.eup %3858 }
0x106d   :  { %v2240_v7 = vmul.f32 1.442695, %v2214_v18  ;;  %v2242_v47 = vmul.f32 1.442695, %v2215_v22  ;;  %v2258_v20 = vsel %vm743_vm7, %v4847_v16, 0.0  ;;  %v4853_v59 = vpop.eup %3860 }
0x106e   :  { %2259 = vadd.xlane.f32.xlu0 %v2258_v20  ;;  %v2194_v4 = vpop.xlane.xlu0 %2193  ;;  %2256 = vadd.xlane.f32.xlu1 %v2255_v10  ;;  %v2197_v52 = vpop.xlane.xlu1 %2196  ;;  %v2252_v41 = vsel %vm743_vm7, %v4853_v59, 0.0 }
0x106f   :  { %3870 = vpow2.f32 %v2240_v7  ;;  %v2216_v60 = vsub.f32 %v4810_v3, %v2194_v4  ;;  %v2217_v6 = vsub.f32 %v4813_v32, %v2197_v52 }
0x1070   :  { %3872 = vpow2.f32 %v2242_v47 }
0x1071   :  { %3874 = vpow2.f32 %v2236_v23  ;;  %v2244_v12 = vmul.f32 1.442695, %v2216_v60  ;;  %v2246_v1 = vmul.f32 1.442695, %v2217_v6 }
0x1072   :  { %3876 = vpow2.f32 %v2238_v40  ;;  %2253 = vadd.xlane.f32.xlu0 %v2252_v41  ;;  %v2200_v44 = vpop.xlane.xlu0 %2199  ;;  %v2203_v56 = vpop.xlane.xlu1 %2202 }
0x1073   :  { %v2218_v30 = vsub.f32 %v4820_v14, %v2200_v44  ;;  %v2219_v27 = vsub.f32 %v4823_v21, %v2203_v56 }
0x1074   :  { %v4859_v37 = vpop.eup %3862 }
0x1075   :  { %v4861_v29 = vpop.eup %3864  ;;  %v2248_v25 = vmul.f32 1.442695, %v2218_v30  ;;  %v2270_v49 = vsel %vm743_vm7, %v4859_v37, 0.0  ;;  %v2250_v0 = vmul.f32 1.442695, %v2219_v27 }
0x1076   :  { %v4865_v57 = vpop.eup %3866  ;;  %2271 = vadd.xlane.f32.xlu0 %v2270_v49  ;;  %v2273_v3 = vsel %vm743_vm7, %v4861_v29, 0.0 }
0x1077   :  { %v4870_v26 = vpop.eup %3868  ;;  %3878 = vpow2.f32 %v2248_v25  ;;  %2274 = vadd.xlane.f32.xlu1 %v2273_v3  ;;  %v2264_v14 = vsel %vm743_vm7, %v4865_v57, 0.0 }
0x1078   :  { %3880 = vpow2.f32 %v2244_v12  ;;  %v2267_v19 = vsel %vm743_vm7, %v4870_v26, 0.0 }
0x1079   :  { %3882 = vpow2.f32 %v2250_v0 }
0x107a   :  { %2265 = vadd.xlane.f32.xlu0 %v2264_v14  ;;  %3884 = vpow2.f32 %v2246_v1 }
0x107b   :  { %2268 = vadd.xlane.f32.xlu1 %v2267_v19 }
0x107c   :  { %v4877_v21 = vpop.eup %3870 }
0x107d   :  { %v4879_v13 = vpop.eup %3872  ;;  %v2282_v61 = vsel %vm743_vm7, %v4877_v21, 0.0 }
0x107e   :  { %v4883_v33 = vpop.eup %3874  ;;  %2283 = vadd.xlane.f32.xlu0 %v2282_v61  ;;  %v2285_v32 = vsel %vm743_vm7, %v4879_v13, 0.0 }
0x107f   :  { %v4887_v46 = vpop.eup %3876  ;;  %2286 = vadd.xlane.f32.xlu1 %v2285_v32  ;;  %v2276_v28 = vsel %vm743_vm7, %v4883_v33, 0.0 }
0x1080   :  { %v2279_v17 = vsel %vm743_vm7, %v4887_v46, 0.0 }
0x1082   :  { %2277 = vadd.xlane.f32.xlu0 %v2276_v28 }
0x1083   :  { %2280 = vadd.xlane.f32.xlu1 %v2279_v17 }
0x1084   :  { %v4893_v18 = vpop.eup %3878 }
0x1085   :  { %v2294_v22 = vsel %vm743_vm7, %v4893_v18, 0.0  ;;  %v4897_v23 = vpop.eup %3880 }
0x1086   :  { %v2288_v7 = vsel %vm743_vm7, %v4897_v23, 0.0  ;;  %v4901_v47 = vpop.eup %3882 }
0x1087   :  { %2295 = vadd.xlane.f32.xlu1 %v2294_v22  ;;  %v2297_v20 = vsel %vm743_vm7, %v4901_v47, 0.0  ;;  %v4905_v10 = vpop.eup %3884 }
0x1088   :  { %v2291_v40 = vsel %vm743_vm7, %v4905_v10, 0.0 }
0x108b   :  { %2289 = vadd.xlane.f32.xlu1 %v2288_v7 }
0x108f   :  { %2298 = vadd.xlane.f32.xlu1 %v2297_v20 }
0x1093   :  { %2292 = vadd.xlane.f32.xlu1 %v2291_v40 }
0x1098   :  { %2342 = vrot.lane.b32.xlu0 %v4693_v63, %s4030_s17 }
0x10a4   :  { %2340 = vrot.lane.b32.xlu1 %v4717_v43, %s4030_s17 }
0x10f3   :  { %v2263_v4 = vpop.xlane.xlu1 %2262 }
0x10f7   :  { %v2260_v52 = vpop.xlane.xlu0 %2259  ;;  %v2257_v41 = vpop.xlane.xlu1 %2256 }
0x10f8   :  { %3886 = vrcp.f32 %v2257_v41 }
0x10fb   :  { %v2254_v60 = vpop.xlane.xlu0 %2253 }
0x10fc   :  { %3888 = vrcp.f32 %v2254_v60 }
0x10fd   :  { %3890 = vrcp.f32 %v2260_v52 }
0x10ff   :  { %v2272_v44 = vpop.xlane.xlu0 %2271 }
0x1100   :  { %v2275_v30 = vpop.xlane.xlu1 %2274 }
0x1103   :  { %v2266_v56 = vpop.xlane.xlu0 %2265 }
0x1104   :  { %v2269_v25 = vpop.xlane.xlu1 %2268  ;;  %3892 = vrcp.f32 %v2266_v56 }
0x1105   :  { %v3887_v49 = vpop.eup %3886  ;;  %3894 = vrcp.f32 %v2269_v25 }
0x1106   :  { %v2317_v63 = vmul.f32 %v3887_v49, %v4842_v62  ;;  %3896 = vrcp.f32 %v2263_v4 }
0x1107   :  { %v2284_v12 = vpop.xlane.xlu0 %2283  ;;  %3898 = vrcp.f32 %v2272_v44 }
0x1108   :  { %v2287_v27 = vpop.xlane.xlu1 %2286  ;;  %3900 = vrcp.f32 %v2275_v30 }
0x1109   :  { %v3889_v3 = vpop.eup %3888 }
0x110a   :  { %v2316_v14 = vmul.f32 %v3889_v3, %v4853_v59  ;;  %v3891_v62 = vpop.eup %3890 }
0x110b   :  { %v2278_v6 = vpop.xlane.xlu0 %2277  ;;  %v2318_v7 = vmul.f32 %v3891_v62, %v4847_v16 }
0x110c   :  { %v2281_v43 = vpop.xlane.xlu1 %2280  ;;  %v2332_v0 = vpack.c.bf16 %v2317_v63, %v2316_v14  ;;  %3902 = vrcp.f32 %v2278_v6 }
0x110d   :  { %3904 = vrcp.f32 %v2281_v43 }
0x110e   :  { %3605 = vmatprep.mubr.msk.bf16.mxu0 %vm743_vm7, %v2332_v0  ;;  %3906 = vrcp.f32 %v2284_v12 }
0x110f   :  { %v2343_v19 = vpop.permute.xlu0 %2342  ;;  %3908 = vrcp.f32 %v2287_v27 }
0x1110   :  { %v2296_v61 = vpop.xlane.xlu1 %2295  ;;  %3601 = vmatprep.subr.bf16.mxu0 %v2343_v19 }
0x1111   :  { %3602 = vmatpush3.bf16.msra.mxu0 %v2343_v19  ;;  %v3893_v32 = vpop.eup %3892 }
0x1112   :  { %v3895_v17 = vpop.eup %3894  ;;  %v2320_v40 = vmul.f32 %v3893_v32, %v4865_v57  ;;  %v3211_v32 = vld [vmem:[%s5067_s25 + $0x28] sm:$0xff] }
0x1113   :  { %v3897_v22 = vpop.eup %3896  ;;  %v2321_v4 = vmul.f32 %v3895_v17, %v4870_v26 }
0x1114   :  { %v2290_v1 = vpop.xlane.xlu1 %2289  ;;  %v2319_v52 = vmul.f32 %v3897_v22, %v4837_v5  ;;  %v3899_v41 = vpop.eup %3898 }
0x1115   :  { %v3901_v60 = vpop.eup %3900  ;;  %v2334_v56 = vpack.c.bf16 %v2321_v4, %v2320_v40  ;;  %v2322_v16 = vmul.f32 %v3899_v41, %v4859_v37 }
0x1116   :  { %v2333_v44 = vpack.c.bf16 %v2319_v52, %v2318_v7  ;;  %v2323_v57 = vmul.f32 %v3901_v60, %v4861_v29 }
0x1118   :  { %v2299_v59 = vpop.xlane.xlu1 %2298  ;;  %v2335_v12 = vpack.c.bf16 %v2323_v57, %v2322_v16 }
0x1119   :  { %v3903_v30 = vpop.eup %3902 }
0x111a   :  { %v3905_v25 = vpop.eup %3904  ;;  %v2324_v26 = vmul.f32 %v3903_v30, %v4883_v33 }
0x111b   :  { %v2325_v5 = vmul.f32 %v3905_v25, %v4887_v46  ;;  %v3907_v49 = vpop.eup %3906 }
0x111c   :  { %v2293_v28 = vpop.xlane.xlu1 %2292  ;;  %v3909_v27 = vpop.eup %3908  ;;  %v2326_v37 = vmul.f32 %v3907_v49, %v4877_v21 }
0x111d   :  { %3910 = vrcp.f32 %v2293_v28  ;;  %v2336_v3 = vpack.c.bf16 %v2325_v5, %v2324_v26  ;;  %v2327_v29 = vmul.f32 %v3909_v27, %v4879_v13 }
0x111e   :  { %3912 = vrcp.f32 %v2290_v1  ;;  %v3212_v1 = vld [vmem:[%s5067_s25 + $0x30] sm:$0xff] }
0x111f   :  { %3914 = vrcp.f32 %v2299_v59  ;;  %v2337_v6 = vpack.c.bf16 %v2327_v29, %v2326_v37  ;;  %v3210_v59 = vld [vmem:[%s5067_s25 + $0x20] sm:$0xff] }
0x1120   :  { %v2341_v20 = vpop.permute.xlu1 %2340  ;;  %3916 = vrcp.f32 %v2296_v61  ;;  %v2575_v28 = vpack.c.bf16 %v3211_v32, %v3210_v59 }
0x1121   :  { %3603 = vmatprep.subr.bf16.mxu0 %v2341_v20 }
0x1122   :  { %3604 = vmatpush3.bf16.msra.mxu0 %v2341_v20 }
0x1125   :  { %3606 = vmatmul.mubr.msk.bf16.vlgmr.msra.gmra.mxu0 %vm743_vm7, %v2333_v44 }
0x1126   :  { %3609 = vmatprep.mubr.msk.bf16.mxu0 %vm743_vm7, %v2334_v56 }
0x112a   :  { %v3911_v14 = vpop.eup %3910 }
0x112b   :  { %v3913_v63 = vpop.eup %3912  ;;  %v2329_v33 = vmul.f32 %v3911_v14, %v4905_v10  ;;  %v3970_v10 = vld [vmem:[%s5066_s21] sm:$0xff] }
0x112c   :  { %v2328_v46 = vmul.f32 %v3913_v63, %v4897_v23  ;;  %v3915_v43 = vpop.eup %3914  ;;  %v3213_v23 = vld [vmem:[%s5067_s25 + $0x38] sm:$0xff] }
0x112d   :  { %3610 = vmatmul.mubr.msk.bf16.gmra.mxu0 %vm743_vm7, %v2335_v12  ;;  %v3917_v19 = vpop.eup %3916  ;;  %v2331_v21 = vmul.f32 %v3915_v43, %v4901_v47  ;;  %v2576_v62 = vpack.c.bf16 %v3213_v23, %v3212_v1 }
0x112e   :  { %3613 = vmatprep.mubr.msk.bf16.mxu0 %vm743_vm7, %v2336_v3  ;;  %v2338_v0 = vpack.c.bf16 %v2329_v33, %v2328_v46  ;;  %v2330_v61 = vmul.f32 %v3917_v19, %v4893_v18 }
0x112f   :  { %3659 = vmatprep.subr.bf16.mxu1 %v2576_v62 }
0x1130   :  { %v2339_v13 = vpack.c.bf16 %v2331_v21, %v2330_v61  ;;  %3660 = vmatpush3.bf16.msra.mxu1 %v2576_v62 }
0x1131   :  { %3661 = vmatprep.subr.bf16.mxu1 %v2575_v28 }
0x1134   :  { %3662 = vmatpush3.bf16.msra.mxu1 %v2575_v28 }
0x1135   :  { %3614 = vmatmul.mubr.msk.bf16.gmra.mxu0 %vm743_vm7, %v2337_v6  ;;  %v3217_v6 = vld [vmem:[%s5068_s29 + $0x1] ss:$0 sm:$0xff] }
0x1136   :  { %3617 = vmatprep.mubr.msk.bf16.mxu0 %vm743_vm7, %v2338_v0 }
0x113d   :  { %3618 = vmatmul.mubr.msk.bf16.gmra.mxu0 %vm743_vm7, %v2339_v13 }
0x113e   :  { %3653 = vmatprep.mubr.f32.mxu0 %v3970_v10 }
0x11e5   :  { %v3607_v17 = vpop.f32.mrf.mxu0 }
0x11e7   :  { %v2404_v22 = vpop.f32.mrf.mxu0 }
0x11e9   :  { %v3608_v47 = vpop.f32.mrf.mxu0 }
0x11eb   :  { %v2407_v7 = vpop.f32.mrf.mxu0 }
0x11ed   :  { %v3611_v18 = vpop.f32.mrf.mxu0 }
0x11ef   :  { %v2420_v20 = vpop.f32.mrf.mxu0 }
0x11f1   :  { %v3612_v40 = vpop.f32.mrf.mxu0 }
0x11f3   :  { %v2423_v4 = vpop.f32.mrf.mxu0 }
0x11f5   :  { %v3615_v52 = vpop.f32.mrf.mxu0 }
0x11f6   :  { %v2477_v27 = vmul.f32 %v4682_v50, %v3615_v52  ;;  %v2472_v50 = vmul.f32 %v4724_v38, %v2423_v4  ;;  %v2467_v38 = vmul.f32 %v4674_v39, %v2404_v22 }
0x11f7   :  { %v2436_v41 = vpop.f32.mrf.mxu0 }
0x11f9   :  { %v3616_v60 = vpop.f32.mrf.mxu0 }
0x11fa   :  { %v2478_v12 = vmul.f32 %v4704_v36, %v3616_v60  ;;  %v2473_v36 = vmul.f32 %v4670_v45, %v3611_v18  ;;  %v2468_v45 = vmul.f32 %v4720_v42, %v2407_v7 }
0x11fb   :  { %v2439_v44 = vpop.f32.mrf.mxu0 }
0x11fd   :  { %v3619_v30 = vpop.f32.mrf.mxu0 }
0x11fe   :  { %v2481_v26 = vmul.f32 %v4686_v51, %v3619_v30  ;;  %v2476_v51 = vmul.f32 %v4728_v48, %v2439_v44  ;;  %v2471_v48 = vmul.f32 %v4678_v31, %v2420_v20  ;;  %v3971_v31 = vld [vmem:[%s5066_s21 + $0x8] sm:$0xff] }
0x11ff   :  { %v2452_v56 = vpop.f32.mrf.mxu0 }
0x1200   :  { %v2479_v49 = vmul.f32 %v4708_v53, %v2452_v56  ;;  %v2474_v53 = vmul.f32 %v4696_v58, %v3612_v40  ;;  %v2469_v58 = vmul.f32 %v4666_v24, %v3607_v17 }
0x1201   :  { %v3620_v25 = vpop.f32.mrf.mxu0 }
0x1202   :  { %v2482_v16 = vmul.f32 %v4712_v34, %v3620_v25  ;;  %v2475_v34 = vmul.f32 %v4700_v54, %v2436_v41  ;;  %v2470_v54 = vmul.f32 %v4690_v55, %v3608_v47  ;;  %v3972_v55 = vld [vmem:[%s5066_s21 + $0x10] sm:$0xff] }
0x1203   :  { %v2455_v57 = vpop.f32.mrf.mxu0 }
0x1204   :  { %3621 = vmatprep.subr.mxu0 %v2482_v16  ;;  %v2480_v5 = vmul.f32 %v4732_v35, %v2455_v57  ;;  %v3973_v35 = vld [vmem:[%s5066_s21 + $0x18] sm:$0xff] }
0x1205   :  { %3622 = vmatpush3.msra.mxu0 %v2482_v16  ;;  %v3224_v16 = vld [vmem:[%s5069_s24 + $0x30] sm:$0xff]  ;;  %v3225_v57 = vld [vmem:[%s5069_s24 + $0x38] sm:$0xff] }
0x1206   :  { %3623 = vmatprep.subr.mxu0 %v2481_v26 }
0x1207   :  { %3624 = vmatpush3.msra.mxu0 %v2481_v26  ;;  %v2732_v26 = vpack.c.bf16 %v3225_v57, %v3224_v16 }
0x1208   :  { %3625 = vmatprep.subr.mxu0 %v2480_v5 }
0x1209   :  { %3626 = vmatpush3.msra.mxu0 %v2480_v5  ;;  %v3222_v5 = vld [vmem:[%s5069_s24 + $0x20] sm:$0xff] }
0x120a   :  { %3627 = vmatprep.subr.mxu0 %v2479_v49 }
0x120b   :  { %3628 = vmatpush3.msra.mxu0 %v2479_v49  ;;  %v3223_v49 = vld [vmem:[%s5069_s24 + $0x28] sm:$0xff] }
0x120c   :  { %3629 = vmatprep.subr.mxu0 %v2478_v12 }
0x120d   :  { %3630 = vmatpush3.msra.mxu0 %v2478_v12  ;;  %v2731_v12 = vpack.c.bf16 %v3223_v49, %v3222_v5 }
0x120e   :  { %3631 = vmatprep.subr.mxu0 %v2477_v27 }
0x120f   :  { %3632 = vmatpush3.msra.mxu0 %v2477_v27 }
0x1210   :  { %3633 = vmatprep.subr.mxu0 %v2476_v51 }
0x1211   :  { %3634 = vmatpush3.msra.mxu0 %v2476_v51 }
0x1212   :  { %3635 = vmatprep.subr.mxu0 %v2475_v34 }
0x1213   :  { %3636 = vmatpush3.msra.mxu0 %v2475_v34 }
0x1214   :  { %3637 = vmatprep.subr.mxu0 %v2474_v53 }
0x1215   :  { %3638 = vmatpush3.msra.mxu0 %v2474_v53 }
0x1216   :  { %3639 = vmatprep.subr.mxu0 %v2473_v36 }
0x1217   :  { %3640 = vmatpush3.msra.mxu0 %v2473_v36 }
0x1218   :  { %3641 = vmatprep.subr.mxu0 %v2472_v50 }
0x1219   :  { %3642 = vmatpush3.msra.mxu0 %v2472_v50 }
0x121a   :  { %3643 = vmatprep.subr.mxu0 %v2471_v48 }
0x121b   :  { %3644 = vmatpush3.msra.mxu0 %v2471_v48 }
0x121c   :  { %3645 = vmatprep.subr.mxu0 %v2470_v54 }
0x121d   :  { %3646 = vmatpush3.msra.mxu0 %v2470_v54 }
0x121e   :  { %3647 = vmatprep.subr.mxu0 %v2469_v58 }
0x121f   :  { %3648 = vmatpush3.msra.mxu0 %v2469_v58 }
0x1220   :  { %3649 = vmatprep.subr.mxu0 %v2468_v45 }
0x1221   :  { %3650 = vmatpush3.msra.mxu0 %v2468_v45 }
0x1222   :  { %3651 = vmatprep.subr.mxu0 %v2467_v38 }
0x1223   :  { %3652 = vmatpush3.msra.mxu0 %v2467_v38 }
0x1224   :  { %3654 = vmatmul.mubr.f32.vlgmr.msra.gmra.mxu0 %v3971_v31  ;;  %3667 = vmatprep.subr.bf16.mxu0 %v2732_v26 }
0x1225   :  { %3656 = vmatprep.mubr.f32.mxu0 %v3972_v55  ;;  %3668 = vmatpush3.bf16.msra.mxu0 %v2732_v26 }
0x1226   :  { %3669 = vmatprep.subr.bf16.mxu0 %v2731_v12 }
0x1228   :  { %3657 = vmatmul.mubr.f32.gmra.mxu0 %v3973_v35 }
0x1229   :  { %3670 = vmatpush3.bf16.msra.mxu0 %v2731_v12 }
0x12e4   :  { %v3655_v24 = vpop.f32.mrf.mxu0 }
0x12e6   :  { %v2549_v3 = vpop.f32.mrf.mxu0 }
0x12e7   :  { %v2573_v14 = vpack.c.bf16 %v3655_v24, %v2549_v3  ;;  %v3220_v24 = vld [vmem:[%s5070_s30 + $0x1] ss:$0 sm:$0xff] }
0x12e8   :  { %v3658_v63 = vpop.f32.mrf.mxu0 }
0x12e9   :  { %3663 = vmatprep.mubr.msk.bf16.mxu1 %vm743_vm7, %v2573_v14 }
0x12ea   :  { %v2559_v42 = vpop.f32.mrf.mxu0 }
0x12eb   :  { %v2574_v37 = vpack.c.bf16 %v3658_v63, %v2559_v42  ;;  %v3221_v42 = vld [vmem:[%s5071_s6 + $0x1] ss:$0 sm:$0xff] }
0x12ed   :  { %3664 = vmatmul.mubr.msk.bf16.vlgmr.msra.gmra.mxu1 %vm743_vm7, %v2574_v37 }
0x13ad   :  { %v3665_v39 = vpop.f32.mrf.mxu1 }
0x13ae   :  { %v2634_v33 = vadd.f32 %v3665_v39, %v4642_v2 }
0x13af   :  { %v2617_v29 = vpop.f32.mrf.mxu1 }
0x13b0   :  { %v2632_v46 = vadd.f32 %v2617_v29, %v4629_v9  ;;  %v4968_v21 = vadd.f32 %v3217_v6, %v2634_v33 }
0x13b1   :  { %v3666_v43 = vpop.f32.mrf.mxu1 }
0x13b2   :  { %v4966_v0 = vadd.f32 %v3217_v6, %v2632_v46  ;;  %v2635_v61 = vadd.f32 %v3666_v43, %v4633_v8  ;;  %v2658_v9 = vsel %vm743_vm7, %v4968_v21, 0.0 }
0x13b3   :  { %v2620_v19 = vpop.f32.mrf.mxu1 }
0x13b4   :  { %v2633_v13 = vadd.f32 %v2620_v19, %v4638_v15  ;;  %v2652_v10 = vsel %vm743_vm7, %v4966_v0, 0.0  ;;  %v4976_v2 = vadd.f32 %v3217_v6, %v2635_v61 }
0x13b5   :  { %2653 = vadd.xlane.f32.xlu0 %v2652_v10 }
0x13b6   :  { %v4974_v1 = vadd.f32 %v3217_v6, %v2633_v13  ;;  %v2661_v8 = vsel %vm743_vm7, %v4976_v2, 0.0 }
0x13b8   :  { %v2655_v23 = vsel %vm743_vm7, %v4974_v1, 0.0 }
0x13b9   :  { %2659 = vadd.xlane.f32.xlu0 %v2658_v9  ;;  %2656 = vadd.xlane.f32.xlu1 %v2655_v23 }
0x13bd   :  { %2662 = vadd.xlane.f32.xlu0 %v2661_v8  ;;  %v3236_v8 = vld [vmem:[%s5072_s12 + $0x70] sm:$0xff] }
0x143e   :  { %v2654_v15 = vpop.xlane.xlu0 %2653 }
0x143f   :  { %v2664_v59 = vmul.f32 0.03125, %v2654_v15  ;;  %v3237_v15 = vld [vmem:[%s5072_s12 + $0x78] sm:$0xff] }
0x1441   :  { %v2668_v62 = vsub.f32 %v4966_v0, %v2664_v59  ;;  %v2830_v59 = vpack.c.bf16 %v3237_v15, %v3236_v8 }
0x1442   :  { %v2660_v32 = vpop.xlane.xlu0 %2659  ;;  %v2657_v28 = vpop.xlane.xlu1 %2656 }
0x1443   :  { %v2666_v17 = vmul.f32 0.03125, %v2660_v32  ;;  %v2665_v22 = vmul.f32 0.03125, %v2657_v28  ;;  %v2672_v47 = vmul.f32 %v2668_v62, %v2668_v62  ;;  %3675 = vmatprep.subr.bf16.mxu1 %v2830_v59  ;;  %v3235_v32 = vld [vmem:[%s5072_s12 + $0x68] sm:$0xff] }
0x1444   :  { %3676 = vmatpush3.bf16.msra.mxu1 %v2830_v59 }
0x1445   :  { %v2670_v7 = vsub.f32 %v4968_v21, %v2666_v17  ;;  %v2669_v18 = vsub.f32 %v4974_v1, %v2665_v22  ;;  %v2676_v20 = vsel %vm743_vm7, %v2672_v47, 0.0  ;;  %v3232_v17 = vld [vmem:[%s5072_s12 + $0x50] sm:$0xff]  ;;  %v3233_v22 = vld [vmem:[%s5072_s12 + $0x58] sm:$0xff] }
0x1446   :  { %2677 = vadd.xlane.f32.xlu0 %v2676_v20  ;;  %v2663_v40 = vpop.xlane.xlu0 %2662  ;;  %v2828_v47 = vpack.c.bf16 %v3233_v22, %v3232_v17 }
0x1447   :  { %v2667_v4 = vmul.f32 0.03125, %v2663_v40  ;;  %v2673_v52 = vmul.f32 %v2669_v18, %v2669_v18  ;;  %v2674_v44 = vmul.f32 %v2670_v7, %v2670_v7  ;;  %v3227_v40 = vld [vmem:[%s5073_s15 + $0x1] ss:$0 sm:$0xff] }
0x1449   :  { %v2671_v41 = vsub.f32 %v4976_v2, %v2667_v4  ;;  %v2679_v60 = vsel %vm743_vm7, %v2673_v52, 0.0  ;;  %v2682_v25 = vsel %vm743_vm7, %v2674_v44, 0.0 }
0x144a   :  { %2680 = vadd.xlane.f32.xlu0 %v2679_v60 }
0x144b   :  { %v2675_v30 = vmul.f32 %v2671_v41, %v2671_v41 }
0x144d   :  { %v2685_v56 = vsel %vm743_vm7, %v2675_v30, 0.0 }
0x144e   :  { %2686 = vadd.xlane.f32.xlu1 %v2685_v56  ;;  %2683 = vadd.xlane.f32.xlu0 %v2682_v25 }
0x14cf   :  { %v2678_v27 = vpop.xlane.xlu0 %2677 }
0x14d0   :  { %v2688_v51 = vmul.f32 0.03125, %v2678_v27 }
0x14d2   :  { %v2692_v34 = vadd.f32 1e-05, %v2688_v51 }
0x14d3   :  { %v2681_v53 = vpop.xlane.xlu0 %2680 }
0x14d4   :  { %3918 = vrsqrt.f32 %v2692_v34  ;;  %v2689_v36 = vmul.f32 0.03125, %v2681_v53 }
0x14d6   :  { %v2693_v50 = vadd.f32 1e-05, %v2689_v36 }
0x14d7   :  { %v2684_v48 = vpop.xlane.xlu0 %2683  ;;  %v2687_v54 = vpop.xlane.xlu1 %2686 }
0x14d8   :  { %3920 = vrsqrt.f32 %v2693_v50  ;;  %v2690_v58 = vmul.f32 0.03125, %v2684_v48  ;;  %v2691_v45 = vmul.f32 0.03125, %v2687_v54 }
0x14da   :  { %v2694_v38 = vadd.f32 1e-05, %v2690_v58  ;;  %v2695_v31 = vadd.f32 1e-05, %v2691_v45 }
0x14dc   :  { %3922 = vrsqrt.f32 %v2694_v38 }
0x14dd   :  { %3924 = vrsqrt.f32 %v2695_v31 }
0x14e1   :  { %v3919_v55 = vpop.eup %3918 }
0x14e2   :  { %v2700_v35 = vmul.f32 %v3919_v55, %v2668_v62  ;;  %v3234_v62 = vld [vmem:[%s5072_s12 + $0x60] sm:$0xff] }
0x14e3   :  { %v2829_v28 = vpack.c.bf16 %v3235_v32, %v3234_v62 }
0x14e4   :  { %v2710_v63 = vmul.f32 %v3220_v24, %v2700_v35 }
0x14e5   :  { %v3921_v3 = vpop.eup %3920  ;;  %3677 = vmatprep.subr.bf16.mxu1 %v2829_v28 }
0x14e6   :  { %v2701_v14 = vmul.f32 %v3921_v3, %v2669_v18  ;;  %v2720_v46 = vadd.f32 %v3221_v42, %v2710_v63  ;;  %3678 = vmatpush3.bf16.msra.mxu1 %v2829_v28  ;;  %v3231_v18 = vld [vmem:[%s5072_s12 + $0x48] sm:$0xff] }
0x14e7   :  { %3679 = vmatprep.subr.bf16.mxu1 %v2828_v47 }
0x14e8   :  { %v2711_v37 = vmul.f32 %v3220_v24, %v2701_v14  ;;  %v2902_v14 = vld [vmem:[%s5075_s20] sm:$0xff] }
0x14e9   :  { %v3923_v39 = vpop.eup %3922 }
0x14ea   :  { %v3925_v29 = vpop.eup %3924  ;;  %v2702_v33 = vmul.f32 %v3923_v39, %v2670_v7  ;;  %v2721_v6 = vadd.f32 %v3221_v42, %v2711_v37  ;;  %3680 = vmatpush3.bf16.msra.mxu1 %v2828_v47  ;;  %v3230_v7 = vld [vmem:[%s5072_s12 + $0x40] sm:$0xff] }
0x14eb   :  { %v2703_v43 = vmul.f32 %v3925_v29, %v2671_v41  ;;  %v2827_v20 = vpack.c.bf16 %v3231_v18, %v3230_v7  ;;  %v3031_v7 = vld [vmem:[%s4187_s3 + $0x10] sm:$0xff]  ;;  %v3032_v18 = vld [vmem:[%s4187_s3 + $0x18] sm:$0xff] }
0x14ec   :  { %v2712_v19 = vmul.f32 %v3220_v24, %v2702_v33  ;;  %v2729_v61 = vpack.c.bf16 %v2721_v6, %v2720_v46  ;;  %v3241_v33 = vld [vmem:[%s5074_s16 + $0x1] ss:$0 sm:$0xff] }
0x14ed   :  { %v2713_v13 = vmul.f32 %v3220_v24, %v2703_v43  ;;  %3681 = vmatprep.subr.bf16.mxu1 %v2827_v20 }
0x14ee   :  { %v2722_v10 = vadd.f32 %v3221_v42, %v2712_v19  ;;  %3671 = vmatprep.mubr.msk.bf16.mxu0 %vm743_vm7, %v2729_v61  ;;  %3682 = vmatpush3.bf16.msra.mxu1 %v2827_v20  ;;  %v3035_v20 = vpack.c.bf16 %v3032_v18, %v3031_v7 }
0x14ef   :  { %v2723_v9 = vadd.f32 %v3221_v42, %v2713_v13 }
0x14f1   :  { %v2730_v23 = vpack.c.bf16 %v2723_v9, %v2722_v10 }
0x14f3   :  { %3672 = vmatmul.mubr.msk.bf16.vlgmr.msra.gmra.mxu0 %vm743_vm7, %v2730_v23 }
0x14f4   :  { %3695 = vmatprep.mubr.msk.f32.mxu0 %vm743_vm7, %v2902_v14 }
0x15b3   :  { %v3673_v4 = vpop.f32.mrf.mxu0 }
0x15b4   :  { %v2790_v52 = vadd.f32 %v3673_v4, %v3227_v40  ;;  %v3030_v4 = vld [vmem:[%s4187_s3 + $0x8] sm:$0xff] }
0x15b5   :  { %v2781_v41 = vpop.f32.mrf.mxu0 }
0x15b6   :  { %v2782_v60 = vadd.f32 %v3227_v40, %v2781_v41  ;;  %v2802_v44 = vmul.f32 0.70710677, %v2790_v52  ;;  %v2798_v45 = vmul.f32 0.5, %v2790_v52 }
0x15b7   :  { %v3674_v30 = vpop.f32.mrf.mxu0 }
0x15b8   :  { %v2800_v56 = vmul.f32 0.70710677, %v2782_v60  ;;  %v2793_v25 = vadd.f32 %v3674_v30, %v3227_v40  ;;  %v2796_v48 = vmul.f32 0.5, %v2782_v60 }
0x15b9   :  { %v2784_v16 = vpop.f32.mrf.mxu0 }
0x15ba   :  { %3926 = verf.f32 %v2800_v56  ;;  %v2803_v57 = vmul.f32 0.70710677, %v2793_v25  ;;  %v2785_v26 = vadd.f32 %v3227_v40, %v2784_v16  ;;  %v2799_v50 = vmul.f32 0.5, %v2793_v25  ;;  %v3029_v40 = vld [vmem:[%s4187_s3] sm:$0xff]  ;;  %s4031_s3 = smov [#allocation2]  }
0x15bb   :  { %3928 = verf.f32 %v2802_v44  ;;  %v3034_v52 = vpack.c.bf16 %v3030_v4, %v3029_v40  ;;  %s3087_s27 = sshll.u32 %s4031_s3, 4  ;;  %s3088_s27 = int_to_ptr.vmem [resolvable:$true] %s3087_s27 }
0x15bc   :  { %3930 = verf.f32 %v2803_v57  ;;  %v2801_v5 = vmul.f32 0.70710677, %v2785_v26  ;;  %v2797_v54 = vmul.f32 0.5, %v2785_v26  ;;  %v3244_v57 = vld [vmem:[%s4177_s14] ss:$0 sm:$0xff]  ;;  %s3974_s14 = scalar_lea.vmem %s3088_s27, 256  ;;  %p3979_p1 = scmp.lt.s32.totalorder %s3088_s27, %s3088_s27 }
0x15bd   :  { %p3975_p0 = scmp.ne.s32.totalorder %s3088_s27, %s3974_s14  ;;  %p3980_p2 = scmp.lt.s32.totalorder %s3974_s14, %s3974_s14 }
0x15be   :  { %3932 = verf.f32 %v2801_v5 }
0x15bf   :  { %p3981_p3 = por %p3980_p2, %p3979_p1 }
0x15c1   :  { %p3982_p4 = pnand %p3981_p3, %p3975_p0 }
0x15c7   :  { %v3927_v49 = vpop.eup %3926 }
0x15c8   :  { %v3929_v12 = vpop.eup %3928  ;;  %v2808_v51 = vadd.f32 1.0, %v3927_v49 }
0x15c9   :  { %v3931_v27 = vpop.eup %3930  ;;  %v2810_v36 = vadd.f32 1.0, %v3929_v12 }
0x15ca   :  { %v2811_v34 = vadd.f32 1.0, %v3931_v27  ;;  %v2812_v31 = vmul.f32 %v2808_v51, %v2796_v48  ;;  %v3245_v27 = vld [vmem:[%s4182_s8] ss:$0 sm:$0xff] }
0x15cb   :  { %v3933_v53 = vpop.eup %3932  ;;  %v2814_v35 = vmul.f32 %v2810_v36, %v2798_v45 }
0x15cc   :  { %v2809_v58 = vadd.f32 1.0, %v3933_v53  ;;  %v2815_v38 = vmul.f32 %v2811_v34, %v2799_v50 }
0x15ce   :  { %v2813_v55 = vmul.f32 %v2809_v58, %v2797_v54  ;;  %v2826_v3 = vpack.c.bf16 %v2815_v38, %v2814_v35 }
0x15d0   :  { %v2825_v24 = vpack.c.bf16 %v2813_v55, %v2812_v31 }
0x15d2   :  { %3683 = vmatprep.mubr.msk.bf16.mxu1 %vm1746_vm8, %v2825_v24 }
0x15d3   :  { %3684 = vmatmul.mubr.msk.bf16.vlgmr.msra.gmra.mxu1 %vm1746_vm8, %v2826_v3 }
0x1693   :  { %v3685_v63 = vpop.f32.mrf.mxu1 }
0x1694   :  { %v2888_v39 = vadd.f32 %v3685_v63, %v4968_v21  ;;  %v2903_v21 = vld [vmem:[%s5075_s20 + $0x8] sm:$0xff] }
0x1695   :  { %v2871_v42 = vpop.f32.mrf.mxu1 }
0x1696   :  { %v2900_v19 = vadd.f32 %v3241_v33, %v2888_v39  ;;  %v2886_v61 = vadd.f32 %v2871_v42, %v4966_v0 }
0x1697   :  { %v3686_v37 = vpop.f32.mrf.mxu1 }
0x1698   :  { %v2889_v29 = vadd.f32 %v3686_v37, %v4976_v2  ;;  %v2898_v10 = vadd.f32 %v3241_v33, %v2886_v61 }
0x1699   :  { %v2874_v46 = vpop.f32.mrf.mxu1 }
0x169a   :  { %v2901_v6 = vadd.f32 %v3241_v33, %v2889_v29  ;;  %v2887_v43 = vadd.f32 %v2874_v46, %v4974_v1 }
0x169c   :  { %3687 = vmatprep.subr.mxu0 %v2901_v6  ;;  %v2899_v13 = vadd.f32 %v3241_v33, %v2887_v43 }
0x169d   :  { %3688 = vmatpush3.msra.mxu0 %v2901_v6 }
0x169e   :  { %3689 = vmatprep.subr.mxu0 %v2900_v19 }
0x169f   :  { %3690 = vmatpush3.msra.mxu0 %v2900_v19 }
0x16a0   :  { %3691 = vmatprep.subr.mxu0 %v2899_v13 }
0x16a1   :  { %3692 = vmatpush3.msra.mxu0 %v2899_v13 }
0x16a2   :  { %3693 = vmatprep.subr.mxu0 %v2898_v10 }
0x16a3   :  { %3694 = vmatpush3.msra.mxu0 %v2898_v10 }
0x16a4   :  { %3696 = vmatmul.mubr.msk.f32.vlgmr.msra.gmra.mxu0 %vm743_vm7, %v2903_v21  ;;  %3698 = vmatprep.subr.bf16.mxu0 %v4027_v11 }
0x16a5   :  { %3702 = vmatprep.mubr.msk.bf16.mxu0 %vm4028_vm0, %v4027_v11  ;;  %3699 = vmatpush3.bf16.msra.mxu0 %v3035_v20 }
0x16a6   :  { %3700 = vmatprep.subr.bf16.mxu0 %v4027_v11 }
0x16a9   :  { %3701 = vmatpush3.bf16.msra.mxu0 %v3034_v52 }
0x1764   :  { %v3697_v1 = vpop.f32.mrf.mxu0 }
0x1765   :  { %v2990_v0 = vsel %vm743_vm7, %v3697_v1, 0.0 }
0x1766   :  { %2991 = vadd.xlane.f32.xlu1 %v2990_v0  ;;  %v2976_v2 = vpop.f32.mrf.mxu0 }
0x1767   :  { %v2987_v9 = vsel %vm743_vm7, %v2976_v2, 0.0 }
0x1768   :  { %2988 = vadd.xlane.f32.xlu0 %v2987_v9 }
0x17ef   :  { %v2992_v23 = vpop.xlane.xlu1 %2991 }
0x17f0   :  { %v2994_v8 = vmul.f32 0.03125, %v2992_v23 }
0x17f1   :  { %v2989_v15 = vpop.xlane.xlu0 %2988 }
0x17f2   :  { %v2996_v59 = vsub.f32 %v3697_v1, %v2994_v8  ;;  %v2993_v62 = vmul.f32 0.03125, %v2989_v15 }
0x17f4   :  { %v2995_v32 = vsub.f32 %v2976_v2, %v2993_v62  ;;  %v2998_v28 = vmul.f32 %v2996_v59, %v2996_v59 }
0x17f6   :  { %v3002_v17 = vsel %vm743_vm7, %v2998_v28, 0.0  ;;  %v2997_v22 = vmul.f32 %v2995_v32, %v2995_v32 }
0x17f7   :  { %3003 = vadd.xlane.f32.xlu1 %v3002_v17 }
0x17f8   :  { %v2999_v47 = vsel %vm743_vm7, %v2997_v22, 0.0 }
0x17f9   :  { %3000 = vadd.xlane.f32.xlu0 %v2999_v47 }
0x1880   :  { %v3004_v41 = vpop.xlane.xlu1 %3003 }
0x1881   :  { %v3006_v60 = vmul.f32 0.03125, %v3004_v41 }
0x1882   :  { %v3001_v44 = vpop.xlane.xlu0 %3000 }
0x1883   :  { %v3008_v30 = vadd.f32 1e-05, %v3006_v60  ;;  %v3005_v56 = vmul.f32 0.03125, %v3001_v44 }
0x1885   :  { %3934 = vrsqrt.f32 %v3008_v30  ;;  %v3007_v25 = vadd.f32 1e-05, %v3005_v56 }
0x1887   :  { %3936 = vrsqrt.f32 %v3007_v25 }
0x1892   :  { %v3935_v16 = vpop.eup %3934 }
0x1893   :  { %v3012_v26 = vmul.f32 %v3935_v16, %v2996_v59 }
0x1894   :  { %v3937_v5 = vpop.eup %3936 }
0x1895   :  { %v3011_v49 = vmul.f32 %v3937_v5, %v2995_v32  ;;  %v3020_v12 = vmul.f32 %v3244_v57, %v3012_v26 }
0x1897   :  { %v3019_v51 = vmul.f32 %v3244_v57, %v3011_v49  ;;  %v3028_v11 = vadd.f32 %v3245_v27, %v3020_v12 }
0x1899   :  { %v3027_v34 = vadd.f32 %v3245_v27, %v3019_v51 }
0x189b   :  { %v3033_v53 = vpack.c.bf16 %v3028_v11, %v3027_v34 }
0x189d   :  { %3703 = vmatmul.mubr.msk.bf16.vlgmr.msra.gmra.mxu0 %vm743_vm7, %v3033_v53 }
0x195d   :  { %v3073_v36 = vpop.f32.mrf.mxu0 }
0x195e   :  { %3080 = vst [vmem:[#allocation2] sm:$0xff] %v3073_v36 }
0x195f   :  { %v3704_v50 = vpop.f32.mrf.mxu0 }
0x1961   :  { %v3076_v48 = vpop.f32.mrf.mxu0 }
0x1962   :  { %3081 = vst [vmem:[#allocation2 + $0x8] sm:$0xff] %v3076_v48 }
0x1963   :  { %v3705_v54 = vpop.f32.mrf.mxu0 }
0x1964   :  { %3985 = shalt.err (!%p3982_p4)
}
0x1965   :  { %s4032_s8 = smov 128   ;;  %s4033_s4 = smov 8  }
0x1966   :  { %3093 = dma.vmem_to_hbm [thread:$0]  %s3088_s27, 256, %s4192_s19, [#allocation3], %s4032_s8, %s4032_s8, %s4033_s4  }
0x1967   :  { %3994 = dma.done.wait [#allocation3], 256  }
0x1968   :  { %3995 = vsyncadd [#allocation3], 4294967040 }
0x1969   :  { %3097 = vsyncpa [#allocation3], 1 }

</bundles_post_ra>
